<compile_context>
chip_gen: v7x
topology: tpu7x:2x2x1
jax: 0.10.0
libtpu: 0.0.40
codegen_flags: <defaults>
</compile_context>

<pallas_src>
import functools
import math

import jax
import jax.numpy as jnp
from jax.experimental import pallas as pl
from jax.experimental.pallas import tpu as pltpu


# ----------------------------- in-kernel math helpers ------------------------------------

def _erf(x):
    # Abramowitz & Stegun 7.1.26 rational approximation (|err| < 1.5e-7) — matches the exact
    # erf-based nn.GELU() to f32 noise.  Division routed to the EUP via pl.reciprocal.
    # TODO(synk): switch to a native erf lowering if/when Mosaic guarantees one.
    a1, a2, a3, a4, a5 = 0.254829592, -0.284496736, 1.421413741, -1.453152027, 1.061405429
    p = 0.3275911
    sgn = jnp.where(x >= 0.0, 1.0, -1.0)
    ax = jnp.abs(x)
    t = pl.reciprocal(1.0 + p * ax, approx=False)
    poly = ((((a5 * t + a4) * t + a3) * t + a2) * t + a1) * t
    return sgn * (1.0 - poly * jnp.exp(-ax * ax))


def _gelu(x):
    return 0.5 * x * (1.0 + _erf(x * (1.0 / math.sqrt(2.0))))


def _layernorm(x, g, b, eps):
    mu = jnp.mean(x, axis=-1, keepdims=True)
    xc = x - mu
    var = jnp.mean(xc * xc, axis=-1, keepdims=True)
    return xc * jax.lax.rsqrt(var + eps) * g + b


def _dot(x, w):
    # bf16 (or f32) operands, always f32 accumulation on the MXU.
    return jnp.dot(x.astype(w.dtype), w, preferred_element_type=jnp.float32)


# ----------------------------------- fused kernel -----------------------------------------

def _pcasimclr_kernel(
    x_ref,
    w0_ref, b0_ref, ge_ref, be_ref,
    w1a_ref, b1a_ref, g1a_ref, be1a_ref,
    w1b_ref, b1b_ref, g1b_ref, be1b_ref,
    w2a_ref, b2a_ref, g2a_ref, be2a_ref,
    w2b_ref, b2b_ref, g2b_ref, be2b_ref,
    wp1_ref, bp1_ref, wp2_ref, bp2_ref,
    o_ref,
    *, ln_eps, l2_eps,
):
    x = x_ref[...]                                           # (tm, in_dim) f32 row tile

    # ---- encoder stem: Linear -> GELU -> LayerNorm ---------------------------------------
    h = _dot(x, w0_ref[...]) + b0_ref[...]
    h = _gelu(h)
    h = _layernorm(h, ge_ref[...], be_ref[...], ln_eps)

    # ---- ResidualBlock x2: x + LN(Linear(GELU(LN(Linear(x))))), Dropout = identity -------
    def res_block(xh, wa, ba, ga, bea, wb, bb, gb, beb):
        y = _dot(xh, wa[...]) + ba[...]
        y = _layernorm(y, ga[...], bea[...], ln_eps)
        y = _gelu(y)
        y = _dot(y, wb[...]) + bb[...]
        y = _layernorm(y, gb[...], beb[...], ln_eps)
        return xh + y

    h = res_block(h, w1a_ref, b1a_ref, g1a_ref, be1a_ref,
                  w1b_ref, b1b_ref, g1b_ref, be1b_ref)
    h = res_block(h, w2a_ref, b2a_ref, g2a_ref, be2a_ref,
                  w2b_ref, b2b_ref, g2b_ref, be2b_ref)
    # encoder nn.Dropout(p=0.1): identity in eval

    # ---- projector: Linear -> ReLU -> Dropout(id) -> Linear -------------------------------
    z = _dot(h, wp1_ref[...]) + bp1_ref[...]
    z = jnp.maximum(z, 0.0)
    z = _dot(z, wp2_ref[...]) + bp2_ref[...]

    # ---- F.normalize(z, dim=1)  (z / max(||z||_2, eps)) ------------------------------------
    ss = jnp.sum(z * z, axis=-1, keepdims=True)
    o_ref[...] = z * jax.lax.rsqrt(jnp.maximum(ss, l2_eps * l2_eps))


# -------------------------------- kernel-call wrapper --------------------------------------

_PARAM_ORDER = (
    "w0", "b0", "ge", "be",
    "w1a", "b1a", "g1a", "be1a",
    "w1b", "b1b", "g1b", "be1b",
    "w2a", "b2a", "g2a", "be2a",
    "w2b", "b2b", "g2b", "be2b",
    "wp1", "bp1", "wp2", "bp2",
)
_MATMUL_WEIGHTS = frozenset({"w0", "w1a", "w1b", "w2a", "w2b", "wp1", "wp2"})


def pcasimclr_forward(x, params, *, block_m=128, ln_eps=1e-5, l2_eps=1e-12,
                      matmul_dtype=jnp.bfloat16):
    B, in_dim = x.shape
    hidden = params["w0"].shape[1]
    out_dim = params["wp2"].shape[1]

    # Pad rows to a multiple of the tile (sublane multiple of 8); padded rows are sliced off.
    mp = max(8, -(-B // 8) * 8)
    tm = min(block_m, mp)
    mp = -(-mp // tm) * tm
    if mp != B:
        x = jnp.pad(x, ((0, mp - B), (0, 0)))

    def prep(name):
        p = params[name]
        if name in _MATMUL_WEIGHTS:
            return p.astype(matmul_dtype)            # MXU operands (bf16 by default)
        return p.reshape(1, -1).astype(jnp.float32)  # biases / LN params stay f32

    ops = [prep(n) for n in _PARAM_ORDER]

    # Weights & per-feature vectors: full-array blocks, constant block index -> fetched once
    # and kept resident in VMEM across all row tiles of the grid.
    param_specs = [pl.BlockSpec(p.shape, lambda i: (0, 0)) for p in ops]

    grid = (mp // tm,)
    flops = 2 * mp * (in_dim * hidden + 5 * hidden * hidden + hidden * out_dim)
    param_bytes = sum(int(p.size) * p.dtype.itemsize for p in ops)
    cost = pl.CostEstimate(
        flops=flops,
        transcendentals=3 * mp * hidden,             # exp inside the three GELUs
        bytes_accessed=mp * in_dim * 4 + param_bytes + mp * out_dim * 4,
    )

    out = pl.pallas_call(
        functools.partial(_pcasimclr_kernel, ln_eps=ln_eps, l2_eps=l2_eps),
        out_shape=jax.ShapeDtypeStruct((mp, out_dim), jnp.float32),
        grid_spec=pltpu.PrefetchScalarGridSpec(
            num_scalar_prefetch=0,
            grid=grid,
            in_specs=[pl.BlockSpec((tm, in_dim), lambda i: (i, 0))] + param_specs,
            out_specs=pl.BlockSpec((tm, out_dim), lambda i: (i, 0)),
        ),
        compiler_params=pltpu.CompilerParams(
            dimension_semantics=("parallel",),        # megacore sharding of row tiles (v7x)
            vmem_limit_bytes=48 * 1024 * 1024,        # headroom on all gens (v7x phys = 64 MiB)
        ),
        cost_estimate=cost,
    )(x, *ops)
    return out[:B]


# ----------------------------- pure-JAX reference & params ---------------------------------

def _reference_forward(x, params, ln_eps=1e-5, l2_eps=1e-12):
    def ln(v, g, b):
        mu = jnp.mean(v, axis=-1, keepdims=True)
        vc = v - mu
        var = jnp.mean(vc * vc, axis=-1, keepdims=True)
        return vc / jnp.sqrt(var + ln_eps) * g + b

    def gelu(v):
        return 0.5 * v * (1.0 + jax.scipy.special.erf(v / jnp.sqrt(2.0)))

    h = gelu(x @ params["w0"] + params["b0"])
    h = ln(h, params["ge"], params["be"])
    for s in ("1", "2"):
        y = h @ params[f"w{s}a"] + params[f"b{s}a"]
        y = ln(y, params[f"g{s}a"], params[f"be{s}a"])
        y = gelu(y)
        y = y @ params[f"w{s}b"] + params[f"b{s}b"]
        y = ln(y, params[f"g{s}b"], params[f"be{s}b"])
        h = h + y
    z = jnp.maximum(h @ params["wp1"] + params["bp1"], 0.0)
    z = z @ params["wp2"] + params["bp2"]
    n = jnp.sqrt(jnp.sum(z * z, axis=-1, keepdims=True))
    return z / jnp.maximum(n, l2_eps)


def init_params(key, input_dim, hidden_dim, out_dim, scale=0.02):
    H = hidden_dim
    ks = iter(jax.random.split(key, 32))

    def w(shape):
        return scale * jax.random.normal(next(ks), shape, jnp.float32)

    def v(n):
        return scale * jax.random.normal(next(ks), (n,), jnp.float32)

    def g(n):
        return 1.0 + scale * jax.random.normal(next(ks), (n,), jnp.float32)

    return {
        "w0": w((input_dim, H)), "b0": v(H), "ge": g(H), "be": v(H),
        "w1a": w((H, H)), "b1a": v(H), "g1a": g(H), "be1a": v(H),
        "w1b": w((H, H)), "b1b": v(H), "g1b": g(H), "be1b": v(H),
        "w2a": w((H, H)), "b2a": v(H), "g2a": g(H), "be2a": v(H),
        "w2b": w((H, H)), "b2b": v(H), "g2b": g(H), "be2b": v(H),
        "wp1": w((H, H)), "bp1": v(H),
        "wp2": w((H, out_dim)), "bp2": v(out_dim),
    }


# --------------------------------------- main ----------------------------------------------

if __name__ == "__main__":
    B, input_dim, hidden_dim, out_dim = 16, 128, 512, 128   # feature dims kept lane-dense (x128)

    key = jax.random.PRNGKey(0)
    k_params, k_x = jax.random.split(key)
    params = init_params(k_params, input_dim, hidden_dim, out_dim)
    x = jax.random.normal(k_x, (B, input_dim), dtype=jnp.float32)

    ref = _reference_forward(x, params)

    # f32-operand run: tight correctness check against the pure-JAX reference.
    fwd_f32 = jax.jit(lambda xx: pcasimclr_forward(xx, params, block_m=8,
                                                   matmul_dtype=jnp.float32))
    out_f32 = jax.block_until_ready(fwd_f32(x))
    assert out_f32.shape == (B, out_dim)
    assert bool(jnp.all(jnp.isfinite(out_f32)))
    assert float(jnp.max(jnp.abs(out_f32 - ref))) < 1e-2

    # bf16-operand / f32-accumulate run (the performance configuration).
    fwd_bf16 = jax.jit(lambda xx: pcasimclr_forward(xx, params, block_m=8,
                                                    matmul_dtype=jnp.bfloat16))
    out = jax.block_until_ready(fwd_bf16(x))
    assert out.shape == (B, out_dim)
    assert bool(jnp.all(jnp.isfinite(out)))
    assert bool(jnp.allclose(jnp.linalg.norm(out, axis=1), 1.0, atol=1e-3))  # unit rows
    assert float(jnp.max(jnp.abs(out - ref))) < 0.1

    print("KERNEL_OK")
</pallas_src>

<mosaic_0001>
module attributes {stable_mosaic.version = 11 : i64} {
  func.func @_pcasimclr_kernel(%arg0: i32, %arg1: memref<8x128xf32, #tpu.memory_space<vmem>>, %arg2: memref<128x512xf32, #tpu.memory_space<vmem>>, %arg3: memref<1x512xf32, #tpu.memory_space<vmem>>, %arg4: memref<1x512xf32, #tpu.memory_space<vmem>>, %arg5: memref<1x512xf32, #tpu.memory_space<vmem>>, %arg6: memref<512x512xf32, #tpu.memory_space<vmem>>, %arg7: memref<1x512xf32, #tpu.memory_space<vmem>>, %arg8: memref<1x512xf32, #tpu.memory_space<vmem>>, %arg9: memref<1x512xf32, #tpu.memory_space<vmem>>, %arg10: memref<512x512xf32, #tpu.memory_space<vmem>>, %arg11: memref<1x512xf32, #tpu.memory_space<vmem>>, %arg12: memref<1x512xf32, #tpu.memory_space<vmem>>, %arg13: memref<1x512xf32, #tpu.memory_space<vmem>>, %arg14: memref<512x512xf32, #tpu.memory_space<vmem>>, %arg15: memref<1x512xf32, #tpu.memory_space<vmem>>, %arg16: memref<1x512xf32, #tpu.memory_space<vmem>>, %arg17: memref<1x512xf32, #tpu.memory_space<vmem>>, %arg18: memref<512x512xf32, #tpu.memory_space<vmem>>, %arg19: memref<1x512xf32, #tpu.memory_space<vmem>>, %arg20: memref<1x512xf32, #tpu.memory_space<vmem>>, %arg21: memref<1x512xf32, #tpu.memory_space<vmem>>, %arg22: memref<512x512xf32, #tpu.memory_space<vmem>>, %arg23: memref<1x512xf32, #tpu.memory_space<vmem>>, %arg24: memref<512x128xf32, #tpu.memory_space<vmem>>, %arg25: memref<1x128xf32, #tpu.memory_space<vmem>>, %arg26: memref<8x128xf32, #tpu.memory_space<vmem>>) attributes {dimension_semantics = [#tpu.dimension_semantics<parallel>], iteration_bounds = array<i64: 2>, scalar_prefetch = 0 : i64, scratch_operands = 0 : i64, tpu.core_type = #tpu.core_type<tc>, window_params = [{transform_indices = @transform_0, window_bounds = array<i64: 8, 128>}, {pipeline_mode = #tpu.pipeline_mode<synchronous>, transform_indices = @transform_1, window_bounds = array<i64: 128, 512>}, {pipeline_mode = #tpu.pipeline_mode<synchronous>, transform_indices = @transform_2, window_bounds = array<i64: 1, 512>}, {pipeline_mode = #tpu.pipeline_mode<synchronous>, transform_indices = @transform_3, window_bounds = array<i64: 1, 512>}, {pipeline_mode = #tpu.pipeline_mode<synchronous>, transform_indices = @transform_4, window_bounds = array<i64: 1, 512>}, {pipeline_mode = #tpu.pipeline_mode<synchronous>, transform_indices = @transform_5, window_bounds = array<i64: 512, 512>}, {pipeline_mode = #tpu.pipeline_mode<synchronous>, transform_indices = @transform_6, window_bounds = array<i64: 1, 512>}, {pipeline_mode = #tpu.pipeline_mode<synchronous>, transform_indices = @transform_7, window_bounds = array<i64: 1, 512>}, {pipeline_mode = #tpu.pipeline_mode<synchronous>, transform_indices = @transform_8, window_bounds = array<i64: 1, 512>}, {pipeline_mode = #tpu.pipeline_mode<synchronous>, transform_indices = @transform_9, window_bounds = array<i64: 512, 512>}, {pipeline_mode = #tpu.pipeline_mode<synchronous>, transform_indices = @transform_10, window_bounds = array<i64: 1, 512>}, {pipeline_mode = #tpu.pipeline_mode<synchronous>, transform_indices = @transform_11, window_bounds = array<i64: 1, 512>}, {pipeline_mode = #tpu.pipeline_mode<synchronous>, transform_indices = @transform_12, window_bounds = array<i64: 1, 512>}, {pipeline_mode = #tpu.pipeline_mode<synchronous>, transform_indices = @transform_13, window_bounds = array<i64: 512, 512>}, {pipeline_mode = #tpu.pipeline_mode<synchronous>, transform_indices = @transform_14, window_bounds = array<i64: 1, 512>}, {pipeline_mode = #tpu.pipeline_mode<synchronous>, transform_indices = @transform_15, window_bounds = array<i64: 1, 512>}, {pipeline_mode = #tpu.pipeline_mode<synchronous>, transform_indices = @transform_16, window_bounds = array<i64: 1, 512>}, {pipeline_mode = #tpu.pipeline_mode<synchronous>, transform_indices = @transform_17, window_bounds = array<i64: 512, 512>}, {pipeline_mode = #tpu.pipeline_mode<synchronous>, transform_indices = @transform_18, window_bounds = array<i64: 1, 512>}, {pipeline_mode = #tpu.pipeline_mode<synchronous>, transform_indices = @transform_19, window_bounds = array<i64: 1, 512>}, {pipeline_mode = #tpu.pipeline_mode<synchronous>, transform_indices = @transform_20, window_bounds = array<i64: 1, 512>}, {pipeline_mode = #tpu.pipeline_mode<synchronous>, transform_indices = @transform_21, window_bounds = array<i64: 512, 512>}, {pipeline_mode = #tpu.pipeline_mode<synchronous>, transform_indices = @transform_22, window_bounds = array<i64: 1, 512>}, {pipeline_mode = #tpu.pipeline_mode<synchronous>, transform_indices = @transform_23, window_bounds = array<i64: 512, 128>}, {pipeline_mode = #tpu.pipeline_mode<synchronous>, transform_indices = @transform_24, window_bounds = array<i64: 1, 128>}, {transform_indices = @transform_25, window_bounds = array<i64: 8, 128>}]} {
    %c0 = arith.constant 0 : index
    %c0_0 = arith.constant 0 : index
    %0 = vector.load %arg1[%c0, %c0_0] : memref<8x128xf32, #tpu.memory_space<vmem>>, vector<8x128xf32>
    %c0_1 = arith.constant 0 : index
    %c0_2 = arith.constant 0 : index
    %1 = vector.load %arg2[%c0_1, %c0_2] : memref<128x512xf32, #tpu.memory_space<vmem>>, vector<128x512xf32>
    %cst = arith.constant dense<0.000000e+00> : vector<8x512xf32>
    %2 = tpu.matmul %0, %1, %cst {dimension_numbers = #tpu.dot_dimension_numbers<[1], [0], [0], [1], [0, 0, 1, 1], [], []>} : vector<8x128xf32>, vector<128x512xf32>, vector<8x512xf32> -> vector<8x512xf32>
    %c0_3 = arith.constant 0 : index
    %c0_4 = arith.constant 0 : index
    %3 = vector.load %arg3[%c0_3, %c0_4] : memref<1x512xf32, #tpu.memory_space<vmem>>, vector<1x512xf32>
    %4 = vector.broadcast %3 : vector<1x512xf32> to vector<8x512xf32>
    %5 = arith.addf %2, %4 : vector<8x512xf32>
    %cst_5 = arith.constant 5.000000e-01 : f32
    %6 = vector.broadcast %cst_5 : f32 to vector<8x512xf32>
    %7 = arith.mulf %6, %5 : vector<8x512xf32>
    %cst_6 = arith.constant 0.707106769 : f32
    %8 = vector.broadcast %cst_6 : f32 to vector<8x512xf32>
    %9 = arith.mulf %5, %8 : vector<8x512xf32>
    %cst_7 = arith.constant 0.000000e+00 : f32
    %10 = vector.broadcast %cst_7 : f32 to vector<8x512xf32>
    %11 = arith.cmpf oge, %9, %10 : vector<8x512xf32>
    %cst_8 = arith.constant 1.000000e+00 : f32
    %cst_9 = arith.constant -1.000000e+00 : f32
    %12 = vector.broadcast %cst_8 : f32 to vector<8x512xf32>
    %13 = vector.broadcast %cst_9 : f32 to vector<8x512xf32>
    %14 = arith.select %11, %12, %13 : vector<8x512xi1>, vector<8x512xf32>
    %15 = math.absf %9 : vector<8x512xf32>
    %cst_10 = arith.constant 0.327591091 : f32
    %16 = vector.broadcast %cst_10 : f32 to vector<8x512xf32>
    %17 = arith.mulf %16, %15 : vector<8x512xf32>
    %cst_11 = arith.constant 1.000000e+00 : f32
    %18 = vector.broadcast %cst_11 : f32 to vector<8x512xf32>
    %19 = arith.addf %18, %17 : vector<8x512xf32>
    %20 = tpu.reciprocal %19 : vector<8x512xf32> -> vector<8x512xf32>
    %cst_12 = arith.constant 1.06140542 : f32
    %21 = vector.broadcast %cst_12 : f32 to vector<8x512xf32>
    %22 = arith.mulf %21, %20 : vector<8x512xf32>
    %cst_13 = arith.constant -1.45315206 : f32
    %23 = vector.broadcast %cst_13 : f32 to vector<8x512xf32>
    %24 = arith.addf %22, %23 : vector<8x512xf32>
    %25 = arith.mulf %24, %20 : vector<8x512xf32>
    %cst_14 = arith.constant 1.42141378 : f32
    %26 = vector.broadcast %cst_14 : f32 to vector<8x512xf32>
    %27 = arith.addf %25, %26 : vector<8x512xf32>
    %28 = arith.mulf %27, %20 : vector<8x512xf32>
    %cst_15 = arith.constant -0.284496725 : f32
    %29 = vector.broadcast %cst_15 : f32 to vector<8x512xf32>
    %30 = arith.addf %28, %29 : vector<8x512xf32>
    %31 = arith.mulf %30, %20 : vector<8x512xf32>
    %cst_16 = arith.constant 0.254829586 : f32
    %32 = vector.broadcast %cst_16 : f32 to vector<8x512xf32>
    %33 = arith.addf %31, %32 : vector<8x512xf32>
    %34 = arith.mulf %33, %20 : vector<8x512xf32>
    %cst_17 = arith.constant 0.000000e+00 : f32
    %35 = vector.broadcast %cst_17 : f32 to vector<8x512xf32>
    %36 = arith.subf %35, %15 : vector<8x512xf32>
    %37 = arith.mulf %36, %15 : vector<8x512xf32>
    %38 = math.exp %37 : vector<8x512xf32>
    %39 = arith.mulf %34, %38 : vector<8x512xf32>
    %cst_18 = arith.constant 1.000000e+00 : f32
    %40 = vector.broadcast %cst_18 : f32 to vector<8x512xf32>
    %41 = arith.subf %40, %39 : vector<8x512xf32>
    %42 = arith.mulf %14, %41 : vector<8x512xf32>
    %cst_19 = arith.constant 1.000000e+00 : f32
    %43 = vector.broadcast %cst_19 : f32 to vector<8x512xf32>
    %44 = arith.addf %43, %42 : vector<8x512xf32>
    %45 = arith.mulf %7, %44 : vector<8x512xf32>
    %c0_20 = arith.constant 0 : index
    %c0_21 = arith.constant 0 : index
    %46 = vector.load %arg4[%c0_20, %c0_21] : memref<1x512xf32, #tpu.memory_space<vmem>>, vector<1x512xf32>
    %c0_22 = arith.constant 0 : index
    %c0_23 = arith.constant 0 : index
    %47 = vector.load %arg5[%c0_22, %c0_23] : memref<1x512xf32, #tpu.memory_space<vmem>>, vector<1x512xf32>
    %cst_24 = arith.constant dense<0.000000e+00> : vector<8xf32>
    %48 = vector.multi_reduction <add>, %45, %cst_24 [1] : vector<8x512xf32> to vector<8xf32>
    %49 = vector.shape_cast %48 : vector<8xf32> to vector<8x1xf32>
    %cst_25 = arith.constant 5.120000e+02 : f32
    %50 = vector.broadcast %cst_25 : f32 to vector<8x1xf32>
    %51 = arith.divf %49, %50 : vector<8x1xf32>
    %52 = vector.broadcast %51 : vector<8x1xf32> to vector<8x512xf32>
    %53 = arith.subf %45, %52 : vector<8x512xf32>
    %54 = arith.mulf %53, %53 : vector<8x512xf32>
    %cst_26 = arith.constant dense<0.000000e+00> : vector<8xf32>
    %55 = vector.multi_reduction <add>, %54, %cst_26 [1] : vector<8x512xf32> to vector<8xf32>
    %56 = vector.shape_cast %55 : vector<8xf32> to vector<8x1xf32>
    %cst_27 = arith.constant 5.120000e+02 : f32
    %57 = vector.broadcast %cst_27 : f32 to vector<8x1xf32>
    %58 = arith.divf %56, %57 : vector<8x1xf32>
    %cst_28 = arith.constant 9.99999974E-6 : f32
    %59 = vector.broadcast %cst_28 : f32 to vector<8x1xf32>
    %60 = arith.addf %58, %59 : vector<8x1xf32>
    %61 = math.rsqrt %60 : vector<8x1xf32>
    %62 = vector.broadcast %61 : vector<8x1xf32> to vector<8x512xf32>
    %63 = arith.mulf %53, %62 : vector<8x512xf32>
    %64 = vector.broadcast %46 : vector<1x512xf32> to vector<8x512xf32>
    %65 = arith.mulf %63, %64 : vector<8x512xf32>
    %66 = vector.broadcast %47 : vector<1x512xf32> to vector<8x512xf32>
    %67 = arith.addf %65, %66 : vector<8x512xf32>
    %c0_29 = arith.constant 0 : index
    %c0_30 = arith.constant 0 : index
    %68 = vector.load %arg6[%c0_29, %c0_30] : memref<512x512xf32, #tpu.memory_space<vmem>>, vector<512x512xf32>
    %cst_31 = arith.constant dense<0.000000e+00> : vector<8x512xf32>
    %69 = tpu.matmul %67, %68, %cst_31 {dimension_numbers = #tpu.dot_dimension_numbers<[1], [0], [0], [1], [0, 0, 1, 1], [], []>} : vector<8x512xf32>, vector<512x512xf32>, vector<8x512xf32> -> vector<8x512xf32>
    %c0_32 = arith.constant 0 : index
    %c0_33 = arith.constant 0 : index
    %70 = vector.load %arg7[%c0_32, %c0_33] : memref<1x512xf32, #tpu.memory_space<vmem>>, vector<1x512xf32>
    %71 = vector.broadcast %70 : vector<1x512xf32> to vector<8x512xf32>
    %72 = arith.addf %69, %71 : vector<8x512xf32>
    %c0_34 = arith.constant 0 : index
    %c0_35 = arith.constant 0 : index
    %73 = vector.load %arg8[%c0_34, %c0_35] : memref<1x512xf32, #tpu.memory_space<vmem>>, vector<1x512xf32>
    %c0_36 = arith.constant 0 : index
    %c0_37 = arith.constant 0 : index
    %74 = vector.load %arg9[%c0_36, %c0_37] : memref<1x512xf32, #tpu.memory_space<vmem>>, vector<1x512xf32>
    %cst_38 = arith.constant dense<0.000000e+00> : vector<8xf32>
    %75 = vector.multi_reduction <add>, %72, %cst_38 [1] : vector<8x512xf32> to vector<8xf32>
    %76 = vector.shape_cast %75 : vector<8xf32> to vector<8x1xf32>
    %cst_39 = arith.constant 5.120000e+02 : f32
    %77 = vector.broadcast %cst_39 : f32 to vector<8x1xf32>
    %78 = arith.divf %76, %77 : vector<8x1xf32>
    %79 = vector.broadcast %78 : vector<8x1xf32> to vector<8x512xf32>
    %80 = arith.subf %72, %79 : vector<8x512xf32>
    %81 = arith.mulf %80, %80 : vector<8x512xf32>
    %cst_40 = arith.constant dense<0.000000e+00> : vector<8xf32>
    %82 = vector.multi_reduction <add>, %81, %cst_40 [1] : vector<8x512xf32> to vector<8xf32>
    %83 = vector.shape_cast %82 : vector<8xf32> to vector<8x1xf32>
    %cst_41 = arith.constant 5.120000e+02 : f32
    %84 = vector.broadcast %cst_41 : f32 to vector<8x1xf32>
    %85 = arith.divf %83, %84 : vector<8x1xf32>
    %cst_42 = arith.constant 9.99999974E-6 : f32
    %86 = vector.broadcast %cst_42 : f32 to vector<8x1xf32>
    %87 = arith.addf %85, %86 : vector<8x1xf32>
    %88 = math.rsqrt %87 : vector<8x1xf32>
    %89 = vector.broadcast %88 : vector<8x1xf32> to vector<8x512xf32>
    %90 = arith.mulf %80, %89 : vector<8x512xf32>
    %91 = vector.broadcast %73 : vector<1x512xf32> to vector<8x512xf32>
    %92 = arith.mulf %90, %91 : vector<8x512xf32>
    %93 = vector.broadcast %74 : vector<1x512xf32> to vector<8x512xf32>
    %94 = arith.addf %92, %93 : vector<8x512xf32>
    %cst_43 = arith.constant 5.000000e-01 : f32
    %95 = vector.broadcast %cst_43 : f32 to vector<8x512xf32>
    %96 = arith.mulf %95, %94 : vector<8x512xf32>
    %cst_44 = arith.constant 0.707106769 : f32
    %97 = vector.broadcast %cst_44 : f32 to vector<8x512xf32>
    %98 = arith.mulf %94, %97 : vector<8x512xf32>
    %cst_45 = arith.constant 0.000000e+00 : f32
    %99 = vector.broadcast %cst_45 : f32 to vector<8x512xf32>
    %100 = arith.cmpf oge, %98, %99 : vector<8x512xf32>
    %cst_46 = arith.constant 1.000000e+00 : f32
    %cst_47 = arith.constant -1.000000e+00 : f32
    %101 = vector.broadcast %cst_46 : f32 to vector<8x512xf32>
    %102 = vector.broadcast %cst_47 : f32 to vector<8x512xf32>
    %103 = arith.select %100, %101, %102 : vector<8x512xi1>, vector<8x512xf32>
    %104 = math.absf %98 : vector<8x512xf32>
    %cst_48 = arith.constant 0.327591091 : f32
    %105 = vector.broadcast %cst_48 : f32 to vector<8x512xf32>
    %106 = arith.mulf %105, %104 : vector<8x512xf32>
    %cst_49 = arith.constant 1.000000e+00 : f32
    %107 = vector.broadcast %cst_49 : f32 to vector<8x512xf32>
    %108 = arith.addf %107, %106 : vector<8x512xf32>
    %109 = tpu.reciprocal %108 : vector<8x512xf32> -> vector<8x512xf32>
    %cst_50 = arith.constant 1.06140542 : f32
    %110 = vector.broadcast %cst_50 : f32 to vector<8x512xf32>
    %111 = arith.mulf %110, %109 : vector<8x512xf32>
    %cst_51 = arith.constant -1.45315206 : f32
    %112 = vector.broadcast %cst_51 : f32 to vector<8x512xf32>
    %113 = arith.addf %111, %112 : vector<8x512xf32>
    %114 = arith.mulf %113, %109 : vector<8x512xf32>
    %cst_52 = arith.constant 1.42141378 : f32
    %115 = vector.broadcast %cst_52 : f32 to vector<8x512xf32>
    %116 = arith.addf %114, %115 : vector<8x512xf32>
    %117 = arith.mulf %116, %109 : vector<8x512xf32>
    %cst_53 = arith.constant -0.284496725 : f32
    %118 = vector.broadcast %cst_53 : f32 to vector<8x512xf32>
    %119 = arith.addf %117, %118 : vector<8x512xf32>
    %120 = arith.mulf %119, %109 : vector<8x512xf32>
    %cst_54 = arith.constant 0.254829586 : f32
    %121 = vector.broadcast %cst_54 : f32 to vector<8x512xf32>
    %122 = arith.addf %120, %121 : vector<8x512xf32>
    %123 = arith.mulf %122, %109 : vector<8x512xf32>
    %cst_55 = arith.constant 0.000000e+00 : f32
    %124 = vector.broadcast %cst_55 : f32 to vector<8x512xf32>
    %125 = arith.subf %124, %104 : vector<8x512xf32>
    %126 = arith.mulf %125, %104 : vector<8x512xf32>
    %127 = math.exp %126 : vector<8x512xf32>
    %128 = arith.mulf %123, %127 : vector<8x512xf32>
    %cst_56 = arith.constant 1.000000e+00 : f32
    %129 = vector.broadcast %cst_56 : f32 to vector<8x512xf32>
    %130 = arith.subf %129, %128 : vector<8x512xf32>
    %131 = arith.mulf %103, %130 : vector<8x512xf32>
    %cst_57 = arith.constant 1.000000e+00 : f32
    %132 = vector.broadcast %cst_57 : f32 to vector<8x512xf32>
    %133 = arith.addf %132, %131 : vector<8x512xf32>
    %134 = arith.mulf %96, %133 : vector<8x512xf32>
    %c0_58 = arith.constant 0 : index
    %c0_59 = arith.constant 0 : index
    %135 = vector.load %arg10[%c0_58, %c0_59] : memref<512x512xf32, #tpu.memory_space<vmem>>, vector<512x512xf32>
    %cst_60 = arith.constant dense<0.000000e+00> : vector<8x512xf32>
    %136 = tpu.matmul %134, %135, %cst_60 {dimension_numbers = #tpu.dot_dimension_numbers<[1], [0], [0], [1], [0, 0, 1, 1], [], []>} : vector<8x512xf32>, vector<512x512xf32>, vector<8x512xf32> -> vector<8x512xf32>
    %c0_61 = arith.constant 0 : index
    %c0_62 = arith.constant 0 : index
    %137 = vector.load %arg11[%c0_61, %c0_62] : memref<1x512xf32, #tpu.memory_space<vmem>>, vector<1x512xf32>
    %138 = vector.broadcast %137 : vector<1x512xf32> to vector<8x512xf32>
    %139 = arith.addf %136, %138 : vector<8x512xf32>
    %c0_63 = arith.constant 0 : index
    %c0_64 = arith.constant 0 : index
    %140 = vector.load %arg12[%c0_63, %c0_64] : memref<1x512xf32, #tpu.memory_space<vmem>>, vector<1x512xf32>
    %c0_65 = arith.constant 0 : index
    %c0_66 = arith.constant 0 : index
    %141 = vector.load %arg13[%c0_65, %c0_66] : memref<1x512xf32, #tpu.memory_space<vmem>>, vector<1x512xf32>
    %cst_67 = arith.constant dense<0.000000e+00> : vector<8xf32>
    %142 = vector.multi_reduction <add>, %139, %cst_67 [1] : vector<8x512xf32> to vector<8xf32>
    %143 = vector.shape_cast %142 : vector<8xf32> to vector<8x1xf32>
    %cst_68 = arith.constant 5.120000e+02 : f32
    %144 = vector.broadcast %cst_68 : f32 to vector<8x1xf32>
    %145 = arith.divf %143, %144 : vector<8x1xf32>
    %146 = vector.broadcast %145 : vector<8x1xf32> to vector<8x512xf32>
    %147 = arith.subf %139, %146 : vector<8x512xf32>
    %148 = arith.mulf %147, %147 : vector<8x512xf32>
    %cst_69 = arith.constant dense<0.000000e+00> : vector<8xf32>
    %149 = vector.multi_reduction <add>, %148, %cst_69 [1] : vector<8x512xf32> to vector<8xf32>
    %150 = vector.shape_cast %149 : vector<8xf32> to vector<8x1xf32>
    %cst_70 = arith.constant 5.120000e+02 : f32
    %151 = vector.broadcast %cst_70 : f32 to vector<8x1xf32>
    %152 = arith.divf %150, %151 : vector<8x1xf32>
    %cst_71 = arith.constant 9.99999974E-6 : f32
    %153 = vector.broadcast %cst_71 : f32 to vector<8x1xf32>
    %154 = arith.addf %152, %153 : vector<8x1xf32>
    %155 = math.rsqrt %154 : vector<8x1xf32>
    %156 = vector.broadcast %155 : vector<8x1xf32> to vector<8x512xf32>
    %157 = arith.mulf %147, %156 : vector<8x512xf32>
    %158 = vector.broadcast %140 : vector<1x512xf32> to vector<8x512xf32>
    %159 = arith.mulf %157, %158 : vector<8x512xf32>
    %160 = vector.broadcast %141 : vector<1x512xf32> to vector<8x512xf32>
    %161 = arith.addf %159, %160 : vector<8x512xf32>
    %162 = arith.addf %67, %161 : vector<8x512xf32>
    %c0_72 = arith.constant 0 : index
    %c0_73 = arith.constant 0 : index
    %163 = vector.load %arg14[%c0_72, %c0_73] : memref<512x512xf32, #tpu.memory_space<vmem>>, vector<512x512xf32>
    %cst_74 = arith.constant dense<0.000000e+00> : vector<8x512xf32>
    %164 = tpu.matmul %162, %163, %cst_74 {dimension_numbers = #tpu.dot_dimension_numbers<[1], [0], [0], [1], [0, 0, 1, 1], [], []>} : vector<8x512xf32>, vector<512x512xf32>, vector<8x512xf32> -> vector<8x512xf32>
    %c0_75 = arith.constant 0 : index
    %c0_76 = arith.constant 0 : index
    %165 = vector.load %arg15[%c0_75, %c0_76] : memref<1x512xf32, #tpu.memory_space<vmem>>, vector<1x512xf32>
    %166 = vector.broadcast %165 : vector<1x512xf32> to vector<8x512xf32>
    %167 = arith.addf %164, %166 : vector<8x512xf32>
    %c0_77 = arith.constant 0 : index
    %c0_78 = arith.constant 0 : index
    %168 = vector.load %arg16[%c0_77, %c0_78] : memref<1x512xf32, #tpu.memory_space<vmem>>, vector<1x512xf32>
    %c0_79 = arith.constant 0 : index
    %c0_80 = arith.constant 0 : index
    %169 = vector.load %arg17[%c0_79, %c0_80] : memref<1x512xf32, #tpu.memory_space<vmem>>, vector<1x512xf32>
    %cst_81 = arith.constant dense<0.000000e+00> : vector<8xf32>
    %170 = vector.multi_reduction <add>, %167, %cst_81 [1] : vector<8x512xf32> to vector<8xf32>
    %171 = vector.shape_cast %170 : vector<8xf32> to vector<8x1xf32>
    %cst_82 = arith.constant 5.120000e+02 : f32
    %172 = vector.broadcast %cst_82 : f32 to vector<8x1xf32>
    %173 = arith.divf %171, %172 : vector<8x1xf32>
    %174 = vector.broadcast %173 : vector<8x1xf32> to vector<8x512xf32>
    %175 = arith.subf %167, %174 : vector<8x512xf32>
    %176 = arith.mulf %175, %175 : vector<8x512xf32>
    %cst_83 = arith.constant dense<0.000000e+00> : vector<8xf32>
    %177 = vector.multi_reduction <add>, %176, %cst_83 [1] : vector<8x512xf32> to vector<8xf32>
    %178 = vector.shape_cast %177 : vector<8xf32> to vector<8x1xf32>
    %cst_84 = arith.constant 5.120000e+02 : f32
    %179 = vector.broadcast %cst_84 : f32 to vector<8x1xf32>
    %180 = arith.divf %178, %179 : vector<8x1xf32>
    %cst_85 = arith.constant 9.99999974E-6 : f32
    %181 = vector.broadcast %cst_85 : f32 to vector<8x1xf32>
    %182 = arith.addf %180, %181 : vector<8x1xf32>
    %183 = math.rsqrt %182 : vector<8x1xf32>
    %184 = vector.broadcast %183 : vector<8x1xf32> to vector<8x512xf32>
    %185 = arith.mulf %175, %184 : vector<8x512xf32>
    %186 = vector.broadcast %168 : vector<1x512xf32> to vector<8x512xf32>
    %187 = arith.mulf %185, %186 : vector<8x512xf32>
    %188 = vector.broadcast %169 : vector<1x512xf32> to vector<8x512xf32>
    %189 = arith.addf %187, %188 : vector<8x512xf32>
    %cst_86 = arith.constant 5.000000e-01 : f32
    %190 = vector.broadcast %cst_86 : f32 to vector<8x512xf32>
    %191 = arith.mulf %190, %189 : vector<8x512xf32>
    %cst_87 = arith.constant 0.707106769 : f32
    %192 = vector.broadcast %cst_87 : f32 to vector<8x512xf32>
    %193 = arith.mulf %189, %192 : vector<8x512xf32>
    %cst_88 = arith.constant 0.000000e+00 : f32
    %194 = vector.broadcast %cst_88 : f32 to vector<8x512xf32>
    %195 = arith.cmpf oge, %193, %194 : vector<8x512xf32>
    %cst_89 = arith.constant 1.000000e+00 : f32
    %cst_90 = arith.constant -1.000000e+00 : f32
    %196 = vector.broadcast %cst_89 : f32 to vector<8x512xf32>
    %197 = vector.broadcast %cst_90 : f32 to vector<8x512xf32>
    %198 = arith.select %195, %196, %197 : vector<8x512xi1>, vector<8x512xf32>
    %199 = math.absf %193 : vector<8x512xf32>
    %cst_91 = arith.constant 0.327591091 : f32
    %200 = vector.broadcast %cst_91 : f32 to vector<8x512xf32>
    %201 = arith.mulf %200, %199 : vector<8x512xf32>
    %cst_92 = arith.constant 1.000000e+00 : f32
    %202 = vector.broadcast %cst_92 : f32 to vector<8x512xf32>
    %203 = arith.addf %202, %201 : vector<8x512xf32>
    %204 = tpu.reciprocal %203 : vector<8x512xf32> -> vector<8x512xf32>
    %cst_93 = arith.constant 1.06140542 : f32
    %205 = vector.broadcast %cst_93 : f32 to vector<8x512xf32>
    %206 = arith.mulf %205, %204 : vector<8x512xf32>
    %cst_94 = arith.constant -1.45315206 : f32
    %207 = vector.broadcast %cst_94 : f32 to vector<8x512xf32>
    %208 = arith.addf %206, %207 : vector<8x512xf32>
    %209 = arith.mulf %208, %204 : vector<8x512xf32>
    %cst_95 = arith.constant 1.42141378 : f32
    %210 = vector.broadcast %cst_95 : f32 to vector<8x512xf32>
    %211 = arith.addf %209, %210 : vector<8x512xf32>
    %212 = arith.mulf %211, %204 : vector<8x512xf32>
    %cst_96 = arith.constant -0.284496725 : f32
    %213 = vector.broadcast %cst_96 : f32 to vector<8x512xf32>
    %214 = arith.addf %212, %213 : vector<8x512xf32>
    %215 = arith.mulf %214, %204 : vector<8x512xf32>
    %cst_97 = arith.constant 0.254829586 : f32
    %216 = vector.broadcast %cst_97 : f32 to vector<8x512xf32>
    %217 = arith.addf %215, %216 : vector<8x512xf32>
    %218 = arith.mulf %217, %204 : vector<8x512xf32>
    %cst_98 = arith.constant 0.000000e+00 : f32
    %219 = vector.broadcast %cst_98 : f32 to vector<8x512xf32>
    %220 = arith.subf %219, %199 : vector<8x512xf32>
    %221 = arith.mulf %220, %199 : vector<8x512xf32>
    %222 = math.exp %221 : vector<8x512xf32>
    %223 = arith.mulf %218, %222 : vector<8x512xf32>
    %cst_99 = arith.constant 1.000000e+00 : f32
    %224 = vector.broadcast %cst_99 : f32 to vector<8x512xf32>
    %225 = arith.subf %224, %223 : vector<8x512xf32>
    %226 = arith.mulf %198, %225 : vector<8x512xf32>
    %cst_100 = arith.constant 1.000000e+00 : f32
    %227 = vector.broadcast %cst_100 : f32 to vector<8x512xf32>
    %228 = arith.addf %227, %226 : vector<8x512xf32>
    %229 = arith.mulf %191, %228 : vector<8x512xf32>
    %c0_101 = arith.constant 0 : index
    %c0_102 = arith.constant 0 : index
    %230 = vector.load %arg18[%c0_101, %c0_102] : memref<512x512xf32, #tpu.memory_space<vmem>>, vector<512x512xf32>
    %cst_103 = arith.constant dense<0.000000e+00> : vector<8x512xf32>
    %231 = tpu.matmul %229, %230, %cst_103 {dimension_numbers = #tpu.dot_dimension_numbers<[1], [0], [0], [1], [0, 0, 1, 1], [], []>} : vector<8x512xf32>, vector<512x512xf32>, vector<8x512xf32> -> vector<8x512xf32>
    %c0_104 = arith.constant 0 : index
    %c0_105 = arith.constant 0 : index
    %232 = vector.load %arg19[%c0_104, %c0_105] : memref<1x512xf32, #tpu.memory_space<vmem>>, vector<1x512xf32>
    %233 = vector.broadcast %232 : vector<1x512xf32> to vector<8x512xf32>
    %234 = arith.addf %231, %233 : vector<8x512xf32>
    %c0_106 = arith.constant 0 : index
    %c0_107 = arith.constant 0 : index
    %235 = vector.load %arg20[%c0_106, %c0_107] : memref<1x512xf32, #tpu.memory_space<vmem>>, vector<1x512xf32>
    %c0_108 = arith.constant 0 : index
    %c0_109 = arith.constant 0 : index
    %236 = vector.load %arg21[%c0_108, %c0_109] : memref<1x512xf32, #tpu.memory_space<vmem>>, vector<1x512xf32>
    %cst_110 = arith.constant dense<0.000000e+00> : vector<8xf32>
    %237 = vector.multi_reduction <add>, %234, %cst_110 [1] : vector<8x512xf32> to vector<8xf32>
    %238 = vector.shape_cast %237 : vector<8xf32> to vector<8x1xf32>
    %cst_111 = arith.constant 5.120000e+02 : f32
    %239 = vector.broadcast %cst_111 : f32 to vector<8x1xf32>
    %240 = arith.divf %238, %239 : vector<8x1xf32>
    %241 = vector.broadcast %240 : vector<8x1xf32> to vector<8x512xf32>
    %242 = arith.subf %234, %241 : vector<8x512xf32>
    %243 = arith.mulf %242, %242 : vector<8x512xf32>
    %cst_112 = arith.constant dense<0.000000e+00> : vector<8xf32>
    %244 = vector.multi_reduction <add>, %243, %cst_112 [1] : vector<8x512xf32> to vector<8xf32>
    %245 = vector.shape_cast %244 : vector<8xf32> to vector<8x1xf32>
    %cst_113 = arith.constant 5.120000e+02 : f32
    %246 = vector.broadcast %cst_113 : f32 to vector<8x1xf32>
    %247 = arith.divf %245, %246 : vector<8x1xf32>
    %cst_114 = arith.constant 9.99999974E-6 : f32
    %248 = vector.broadcast %cst_114 : f32 to vector<8x1xf32>
    %249 = arith.addf %247, %248 : vector<8x1xf32>
    %250 = math.rsqrt %249 : vector<8x1xf32>
    %251 = vector.broadcast %250 : vector<8x1xf32> to vector<8x512xf32>
    %252 = arith.mulf %242, %251 : vector<8x512xf32>
    %253 = vector.broadcast %235 : vector<1x512xf32> to vector<8x512xf32>
    %254 = arith.mulf %252, %253 : vector<8x512xf32>
    %255 = vector.broadcast %236 : vector<1x512xf32> to vector<8x512xf32>
    %256 = arith.addf %254, %255 : vector<8x512xf32>
    %257 = arith.addf %162, %256 : vector<8x512xf32>
    %c0_115 = arith.constant 0 : index
    %c0_116 = arith.constant 0 : index
    %258 = vector.load %arg22[%c0_115, %c0_116] : memref<512x512xf32, #tpu.memory_space<vmem>>, vector<512x512xf32>
    %cst_117 = arith.constant dense<0.000000e+00> : vector<8x512xf32>
    %259 = tpu.matmul %257, %258, %cst_117 {dimension_numbers = #tpu.dot_dimension_numbers<[1], [0], [0], [1], [0, 0, 1, 1], [], []>} : vector<8x512xf32>, vector<512x512xf32>, vector<8x512xf32> -> vector<8x512xf32>
    %c0_118 = arith.constant 0 : index
    %c0_119 = arith.constant 0 : index
    %260 = vector.load %arg23[%c0_118, %c0_119] : memref<1x512xf32, #tpu.memory_space<vmem>>, vector<1x512xf32>
    %261 = vector.broadcast %260 : vector<1x512xf32> to vector<8x512xf32>
    %262 = arith.addf %259, %261 : vector<8x512xf32>
    %cst_120 = arith.constant 0.000000e+00 : f32
    %263 = vector.broadcast %cst_120 : f32 to vector<8x512xf32>
    %264 = arith.maximumf %262, %263 : vector<8x512xf32>
    %c0_121 = arith.constant 0 : index
    %c0_122 = arith.constant 0 : index
    %265 = vector.load %arg24[%c0_121, %c0_122] : memref<512x128xf32, #tpu.memory_space<vmem>>, vector<512x128xf32>
    %cst_123 = arith.constant dense<0.000000e+00> : vector<8x128xf32>
    %266 = tpu.matmul %264, %265, %cst_123 {dimension_numbers = #tpu.dot_dimension_numbers<[1], [0], [0], [1], [0, 0, 1, 1], [], []>} : vector<8x512xf32>, vector<512x128xf32>, vector<8x128xf32> -> vector<8x128xf32>
    %c0_124 = arith.constant 0 : index
    %c0_125 = arith.constant 0 : index
    %267 = vector.load %arg25[%c0_124, %c0_125] : memref<1x128xf32, #tpu.memory_space<vmem>>, vector<1x128xf32>
    %268 = vector.broadcast %267 : vector<1x128xf32> to vector<8x128xf32>
    %269 = arith.addf %266, %268 : vector<8x128xf32>
    %270 = arith.mulf %269, %269 : vector<8x128xf32>
    %cst_126 = arith.constant dense<0.000000e+00> : vector<8xf32>
    %271 = vector.multi_reduction <add>, %270, %cst_126 [1] : vector<8x128xf32> to vector<8xf32>
    %272 = vector.shape_cast %271 : vector<8xf32> to vector<8x1xf32>
    %cst_127 = arith.constant 1.000000e-24 : f32
    %273 = vector.broadcast %cst_127 : f32 to vector<8x1xf32>
    %274 = arith.maximumf %272, %273 : vector<8x1xf32>
    %275 = math.rsqrt %274 : vector<8x1xf32>
    %276 = vector.broadcast %275 : vector<8x1xf32> to vector<8x128xf32>
    %277 = arith.mulf %269, %276 : vector<8x128xf32>
    %c0_128 = arith.constant 0 : index
    %c0_129 = arith.constant 0 : index
    %278 = vector.load %arg26[%c0_128, %c0_129] : memref<8x128xf32, #tpu.memory_space<vmem>>, vector<8x128xf32>
    tpu.vector_store %arg26[%c0_128, %c0_129], %277 {strides = array<i32>} : memref<8x128xf32, #tpu.memory_space<vmem>>, vector<8x128xf32>,
    return
  }
  func.func @transform_0(%arg0: i32) -> (i32, i32) {
    %c0_i32 = arith.constant 0 : i32
    %c0_i32_0 = arith.constant 0 : i32
    return %arg0, %c0_i32 : i32, i32
  }
  func.func @transform_1(%arg0: i32) -> (i32, i32) {
    %c0_i32 = arith.constant 0 : i32
    %c0_i32_0 = arith.constant 0 : i32
    %c0_i32_1 = arith.constant 0 : i32
    return %c0_i32, %c0_i32_0 : i32, i32
  }
  func.func @transform_2(%arg0: i32) -> (i32, i32) {
    %c0_i32 = arith.constant 0 : i32
    %c0_i32_0 = arith.constant 0 : i32
    %c0_i32_1 = arith.constant 0 : i32
    return %c0_i32, %c0_i32_0 : i32, i32
  }
  func.func @transform_3(%arg0: i32) -> (i32, i32) {
    %c0_i32 = arith.constant 0 : i32
    %c0_i32_0 = arith.constant 0 : i32
    %c0_i32_1 = arith.constant 0 : i32
    return %c0_i32, %c0_i32_0 : i32, i32
  }
  func.func @transform_4(%arg0: i32) -> (i32, i32) {
    %c0_i32 = arith.constant 0 : i32
    %c0_i32_0 = arith.constant 0 : i32
    %c0_i32_1 = arith.constant 0 : i32
    return %c0_i32, %c0_i32_0 : i32, i32
  }
  func.func @transform_5(%arg0: i32) -> (i32, i32) {
    %c0_i32 = arith.constant 0 : i32
    %c0_i32_0 = arith.constant 0 : i32
    %c0_i32_1 = arith.constant 0 : i32
    return %c0_i32, %c0_i32_0 : i32, i32
  }
  func.func @transform_6(%arg0: i32) -> (i32, i32) {
    %c0_i32 = arith.constant 0 : i32
    %c0_i32_0 = arith.constant 0 : i32
    %c0_i32_1 = arith.constant 0 : i32
    return %c0_i32, %c0_i32_0 : i32, i32
  }
  func.func @transform_7(%arg0: i32) -> (i32, i32) {
    %c0_i32 = arith.constant 0 : i32
    %c0_i32_0 = arith.constant 0 : i32
    %c0_i32_1 = arith.constant 0 : i32
    return %c0_i32, %c0_i32_0 : i32, i32
  }
  func.func @transform_8(%arg0: i32) -> (i32, i32) {
    %c0_i32 = arith.constant 0 : i32
    %c0_i32_0 = arith.constant 0 : i32
    %c0_i32_1 = arith.constant 0 : i32
    return %c0_i32, %c0_i32_0 : i32, i32
  }
  func.func @transform_9(%arg0: i32) -> (i32, i32) {
    %c0_i32 = arith.constant 0 : i32
    %c0_i32_0 = arith.constant 0 : i32
    %c0_i32_1 = arith.constant 0 : i32
    return %c0_i32, %c0_i32_0 : i32, i32
  }
  func.func @transform_10(%arg0: i32) -> (i32, i32) {
    %c0_i32 = arith.constant 0 : i32
    %c0_i32_0 = arith.constant 0 : i32
    %c0_i32_1 = arith.constant 0 : i32
    return %c0_i32, %c0_i32_0 : i32, i32
  }
  func.func @transform_11(%arg0: i32) -> (i32, i32) {
    %c0_i32 = arith.constant 0 : i32
    %c0_i32_0 = arith.constant 0 : i32
    %c0_i32_1 = arith.constant 0 : i32
    return %c0_i32, %c0_i32_0 : i32, i32
  }
  func.func @transform_12(%arg0: i32) -> (i32, i32) {
    %c0_i32 = arith.constant 0 : i32
    %c0_i32_0 = arith.constant 0 : i32
    %c0_i32_1 = arith.constant 0 : i32
    return %c0_i32, %c0_i32_0 : i32, i32
  }
  func.func @transform_13(%arg0: i32) -> (i32, i32) {
    %c0_i32 = arith.constant 0 : i32
    %c0_i32_0 = arith.constant 0 : i32
    %c0_i32_1 = arith.constant 0 : i32
    return %c0_i32, %c0_i32_0 : i32, i32
  }
  func.func @transform_14(%arg0: i32) -> (i32, i32) {
    %c0_i32 = arith.constant 0 : i32
    %c0_i32_0 = arith.constant 0 : i32
    %c0_i32_1 = arith.constant 0 : i32
    return %c0_i32, %c0_i32_0 : i32, i32
  }
  func.func @transform_15(%arg0: i32) -> (i32, i32) {
    %c0_i32 = arith.constant 0 : i32
    %c0_i32_0 = arith.constant 0 : i32
    %c0_i32_1 = arith.constant 0 : i32
    return %c0_i32, %c0_i32_0 : i32, i32
  }
  func.func @transform_16(%arg0: i32) -> (i32, i32) {
    %c0_i32 = arith.constant 0 : i32
    %c0_i32_0 = arith.constant 0 : i32
    %c0_i32_1 = arith.constant 0 : i32
    return %c0_i32, %c0_i32_0 : i32, i32
  }
  func.func @transform_17(%arg0: i32) -> (i32, i32) {
    %c0_i32 = arith.constant 0 : i32
    %c0_i32_0 = arith.constant 0 : i32
    %c0_i32_1 = arith.constant 0 : i32
    return %c0_i32, %c0_i32_0 : i32, i32
  }
  func.func @transform_18(%arg0: i32) -> (i32, i32) {
    %c0_i32 = arith.constant 0 : i32
    %c0_i32_0 = arith.constant 0 : i32
    %c0_i32_1 = arith.constant 0 : i32
    return %c0_i32, %c0_i32_0 : i32, i32
  }
  func.func @transform_19(%arg0: i32) -> (i32, i32) {
    %c0_i32 = arith.constant 0 : i32
    %c0_i32_0 = arith.constant 0 : i32
    %c0_i32_1 = arith.constant 0 : i32
    return %c0_i32, %c0_i32_0 : i32, i32
  }
  func.func @transform_20(%arg0: i32) -> (i32, i32) {
    %c0_i32 = arith.constant 0 : i32
    %c0_i32_0 = arith.constant 0 : i32
    %c0_i32_1 = arith.constant 0 : i32
    return %c0_i32, %c0_i32_0 : i32, i32
  }
  func.func @transform_21(%arg0: i32) -> (i32, i32) {
    %c0_i32 = arith.constant 0 : i32
    %c0_i32_0 = arith.constant 0 : i32
    %c0_i32_1 = arith.constant 0 : i32
    return %c0_i32, %c0_i32_0 : i32, i32
  }
  func.func @transform_22(%arg0: i32) -> (i32, i32) {
    %c0_i32 = arith.constant 0 : i32
    %c0_i32_0 = arith.constant 0 : i32
    %c0_i32_1 = arith.constant 0 : i32
    return %c0_i32, %c0_i32_0 : i32, i32
  }
  func.func @transform_23(%arg0: i32) -> (i32, i32) {
    %c0_i32 = arith.constant 0 : i32
    %c0_i32_0 = arith.constant 0 : i32
    %c0_i32_1 = arith.constant 0 : i32
    return %c0_i32, %c0_i32_0 : i32, i32
  }
  func.func @transform_24(%arg0: i32) -> (i32, i32) {
    %c0_i32 = arith.constant 0 : i32
    %c0_i32_0 = arith.constant 0 : i32
    %c0_i32_1 = arith.constant 0 : i32
    return %c0_i32, %c0_i32_0 : i32, i32
  }
  func.func @transform_25(%arg0: i32) -> (i32, i32) {
    %c0_i32 = arith.constant 0 : i32
    %c0_i32_0 = arith.constant 0 : i32
    return %arg0, %c0_i32 : i32, i32
  }
}

</mosaic_0001>

<bundles_post_ra>
// kernel: _lambda_.1
= control target key start
LH: loop header
LB: loop body
LE: loop exit
PB: predicated region body
PF: predicated region fallthrough
CT: control target
= control target key end

     0   :  { %s8413_s0 = inlined_call_operand.hbm [shape: f32[16,128], index: 0, kind: input, shape index: {}]   ;;  %s8414_s1 = inlined_call_operand.hbm [shape: f32[128,512], index: 1, kind: input, shape index: {}]   ;;  %s8415_s2 = inlined_call_operand.hbm [shape: f32[1,512], index: 2, kind: input, shape index: {}]   ;;  %s8416_s3 = inlined_call_operand.hbm [shape: f32[1,512], index: 3, kind: input, shape index: {}]   ;;  %s8417_s4 = inlined_call_operand.hbm [shape: f32[1,512], index: 4, kind: input, shape index: {}]   ;;  %s8418_s5 = inlined_call_operand.hbm [shape: f32[512,512], index: 5, kind: input, shape index: {}]   ;;  %s8419_s6 = inlined_call_operand.hbm [shape: f32[1,512], index: 6, kind: input, shape index: {}]   ;;  %s8420_s7 = inlined_call_operand.hbm [shape: f32[1,512], index: 7, kind: input, shape index: {}]   ;;  %s8421_s8 = inlined_call_operand.vmem [shape: f32[1,512], index: 8, kind: input, shape index: {}]   ;;  %s8422_s9 = inlined_call_operand.hbm [shape: f32[512,512], index: 9, kind: input, shape index: {}]   ;;  %s8423_s10 = inlined_call_operand.vmem [shape: f32[1,512], index: 10, kind: input, shape index: {}]   ;;  %s8424_s11 = inlined_call_operand.vmem [shape: f32[1,512], index: 11, kind: input, shape index: {}]   ;;  %s8425_s12 = inlined_call_operand.vmem [shape: f32[1,512], index: 12, kind: input, shape index: {}]   ;;  %s8426_s13 = inlined_call_operand.hbm [shape: f32[512,512], index: 13, kind: input, shape index: {}]   ;;  %s8427_s14 = inlined_call_operand.vmem [shape: f32[1,512], index: 14, kind: input, shape index: {}]   ;;  %s8428_s15 = inlined_call_operand.vmem [shape: f32[1,512], index: 15, kind: input, shape index: {}]   ;;  %s8429_s16 = inlined_call_operand.vmem [shape: f32[1,512], index: 16, kind: input, shape index: {}]   ;;  %s8430_s17 = inlined_call_operand.hbm [shape: f32[512,512], index: 17, kind: input, shape index: {}]   ;;  %s8431_s18 = inlined_call_operand.vmem [shape: f32[1,512], index: 18, kind: input, shape index: {}]   ;;  %s8432_s19 = inlined_call_operand.vmem [shape: f32[1,512], index: 19, kind: input, shape index: {}]   ;;  %s8433_s20 = inlined_call_operand.vmem [shape: f32[1,512], index: 20, kind: input, shape index: {}]   ;;  %s8434_s21 = inlined_call_operand.hbm [shape: f32[512,512], index: 21, kind: input, shape index: {}]   ;;  %s8435_s22 = inlined_call_operand.vmem [shape: f32[1,512], index: 22, kind: input, shape index: {}]   ;;  %s8436_s23 = inlined_call_operand.hbm [shape: f32[512,128], index: 23, kind: input, shape index: {}]   ;;  %s8437_s24 = inlined_call_operand.vmem [shape: f32[1,128], index: 24, kind: input, shape index: {}]   ;;  %s8438_s25 = inlined_call_operand.hbm [shape: f32[16,128], index: 25, kind: output, shape index: {}]  }
   0x1   :  { %8462 = sst [smem:[#allocation32_spill]] %s8413_s0 }
   0x2   :  { %8463 = sst [smem:[#allocation33_spill]] %s8414_s1 }
   0x3   :  { %8464 = sst [smem:[#allocation34_spill]] %s8415_s2 }
   0x4   :  { %8465 = sst [smem:[#allocation35_spill]] %s8416_s3 }
   0x5   :  { %8466 = sst [smem:[#allocation36_spill]] %s8417_s4 }
   0x6   :  { %8467 = sst [smem:[#allocation37_spill]] %s8418_s5 }
   0x7   :  { %8468 = sst [smem:[#allocation38_spill]] %s8419_s6 }
   0x8   :  { %8469 = sst [smem:[#allocation39_spill]] %s8420_s7 }
   0x9   :  { %8470 = sst [smem:[#allocation40_spill]] %s8421_s8 }
   0xa   :  { %8471 = sst [smem:[#allocation41_spill]] %s8422_s9 }
   0xb   :  { %8472 = sst [smem:[#allocation42_spill]] %s8425_s12 }
   0xc   :  { %8473 = sst [smem:[#allocation43_spill]] %s8426_s13 }
   0xd   :  { %8474 = sst [smem:[#allocation44_spill]] %s8427_s14 }
   0xe   :  { %8475 = sst [smem:[#allocation45_spill]] %s8428_s15 }
   0xf   :  { %8476 = sst [smem:[#allocation46_spill]] %s8429_s16 }
  0x10   :  { %8477 = sst [smem:[#allocation47_spill]] %s8431_s18 }
  0x11   :  { %8478 = sst [smem:[#allocation48_spill]] %s8432_s19 }
  0x12   :  { %8479 = sst [smem:[#allocation49_spill]] %s8433_s20 }
  0x13   :  { %8480 = sst [smem:[#allocation50_spill]] %s8435_s22 }
  0x14   :  { %8481 = sst [smem:[#allocation51_spill]] %s8437_s24 }
  0x15   :  { %8482 = sst [smem:[#allocation52_spill]] %s8438_s25 }
  0x16   :  { %30 = vsyncpa [#allocation3], 0 }
  0x17   :  { %32 = vsyncpa [#allocation3 + $0x1], 0 }
  0x18   :  { %33 = vsyncpa [#allocation6], 0 }
  0x19   :  { %34 = vsyncpa [#allocation9], 0 }
  0x1a   :  { %35 = vsyncpa [#allocation12], 0 }
  0x1b   :  { %36 = vsyncpa [#allocation15], 0 }
  0x1c   :  { %37 = vsyncpa [#allocation18], 0 }
  0x1d   :  { %38 = vsyncpa [#allocation21], 0 }
  0x1e   :  { %39 = vsyncpa [#allocation4], 0 }
  0x1f   :  { %41 = vsyncpa [#allocation4 + $0x1], 0  ;;  %s7510_s29 = smov 0   ;;  %s7512_s2 = smov 0  }
  0x20   :  { %s7514_s6 = smov 0   ;;  %s7516_s30 = smov 0  }
  0x21 LB: > { %s7360_s7 = smov [#allocation5]   ;;  %s7531_s26 = sadd.s32 4294967295, %s7358_s30   ;;  %s7358_s30 = sphi %s7516_s30, %s8534_s30   ;;  %s7354_s6 = sphi %s7514_s6, %s8533_s6   ;;  %s7350_s2 = sphi %s7512_s2, %s8532_s2   ;;  %s7346_s29 = sphi %s7510_s29, %s8531_s29  }
  0x22   : > { %s620_s3 = sshll.u32 %s7360_s7, 4  ;;  %p5115_p0 = scmp.ge.s32.totalorder %s7358_s30, 1  ;;  %s7536_s3 = int_to_ptr.vmem [resolvable:$true] %s620_s3 }
  0x23   : > { %p8451_p1 = scmp.eq.s32.totalorder %s7531_s26, 0  ;;  %p608_p2 = scmp.lt.s32.totalorder %s7358_s30, 3 }
  0x24   : > { %s7361_s8 = smov [#allocation8]   ;;  %s7362_s28 = smov [#allocation11]  }
  0x25   : > { %p7538_p3 = pnand %p5115_p0, %p608_p2  ;;  %s645_s27 = sshll.u32 %s7361_s8, 4  ;;  %s7551_s27 = int_to_ptr.vmem [resolvable:$true] %s645_s27 }
  0x26   : > { %s666_s9 = sshll.u32 %s7362_s28, 4  ;;  %s8485_s7 = sld [smem:[#allocation33_spill]]  ;;  %s7553_s9 = int_to_ptr.vmem [resolvable:$true] %s666_s9 }
  0x27   : > { %s8483_s1 = scalar_select %p7538_p3, 1, 0 }
  0x28   : > { %p6721_p5 = pneg %p7538_p3 }
  0x2a   : > { %p7547_p6 = pnand %p6721_p5, %p8451_p1 }
  0x2c   : > { %s6902_s25 = scalar_lea.hbm %s8485_s7, 8192  ;;  %p7563_p8 = pneg %p7547_p6 }
  0x2d   : > { %p6903_p7 = scmp.ne.s32.totalorder %s8485_s7, %s6902_s25  ;;  %p6909_p11 = scmp.lt.u32.totalorder %s6902_s25, %s8485_s7 }
  0x2f   : > { %p6905_p9 = pnand %p7563_p8, %p6903_p7 }
  0x31   : > { %p6906_p10 = pneg %p6905_p9 }
  0x33   : > { %p6911_p12 = pnand %p6909_p11, %p6906_p10 }
  0x35   : > { %6914 = shalt.err (!%p6911_p12)
}
  0x36   : > { %s6915_s22 = scalar_lea.vmem %s7536_s3, 8192  ;;  %p6923_p5 = scmp.lt.s32.totalorder %s7536_s3, %s7536_s3 }
  0x37   : > { %p6916_p13 = scmp.ne.s32.totalorder %s7536_s3, %s6915_s22  ;;  %p6924_p4 = scmp.lt.s32.totalorder %s6915_s22, %s6915_s22 }
  0x39   : > { %p6918_p0 = pnand %p6916_p13, %p7563_p8  ;;  %p6925_p7 = por %p6924_p4, %p6923_p5 }
  0x3b   : > { %p6919_p2 = pneg %p6918_p0 }
  0x3d   : > { %p6926_p9 = pnand %p6925_p7, %p6919_p2 }
  0x3f   : > { %6929 = shalt.err (!%p6926_p9)
}
  0x40   : > { %s8453_s24 = smov 512   ;;  %s8455_s20 = smov 32  }
  0x41   : > { %6724 = dma.hbm_to_vmem [thread:$0]  (!%p7547_p6), %s8485_s7, 8192, %s7536_s3, [#allocation6], %s8453_s24, %s8453_s24, %s8455_s20  }
  0x42   : > { %s8487_s19 = sld [smem:[#allocation35_spill]] }
  0x48   : > { %s6930_s22 = scalar_lea.hbm %s8487_s19, 64 }
  0x49   : > { %p6931_p4 = scmp.ne.s32.totalorder %s8487_s19, %s6930_s22  ;;  %p6937_p12 = scmp.lt.u32.totalorder %s6930_s22, %s8487_s19 }
  0x4b   : > { %p6933_p10 = pnand %p6931_p4, %p7563_p8 }
  0x4d   : > { %p6934_p11 = pneg %p6933_p10 }
  0x4f   : > { %p6939_p13 = pnand %p6937_p12, %p6934_p11 }
  0x51   : > { %6942 = shalt.err (!%p6939_p13)
}
  0x52   : > { %s6943_s3 = scalar_lea.vmem %s7551_s27, 64  ;;  %p6951_p7 = scmp.lt.s32.totalorder %s7551_s27, %s7551_s27 }
  0x53   : > { %p6944_p0 = scmp.ne.s32.totalorder %s7551_s27, %s6943_s3  ;;  %p6952_p9 = scmp.lt.s32.totalorder %s6943_s3, %s6943_s3 }
  0x55   : > { %p6946_p2 = pnand %p6944_p0, %p7563_p8  ;;  %p6953_p4 = por %p6952_p9, %p6951_p7 }
  0x57   : > { %p6947_p5 = pneg %p6946_p2 }
  0x59   : > { %p6954_p10 = pnand %p6953_p4, %p6947_p5 }
  0x5b   : > { %6957 = shalt.err (!%p6954_p10)
}
  0x5c   : > { %6730 = dma.hbm_to_vmem [thread:$0]  (!%p7547_p6), %s8487_s19, 64, %s7551_s27, [#allocation9]  }
  0x5d   : > { %s8488_s25 = sld [smem:[#allocation37_spill]] }
  0x63   : > { %s6958_s5 = scalar_lea.hbm %s8488_s25, 32768 }
  0x64   : > { %p6959_p11 = scmp.ne.s32.totalorder %s8488_s25, %s6958_s5  ;;  %p6965_p0 = scmp.lt.u32.totalorder %s6958_s5, %s8488_s25 }
  0x66   : > { %p6961_p12 = pnand %p6959_p11, %p7563_p8 }
  0x68   : > { %p6962_p13 = pneg %p6961_p12 }
  0x6a   : > { %p6967_p2 = pnand %p6965_p0, %p6962_p13 }
  0x6c   : > { %6970 = shalt.err (!%p6967_p2)
}
  0x6d   : > { %s6971_s27 = scalar_lea.vmem %s7553_s9, 32768  ;;  %p6979_p4 = scmp.lt.s32.totalorder %s7553_s9, %s7553_s9 }
  0x6e   : > { %p6972_p5 = scmp.ne.s32.totalorder %s7553_s9, %s6971_s27  ;;  %p6980_p10 = scmp.lt.s32.totalorder %s6971_s27, %s6971_s27 }
  0x70   : > { %p6974_p7 = pnand %p6972_p5, %p7563_p8  ;;  %p6981_p11 = por %p6980_p10, %p6979_p4 }
  0x72   : > { %p6975_p9 = pneg %p6974_p7 }
  0x74   : > { %p6982_p12 = pnand %p6981_p11, %p6975_p9 }
  0x76   : > { %6985 = shalt.err (!%p6982_p12)
}
  0x77   : > { %6736 = dma.hbm_to_vmem [thread:$0]  (!%p7547_p6), %s8488_s25, 32768, %s7553_s9, [#allocation12], %s8453_s24, %s8453_s24, %s8455_s20  }
  0x78   : > { %s7365_s16 = smov [#allocation14]   ;;  %s7366_s5 = smov [#allocation17]  }
  0x79   : > { %s691_s18 = sshll.u32 %s7365_s16, 4  ;;  %s726_s0 = sshll.u32 %s7366_s5, 4  ;;  %s692_s18 = int_to_ptr.vmem [resolvable:$true] %s691_s18  ;;  %s727_s0 = int_to_ptr.vmem [resolvable:$true] %s726_s0 }
  0x7a   : > { %s8489_s3 = sld [smem:[#allocation39_spill]] }
  0x80   : > { %s6986_s27 = scalar_lea.hbm %s8489_s3, 64 }
  0x81   : > { %p6987_p13 = scmp.ne.s32.totalorder %s8489_s3, %s6986_s27  ;;  %p6993_p5 = scmp.lt.u32.totalorder %s6986_s27, %s8489_s3 }
  0x83   : > { %p6989_p0 = pnand %p6987_p13, %p7563_p8 }
  0x85   : > { %p6990_p2 = pneg %p6989_p0 }
  0x87   : > { %p6995_p7 = pnand %p6993_p5, %p6990_p2 }
  0x89   : > { %6998 = shalt.err (!%p6995_p7)
}
  0x8a   : > { %s6999_s9 = scalar_lea.vmem %s692_s18, 64  ;;  %p7007_p11 = scmp.lt.s32.totalorder %s692_s18, %s692_s18 }
  0x8b   : > { %p7000_p9 = scmp.ne.s32.totalorder %s692_s18, %s6999_s9  ;;  %p7008_p12 = scmp.lt.s32.totalorder %s6999_s9, %s6999_s9 }
  0x8d   : > { %p7002_p4 = pnand %p7000_p9, %p7563_p8  ;;  %p7009_p1 = por %p7008_p12, %p7007_p11 }
  0x8f   : > { %p7003_p10 = pneg %p7002_p4 }
  0x91   : > { %p7010_p3 = pnand %p7009_p1, %p7003_p10 }
  0x93   : > { %7013 = shalt.err (!%p7010_p3)
}
  0x94   : > { %6742 = dma.hbm_to_vmem [thread:$0]  (!%p7547_p6), %s8489_s3, 64, %s692_s18, [#allocation15]  }
  0x95   : > { %s8490_s13 = sld [smem:[#allocation43_spill]] }
  0x9b   : > { %s7014_s16 = scalar_lea.hbm %s8490_s13, 32768 }
  0x9c   : > { %p7015_p13 = scmp.ne.s32.totalorder %s8490_s13, %s7014_s16  ;;  %p7021_p3 = scmp.lt.u32.totalorder %s7014_s16, %s8490_s13 }
  0x9e   : > { %p7017_p0 = pnand %p7015_p13, %p7563_p8 }
  0xa0   : > { %p7018_p1 = pneg %p7017_p0 }
  0xa2   : > { %p7023_p2 = pnand %p7021_p3, %p7018_p1 }
  0xa4   : > { %7026 = shalt.err (!%p7023_p2)
}
  0xa5   : > { %s7027_s14 = scalar_lea.vmem %s727_s0, 32768  ;;  %p7035_p4 = scmp.lt.s32.totalorder %s727_s0, %s727_s0 }
  0xa6   : > { %p7028_p5 = scmp.ne.s32.totalorder %s727_s0, %s7027_s14  ;;  %p7036_p10 = scmp.lt.s32.totalorder %s7027_s14, %s7027_s14 }
  0xa8   : > { %p7030_p7 = pnand %p7028_p5, %p7563_p8  ;;  %p7037_p11 = por %p7036_p10, %p7035_p4 }
  0xaa   : > { %p7031_p9 = pneg %p7030_p7 }
  0xac   : > { %p7038_p12 = pnand %p7037_p11, %p7031_p9 }
  0xae   : > { %7041 = shalt.err (!%p7038_p12)
}
  0xaf   : > { %6748 = dma.hbm_to_vmem [thread:$0]  (!%p7547_p6), %s8490_s13, 32768, %s727_s0, [#allocation18], %s8453_s24, %s8453_s24, %s8455_s20  }
  0xb0   : > { %s7367_s19 = smov [#allocation20]   ;;  %s7368_s12 = smov [#allocation7]  }
  0xb1   : > { %s770_s7 = sshll.u32 %s7367_s19, 4  ;;  %s634_s15 = sshll.u32 %s7368_s12, 4  ;;  %s771_s7 = int_to_ptr.vmem [resolvable:$true] %s770_s7  ;;  %s635_s15 = int_to_ptr.vmem [resolvable:$true] %s634_s15 }
  0xb2   : > { %s7042_s28 = scalar_lea.hbm %s8434_s21, 32768 }
  0xb3   : > { %p7043_p13 = scmp.ne.s32.totalorder %s8434_s21, %s7042_s28  ;;  %p7049_p3 = scmp.lt.u32.totalorder %s7042_s28, %s8434_s21 }
  0xb5   : > { %p7045_p0 = pnand %p7043_p13, %p7563_p8 }
  0xb7   : > { %p7046_p1 = pneg %p7045_p0 }
  0xb9   : > { %p7051_p2 = pnand %p7049_p3, %p7046_p1 }
  0xbb   : > { %7054 = shalt.err (!%p7051_p2)
}
  0xbc   : > { %s7055_s0 = scalar_lea.vmem %s771_s7, 32768  ;;  %p7063_p4 = scmp.lt.s32.totalorder %s771_s7, %s771_s7 }
  0xbd   : > { %p7056_p5 = scmp.ne.s32.totalorder %s771_s7, %s7055_s0  ;;  %p7064_p10 = scmp.lt.s32.totalorder %s7055_s0, %s7055_s0 }
  0xbf   : > { %p7058_p7 = pnand %p7056_p5, %p7563_p8  ;;  %p7065_p11 = por %p7064_p10, %p7063_p4 }
  0xc1   : > { %p7059_p9 = pneg %p7058_p7 }
  0xc3   : > { %p7066_p12 = pnand %p7065_p11, %p7059_p9 }
  0xc5   : > { %7069 = shalt.err (!%p7066_p12)
}
  0xc6   : > { %6754 = dma.hbm_to_vmem [thread:$0]  (!%p7547_p6), %s8434_s21, 32768, %s771_s7, [#allocation21], %s8453_s24, %s8453_s24, %s8455_s20  }
  0xc7   : > { %s8491_s5 = sld [smem:[#allocation34_spill]] }
  0xcd   : > { %s7070_s28 = scalar_lea.hbm %s8491_s5, 64 }
  0xce   : > { %p7071_p13 = scmp.ne.s32.totalorder %s8491_s5, %s7070_s28  ;;  %p7077_p3 = scmp.lt.u32.totalorder %s7070_s28, %s8491_s5 }
  0xd0   : > { %p7073_p0 = pnand %p7071_p13, %p7563_p8 }
  0xd2   : > { %p7074_p1 = pneg %p7073_p0 }
  0xd4   : > { %p7079_p2 = pnand %p7077_p3, %p7074_p1 }
  0xd6   : > { %7082 = shalt.err (!%p7079_p2)
}
  0xd7   : > { %s7083_s0 = scalar_lea.vmem %s635_s15, 64  ;;  %p7091_p4 = scmp.lt.s32.totalorder %s635_s15, %s635_s15 }
  0xd8   : > { %p7084_p5 = scmp.ne.s32.totalorder %s635_s15, %s7083_s0  ;;  %p7092_p10 = scmp.lt.s32.totalorder %s7083_s0, %s7083_s0 }
  0xda   : > { %p7086_p7 = pnand %p7084_p5, %p7563_p8  ;;  %p7093_p11 = por %p7092_p10, %p7091_p4 }
  0xdc   : > { %p7087_p9 = pneg %p7086_p7 }
  0xde   : > { %p7094_p12 = pnand %p7093_p11, %p7087_p9 }
  0xe0   : > { %7097 = shalt.err (!%p7094_p12)
}
  0xe1   : > { %6727 = dma.hbm_to_vmem [thread:$0]  (!%p7547_p6), %s8491_s5, 64, %s635_s15, [#allocation6]  }
  0xe2   : > { %s7369_s19 = smov [#allocation10]   ;;  %s7370_s16 = smov [#allocation13]  }
  0xe3   : > { %s656_s12 = sshll.u32 %s7369_s19, 4  ;;  %s680_s28 = sshll.u32 %s7370_s16, 4  ;;  %s657_s12 = int_to_ptr.vmem [resolvable:$true] %s656_s12  ;;  %s681_s28 = int_to_ptr.vmem [resolvable:$true] %s680_s28 }
  0xe4   : > { %s8492_s14 = sld [smem:[#allocation36_spill]] }
  0xea   : > { %s7098_s18 = scalar_lea.hbm %s8492_s14, 64 }
  0xeb   : > { %p7099_p13 = scmp.ne.s32.totalorder %s8492_s14, %s7098_s18  ;;  %p7105_p3 = scmp.lt.u32.totalorder %s7098_s18, %s8492_s14 }
  0xed   : > { %p7101_p0 = pnand %p7099_p13, %p7563_p8 }
  0xef   : > { %p7102_p1 = pneg %p7101_p0 }
  0xf1   : > { %p7107_p2 = pnand %p7105_p3, %p7102_p1 }
  0xf3   : > { %7110 = shalt.err (!%p7107_p2)
}
  0xf4   : > { %s7111_s15 = scalar_lea.vmem %s657_s12, 64  ;;  %p7119_p4 = scmp.lt.s32.totalorder %s657_s12, %s657_s12 }
  0xf5   : > { %p7112_p5 = scmp.ne.s32.totalorder %s657_s12, %s7111_s15  ;;  %p7120_p10 = scmp.lt.s32.totalorder %s7111_s15, %s7111_s15 }
  0xf7   : > { %p7114_p7 = pnand %p7112_p5, %p7563_p8  ;;  %p7121_p11 = por %p7120_p10, %p7119_p4 }
  0xf9   : > { %p7115_p9 = pneg %p7114_p7 }
  0xfb   : > { %p7122_p12 = pnand %p7121_p11, %p7115_p9 }
  0xfd   : > { %7125 = shalt.err (!%p7122_p12)
}
  0xfe   : > { %6733 = dma.hbm_to_vmem [thread:$0]  (!%p7547_p6), %s8492_s14, 64, %s657_s12, [#allocation9]  }
  0xff   : > { %s8493_s16 = sld [smem:[#allocation38_spill]] }
 0x105   : > { %s7126_s22 = scalar_lea.hbm %s8493_s16, 64 }
 0x106   : > { %p7127_p13 = scmp.ne.s32.totalorder %s8493_s16, %s7126_s22  ;;  %p7133_p3 = scmp.lt.u32.totalorder %s7126_s22, %s8493_s16 }
 0x108   : > { %p7129_p0 = pnand %p7127_p13, %p7563_p8 }
 0x10a   : > { %p7130_p1 = pneg %p7129_p0 }
 0x10c   : > { %p7135_p2 = pnand %p7133_p3, %p7130_p1 }
 0x10e   : > { %7138 = shalt.err (!%p7135_p2)
}
 0x10f   : > { %s7139_s15 = scalar_lea.vmem %s681_s28, 64  ;;  %p7147_p4 = scmp.lt.s32.totalorder %s681_s28, %s681_s28 }
 0x110   : > { %p7140_p5 = scmp.ne.s32.totalorder %s681_s28, %s7139_s15  ;;  %p7148_p10 = scmp.lt.s32.totalorder %s7139_s15, %s7139_s15 }
 0x112   : > { %p7142_p7 = pnand %p7140_p5, %p7563_p8  ;;  %p7149_p11 = por %p7148_p10, %p7147_p4 }
 0x114   : > { %p7143_p9 = pneg %p7142_p7 }
 0x116   : > { %p7150_p12 = pnand %p7149_p11, %p7143_p9 }
 0x118   : > { %7153 = shalt.err (!%p7150_p12)
}
 0x119   : > { %6739 = dma.hbm_to_vmem [thread:$0]  (!%p7547_p6), %s8493_s16, 64, %s681_s28, [#allocation12]  }
 0x11a   : > { %s7371_s9 = smov [#allocation16]   ;;  %s7372_s19 = smov [#allocation19]  }
 0x11b   : > { %s704_s20 = sshll.u32 %s7371_s9, 4  ;;  %s748_s22 = sshll.u32 %s7372_s19, 4  ;;  %s705_s20 = int_to_ptr.vmem [resolvable:$true] %s704_s20  ;;  %s749_s22 = int_to_ptr.vmem [resolvable:$true] %s748_s22 }
 0x11c   : > { %s8494_s0 = sld [smem:[#allocation41_spill]] }
 0x122   : > { %s7154_s7 = scalar_lea.hbm %s8494_s0, 32768 }
 0x123   : > { %p7155_p13 = scmp.ne.s32.totalorder %s8494_s0, %s7154_s7  ;;  %p7161_p3 = scmp.lt.u32.totalorder %s7154_s7, %s8494_s0 }
 0x125   : > { %p7157_p0 = pnand %p7155_p13, %p7563_p8 }
 0x127   : > { %p7158_p1 = pneg %p7157_p0 }
 0x129   : > { %p7163_p2 = pnand %p7161_p3, %p7158_p1 }
 0x12b   : > { %7166 = shalt.err (!%p7163_p2)
}
 0x12c   : > { %s7167_s28 = scalar_lea.vmem %s705_s20, 32768  ;;  %p7175_p4 = scmp.lt.s32.totalorder %s705_s20, %s705_s20 }
 0x12d   : > { %p7168_p5 = scmp.ne.s32.totalorder %s705_s20, %s7167_s28  ;;  %p7176_p10 = scmp.lt.s32.totalorder %s7167_s28, %s7167_s28 }
 0x12f   : > { %p7170_p7 = pnand %p7168_p5, %p7563_p8  ;;  %p7177_p11 = por %p7176_p10, %p7175_p4 }
 0x131   : > { %p7171_p9 = pneg %p7170_p7 }
 0x133   : > { %p7178_p12 = pnand %p7177_p11, %p7171_p9 }
 0x135   : > { %7181 = shalt.err (!%p7178_p12)
}
 0x136   : > { %s8495_s3 = smov 32   ;;  %s8496_s24 = smov 512  }
 0x137   : > { %6745 = dma.hbm_to_vmem [thread:$0]  (!%p7547_p6), %s8494_s0, 32768, %s705_s20, [#allocation15], %s8496_s24, %s8496_s24, %s8495_s3  }
 0x138   : > { %s7182_s18 = scalar_lea.hbm %s8430_s17, 32768 }
 0x139   : > { %p7183_p13 = scmp.ne.s32.totalorder %s8430_s17, %s7182_s18  ;;  %p7189_p3 = scmp.lt.u32.totalorder %s7182_s18, %s8430_s17 }
 0x13b   : > { %p7185_p0 = pnand %p7183_p13, %p7563_p8 }
 0x13d   : > { %p7186_p1 = pneg %p7185_p0 }
 0x13f   : > { %p7191_p2 = pnand %p7189_p3, %p7186_p1 }
 0x141   : > { %7194 = shalt.err (!%p7191_p2)
}
 0x142   : > { %s7195_s5 = scalar_lea.vmem %s749_s22, 32768  ;;  %p7203_p4 = scmp.lt.s32.totalorder %s749_s22, %s749_s22 }
 0x143   : > { %p7196_p5 = scmp.ne.s32.totalorder %s749_s22, %s7195_s5  ;;  %p7204_p10 = scmp.lt.s32.totalorder %s7195_s5, %s7195_s5 }
 0x145   : > { %p7198_p7 = pnand %p7196_p5, %p7563_p8  ;;  %p7205_p11 = por %p7204_p10, %p7203_p4 }
 0x147   : > { %p7199_p9 = pneg %p7198_p7 }
 0x149   : > { %p7206_p12 = pnand %p7205_p11, %p7199_p9 }
 0x14b   : > { %7209 = shalt.err (!%p7206_p12)
}
 0x14c   : > { %6751 = dma.hbm_to_vmem [thread:$0]  (!%p7547_p6), %s8430_s17, 32768, %s749_s22, [#allocation18], %s8496_s24, %s8496_s24, %s8495_s3  }
 0x14d   : > { %s7373_s19 = smov [#allocation22]   ;;  %s7210_s15 = scalar_lea.hbm %s8436_s23, 8192 }
 0x14e   : > { %s786_s27 = sshll.u32 %s7373_s19, 4  ;;  %p7211_p13 = scmp.ne.s32.totalorder %s8436_s23, %s7210_s15  ;;  %s787_s27 = int_to_ptr.vmem [resolvable:$true] %s786_s27 }
 0x14f   : > { %p7217_p3 = scmp.lt.u32.totalorder %s7210_s15, %s8436_s23 }
 0x150   : > { %p7213_p0 = pnand %p7211_p13, %p7563_p8 }
 0x152   : > { %p7214_p1 = pneg %p7213_p0 }
 0x154   : > { %p7219_p2 = pnand %p7217_p3, %p7214_p1 }
 0x156   : > { %7222 = shalt.err (!%p7219_p2)
}
 0x157   : > { %s7223_s22 = scalar_lea.vmem %s787_s27, 8192  ;;  %p7231_p4 = scmp.lt.s32.totalorder %s787_s27, %s787_s27 }
 0x158   : > { %p7224_p5 = scmp.ne.s32.totalorder %s787_s27, %s7223_s22  ;;  %p7232_p10 = scmp.lt.s32.totalorder %s7223_s22, %s7223_s22 }
 0x15a   : > { %p7226_p7 = pnand %p7224_p5, %p7563_p8  ;;  %p7233_p11 = por %p7232_p10, %p7231_p4 }
 0x15c   : > { %p7227_p9 = pneg %p7226_p7 }
 0x15e   : > { %p7234_p12 = pnand %p7233_p11, %p7227_p9 }
 0x160   : > { %7237 = shalt.err (!%p7234_p12)
}
 0x161   : > { %s7374_s3 = smov 128   ;;  %s7375_s8 = smov 8  }
 0x162   : > { %6757 = dma.hbm_to_vmem [thread:$0]  (!%p7547_p6), %s8436_s23, 8192, %s787_s27, [#allocation21], %s7374_s3, %s7374_s3, %s7375_s8  }
 0x163   : > { %s5114_s20 = sadd.s32 4294967294, %s7358_s30   ;;  %s7812_s9 = sadd.s32 1, %s7358_s30  }
 0x164   : > { %s51_s19 = ssub.s32 %s7358_s30, %s7812_s9  ;;  %s54_s18 = sadd.s32 1, %s7354_s6 }
 0x165   : > { %p52_p8 = scmp.eq.s32.totalorder %s51_s19, 0  ;;  %p61_p13 = scmp.ne.s32.totalorder %s7354_s6, %s7350_s2 }
 0x166   : > { %p62_p0 = scmp.eq.s32.totalorder %s7358_s30, 0  ;;  %p67_p1 = scmp.ne.s32.totalorder %s7350_s2, %s7346_s29 }
 0x167   : > { %s7823_s7 = scalar_select %p52_p8, %s7354_s6, %s54_s18  }
 0x168   : > { %p7825_p3 = por %p62_p0, %p61_p13  ;;  %p8498_p2 = scmp.eq.s32.totalorder %s7531_s26, 0 }
 0x169   : > { %p595_p5 = scmp.eq.s32.totalorder %s7531_s26, 1  ;;  %p601_p7 = scmp.eq.s32.totalorder %s5114_s20, 1 }
 0x16a   : > { %p7831_p6 = por %p8498_p2, %p67_p1  ;;  %p6778_p9 = scmp.lt.s32.totalorder %s7358_s30, 2 }
 0x16b   : > { %s803_s15 = sand.u32 1, %s7354_s6   ;;  %p7838_p4 = por %p595_p5, %p61_p13 }
 0x16c   : > { %p7842_p10 = por %p601_p7, %p67_p1  ;;  %s5129_s5 = sshll.u32 %s803_s15, 3 }
 0x16d   : > { %s8500_s12 = scalar_select %p7838_p4, 1, 0 }
 0x16e   : > { %s8501_s28 = scalar_select %p7842_p10, 1, 0 }
 0x16f   : > { %s5130_s22 = sshll.u32 %s7358_s30, 7  ;;  %s8502_s0 = sld [smem:[#allocation32_spill]] }
 0x170   : > { %s807_s20 = scalar_lea.vmem [#allocation2], %s5129_s5  ;;  %p7856_p11 = pnand %p6778_p9, %p7825_p3 }
 0x171   : > { %s814_s19 = sshll.u32 %s807_s20, 4  ;;  %s804_s13 = scalar_lea.sflag [#allocation3], %s803_s15  ;;  %s7852_s19 = int_to_ptr.vmem [resolvable:$true] %s814_s19 }
 0x172   : > { %p7240_p8 = pneg %p7856_p11 }
 0x175   : > { %s7850_s24 = scalar_lea.hbm %s8502_s0, %s5130_s22  ;;  %s7243_s3 = scalar_lea.hbm %s8502_s0, 256 }
 0x176   : > { %s7238_s14 = scalar_lea.hbm %s7850_s24, 128  ;;  %p7244_p1 = scmp.lt.u32.totalorder %s7850_s24, %s8502_s0 }
 0x177   : > { %p7239_p12 = scmp.ne.s32.totalorder %s7850_s24, %s7238_s14  ;;  %p7245_p3 = scmp.lt.u32.totalorder %s7243_s3, %s7238_s14 }
 0x178   : > { %p7247_p5 = scmp.lt.u32.totalorder %s7238_s14, %s7850_s24 }
 0x179   : > { %p7241_p13 = pnand %p7240_p8, %p7239_p12  ;;  %p7246_p2 = por %p7245_p3, %p7244_p1 }
 0x17b   : > { %p7242_p0 = pneg %p7241_p13  ;;  %p7248_p7 = por %p7247_p5, %p7246_p2 }
 0x17d   : > { %p7249_p9 = pnand %p7248_p7, %p7242_p0 }
 0x17f   : > { %7252 = shalt.err (!%p7249_p9)
}
 0x180   : > { %s7253_s15 = scalar_lea.vmem %s7852_s19, 128  ;;  %s7376_s20 = smov [#allocation2]  }
 0x181   : > { %p7254_p12 = scmp.ne.s32.totalorder %s7852_s19, %s7253_s15  ;;  %s7258_s5 = sshll.u32 %s7376_s20, 4  ;;  %s7259_s5 = int_to_ptr.vmem [resolvable:$false] %s7258_s5 }
 0x182   : > { %s7260_s22 = scalar_lea.vmem %s7259_s5, 256  ;;  %p7261_p4 = scmp.lt.s32.totalorder %s7852_s19, %s7259_s5 }
 0x183   : > { %p7256_p13 = pnand %p7254_p12, %p7240_p8  ;;  %p7262_p1 = scmp.lt.s32.totalorder %s7260_s22, %s7253_s15 }
 0x185   : > { %p7257_p10 = pneg %p7256_p13  ;;  %p7263_p3 = por %p7262_p1, %p7261_p4 }
 0x187   : > { %p7264_p2 = pnand %p7263_p3, %p7257_p10 }
 0x189   : > { %7267 = shalt.err (!%p7264_p2)
}
 0x18a   : > { %6761 = dma.hbm_to_vmem [thread:$0]  (!%p7856_p11), %s7850_s24, 128, %s7852_s19, %s804_s13  }
 0x18b   : > { %p8504_p0 = scmp.ne.s32.totalorder %s8483_s1, 0 }
 0x18c   : > { %s7888_s14 = sand.u32 (!%p8504_p0), 1, %s7350_s2  }
 0x18d   : > { %823 = sbr.rel (%p8504_p0) target bundleno = 4230 (0x1086), region = 120  ;;  %s5132_s3 = sshll.u32 (!%p8504_p0), %s7888_s14, 3 }
 0x18e   : > { %s826_s4 = scalar_lea.sflag (!%p8504_p0), [#allocation3], %s7888_s14  ;;  %s7894_s8 = scalar_lea.vmem (!%p8504_p0), [#allocation2], %s5132_s3 }
 0x194   : > { %7313 = dma.done.wait (%p7831_p6), %s826_s4, 128  }
 0x195   : > { %7315 = vsyncadd (%p7831_p6), %s826_s4, 4294967168  ;;  %p8505_p4 = scmp.eq.s32.totalorder %s7531_s26, 0 }
 0x197   : > { %7317 = dma.done.wait (%p8505_p4), [#allocation6], 8256   ;;  %p8506_p10 = pmov %p8505_p4 }
 0x198   : > { %p8507_p11 = pmov %p8505_p4 }
 0x199   : > { %7319 = vsyncadd (%p8506_p10), [#allocation6], 4294959040 }
 0x19a   : > { %7321 = dma.done.wait (%p8507_p11), [#allocation9], 128   ;;  %p8508_p8 = pmov %p8505_p4 }
 0x19b   : > { %p8509_p5 = pmov %p8505_p4 }
 0x19c   : > { %7323 = vsyncadd (%p8508_p8), [#allocation9], 4294967168 }
 0x19d   : > { %7325 = dma.done.wait (%p8509_p5), [#allocation12], 32832   ;;  %p8510_p7 = pmov %p8505_p4 }
 0x19e   : > { %p8511_p6 = pmov %p8505_p4 }
 0x19f   : > { %7327 = vsyncadd (%p8510_p7), [#allocation12], 4294934464 }
 0x1a0   : > { %7329 = dma.done.wait (%p8511_p6), [#allocation15], 32832   ;;  %p8512_p9 = pmov %p8505_p4 }
 0x1a1   : > { %p8513_p12 = pmov %p8505_p4 }
 0x1a2   : > { %7331 = vsyncadd (%p8512_p9), [#allocation15], 4294934464 }
 0x1a3   : > { %7333 = dma.done.wait (%p8513_p12), [#allocation18], 65536   ;;  %p8514_p13 = pmov %p8505_p4 }
 0x1a4   : > { %p8515_p1 = pmov %p8505_p4 }
 0x1a5   : > { %7335 = vsyncadd (%p8514_p13), [#allocation18], 4294901760 }
 0x1a6   : > { %7337 = dma.done.wait (%p8515_p1), [#allocation21], 40960   ;;  %p8516_p3 = pmov %p8515_p1 }
 0x1a7   : > { %v7377_v0 = vmov 0.0   ;;  %v946_v1 = vld [vmem:[#allocation5 + $0x8] sm:$0xff]  ;;  %v948_v3 = vld [vmem:[#allocation5 + $0x18] sm:$0xff]  ;;  %v945_v6 = vld [vmem:[#allocation5] sm:$0xff]  ;;  %s8517_s27 = sld [smem:[#allocation40_spill]]  ;;  %s8518_s22 = sld [smem:[#allocation42_spill]] }
 0x1a8   : > { %7339 = vsyncadd (%p8516_p3), [#allocation21], 4294926336  ;;  %1095 = vmatprep.mubr.f32.mxu0 %v7377_v0  ;;  %1166 = vmatprep.mubr.f32.mxu1 %v7377_v0  ;;  %v950_v2 = vld [vmem:[#allocation5 + $0x28] sm:$0xff]  ;;  %v952_v5 = vld [vmem:[#allocation5 + $0x38] sm:$0xff]  ;;  %s8519_s13 = sld [smem:[#allocation44_spill]]  ;;  %s8520_s24 = sld [smem:[#allocation45_spill]] }
 0x1a9   : > { %v5221_v4 = vpack.c.bf16 %v950_v2, %v946_v1  ;;  %v949_v7 = vld [vmem:[#allocation5 + $0x20] sm:$0xff]  ;;  %v5253_v8 = vpack.c.bf16 %v952_v5, %v948_v3  ;;  %v947_v10 = vld [vmem:[#allocation5 + $0x10] sm:$0xff]  ;;  %v954_v12 = vld [vmem:[#allocation5 + $0x48] sm:$0xff]  ;;  %s8521_s15 = sld [smem:[#allocation46_spill]]  ;;  %s5148_s4 = sshll.u32 %s7531_s26, 7 }
 0x1aa   : > { %v5223_v9 = vpack.c.bf16 %v949_v7, %v945_v6  ;;  %v951_v11 = vld [vmem:[#allocation5 + $0x30] sm:$0xff]  ;;  %v958_v14 = vld [vmem:[#allocation5 + $0x68] sm:$0xff]  ;;  %v956_v15 = vld [vmem:[#allocation5 + $0x58] sm:$0xff]  ;;  %s4917_s18 = scalar_lea.sflag [#allocation4], %s7888_s14  ;;  %p8528_p0 = scmp.ne.s32.totalorder %s8500_s12, 0 }
 0x1ab   : > { %5222 = vmatprep.subr.bf16.mxu0 %v5221_v4  ;;  %v5255_v13 = vpack.c.bf16 %v951_v11, %v947_v10  ;;  %v960_v16 = vld [vmem:[#allocation5 + $0x78] sm:$0xff]  ;;  %5254 = vmatprep.subr.bf16.mxu1 %v5253_v8  ;;  %v5225_v17 = vpack.c.bf16 %v958_v14, %v954_v12  ;;  %v953_v19 = vld [vmem:[#allocation5 + $0x40] sm:$0xff]  ;;  %v955_v21 = vld [vmem:[#allocation5 + $0x50] sm:$0xff]  ;;  %s7379_s26 = smov [#allocation23]  }
 0x1ac   : > { %5224 = vmatpush1.bf16.msra.mxu0 %v5223_v9  ;;  %v5257_v18 = vpack.c.bf16 %v960_v16, %v956_v15  ;;  %v957_v20 = vld [vmem:[#allocation5 + $0x60] sm:$0xff]  ;;  %v959_v23 = vld [vmem:[#allocation5 + $0x70] sm:$0xff]  ;;  %v962_v24 = vld [vmem:[#allocation5 + $0x88] sm:$0xff] }
 0x1ad   : > { %5256 = vmatpush1.bf16.msra.mxu1 %v5255_v13  ;;  %v5227_v22 = vpack.c.bf16 %v957_v20, %v953_v19  ;;  %v966_v25 = vld [vmem:[#allocation5 + $0xa8] sm:$0xff]  ;;  %5226 = vmatprep.subr.bf16.mxu0 %v5225_v17  ;;  %v5259_v26 = vpack.c.bf16 %v959_v23, %v955_v21  ;;  %v964_v28 = vld [vmem:[#allocation5 + $0x98] sm:$0xff]  ;;  %v961_v30 = vld [vmem:[#allocation5 + $0x80] sm:$0xff] }
 0x1ae   : > { %5258 = vmatprep.subr.bf16.mxu1 %v5257_v18  ;;  %v5229_v27 = vpack.c.bf16 %v966_v25, %v962_v24  ;;  %v968_v29 = vld [vmem:[#allocation5 + $0xb8] sm:$0xff]  ;;  %v965_v32 = vld [vmem:[#allocation5 + $0xa0] sm:$0xff]  ;;  %v963_v33 = vld [vmem:[#allocation5 + $0x90] sm:$0xff] }
 0x1af   : > { %v5261_v31 = vpack.c.bf16 %v968_v29, %v964_v28  ;;  %v967_v34 = vld [vmem:[#allocation5 + $0xb0] sm:$0xff]  ;;  %v5231_v35 = vpack.c.bf16 %v965_v32, %v961_v30  ;;  %v970_v36 = vld [vmem:[#allocation5 + $0xc8] sm:$0xff]  ;;  %v972_v38 = vld [vmem:[#allocation5 + $0xd8] sm:$0xff] }
 0x1b0   : > { %5228 = vmatpush1.bf16.msra.mxu0 %v5227_v22  ;;  %v974_v37 = vld [vmem:[#allocation5 + $0xe8] sm:$0xff]  ;;  %v5263_v39 = vpack.c.bf16 %v967_v34, %v963_v33  ;;  %v976_v41 = vld [vmem:[#allocation5 + $0xf8] sm:$0xff]  ;;  %v969_v42 = vld [vmem:[#allocation5 + $0xc0] sm:$0xff]  ;;  %v1011_v34 = vlaneseq }
 0x1b1   : > { %5260 = vmatpush1.bf16.msra.mxu1 %v5259_v26  ;;  %5230 = vmatprep.subr.bf16.mxu0 %v5229_v27  ;;  %v5233_v40 = vpack.c.bf16 %v974_v37, %v970_v36  ;;  %v973_v43 = vld [vmem:[#allocation5 + $0xe0] sm:$0xff]  ;;  %v5265_v44 = vpack.c.bf16 %v976_v41, %v972_v38  ;;  %v971_v45 = vld [vmem:[#allocation5 + $0xd0] sm:$0xff]  ;;  %v978_v47 = vld [vmem:[#allocation5 + $0x108] sm:$0xff] }
 0x1b2   : > { %5262 = vmatprep.subr.bf16.mxu1 %v5261_v31  ;;  %v975_v46 = vld [vmem:[#allocation5 + $0xf0] sm:$0xff]  ;;  %v982_v48 = vld [vmem:[#allocation5 + $0x128] sm:$0xff]  ;;  %v980_v49 = vld [vmem:[#allocation5 + $0x118] sm:$0xff]  ;;  %v5235_v51 = vpack.c.bf16 %v973_v43, %v969_v42 }
 0x1b3   : > { %v984_v50 = vld [vmem:[#allocation5 + $0x138] sm:$0xff]  ;;  %v5267_v52 = vpack.c.bf16 %v975_v46, %v971_v45  ;;  %v5237_v53 = vpack.c.bf16 %v982_v48, %v978_v47  ;;  %v977_v54 = vld [vmem:[#allocation5 + $0x100] sm:$0xff]  ;;  %v979_v56 = vld [vmem:[#allocation5 + $0x110] sm:$0xff] }
 0x1b4   : > { %5232 = vmatpush1.bf16.msra.mxu0 %v5231_v35  ;;  %v981_v55 = vld [vmem:[#allocation5 + $0x120] sm:$0xff]  ;;  %v5269_v57 = vpack.c.bf16 %v984_v50, %v980_v49  ;;  %v983_v58 = vld [vmem:[#allocation5 + $0x130] sm:$0xff]  ;;  %v986_v59 = vld [vmem:[#allocation5 + $0x148] sm:$0xff]  ;;  %v1012_v35 = vshrl.u32 %v1011_v34, 7 }
 0x1b5   : > { %5264 = vmatpush1.bf16.msra.mxu1 %v5263_v39  ;;  %5234 = vmatprep.subr.bf16.mxu0 %v5233_v40  ;;  %v990_v60 = vld [vmem:[#allocation5 + $0x168] sm:$0xff]  ;;  %v988_v61 = vld [vmem:[#allocation5 + $0x158] sm:$0xff]  ;;  %v5239_v63 = vpack.c.bf16 %v981_v55, %v977_v54  ;;  %v5271_v0 = vpack.c.bf16 %v983_v58, %v979_v56  ;;  %v985_v2 = vld [vmem:[#allocation5 + $0x140] sm:$0xff] }
 0x1b6   : > { %5266 = vmatprep.subr.bf16.mxu1 %v5265_v44  ;;  %v992_v62 = vld [vmem:[#allocation5 + $0x178] sm:$0xff]  ;;  %v5241_v1 = vpack.c.bf16 %v990_v60, %v986_v59  ;;  %v989_v3 = vld [vmem:[#allocation5 + $0x160] sm:$0xff]  ;;  %v987_v4 = vld [vmem:[#allocation5 + $0x150] sm:$0xff]  ;;  %v7925_v36 = vsub.s32 0, %v1012_v35  ;;  %v7927_v38 = vsub.s32 2, %v1012_v35  ;;  %v7929_v39 = vsub.s32 1, %v1012_v35 }
 0x1b7   : > { %v5273_v5 = vpack.c.bf16 %v992_v62, %v988_v61  ;;  %v991_v6 = vld [vmem:[#allocation5 + $0x170] sm:$0xff]  ;;  %v994_v7 = vld [vmem:[#allocation5 + $0x188] sm:$0xff]  ;;  %v996_v9 = vld [vmem:[#allocation5 + $0x198] sm:$0xff]  ;;  %v5243_v11 = vpack.c.bf16 %v989_v3, %v985_v2  ;;  %v7931_v40 = vsub.s32 3, %v1012_v35 }
 0x1b8   : > { %5236 = vmatpush1.bf16.msra.mxu0 %v5235_v51  ;;  %v998_v8 = vld [vmem:[#allocation5 + $0x1a8] sm:$0xff]  ;;  %v1000_v10 = vld [vmem:[#allocation5 + $0x1b8] sm:$0xff]  ;;  %v5275_v12 = vpack.c.bf16 %v991_v6, %v987_v4  ;;  %v993_v14 = vld [vmem:[#allocation5 + $0x180] sm:$0xff] }
 0x1b9   : > { %5268 = vmatpush1.bf16.msra.mxu1 %v5267_v52  ;;  %5238 = vmatprep.subr.bf16.mxu0 %v5237_v53  ;;  %v5245_v13 = vpack.c.bf16 %v998_v8, %v994_v7  ;;  %v997_v15 = vld [vmem:[#allocation5 + $0x1a0] sm:$0xff]  ;;  %v995_v16 = vld [vmem:[#allocation5 + $0x190] sm:$0xff]  ;;  %v5277_v17 = vpack.c.bf16 %v1000_v10, %v996_v9  ;;  %v1002_v19 = vld [vmem:[#allocation5 + $0x1c8] sm:$0xff] }
 0x1ba   : > { %5270 = vmatprep.subr.bf16.mxu1 %v5269_v57  ;;  %v999_v18 = vld [vmem:[#allocation5 + $0x1b0] sm:$0xff]  ;;  %v1006_v20 = vld [vmem:[#allocation5 + $0x1e8] sm:$0xff]  ;;  %v1004_v21 = vld [vmem:[#allocation5 + $0x1d8] sm:$0xff]  ;;  %v5247_v23 = vpack.c.bf16 %v997_v15, %v993_v14 }
 0x1bb   : > { %v1008_v22 = vld [vmem:[#allocation5 + $0x1f8] sm:$0xff]  ;;  %v5279_v24 = vpack.c.bf16 %v999_v18, %v995_v16  ;;  %v5249_v25 = vpack.c.bf16 %v1006_v20, %v1002_v19  ;;  %v1001_v26 = vld [vmem:[#allocation5 + $0x1c0] sm:$0xff]  ;;  %v1003_v29 = vld [vmem:[#allocation5 + $0x1d0] sm:$0xff] }
 0x1bc   : > { %5240 = vmatpush1.bf16.msra.mxu0 %v5239_v63  ;;  %v1005_v27 = vld [vmem:[#allocation5 + $0x1e0] sm:$0xff]  ;;  %v5281_v28 = vpack.c.bf16 %v1008_v22, %v1004_v21  ;;  %v1007_v30 = vld [vmem:[#allocation5 + $0x1f0] sm:$0xff] }
 0x1bd   : > { %5272 = vmatpush1.bf16.msra.mxu1 %v5271_v0  ;;  %5242 = vmatprep.subr.bf16.mxu0 %v5241_v1  ;;  %v5251_v31 = vpack.c.bf16 %v1005_v27, %v1001_v26  ;;  %v5283_v32 = vpack.c.bf16 %v1007_v30, %v1003_v29  ;;  %v944_v33 = vld [vmem:[%s7894_s8] sm:$0xff]  ;;  %v1009_v37 = vld [vmem:[#allocation7] sm:$0xf]  ;;  %s943_s8 = scalar_lea.vmem [#allocation23], %s5132_s3  ;;  %s7272_s3 = sshll.u32 %s7379_s26, 4  ;;  %s7273_s3 = int_to_ptr.vmem [resolvable:$false] %s7272_s3 }
 0x1be   : > { %5274 = vmatprep.subr.bf16.mxu1 %v5273_v5  ;;  %v1014_v41 = vrot.slane %v1009_v37, %v7925_v36  ;;  %v1022_v42 = vrot.slane %v1009_v37, %v7927_v38  ;;  %v1018_v43 = vrot.slane %v1009_v37, %v7929_v39  ;;  %v1026_v44 = vrot.slane %v1009_v37, %v7931_v40  ;;  %s7274_s20 = scalar_lea.vmem %s7273_s3, 256 }
 0x1c0   : > { %5244 = vmatpush1.bf16.msra.mxu0 %v5243_v11 }
 0x1c1   : > { %5276 = vmatpush1.bf16.msra.mxu1 %v5275_v12  ;;  %5246 = vmatprep.subr.bf16.mxu0 %v5245_v13 }
 0x1c2   : > { %5278 = vmatprep.subr.bf16.mxu1 %v5277_v17 }
 0x1c4   : > { %5248 = vmatpush1.bf16.msra.mxu0 %v5247_v23 }
 0x1c5   : > { %5280 = vmatpush1.bf16.msra.mxu1 %v5279_v24  ;;  %5250 = vmatprep.subr.bf16.mxu0 %v5249_v25 }
 0x1c6   : > { %5282 = vmatprep.subr.bf16.mxu1 %v5281_v28 }
 0x1c8   : > { %5252 = vmatpush1.bf16.msra.mxu0 %v5251_v31 }
 0x1c9   : > { %5284 = vmatpush1.bf16.msra.mxu1 %v5283_v32 }
 0x1cb   : > { %1096 = vmatmul.mubr.f32.vlgmr.msra.gmra.mrb[0].mxu0 %v944_v33 }
 0x1cc   : > { %1167 = vmatmul.mubr.f32.vlgmr.msra.gmra.mrb[0].mxu1 %v944_v33 }
 0x29e   : > { %v1097_v45 = vpop.f32.mrb[0].mxu0 }
 0x29f   : > { %v7937_v46 = vadd.f32 %v1097_v45, %v1014_v41  ;;  %v1168_v47 = vpop.f32.mrb[0].mxu1  ;;  %v1099_v48 = vpop.f32.mrb[1].mxu0 }
 0x2a0   : > { %v7939_v49 = vadd.f32 %v1168_v47, %v1022_v42  ;;  %v7941_v50 = vadd.f32 %v1099_v48, %v1018_v43  ;;  %v1170_v51 = vpop.f32.mrb[1].mxu1 }
 0x2a1   : > { %v7944_v52 = vmul.f32 0.70710677, %v7937_v46  ;;  %v7946_v53 = vadd.f32 %v1170_v51, %v1026_v44 }
 0x2a2   : > { %v7949_v54 = vmul.f32 0.70710677, %v7939_v49  ;;  %v7952_v55 = vmul.f32 0.70710677, %v7941_v50 }
 0x2a3   : > { %v1189_v56 = vand.u32 2147483647, %v7944_v52  ;;  %v7956_v57 = vmul.f32 0.70710677, %v7946_v53  ;;  %vm1181_vm0 = vcmp.ge.f32.partialorder %v7944_v52, 0.0 }
 0x2a4   : > { %v1191_v58 = vand.u32 2147483647, %v7949_v54  ;;  %v1190_v61 = vand.u32 2147483647, %v7952_v55  ;;  %vm1183_vm1 = vcmp.ge.f32.partialorder %v7949_v54, 0.0  ;;  %vm1182_vm2 = vcmp.ge.f32.partialorder %v7952_v55, 0.0 }
 0x2a5   : > { %v1193_v59 = vmul.f32 0.3275911, %v1189_v56  ;;  %v1192_v63 = vand.u32 2147483647, %v7956_v57  ;;  %v1241_v5 = vsub.f32 0.0, %v1189_v56  ;;  %vm1184_vm3 = vcmp.ge.f32.partialorder %v7956_v57, 0.0 }
 0x2a6   : > { %v1195_v60 = vmul.f32 0.3275911, %v1191_v58  ;;  %v1194_v1 = vmul.f32 0.3275911, %v1190_v61  ;;  %v1243_v6 = vsub.f32 0.0, %v1191_v58  ;;  %v1242_v9 = vsub.f32 0.0, %v1190_v61 }
 0x2a7   : > { %v1197_v62 = vadd.f32 1.0, %v1193_v59  ;;  %v1196_v2 = vmul.f32 0.3275911, %v1192_v63  ;;  %v1245_v8 = vmul.f32 %v1241_v5, %v1189_v56  ;;  %v1244_v13 = vsub.f32 0.0, %v1192_v63 }
 0x2a8   : > { %v1199_v0 = vadd.f32 1.0, %v1195_v60  ;;  %v1198_v3 = vadd.f32 1.0, %v1194_v1  ;;  %v1247_v12 = vmul.f32 %v1243_v6, %v1191_v58  ;;  %v1246_v18 = vmul.f32 %v1242_v9, %v1190_v61 }
 0x2a9   : > { %6842 = vrcp.f32 %v1197_v62  ;;  %v1200_v4 = vadd.f32 1.0, %v1196_v2  ;;  %v1249_v17 = vmul.f32 1.442695, %v1245_v8  ;;  %v1248_v24 = vmul.f32 %v1244_v13, %v1192_v63 }
 0x2aa   : > { %6844 = vrcp.f32 %v1199_v0  ;;  %v1253_v21 = vmul.f32 1.442695, %v1247_v12  ;;  %v1251_v29 = vmul.f32 1.442695, %v1246_v18  ;;  %v7378_v12 = vmov -1.0  }
 0x2ab   : > { %6846 = vrcp.f32 %v1198_v3  ;;  %v1255_v34 = vmul.f32 1.442695, %v1248_v24  ;;  %v1188_v55 = vsel %vm1184_vm3, 1.0, %v7378_v12  ;;  %v1175_v57 = vmul.f32 0.5, %v7939_v49  ;;  %v1359_v49 = vld [vmem:[#allocation11 + $0x18] sm:$0xff] }
 0x2ac   : > { %6848 = vrcp.f32 %v1200_v4 }
 0x2ad   : > { %6850 = vpow2.f32 %v1249_v17  ;;  %v1187_v17 = vsel %vm1183_vm1, 1.0, %v7378_v12 }
 0x2ae   : > { %6852 = vpow2.f32 %v1253_v21  ;;  %v1173_v21 = vmul.f32 0.5, %v7937_v46 }
 0x2af   : > { %6854 = vpow2.f32 %v1251_v29 }
 0x2b0   : > { %6856 = vpow2.f32 %v1255_v34 }
 0x2b3   : > { %v6843_v7 = vpop.eup %6842 }
 0x2b4   : > { %v6845_v10 = vpop.eup %6844  ;;  %v1205_v11 = vmul.f32 1.0614054, %v6843_v7 }
 0x2b5   : > { %v1207_v14 = vmul.f32 1.0614054, %v6845_v10  ;;  %v6847_v16 = vpop.eup %6846 }
 0x2b6   : > { %v1209_v15 = vadd.f32 -1.4531521, %v1205_v11  ;;  %v1206_v22 = vmul.f32 1.0614054, %v6847_v16  ;;  %v6849_v23 = vpop.eup %6848 }
 0x2b7   : > { %v1211_v19 = vadd.f32 -1.4531521, %v1207_v14  ;;  %v1208_v28 = vmul.f32 1.0614054, %v6849_v23  ;;  %v6851_v63 = vpop.eup %6850 }
 0x2b8   : > { %v1213_v20 = vmul.f32 %v6843_v7, %v1209_v15  ;;  %v1210_v27 = vadd.f32 -1.4531521, %v1206_v22  ;;  %v6853_v1 = vpop.eup %6852 }
 0x2b9   : > { %v1215_v25 = vmul.f32 %v6845_v10, %v1211_v19  ;;  %v1212_v33 = vadd.f32 -1.4531521, %v1208_v28  ;;  %v6855_v11 = vpop.eup %6854 }
 0x2ba   : > { %v1217_v26 = vadd.f32 1.4214138, %v1213_v20  ;;  %v1214_v32 = vmul.f32 %v6847_v16, %v1210_v27  ;;  %v6857_v52 = vpop.eup %6856  ;;  %v1186_v20 = vsel %vm1182_vm2, 1.0, %v7378_v12 }
 0x2bb   : > { %v1219_v30 = vadd.f32 1.4214138, %v1215_v25  ;;  %v1216_v42 = vmul.f32 %v6849_v23, %v1212_v33  ;;  %v1174_v25 = vmul.f32 0.5, %v7941_v50 }
 0x2bc   : > { %v1221_v31 = vmul.f32 %v6843_v7, %v1217_v26  ;;  %v1218_v41 = vadd.f32 1.4214138, %v1214_v32 }
 0x2bd   : > { %v1223_v35 = vmul.f32 %v6845_v10, %v1219_v30  ;;  %v1220_v47 = vadd.f32 1.4214138, %v1216_v42  ;;  %v1363_v42 = vld [vmem:[#allocation11 + $0x38] sm:$0xff] }
 0x2be   : > { %v1225_v37 = vadd.f32 -0.28449672, %v1221_v31  ;;  %v1222_v45 = vmul.f32 %v6847_v16, %v1218_v41  ;;  %v1176_v31 = vmul.f32 0.5, %v7946_v53  ;;  %v5413_v53 = vpack.c.bf16 %v1363_v42, %v1359_v49  ;;  %v1394_v49 = vld [vmem:[#allocation11 + $0x130] sm:$0xff]  ;;  %v1401_v42 = vld [vmem:[#allocation11 + $0x168] sm:$0xff] }
 0x2bf   : > { %v1227_v43 = vadd.f32 -0.28449672, %v1223_v35  ;;  %v1224_v58 = vmul.f32 %v6849_v23, %v1220_v47  ;;  %v1357_v35 = vld [vmem:[#allocation11 + $0x8] sm:$0xff]  ;;  %v1358_v47 = vld [vmem:[#allocation11 + $0x10] sm:$0xff] }
 0x2c0   : > { %v1229_v44 = vmul.f32 %v6843_v7, %v1225_v37  ;;  %v1226_v56 = vadd.f32 -0.28449672, %v1222_v45  ;;  %v1361_v37 = vld [vmem:[#allocation11 + $0x28] sm:$0xff]  ;;  %5414 = vmatprep.subr.bf16.mxu1 %v5413_v53 }
 0x2c1   : > { %v1231_v48 = vmul.f32 %v6845_v10, %v1227_v43  ;;  %v1228_v62 = vadd.f32 -0.28449672, %v1224_v58  ;;  %v5285_v41 = vpack.c.bf16 %v1361_v37, %v1357_v35  ;;  %v1356_v43 = vld [vmem:[#allocation11] sm:$0xff]  ;;  %v1369_v58 = vld [vmem:[#allocation11 + $0x68] sm:$0xff]  ;;  %v1390_v35 = vld [vmem:[#allocation11 + $0x110] sm:$0xff] }
 0x2c2   : > { %v1233_v51 = vadd.f32 0.2548296, %v1229_v44  ;;  %v1230_v61 = vmul.f32 %v6847_v16, %v1226_v56  ;;  %v1360_v44 = vld [vmem:[#allocation11 + $0x20] sm:$0xff] }
 0x2c3   : > { %v1235_v59 = vadd.f32 0.2548296, %v1231_v48  ;;  %v1232_v4 = vmul.f32 %v6849_v23, %v1228_v62  ;;  %v5287_v45 = vpack.c.bf16 %v1360_v44, %v1356_v43  ;;  %v1362_v48 = vld [vmem:[#allocation11 + $0x30] sm:$0xff]  ;;  %5286 = vmatprep.subr.bf16.mxu0 %v5285_v41  ;;  %v1397_v41 = vld [vmem:[#allocation11 + $0x148] sm:$0xff]  ;;  %v1399_v43 = vld [vmem:[#allocation11 + $0x158] sm:$0xff] }
 0x2c4   : > { %v1237_v60 = vmul.f32 %v6843_v7, %v1233_v51  ;;  %v1234_v3 = vadd.f32 0.2548296, %v1230_v61  ;;  %v1185_v7 = vsel %vm1181_vm0, 1.0, %v7378_v12  ;;  %v1365_v51 = vld [vmem:[#allocation11 + $0x48] sm:$0xff]  ;;  %v5415_v56 = vpack.c.bf16 %v1362_v48, %v1358_v47  ;;  %v1403_v44 = vld [vmem:[#allocation11 + $0x178] sm:$0xff]  ;;  %v1396_v48 = vld [vmem:[#allocation11 + $0x140] sm:$0xff] }
 0x2c5   : > { %v1239_v0 = vmul.f32 %v6845_v10, %v1235_v59  ;;  %v1236_v9 = vadd.f32 0.2548296, %v1232_v4  ;;  %v1367_v59 = vld [vmem:[#allocation11 + $0x58] sm:$0xff]  ;;  %5288 = vmatpush1.bf16.msra.mxu0 %v5287_v45  ;;  %v5289_v61 = vpack.c.bf16 %v1369_v58, %v1365_v51  ;;  %v1373_v4 = vld [vmem:[#allocation11 + $0x88] sm:$0xff]  ;;  %v5431_v45 = vpack.c.bf16 %v1394_v49, %v1390_v35  ;;  %v1400_v51 = vld [vmem:[#allocation11 + $0x160] sm:$0xff] }
 0x2c6   : > { %v1257_v2 = vmul.f32 %v6851_v63, %v1237_v60  ;;  %v1238_v8 = vmul.f32 %v6847_v16, %v1234_v3  ;;  %v1371_v60 = vld [vmem:[#allocation11 + $0x78] sm:$0xff]  ;;  %v1364_v63 = vld [vmem:[#allocation11 + $0x40] sm:$0xff]  ;;  %5416 = vmatpush1.bf16.msra.mxu1 %v5415_v56  ;;  %v1370_v3 = vld [vmem:[#allocation11 + $0x70] sm:$0xff]  ;;  %v5305_v47 = vpack.c.bf16 %v1401_v42, %v1397_v41  ;;  %v5433_v58 = vpack.c.bf16 %v1403_v44, %v1399_v43 }
 0x2c7   : > { %v1259_v5 = vmul.f32 %v6853_v1, %v1239_v0  ;;  %v1240_v15 = vmul.f32 %v6849_v23, %v1236_v9  ;;  %v5417_v62 = vpack.c.bf16 %v1371_v60, %v1367_v59  ;;  %v1368_v0 = vld [vmem:[#allocation11 + $0x60] sm:$0xff]  ;;  %v1366_v1 = vld [vmem:[#allocation11 + $0x50] sm:$0xff]  ;;  %5290 = vmatprep.subr.bf16.mxu0 %v5289_v61  ;;  %v1375_v9 = vld [vmem:[#allocation11 + $0x98] sm:$0xff] }
 0x2c8   : > { %v1261_v6 = vsub.f32 1.0, %v1257_v2  ;;  %v1258_v10 = vmul.f32 %v6855_v11, %v1238_v8  ;;  %v5291_v2 = vpack.c.bf16 %v1368_v0, %v1364_v63  ;;  %v1379_v11 = vld [vmem:[#allocation11 + $0xb8] sm:$0xff]  ;;  %v1398_v56 = vld [vmem:[#allocation11 + $0x150] sm:$0xff]  ;;  %v1405_v60 = vld [vmem:[#allocation11 + $0x188] sm:$0xff]  ;;  %v5307_v0 = vpack.c.bf16 %v1400_v51, %v1396_v48 }
 0x2c9   : > { %v1263_v13 = vsub.f32 1.0, %v1259_v5  ;;  %v1260_v54 = vmul.f32 %v6857_v52, %v1240_v15  ;;  %v1377_v5 = vld [vmem:[#allocation11 + $0xa8] sm:$0xff]  ;;  %5418 = vmatprep.subr.bf16.mxu1 %v5417_v62  ;;  %v1378_v15 = vld [vmem:[#allocation11 + $0xb0] sm:$0xff]  ;;  %v1407_v62 = vld [vmem:[#allocation11 + $0x198] sm:$0xff] }
 0x2ca   : > { %v1265_v14 = vmul.f32 %v1261_v6, %v1185_v7  ;;  %v1262_v19 = vsub.f32 1.0, %v1258_v10  ;;  %v5419_v6 = vpack.c.bf16 %v1370_v3, %v1366_v1  ;;  %v5293_v8 = vpack.c.bf16 %v1377_v5, %v1373_v4  ;;  %v1372_v7 = vld [vmem:[#allocation11 + $0x80] sm:$0xff]  ;;  %v1374_v10 = vld [vmem:[#allocation11 + $0x90] sm:$0xff]  ;;  %5292 = vmatpush1.bf16.msra.mxu0 %v5291_v2  ;;  %v1409_v61 = vld [vmem:[#allocation11 + $0x1a8] sm:$0xff] }
 0x2cb   : > { %v1267_v16 = vmul.f32 %v1263_v13, %v1187_v17  ;;  %v1264_v24 = vsub.f32 1.0, %v1260_v54  ;;  %v5421_v13 = vpack.c.bf16 %v1379_v11, %v1375_v9  ;;  %v1381_v17 = vld [vmem:[#allocation11 + $0xc8] sm:$0xff]  ;;  %v5423_v54 = vpack.c.bf16 %v1378_v15, %v1374_v10  ;;  %v1402_v59 = vld [vmem:[#allocation11 + $0x170] sm:$0xff]  ;;  %v1411_v63 = vld [vmem:[#allocation11 + $0x1b8] sm:$0xff] }
 0x2cc   : > { %v1269_v18 = vadd.f32 1.0, %v1265_v14  ;;  %v1266_v22 = vmul.f32 %v1262_v19, %v1186_v20  ;;  %v1376_v14 = vld [vmem:[#allocation11 + $0xa0] sm:$0xff]  ;;  %v1383_v19 = vld [vmem:[#allocation11 + $0xd8] sm:$0xff]  ;;  %5420 = vmatpush1.bf16.msra.mxu1 %v5419_v6  ;;  %5294 = vmatprep.subr.bf16.mxu0 %v5293_v8  ;;  %v5435_v1 = vpack.c.bf16 %v1402_v59, %v1398_v56  ;;  %v5309_v2 = vpack.c.bf16 %v1409_v61, %v1405_v60  ;;  %v1406_v5 = vld [vmem:[#allocation11 + $0x190] sm:$0xff] }
 0x2cd   : > { %v1268_v27 = vmul.f32 %v1264_v24, %v1188_v55  ;;  %v1271_v28 = vadd.f32 1.0, %v1267_v16  ;;  %v5295_v52 = vpack.c.bf16 %v1376_v14, %v1372_v7  ;;  %v1387_v20 = vld [vmem:[#allocation11 + $0xf8] sm:$0xff]  ;;  %5422 = vmatprep.subr.bf16.mxu1 %v5421_v13  ;;  %v1386_v55 = vld [vmem:[#allocation11 + $0xf0] sm:$0xff]  ;;  %v1404_v3 = vld [vmem:[#allocation11 + $0x180] sm:$0xff]  ;;  %v5437_v6 = vpack.c.bf16 %v1411_v63, %v1407_v62 }
 0x2ce   : > { %v7971_v23 = vmul.f32 %v1269_v18, %v1173_v21  ;;  %v1270_v26 = vadd.f32 1.0, %v1266_v22  ;;  %v1385_v18 = vld [vmem:[#allocation11 + $0xe8] sm:$0xff]  ;;  %v1380_v21 = vld [vmem:[#allocation11 + $0xc0] sm:$0xff]  ;;  %v5425_v24 = vpack.c.bf16 %v1387_v20, %v1383_v19  ;;  %v1410_v8 = vld [vmem:[#allocation11 + $0x1b0] sm:$0xff] }
 0x2cf   : > { %v1272_v30 = vadd.f32 1.0, %v1268_v27  ;;  %v7977_v32 = vmul.f32 %v1271_v28, %v1175_v57  ;;  %v5297_v16 = vpack.c.bf16 %v1385_v18, %v1381_v17  ;;  %v1384_v22 = vld [vmem:[#allocation11 + $0xe0] sm:$0xff]  ;;  %v1393_v27 = vld [vmem:[#allocation11 + $0x128] sm:$0xff]  ;;  %v1391_v28 = vld [vmem:[#allocation11 + $0x118] sm:$0xff]  ;;  %5296 = vmatpush1.bf16.msra.mxu0 %v5295_v52  ;;  %v5439_v10 = vpack.c.bf16 %v1410_v8, %v1406_v5 }
 0x2d0   : > { %v7974_v29 = vmul.f32 %v1270_v26, %v1174_v25  ;;  %v1382_v25 = vld [vmem:[#allocation11 + $0xd0] sm:$0xff]  ;;  %v1389_v26 = vld [vmem:[#allocation11 + $0x108] sm:$0xff]  ;;  %v1395_v57 = vld [vmem:[#allocation11 + $0x138] sm:$0xff]  ;;  %5424 = vmatpush1.bf16.msra.mxu1 %v5423_v54 }
 0x2d1   : > { %v7981_v50 = vmul.f32 %v1272_v30, %v1176_v31  ;;  %v5299_v30 = vpack.c.bf16 %v1384_v22, %v1380_v21  ;;  %5298 = vmatprep.subr.bf16.mxu0 %v5297_v16  ;;  %v5427_v31 = vpack.c.bf16 %v1386_v55, %v1382_v25  ;;  %5426 = vmatprep.subr.bf16.mxu1 %v5425_v24  ;;  %v1408_v4 = vld [vmem:[#allocation11 + $0x1a0] sm:$0xff]  ;;  %v1413_v9 = vld [vmem:[#allocation11 + $0x1c8] sm:$0xff]  ;;  %v1415_v7 = vld [vmem:[#allocation11 + $0x1d8] sm:$0xff] }
 0x2d2   : > { %v1279_v46 = vadd.f32 %v7974_v29, %v7971_v23  ;;  %v5429_v37 = vpack.c.bf16 %v1395_v57, %v1391_v28  ;;  %v1417_v11 = vld [vmem:[#allocation11 + $0x1e8] sm:$0xff]  ;;  %v1419_v13 = vld [vmem:[#allocation11 + $0x1f8] sm:$0xff]  ;;  %v5311_v14 = vpack.c.bf16 %v1408_v4, %v1404_v3  ;;  %v1412_v52 = vld [vmem:[#allocation11 + $0x1c0] sm:$0xff] }
 0x2d3   : > { %5300 = vmatpush1.bf16.msra.mxu0 %v5299_v30  ;;  %v5313_v15 = vpack.c.bf16 %v1417_v11, %v1413_v9  ;;  %v1416_v17 = vld [vmem:[#allocation11 + $0x1e0] sm:$0xff]  ;;  %v1414_v18 = vld [vmem:[#allocation11 + $0x1d0] sm:$0xff]  ;;  %v5441_v19 = vpack.c.bf16 %v1419_v13, %v1415_v7  ;;  %v1421_v16 = vld [vmem:[#allocation11 + $0x208] sm:$0xff] }
 0x2d4   : > { %v1280_v33 = vadd.f32 %v1279_v46, %v7977_v32  ;;  %v5301_v46 = vpack.c.bf16 %v1393_v27, %v1389_v26  ;;  %5428 = vmatpush1.bf16.msra.mxu1 %v5427_v31  ;;  %v1418_v54 = vld [vmem:[#allocation11 + $0x1f0] sm:$0xff]  ;;  %v1425_v20 = vld [vmem:[#allocation11 + $0x228] sm:$0xff]  ;;  %v1423_v21 = vld [vmem:[#allocation11 + $0x218] sm:$0xff]  ;;  %v5315_v24 = vpack.c.bf16 %v1416_v17, %v1412_v52 }
 0x2d5   : > { %5430 = vmatprep.subr.bf16.mxu1 %v5429_v37  ;;  %v1427_v22 = vld [vmem:[#allocation11 + $0x238] sm:$0xff]  ;;  %v5443_v25 = vpack.c.bf16 %v1418_v54, %v1414_v18  ;;  %v5317_v55 = vpack.c.bf16 %v1425_v20, %v1421_v16  ;;  %v1420_v26 = vld [vmem:[#allocation11 + $0x200] sm:$0xff]  ;;  %v1422_v28 = vld [vmem:[#allocation11 + $0x210] sm:$0xff] }
 0x2d6   : > { %v1281_v34 = vadd.f32 %v1280_v33, %v7981_v50  ;;  %v1388_v33 = vld [vmem:[#allocation11 + $0x100] sm:$0xff]  ;;  %5302 = vmatprep.subr.bf16.mxu0 %v5301_v46  ;;  %v5445_v57 = vpack.c.bf16 %v1427_v22, %v1423_v21  ;;  %v1426_v30 = vld [vmem:[#allocation11 + $0x230] sm:$0xff]  ;;  %v1429_v31 = vld [vmem:[#allocation11 + $0x248] sm:$0xff] }
 0x2d7   : > { %v1424_v27 = vld [vmem:[#allocation11 + $0x220] sm:$0xff]  ;;  %v1433_v46 = vld [vmem:[#allocation11 + $0x268] sm:$0xff]  ;;  %v5447_v37 = vpack.c.bf16 %v1426_v30, %v1422_v28  ;;  %v1430_v43 = vld [vmem:[#allocation11 + $0x250] sm:$0xff] }
 0x2d8   : > { %1282 = vadd.xlane.f32.xlu0 %v1281_v34  ;;  %v1392_v34 = vld [vmem:[#allocation11 + $0x120] sm:$0xff]  ;;  %5432 = vmatpush1.bf16.msra.mxu1 %v5431_v45  ;;  %v5319_v35 = vpack.c.bf16 %v1424_v27, %v1420_v26  ;;  %v5321_v49 = vpack.c.bf16 %v1433_v46, %v1429_v31  ;;  %v1437_v45 = vld [vmem:[#allocation11 + $0x288] sm:$0xff]  ;;  %v1439_v48 = vld [vmem:[#allocation11 + $0x298] sm:$0xff] }
 0x2d9   : > { %v5303_v53 = vpack.c.bf16 %v1392_v34, %v1388_v33  ;;  %5434 = vmatprep.subr.bf16.mxu1 %v5433_v58  ;;  %v1431_v33 = vld [vmem:[#allocation11 + $0x258] sm:$0xff]  ;;  %v1428_v41 = vld [vmem:[#allocation11 + $0x240] sm:$0xff]  ;;  %v1438_v63 = vld [vmem:[#allocation11 + $0x290] sm:$0xff] }
 0x2da   : > { %v1435_v34 = vld [vmem:[#allocation11 + $0x278] sm:$0xff]  ;;  %v1432_v42 = vld [vmem:[#allocation11 + $0x260] sm:$0xff]  ;;  %v1446_v20 = vld [vmem:[#allocation11 + $0x2d0] sm:$0xff] }
 0x2db   : > { %5304 = vmatpush1.bf16.msra.mxu0 %v5303_v53  ;;  %v5449_v44 = vpack.c.bf16 %v1435_v34, %v1431_v33  ;;  %v1434_v53 = vld [vmem:[#allocation11 + $0x270] sm:$0xff]  ;;  %v1443_v51 = vld [vmem:[#allocation11 + $0x2b8] sm:$0xff]  ;;  %v5323_v56 = vpack.c.bf16 %v1432_v42, %v1428_v41  ;;  %v1436_v60 = vld [vmem:[#allocation11 + $0x280] sm:$0xff] }
 0x2dc   : > { %5306 = vmatprep.subr.bf16.mxu0 %v5305_v47  ;;  %5436 = vmatpush1.bf16.msra.mxu1 %v5435_v1  ;;  %v1441_v47 = vld [vmem:[#allocation11 + $0x2a8] sm:$0xff]  ;;  %v5451_v58 = vpack.c.bf16 %v1434_v53, %v1430_v43  ;;  %v1440_v61 = vld [vmem:[#allocation11 + $0x2a0] sm:$0xff]  ;;  %v5453_v62 = vpack.c.bf16 %v1443_v51, %v1439_v48  ;;  %v1451_v17 = vld [vmem:[#allocation11 + $0x2f8] sm:$0xff] }
 0x2dd   : > { %5438 = vmatprep.subr.bf16.mxu1 %v5437_v6  ;;  %v5325_v59 = vpack.c.bf16 %v1441_v47, %v1437_v45  ;;  %v5327_v1 = vpack.c.bf16 %v1440_v61, %v1436_v60  ;;  %v1444_v18 = vld [vmem:[#allocation11 + $0x2c0] sm:$0xff]  ;;  %v1450_v21 = vld [vmem:[#allocation11 + $0x2f0] sm:$0xff]  ;;  %v1459_v27 = vld [vmem:[#allocation11 + $0x338] sm:$0xff] }
 0x2de   : > { %v5459_v22 = vpack.c.bf16 %v1450_v21, %v1446_v20  ;;  %v1452_v28 = vld [vmem:[#allocation11 + $0x300] sm:$0xff]  ;;  %v1454_v46 = vld [vmem:[#allocation11 + $0x310] sm:$0xff]  ;;  %v1461_v34 = vld [vmem:[#allocation11 + $0x348] sm:$0xff] }
 0x2df   : > { %5308 = vmatpush1.bf16.msra.mxu0 %v5307_v0  ;;  %v1442_v0 = vld [vmem:[#allocation11 + $0x2b0] sm:$0xff]  ;;  %v1467_v41 = vld [vmem:[#allocation11 + $0x378] sm:$0xff]  ;;  %v1464_v53 = vld [vmem:[#allocation11 + $0x360] sm:$0xff] }
 0x2e0   : > { %5310 = vmatprep.subr.bf16.mxu0 %v5309_v2  ;;  %5440 = vmatpush1.bf16.msra.mxu1 %v5439_v10  ;;  %v5455_v2 = vpack.c.bf16 %v1442_v0, %v1438_v63  ;;  %v1458_v33 = vld [vmem:[#allocation11 + $0x330] sm:$0xff]  ;;  %v1469_v51 = vld [vmem:[#allocation11 + $0x388] sm:$0xff]  ;;  %v1471_v60 = vld [vmem:[#allocation11 + $0x398] sm:$0xff] }
 0x2e1   : > { %5442 = vmatprep.subr.bf16.mxu1 %v5441_v19  ;;  %v1448_v19 = vld [vmem:[#allocation11 + $0x2e0] sm:$0xff]  ;;  %v1462_v45 = vld [vmem:[#allocation11 + $0x350] sm:$0xff]  ;;  %v1475_v61 = vld [vmem:[#allocation11 + $0x3b8] sm:$0xff] }
 0x2e2   : > { %v5331_v16 = vpack.c.bf16 %v1448_v19, %v1444_v18  ;;  %v1466_v48 = vld [vmem:[#allocation11 + $0x370] sm:$0xff]  ;;  %v5469_v63 = vpack.c.bf16 %v1475_v61, %v1471_v60  ;;  %v1472_v0 = vld [vmem:[#allocation11 + $0x3a0] sm:$0xff]  ;;  %v1485_v18 = vld [vmem:[#allocation11 + $0x408] sm:$0xff] }
 0x2e3   : > { %5312 = vmatpush1.bf16.msra.mxu0 %v5311_v14  ;;  %v1489_v19 = vld [vmem:[#allocation11 + $0x428] sm:$0xff]  ;;  %v1491_v20 = vld [vmem:[#allocation11 + $0x438] sm:$0xff] }
 0x2e4   : > { %5314 = vmatprep.subr.bf16.mxu0 %v5313_v15  ;;  %5444 = vmatpush1.bf16.msra.mxu1 %v5443_v25  ;;  %v1449_v15 = vld [vmem:[#allocation11 + $0x2e8] sm:$0xff]  ;;  %v1499_v61 = vld [vmem:[#allocation11 + $0x478] sm:$0xff] }
 0x2e5   : > { %5446 = vmatprep.subr.bf16.mxu1 %v5445_v57  ;;  %v1457_v25 = vld [vmem:[#allocation11 + $0x328] sm:$0xff]  ;;  %v1456_v57 = vld [vmem:[#allocation11 + $0x320] sm:$0xff] }
 0x2e6   : > { %v5335_v31 = vpack.c.bf16 %v1456_v57, %v1452_v28  ;;  %v1497_v60 = vld [vmem:[#allocation11 + $0x468] sm:$0xff] }
 0x2e7   : > { %5316 = vmatpush1.bf16.msra.mxu0 %v5315_v24  ;;  %v1453_v24 = vld [vmem:[#allocation11 + $0x308] sm:$0xff] }
 0x2e8   : > { %5318 = vmatprep.subr.bf16.mxu0 %v5317_v55  ;;  %5448 = vmatpush1.bf16.msra.mxu1 %v5447_v37  ;;  %v1455_v55 = vld [vmem:[#allocation11 + $0x318] sm:$0xff]  ;;  %v5333_v26 = vpack.c.bf16 %v1457_v25, %v1453_v24  ;;  %v1465_v37 = vld [vmem:[#allocation11 + $0x368] sm:$0xff] }
 0x2e9   : > { %5450 = vmatprep.subr.bf16.mxu1 %v5449_v44  ;;  %v5461_v30 = vpack.c.bf16 %v1459_v27, %v1455_v55  ;;  %v5337_v42 = vpack.c.bf16 %v1465_v37, %v1461_v34  ;;  %v1460_v44 = vld [vmem:[#allocation11 + $0x340] sm:$0xff]  ;;  %v1277_v55 = vld [vmem:[#allocation8] sm:$0xf] }
 0x2ea   : > { %v5339_v47 = vpack.c.bf16 %v1464_v53, %v1460_v44  ;;  %v1314_v27 = vrot.slane %v1277_v55, %v7929_v39  ;;  %v1310_v28 = vrot.slane %v1277_v55, %v7925_v36  ;;  %v1318_v57 = vrot.slane %v1277_v55, %v7927_v38  ;;  %v1486_v44 = vld [vmem:[#allocation11 + $0x410] sm:$0xff] }
 0x2eb   : > { %5320 = vmatpush1.bf16.msra.mxu0 %v5319_v35  ;;  %v5463_v35 = vpack.c.bf16 %v1458_v33, %v1454_v46  ;;  %v1322_v33 = vrot.slane %v1277_v55, %v7931_v40  ;;  %v1490_v53 = vld [vmem:[#allocation11 + $0x430] sm:$0xff] }
 0x2ec   : > { %5322 = vmatprep.subr.bf16.mxu0 %v5321_v49  ;;  %5452 = vmatpush1.bf16.msra.mxu1 %v5451_v58  ;;  %v1463_v49 = vld [vmem:[#allocation11 + $0x358] sm:$0xff]  ;;  %v5467_v58 = vpack.c.bf16 %v1466_v48, %v1462_v45  ;;  %v1493_v48 = vld [vmem:[#allocation11 + $0x448] sm:$0xff] }
 0x2ed   : > { %5454 = vmatprep.subr.bf16.mxu1 %v5453_v62  ;;  %v5465_v43 = vpack.c.bf16 %v1467_v41, %v1463_v49  ;;  %v1468_v62 = vld [vmem:[#allocation11 + $0x380] sm:$0xff] }
 0x2ee   : > { %v1484_v49 = vld [vmem:[#allocation11 + $0x400] sm:$0xff] }
 0x2ef   : > { %5324 = vmatpush1.bf16.msra.mxu0 %v5323_v56  ;;  %v1473_v56 = vld [vmem:[#allocation11 + $0x3a8] sm:$0xff]  ;;  %v1488_v41 = vld [vmem:[#allocation11 + $0x420] sm:$0xff] }
 0x2f0   : > { %5326 = vmatprep.subr.bf16.mxu0 %v5325_v59  ;;  %5456 = vmatpush1.bf16.msra.mxu1 %v5455_v2  ;;  %v5341_v59 = vpack.c.bf16 %v1473_v56, %v1469_v51  ;;  %v1474_v2 = vld [vmem:[#allocation11 + $0x3b0] sm:$0xff]  ;;  %v5351_v56 = vpack.c.bf16 %v1488_v41, %v1484_v49 }
 0x2f3   : > { %5328 = vmatpush1.bf16.msra.mxu0 %v5327_v1  ;;  %v1470_v1 = vld [vmem:[#allocation11 + $0x390] sm:$0xff] }
 0x365   : > { %v1283_v3 = vpop.xlane.xlu0 %1282 }
 0x366   : > { %v1285_v4 = vmul.f32 0.001953125, %v1283_v3  ;;  %v5343_v3 = vpack.c.bf16 %v1472_v0, %v1468_v62 }
 0x368   : > { %v7986_v5 = vsub.f32 %v7971_v23, %v1285_v4  ;;  %v7989_v6 = vsub.f32 %v7974_v29, %v1285_v4  ;;  %v7992_v8 = vsub.f32 %v7977_v32, %v1285_v4  ;;  %v7995_v9 = vsub.f32 %v7981_v50, %v1285_v4  ;;  %v1445_v32 = vld [vmem:[#allocation11 + $0x2c8] sm:$0xff]  ;;  %v1447_v50 = vld [vmem:[#allocation11 + $0x2d8] sm:$0xff] }
 0x369   : > { %v5329_v52 = vpack.c.bf16 %v1449_v15, %v1445_v32  ;;  %v5457_v54 = vpack.c.bf16 %v1451_v17, %v1447_v50  ;;  %v1477_v4 = vld [vmem:[#allocation11 + $0x3c8] sm:$0xff]  ;;  %v1478_v15 = vld [vmem:[#allocation11 + $0x3d0] sm:$0xff] }
 0x36a   : > { %v1290_v11 = vmul.f32 %v7986_v5, %v7986_v5  ;;  %v1291_v7 = vmul.f32 %v7989_v6, %v7989_v6  ;;  %v1292_v13 = vmul.f32 %v7992_v8, %v7992_v8  ;;  %v1293_v29 = vmul.f32 %v7995_v9, %v7995_v9  ;;  %v1482_v50 = vld [vmem:[#allocation11 + $0x3f0] sm:$0xff] }
 0x36b   : > { %5330 = vmatprep.subr.bf16.mxu0 %v5329_v52  ;;  %5458 = vmatprep.subr.bf16.mxu1 %v5457_v54  ;;  %v5475_v17 = vpack.c.bf16 %v1482_v50, %v1478_v15  ;;  %v1487_v54 = vld [vmem:[#allocation11 + $0x418] sm:$0xff]  ;;  %v1504_v15 = vld [vmem:[#allocation11 + $0x4a0] sm:$0xff] }
 0x36c   : > { %v1294_v23 = vadd.f32 %v1291_v7, %v1290_v11  ;;  %5332 = vmatpush1.bf16.msra.mxu0 %v5331_v16  ;;  %5460 = vmatpush1.bf16.msra.mxu1 %v5459_v22  ;;  %v1481_v11 = vld [vmem:[#allocation11 + $0x3e8] sm:$0xff]  ;;  %v1479_v7 = vld [vmem:[#allocation11 + $0x3d8] sm:$0xff]  ;;  %v5349_v16 = vpack.c.bf16 %v1489_v19, %v1485_v18  ;;  %v5477_v21 = vpack.c.bf16 %v1491_v20, %v1487_v54  ;;  %v1506_v18 = vld [vmem:[#allocation11 + $0x4b0] sm:$0xff] }
 0x36d   : > { %5334 = vmatprep.subr.bf16.mxu0 %v5333_v26  ;;  %5462 = vmatprep.subr.bf16.mxu1 %v5461_v30  ;;  %v1278_v26 = vld [vmem:[#allocation10] sm:$0xf]  ;;  %v1509_v19 = vld [vmem:[#allocation11 + $0x4c8] sm:$0xff] }
 0x36e   : > { %v1295_v14 = vadd.f32 %v1294_v23, %v1292_v13  ;;  %v5471_v13 = vpack.c.bf16 %v1474_v2, %v1470_v1  ;;  %v5345_v23 = vpack.c.bf16 %v1481_v11, %v1477_v4  ;;  %v1335_v46 = vrot.slane %v1278_v26, %v7925_v36  ;;  %v1494_v1 = vld [vmem:[#allocation11 + $0x450] sm:$0xff]  ;;  %v1513_v54 = vld [vmem:[#allocation11 + $0x4e8] sm:$0xff]  ;;  %v1515_v20 = vld [vmem:[#allocation11 + $0x4f8] sm:$0xff] }
 0x36f   : > { %v1343_v34 = vrot.slane %v1278_v26, %v7927_v38  ;;  %v1498_v2 = vld [vmem:[#allocation11 + $0x470] sm:$0xff]  ;;  %v5353_v4 = vpack.c.bf16 %v1497_v60, %v1493_v48  ;;  %v5361_v55 = vpack.c.bf16 %v1513_v54, %v1509_v19  ;;  %v1544_v19 = vld [vmem:[#allocation11 + $0x5e0] sm:$0xff] }
 0x370   : > { %v1296_v10 = vadd.f32 %v1295_v14, %v1293_v29  ;;  %5336 = vmatpush1.bf16.msra.mxu0 %v5335_v31  ;;  %5464 = vmatpush1.bf16.msra.mxu1 %v5463_v35  ;;  %v1483_v29 = vld [vmem:[#allocation11 + $0x3f8] sm:$0xff]  ;;  %v1476_v14 = vld [vmem:[#allocation11 + $0x3c0] sm:$0xff]  ;;  %v1339_v31 = vrot.slane %v1278_v26, %v7929_v39 }
 0x371   : > { %5338 = vmatprep.subr.bf16.mxu0 %v5337_v42  ;;  %5466 = vmatprep.subr.bf16.mxu1 %v5465_v43  ;;  %v5473_v32 = vpack.c.bf16 %v1483_v29, %v1479_v7  ;;  %v1505_v7 = vld [vmem:[#allocation11 + $0x4a8] sm:$0xff] }
 0x372   : > { %1297 = vadd.xlane.f32.xlu0 %v1296_v10  ;;  %v1480_v10 = vld [vmem:[#allocation11 + $0x3e0] sm:$0xff] }
 0x373   : > { %v5347_v52 = vpack.c.bf16 %v1480_v10, %v1476_v14  ;;  %v5483_v10 = vpack.c.bf16 %v1498_v2, %v1494_v1  ;;  %v1539_v1 = vld [vmem:[#allocation11 + $0x5b8] sm:$0xff] }
 0x374   : > { %5340 = vmatpush1.bf16.msra.mxu0 %v5339_v47  ;;  %5468 = vmatpush1.bf16.msra.mxu1 %v5467_v58 }
 0x375   : > { %5342 = vmatprep.subr.bf16.mxu0 %v5341_v59  ;;  %5470 = vmatprep.subr.bf16.mxu1 %v5469_v63  ;;  %v1347_v59 = vrot.slane %v1278_v26, %v7931_v40  ;;  %v1492_v63 = vld [vmem:[#allocation11 + $0x440] sm:$0xff] }
 0x378   : > { %5344 = vmatpush1.bf16.msra.mxu0 %v5343_v3  ;;  %5472 = vmatpush1.bf16.msra.mxu1 %v5471_v13  ;;  %v1501_v3 = vld [vmem:[#allocation11 + $0x488] sm:$0xff]  ;;  %v1503_v13 = vld [vmem:[#allocation11 + $0x498] sm:$0xff] }
 0x379   : > { %5346 = vmatprep.subr.bf16.mxu0 %v5345_v23  ;;  %5474 = vmatprep.subr.bf16.mxu1 %v5473_v32  ;;  %v1507_v23 = vld [vmem:[#allocation11 + $0x4b8] sm:$0xff]  ;;  %v1500_v32 = vld [vmem:[#allocation11 + $0x480] sm:$0xff]  ;;  %v5357_v50 = vpack.c.bf16 %v1505_v7, %v1501_v3 }
 0x37c   : > { %5348 = vmatpush1.bf16.msra.mxu0 %v5347_v52  ;;  %5476 = vmatpush1.bf16.msra.mxu1 %v5475_v17  ;;  %v5485_v52 = vpack.c.bf16 %v1507_v23, %v1503_v13  ;;  %v1502_v17 = vld [vmem:[#allocation11 + $0x490] sm:$0xff] }
 0x37d   : > { %5350 = vmatprep.subr.bf16.mxu0 %v5349_v16  ;;  %5478 = vmatprep.subr.bf16.mxu1 %v5477_v21  ;;  %v1511_v16 = vld [vmem:[#allocation11 + $0x4d8] sm:$0xff]  ;;  %v5359_v21 = vpack.c.bf16 %v1504_v15, %v1500_v32  ;;  %v1534_v23 = vld [vmem:[#allocation11 + $0x590] sm:$0xff]  ;;  %v1545_v32 = vld [vmem:[#allocation11 + $0x5e8] sm:$0xff] }
 0x37e   : > { %v5489_v26 = vpack.c.bf16 %v1515_v20, %v1511_v16  ;;  %v1543_v15 = vld [vmem:[#allocation11 + $0x5d8] sm:$0xff]  ;;  %v1542_v20 = vld [vmem:[#allocation11 + $0x5d0] sm:$0xff] }
 0x3ff   : > { %v1298_v22 = vpop.xlane.xlu0 %1297 }
 0x400   : > { %v1299_v24 = vmul.f32 0.001953125, %v1298_v22  ;;  %v5487_v22 = vpack.c.bf16 %v1506_v18, %v1502_v17  ;;  %v1540_v18 = vld [vmem:[#allocation11 + $0x5c0] sm:$0xff] }
 0x402   : > { %v1300_v25 = vadd.f32 1e-05, %v1299_v24  ;;  %v1508_v24 = vld [vmem:[#allocation11 + $0x4c0] sm:$0xff] }
 0x404   : > { %6858 = vrsqrt.f32 %v1300_v25  ;;  %v1512_v25 = vld [vmem:[#allocation11 + $0x4e0] sm:$0xff] }
 0x40e   : > { %v6859_v30 = vpop.eup %6858 }
 0x40f   : > { %v1303_v35 = vmul.f32 %v6859_v30, %v7989_v6  ;;  %v1302_v37 = vmul.f32 %v6859_v30, %v7986_v5  ;;  %v1305_v42 = vmul.f32 %v6859_v30, %v7995_v9  ;;  %v1304_v43 = vmul.f32 %v6859_v30, %v7992_v8  ;;  %v1495_v6 = vld [vmem:[#allocation11 + $0x458] sm:$0xff]  ;;  %v1496_v8 = vld [vmem:[#allocation11 + $0x460] sm:$0xff]  ;;  %v1521_v30 = vld [vmem:[#allocation11 + $0x528] sm:$0xff] }
 0x410   : > { %v5479_v9 = vpack.c.bf16 %v1490_v53, %v1486_v44  ;;  %v5481_v11 = vpack.c.bf16 %v1499_v61, %v1495_v6  ;;  %v5355_v14 = vpack.c.bf16 %v1496_v8, %v1492_v63  ;;  %v1525_v44 = vld [vmem:[#allocation11 + $0x548] sm:$0xff]  ;;  %v1526_v6 = vld [vmem:[#allocation11 + $0x550] sm:$0xff]  ;;  %v1535_v8 = vld [vmem:[#allocation11 + $0x598] sm:$0xff] }
 0x411   : > { %v1328_v45 = vmul.f32 %v1314_v27, %v1303_v35  ;;  %v1327_v47 = vmul.f32 %v1310_v28, %v1302_v37  ;;  %v1329_v51 = vmul.f32 %v1318_v57, %v1304_v43  ;;  %v1330_v58 = vmul.f32 %v1322_v33, %v1305_v42  ;;  %v1510_v27 = vld [vmem:[#allocation11 + $0x4d0] sm:$0xff]  ;;  %v1517_v57 = vld [vmem:[#allocation11 + $0x508] sm:$0xff]  ;;  %v1516_v35 = vld [vmem:[#allocation11 + $0x500] sm:$0xff] }
 0x412   : > { %v1514_v28 = vld [vmem:[#allocation11 + $0x4f0] sm:$0xff]  ;;  %v5363_v33 = vpack.c.bf16 %v1512_v25, %v1508_v24  ;;  %v1520_v37 = vld [vmem:[#allocation11 + $0x520] sm:$0xff]  ;;  %v5365_v49 = vpack.c.bf16 %v1521_v30, %v1517_v57  ;;  %v1529_v53 = vld [vmem:[#allocation11 + $0x568] sm:$0xff]  ;;  %v5501_v13 = vpack.c.bf16 %v1539_v1, %v1535_v8 }
 0x413   : > { %v8017_v5 = vadd.f32 %v1339_v31, %v1328_v45  ;;  %v8019_v62 = vadd.f32 %v1335_v46, %v1327_v47  ;;  %v8021_v0 = vadd.f32 %v1343_v34, %v1329_v51  ;;  %v8027_v29 = vadd.f32 %v1347_v59, %v1330_v58  ;;  %v1519_v31 = vld [vmem:[#allocation11 + $0x518] sm:$0xff]  ;;  %v1518_v42 = vld [vmem:[#allocation11 + $0x510] sm:$0xff]  ;;  %v1528_v58 = vld [vmem:[#allocation11 + $0x560] sm:$0xff] }
 0x414   : > { %v1523_v46 = vld [vmem:[#allocation11 + $0x538] sm:$0xff]  ;;  %v5491_v34 = vpack.c.bf16 %v1514_v28, %v1510_v27  ;;  %v1522_v43 = vld [vmem:[#allocation11 + $0x530] sm:$0xff]  ;;  %v5367_v48 = vpack.c.bf16 %v1520_v37, %v1516_v35  ;;  %v5369_v59 = vpack.c.bf16 %v1529_v53, %v1525_v44  ;;  %v1537_v63 = vld [vmem:[#allocation11 + $0x5a8] sm:$0xff] }
 0x415   : > { %1698 = vmatprep.mubr.f32.mxu0 %v8017_v5  ;;  %1840 = vmatprep.mubr.f32.mxu1 %v8017_v5  ;;  %v5493_v41 = vpack.c.bf16 %v1523_v46, %v1519_v31  ;;  %v1527_v45 = vld [vmem:[#allocation11 + $0x558] sm:$0xff]  ;;  %v5495_v51 = vpack.c.bf16 %v1522_v43, %v1518_v42  ;;  %v1530_v61 = vld [vmem:[#allocation11 + $0x570] sm:$0xff]  ;;  %v1553_v24 = vld [vmem:[#allocation11 + $0x628] sm:$0xff] }
 0x416   : > { %1699 = vmatmul.mubr.f32.vlgmr.msra.gmra.mrb[2].mxu0 %v8019_v62  ;;  %1841 = vmatmul.mubr.f32.vlgmr.msra.gmra.mrb[2].mxu1 %v8019_v62  ;;  %v1531_v47 = vld [vmem:[#allocation11 + $0x578] sm:$0xff]  ;;  %v5499_v3 = vpack.c.bf16 %v1530_v61, %v1526_v6  ;;  %v1548_v28 = vld [vmem:[#allocation11 + $0x600] sm:$0xff]  ;;  %v1550_v46 = vld [vmem:[#allocation11 + $0x610] sm:$0xff] }
 0x417   : > { %5352 = vmatpush1.bf16.msra.mxu0 %v5351_v56  ;;  %5480 = vmatpush1.bf16.msra.mxu1 %v5479_v9  ;;  %v1524_v56 = vld [vmem:[#allocation11 + $0x540] sm:$0xff]  ;;  %v5497_v60 = vpack.c.bf16 %v1531_v47, %v1527_v45  ;;  %v1533_v9 = vld [vmem:[#allocation11 + $0x588] sm:$0xff]  ;;  %v1551_v25 = vld [vmem:[#allocation11 + $0x618] sm:$0xff] }
 0x418   : > { %1769 = vmatprep.mubr.f32.mxu0 %v8027_v29  ;;  %1911 = vmatprep.mubr.f32.mxu1 %v8027_v29  ;;  %v5371_v2 = vpack.c.bf16 %v1528_v58, %v1524_v56  ;;  %v5373_v7 = vpack.c.bf16 %v1537_v63, %v1533_v9  ;;  %v1552_v57 = vld [vmem:[#allocation11 + $0x620] sm:$0xff]  ;;  %v1561_v35 = vld [vmem:[#allocation11 + $0x668] sm:$0xff]  ;;  %v1559_v37 = vld [vmem:[#allocation11 + $0x658] sm:$0xff] }
 0x419   : > { %5354 = vmatprep.subr.bf16.mxu0 %v5353_v4  ;;  %5482 = vmatprep.subr.bf16.mxu1 %v5481_v11  ;;  %v1532_v4 = vld [vmem:[#allocation11 + $0x580] sm:$0xff]  ;;  %v1558_v47 = vld [vmem:[#allocation11 + $0x650] sm:$0xff]  ;;  %v1569_v56 = vld [vmem:[#allocation11 + $0x6a8] sm:$0xff] }
 0x41a   : > { %v1536_v11 = vld [vmem:[#allocation11 + $0x5a0] sm:$0xff]  ;;  %v1567_v58 = vld [vmem:[#allocation11 + $0x698] sm:$0xff]  ;;  %v1566_v1 = vld [vmem:[#allocation11 + $0x690] sm:$0xff] }
 0x41b   : > { %5356 = vmatpush1.bf16.msra.mxu0 %v5355_v14  ;;  %5484 = vmatpush1.bf16.msra.mxu1 %v5483_v10  ;;  %v1538_v14 = vld [vmem:[#allocation11 + $0x5b0] sm:$0xff]  ;;  %v1541_v10 = vld [vmem:[#allocation11 + $0x5c8] sm:$0xff]  ;;  %v1556_v43 = vld [vmem:[#allocation11 + $0x640] sm:$0xff] }
 0x41c   : > { %5358 = vmatprep.subr.bf16.mxu0 %v5357_v50  ;;  %5486 = vmatprep.subr.bf16.mxu1 %v5485_v52  ;;  %v1547_v50 = vld [vmem:[#allocation11 + $0x5f8] sm:$0xff]  ;;  %v5375_v52 = vpack.c.bf16 %v1536_v11, %v1532_v4  ;;  %v5503_v17 = vpack.c.bf16 %v1538_v14, %v1534_v23  ;;  %v5377_v54 = vpack.c.bf16 %v1545_v32, %v1541_v10  ;;  %v1560_v44 = vld [vmem:[#allocation11 + $0x660] sm:$0xff]  ;;  %v1577_v4 = vld [vmem:[#allocation11 + $0x6e8] sm:$0xff] }
 0x41d   : > { %v5505_v16 = vpack.c.bf16 %v1547_v50, %v1543_v15  ;;  %v1564_v61 = vld [vmem:[#allocation11 + $0x680] sm:$0xff]  ;;  %v1575_v11 = vld [vmem:[#allocation11 + $0x6d8] sm:$0xff]  ;;  %v1574_v50 = vld [vmem:[#allocation11 + $0x6d0] sm:$0xff] }
 0x41e   : > { %v1568_v9 = vld [vmem:[#allocation11 + $0x6a0] sm:$0xff] }
 0x41f   : > { %5360 = vmatpush1.bf16.msra.mxu0 %v5359_v21  ;;  %5488 = vmatpush1.bf16.msra.mxu1 %v5487_v22  ;;  %v1546_v21 = vld [vmem:[#allocation11 + $0x5f0] sm:$0xff]  ;;  %v1549_v22 = vld [vmem:[#allocation11 + $0x608] sm:$0xff]  ;;  %v1572_v14 = vld [vmem:[#allocation11 + $0x6c0] sm:$0xff] }
 0x420   : > { %5362 = vmatprep.subr.bf16.mxu0 %v5361_v55  ;;  %5490 = vmatprep.subr.bf16.mxu1 %v5489_v26  ;;  %v1555_v55 = vld [vmem:[#allocation11 + $0x638] sm:$0xff]  ;;  %v5379_v26 = vpack.c.bf16 %v1544_v19, %v1540_v18  ;;  %v5507_v27 = vpack.c.bf16 %v1546_v21, %v1542_v20  ;;  %v5381_v30 = vpack.c.bf16 %v1553_v24, %v1549_v22  ;;  %v1576_v10 = vld [vmem:[#allocation11 + $0x6e0] sm:$0xff]  ;;  %v1585_v18 = vld [vmem:[#allocation11 + $0x728] sm:$0xff] }
 0x421   : > { %v5509_v31 = vpack.c.bf16 %v1555_v55, %v1551_v25  ;;  %v1583_v19 = vld [vmem:[#allocation11 + $0x718] sm:$0xff]  ;;  %v1580_v21 = vld [vmem:[#allocation11 + $0x700] sm:$0xff]  ;;  %v1582_v55 = vld [vmem:[#allocation11 + $0x710] sm:$0xff] }
 0x422   : > { %v1584_v22 = vld [vmem:[#allocation11 + $0x720] sm:$0xff] }
 0x423   : > { %5364 = vmatpush1.bf16.msra.mxu0 %v5363_v33  ;;  %5492 = vmatpush1.bf16.msra.mxu1 %v5491_v34  ;;  %v1554_v33 = vld [vmem:[#allocation11 + $0x630] sm:$0xff]  ;;  %v1557_v34 = vld [vmem:[#allocation11 + $0x648] sm:$0xff] }
 0x424   : > { %5366 = vmatprep.subr.bf16.mxu0 %v5365_v49  ;;  %5494 = vmatprep.subr.bf16.mxu1 %v5493_v41  ;;  %v1563_v49 = vld [vmem:[#allocation11 + $0x678] sm:$0xff]  ;;  %v5383_v41 = vpack.c.bf16 %v1552_v57, %v1548_v28  ;;  %v5511_v42 = vpack.c.bf16 %v1554_v33, %v1550_v46  ;;  %v5385_v53 = vpack.c.bf16 %v1561_v35, %v1557_v34  ;;  %v1593_v28 = vld [vmem:[#allocation11 + $0x768] sm:$0xff]  ;;  %v1588_v33 = vld [vmem:[#allocation11 + $0x740] sm:$0xff] }
 0x425   : > { %v5513_v45 = vpack.c.bf16 %v1563_v49, %v1559_v37  ;;  %v1591_v57 = vld [vmem:[#allocation11 + $0x758] sm:$0xff]  ;;  %v1592_v34 = vld [vmem:[#allocation11 + $0x760] sm:$0xff]  ;;  %v1590_v49 = vld [vmem:[#allocation11 + $0x750] sm:$0xff] }
 0x427   : > { %5368 = vmatpush1.bf16.msra.mxu0 %v5367_v48  ;;  %5496 = vmatpush1.bf16.msra.mxu1 %v5495_v51  ;;  %v1562_v48 = vld [vmem:[#allocation11 + $0x670] sm:$0xff]  ;;  %v1565_v51 = vld [vmem:[#allocation11 + $0x688] sm:$0xff] }
 0x428   : > { %5370 = vmatprep.subr.bf16.mxu0 %v5369_v59  ;;  %5498 = vmatprep.subr.bf16.mxu1 %v5497_v60  ;;  %v1571_v59 = vld [vmem:[#allocation11 + $0x6b8] sm:$0xff]  ;;  %v5387_v60 = vpack.c.bf16 %v1560_v44, %v1556_v43  ;;  %v5515_v6 = vpack.c.bf16 %v1562_v48, %v1558_v47  ;;  %v5389_v63 = vpack.c.bf16 %v1569_v56, %v1565_v51  ;;  %v1601_v43 = vld [vmem:[#allocation11 + $0x7a8] sm:$0xff]  ;;  %v1596_v48 = vld [vmem:[#allocation11 + $0x780] sm:$0xff] }
 0x429   : > { %v5517_v8 = vpack.c.bf16 %v1571_v59, %v1567_v58  ;;  %v1599_v44 = vld [vmem:[#allocation11 + $0x798] sm:$0xff]  ;;  %v1600_v51 = vld [vmem:[#allocation11 + $0x7a0] sm:$0xff]  ;;  %v1598_v59 = vld [vmem:[#allocation11 + $0x790] sm:$0xff] }
 0x42b   : > { %5372 = vmatpush1.bf16.msra.mxu0 %v5371_v2  ;;  %5500 = vmatpush1.bf16.msra.mxu1 %v5499_v3  ;;  %v1570_v2 = vld [vmem:[#allocation11 + $0x6b0] sm:$0xff]  ;;  %v1573_v3 = vld [vmem:[#allocation11 + $0x6c8] sm:$0xff] }
 0x42c   : > { %5374 = vmatprep.subr.bf16.mxu0 %v5373_v7  ;;  %5502 = vmatprep.subr.bf16.mxu1 %v5501_v13  ;;  %v1579_v7 = vld [vmem:[#allocation11 + $0x6f8] sm:$0xff]  ;;  %v5391_v13 = vpack.c.bf16 %v1568_v9, %v1564_v61  ;;  %v5519_v23 = vpack.c.bf16 %v1570_v2, %v1566_v1  ;;  %v5393_v32 = vpack.c.bf16 %v1577_v4, %v1573_v3  ;;  %v1609_v61 = vld [vmem:[#allocation11 + $0x7e8] sm:$0xff]  ;;  %v1604_v2 = vld [vmem:[#allocation11 + $0x7c0] sm:$0xff] }
 0x42d   : > { %v5521_v15 = vpack.c.bf16 %v1579_v7, %v1575_v11  ;;  %v1607_v9 = vld [vmem:[#allocation11 + $0x7d8] sm:$0xff]  ;;  %v1608_v11 = vld [vmem:[#allocation11 + $0x7e0] sm:$0xff]  ;;  %v1606_v7 = vld [vmem:[#allocation11 + $0x7d0] sm:$0xff] }
 0x42f   : > { %5376 = vmatpush1.bf16.msra.mxu0 %v5375_v52  ;;  %5504 = vmatpush1.bf16.msra.mxu1 %v5503_v17  ;;  %v1578_v52 = vld [vmem:[#allocation11 + $0x6f0] sm:$0xff]  ;;  %v1581_v17 = vld [vmem:[#allocation11 + $0x708] sm:$0xff] }
 0x430   : > { %5378 = vmatprep.subr.bf16.mxu0 %v5377_v54  ;;  %5506 = vmatprep.subr.bf16.mxu1 %v5505_v16  ;;  %v1587_v54 = vld [vmem:[#allocation11 + $0x738] sm:$0xff]  ;;  %v5395_v16 = vpack.c.bf16 %v1576_v10, %v1572_v14  ;;  %v5523_v20 = vpack.c.bf16 %v1578_v52, %v1574_v50  ;;  %v5397_v24 = vpack.c.bf16 %v1585_v18, %v1581_v17  ;;  %v1612_v10 = vld [vmem:[#allocation13] sm:$0xf] }
 0x431   : > { %v5525_v25 = vpack.c.bf16 %v1587_v54, %v1583_v19  ;;  %v1625_v52 = vrot.slane %v1612_v10, %v7927_v38 }
 0x433   : > { %5380 = vmatpush1.bf16.msra.mxu0 %v5379_v26  ;;  %5508 = vmatpush1.bf16.msra.mxu1 %v5507_v27  ;;  %v1586_v26 = vld [vmem:[#allocation11 + $0x730] sm:$0xff]  ;;  %v1589_v27 = vld [vmem:[#allocation11 + $0x748] sm:$0xff] }
 0x434   : > { %5382 = vmatprep.subr.bf16.mxu0 %v5381_v30  ;;  %5510 = vmatprep.subr.bf16.mxu1 %v5509_v31  ;;  %v1595_v30 = vld [vmem:[#allocation11 + $0x778] sm:$0xff]  ;;  %v5399_v31 = vpack.c.bf16 %v1584_v22, %v1580_v21  ;;  %v5527_v46 = vpack.c.bf16 %v1586_v26, %v1582_v55  ;;  %v5401_v35 = vpack.c.bf16 %v1593_v28, %v1589_v27 }
 0x435   : > { %v5529_v37 = vpack.c.bf16 %v1595_v30, %v1591_v57 }
 0x437   : > { %5384 = vmatpush1.bf16.msra.mxu0 %v5383_v41  ;;  %5512 = vmatpush1.bf16.msra.mxu1 %v5511_v42  ;;  %v1594_v41 = vld [vmem:[#allocation11 + $0x770] sm:$0xff]  ;;  %v1597_v42 = vld [vmem:[#allocation11 + $0x788] sm:$0xff] }
 0x438   : > { %5386 = vmatprep.subr.bf16.mxu0 %v5385_v53  ;;  %5514 = vmatprep.subr.bf16.mxu1 %v5513_v45  ;;  %v1603_v53 = vld [vmem:[#allocation11 + $0x7b8] sm:$0xff]  ;;  %v5403_v45 = vpack.c.bf16 %v1592_v34, %v1588_v33  ;;  %v5531_v47 = vpack.c.bf16 %v1594_v41, %v1590_v49  ;;  %v5405_v56 = vpack.c.bf16 %v1601_v43, %v1597_v42  ;;  %v2101_v42 = vld [vmem:[#allocation16 + $0x8] sm:$0xff] }
 0x439   : > { %v5533_v58 = vpack.c.bf16 %v1603_v53, %v1599_v44  ;;  %v2105_v43 = vld [vmem:[#allocation16 + $0x28] sm:$0xff]  ;;  %v2103_v44 = vld [vmem:[#allocation16 + $0x18] sm:$0xff] }
 0x43a   : > { %v5541_v53 = vpack.c.bf16 %v2105_v43, %v2101_v42 }
 0x43b   : > { %5388 = vmatpush1.bf16.msra.mxu0 %v5387_v60  ;;  %5516 = vmatpush1.bf16.msra.mxu1 %v5515_v6  ;;  %v1602_v60 = vld [vmem:[#allocation11 + $0x7b0] sm:$0xff]  ;;  %v1605_v6 = vld [vmem:[#allocation11 + $0x7c8] sm:$0xff] }
 0x43c   : > { %5390 = vmatprep.subr.bf16.mxu0 %v5389_v63  ;;  %5518 = vmatprep.subr.bf16.mxu1 %v5517_v8  ;;  %v1611_v63 = vld [vmem:[#allocation11 + $0x7f8] sm:$0xff]  ;;  %v5407_v8 = vpack.c.bf16 %v1600_v51, %v1596_v48  ;;  %v5535_v1 = vpack.c.bf16 %v1602_v60, %v1598_v59  ;;  %v5409_v3 = vpack.c.bf16 %v1609_v61, %v1605_v6  ;;  %v2104_v48 = vld [vmem:[#allocation16 + $0x20] sm:$0xff]  ;;  %v2109_v60 = vld [vmem:[#allocation16 + $0x48] sm:$0xff] }
 0x43d   : > { %v5537_v4 = vpack.c.bf16 %v1611_v63, %v1607_v9  ;;  %v2106_v59 = vld [vmem:[#allocation16 + $0x30] sm:$0xff]  ;;  %v2113_v61 = vld [vmem:[#allocation16 + $0x68] sm:$0xff]  ;;  %v2111_v9 = vld [vmem:[#allocation16 + $0x58] sm:$0xff] }
 0x43e   : > { %v2115_v63 = vld [vmem:[#allocation16 + $0x78] sm:$0xff] }
 0x43f   : > { %5392 = vmatpush1.bf16.msra.mxu0 %v5391_v13  ;;  %5520 = vmatpush1.bf16.msra.mxu1 %v5519_v23  ;;  %v1610_v13 = vld [vmem:[#allocation11 + $0x7f0] sm:$0xff]  ;;  %v5411_v23 = vpack.c.bf16 %v1608_v11, %v1604_v2  ;;  %v2108_v2 = vld [vmem:[#allocation16 + $0x40] sm:$0xff] }
 0x440   : > { %5394 = vmatprep.subr.bf16.mxu0 %v5393_v32  ;;  %5522 = vmatprep.subr.bf16.mxu1 %v5521_v15  ;;  %v5539_v14 = vpack.c.bf16 %v1610_v13, %v1606_v7  ;;  %v1617_v32 = vrot.slane %v1612_v10, %v7925_v36  ;;  %v1621_v15 = vrot.slane %v1612_v10, %v7929_v39  ;;  %v2114_v7 = vld [vmem:[#allocation16 + $0x70] sm:$0xff]  ;;  %v2117_v13 = vld [vmem:[#allocation16 + $0x88] sm:$0xff] }
 0x443   : > { %5396 = vmatpush1.bf16.msra.mxu0 %v5395_v16  ;;  %5524 = vmatpush1.bf16.msra.mxu1 %v5523_v20  ;;  %v1629_v20 = vrot.slane %v1612_v10, %v7931_v40 }
 0x444   : > { %5398 = vmatprep.subr.bf16.mxu0 %v5397_v24  ;;  %5526 = vmatprep.subr.bf16.mxu1 %v5525_v25 }
 0x447   : > { %5400 = vmatpush1.bf16.msra.mxu0 %v5399_v31  ;;  %5528 = vmatpush1.bf16.msra.mxu1 %v5527_v46 }
 0x448   : > { %5402 = vmatprep.subr.bf16.mxu0 %v5401_v35  ;;  %5530 = vmatprep.subr.bf16.mxu1 %v5529_v37 }
 0x44b   : > { %5404 = vmatpush1.bf16.msra.mxu0 %v5403_v45  ;;  %5532 = vmatpush1.bf16.msra.mxu1 %v5531_v47  ;;  %v2107_v45 = vld [vmem:[#allocation16 + $0x38] sm:$0xff]  ;;  %v2100_v47 = vld [vmem:[#allocation16] sm:$0xff] }
 0x44c   : > { %5406 = vmatprep.subr.bf16.mxu0 %v5405_v56  ;;  %5534 = vmatprep.subr.bf16.mxu1 %v5533_v58  ;;  %v5669_v51 = vpack.c.bf16 %v2107_v45, %v2103_v44  ;;  %v5543_v56 = vpack.c.bf16 %v2104_v48, %v2100_v47  ;;  %v2102_v58 = vld [vmem:[#allocation16 + $0x10] sm:$0xff]  ;;  %v2132_v44 = vld [vmem:[#allocation16 + $0x100] sm:$0xff] }
 0x44d   : > { %v5671_v6 = vpack.c.bf16 %v2106_v59, %v2102_v58  ;;  %v2134_v45 = vld [vmem:[#allocation16 + $0x110] sm:$0xff]  ;;  %v2143_v58 = vld [vmem:[#allocation16 + $0x158] sm:$0xff] }
 0x44e   : > { %v2138_v48 = vld [vmem:[#allocation16 + $0x130] sm:$0xff]  ;;  %v2147_v59 = vld [vmem:[#allocation16 + $0x178] sm:$0xff] }
 0x44f   : > { %5408 = vmatpush1.bf16.msra.mxu0 %v5407_v8  ;;  %5536 = vmatpush1.bf16.msra.mxu1 %v5535_v1  ;;  %v5545_v8 = vpack.c.bf16 %v2113_v61, %v2109_v60  ;;  %v5673_v1 = vpack.c.bf16 %v2115_v63, %v2111_v9  ;;  %v2140_v9 = vld [vmem:[#allocation16 + $0x140] sm:$0xff] }
 0x450   : > { %5410 = vmatprep.subr.bf16.mxu0 %v5409_v3  ;;  %5538 = vmatprep.subr.bf16.mxu1 %v5537_v4  ;;  %v2112_v3 = vld [vmem:[#allocation16 + $0x60] sm:$0xff]  ;;  %v2110_v4 = vld [vmem:[#allocation16 + $0x50] sm:$0xff] }
 0x451   : > { %v5547_v11 = vpack.c.bf16 %v2112_v3, %v2108_v2  ;;  %v2144_v63 = vld [vmem:[#allocation16 + $0x160] sm:$0xff]  ;;  %v2146_v2 = vld [vmem:[#allocation16 + $0x170] sm:$0xff]  ;;  %v2149_v3 = vld [vmem:[#allocation16 + $0x188] sm:$0xff] }
 0x453   : > { %5412 = vmatpush1.bf16.msra.mxu0 %v5411_v23  ;;  %5540 = vmatpush1.bf16.msra.mxu1 %v5539_v14  ;;  %v2121_v23 = vld [vmem:[#allocation16 + $0xa8] sm:$0xff]  ;;  %v5675_v14 = vpack.c.bf16 %v2114_v7, %v2110_v4  ;;  %v2155_v7 = vld [vmem:[#allocation16 + $0x1b8] sm:$0xff] }
 0x454   : > { %5542 = vmatprep.subr.bf16.mxu0 %v5541_v53  ;;  %5670 = vmatprep.subr.bf16.mxu1 %v5669_v51  ;;  %v5549_v10 = vpack.c.bf16 %v2121_v23, %v2117_v13  ;;  %v2136_v53 = vld [vmem:[#allocation16 + $0x120] sm:$0xff]  ;;  %v2141_v51 = vld [vmem:[#allocation16 + $0x148] sm:$0xff]  ;;  %v5563_v13 = vpack.c.bf16 %v2144_v63, %v2140_v9  ;;  %v2178_v63 = vld [vmem:[#allocation16 + $0x270] sm:$0xff] }
 0x455   : > { %v5559_v60 = vpack.c.bf16 %v2136_v53, %v2132_v44  ;;  %v2153_v4 = vld [vmem:[#allocation16 + $0x1a8] sm:$0xff]  ;;  %v2170_v53 = vld [vmem:[#allocation16 + $0x230] sm:$0xff] }
 0x456   : > { %1770 = vmatmul.mubr.f32.vlgmr.msra.gmra.mrb[2].mxu0 %v8021_v0  ;;  %1912 = vmatmul.mubr.f32.vlgmr.msra.gmra.mrb[2].mxu1 %v8021_v0 }
 0x457   : > { %5544 = vmatpush1.bf16.msra.mxu0 %v5543_v56  ;;  %5672 = vmatpush1.bf16.msra.mxu1 %v5671_v6  ;;  %v2145_v56 = vld [vmem:[#allocation16 + $0x168] sm:$0xff]  ;;  %v5687_v6 = vpack.c.bf16 %v2138_v48, %v2134_v45  ;;  %v2175_v48 = vld [vmem:[#allocation16 + $0x258] sm:$0xff] }
 0x458   : > { %5546 = vmatprep.subr.bf16.mxu0 %v5545_v8  ;;  %5674 = vmatprep.subr.bf16.mxu1 %v5673_v1  ;;  %v5561_v61 = vpack.c.bf16 %v2145_v56, %v2141_v51  ;;  %v2142_v8 = vld [vmem:[#allocation16 + $0x150] sm:$0xff]  ;;  %v5689_v1 = vpack.c.bf16 %v2147_v59, %v2143_v58  ;;  %v2173_v45 = vld [vmem:[#allocation16 + $0x248] sm:$0xff]  ;;  %v2179_v51 = vld [vmem:[#allocation16 + $0x278] sm:$0xff] }
 0x459   : > { %v5691_v23 = vpack.c.bf16 %v2146_v2, %v2142_v8  ;;  %v5705_v9 = vpack.c.bf16 %v2179_v51, %v2175_v48  ;;  %v2181_v8 = vld [vmem:[#allocation16 + $0x288] sm:$0xff]  ;;  %v2183_v2 = vld [vmem:[#allocation16 + $0x298] sm:$0xff] }
 0x45b   : > { %5548 = vmatpush1.bf16.msra.mxu0 %v5547_v11  ;;  %5676 = vmatpush1.bf16.msra.mxu1 %v5675_v14  ;;  %v2151_v11 = vld [vmem:[#allocation16 + $0x198] sm:$0xff]  ;;  %v5565_v14 = vpack.c.bf16 %v2153_v4, %v2149_v3 }
 0x45c   : > { %5550 = vmatprep.subr.bf16.mxu0 %v5549_v10  ;;  %v2148_v10 = vld [vmem:[#allocation16 + $0x180] sm:$0xff]  ;;  %v2187_v3 = vld [vmem:[#allocation16 + $0x2b8] sm:$0xff] }
 0x529   : > { %v1771_v50 = vpop.f32.mrb[2].mxu0  ;;  %v1913_v17 = vpop.f32.mrb[2].mxu1 }
 0x52a   : > { %v6629_v18 = vadd.f32 %v1771_v50, %v1617_v32  ;;  %v1773_v19 = vpop.f32.mrb[3].mxu0  ;;  %v1915_v54 = vpop.f32.mrb[3].mxu1  ;;  %v6631_v21 = vadd.f32 %v1913_v17, %v1625_v52  ;;  %v2119_v32 = vld [vmem:[#allocation16 + $0x98] sm:$0xff]  ;;  %v2116_v50 = vld [vmem:[#allocation16 + $0x80] sm:$0xff] }
 0x52b   : > { %v6630_v16 = vadd.f32 %v1773_v19, %v1621_v15  ;;  %v6632_v24 = vadd.f32 %v1915_v54, %v1629_v20  ;;  %v2123_v15 = vld [vmem:[#allocation16 + $0xb8] sm:$0xff]  ;;  %v2120_v17 = vld [vmem:[#allocation16 + $0xa0] sm:$0xff]  ;;  %v2122_v19 = vld [vmem:[#allocation16 + $0xb0] sm:$0xff] }
 0x52c   : > { %v5677_v52 = vpack.c.bf16 %v2123_v15, %v2119_v32  ;;  %v5551_v54 = vpack.c.bf16 %v2120_v17, %v2116_v50  ;;  %v2129_v20 = vld [vmem:[#allocation16 + $0xe8] sm:$0xff]  ;;  %v2152_v32 = vld [vmem:[#allocation16 + $0x1a0] sm:$0xff]  ;;  %v2150_v15 = vld [vmem:[#allocation16 + $0x190] sm:$0xff]  ;;  %v5693_v50 = vpack.c.bf16 %v2155_v7, %v2151_v11 }
 0x52d   : > { %v1920_v22 = vadd.f32 %v6630_v16, %v6629_v18  ;;  %v2157_v17 = vld [vmem:[#allocation16 + $0x1c8] sm:$0xff] }
 0x52e   : > { %5678 = vmatprep.subr.bf16.mxu1 %v5677_v52  ;;  %5552 = vmatpush1.bf16.msra.mxu0 %v5551_v54  ;;  %v2154_v52 = vld [vmem:[#allocation16 + $0x1b0] sm:$0xff]  ;;  %v2163_v54 = vld [vmem:[#allocation16 + $0x1f8] sm:$0xff] }
 0x52f   : > { %v1921_v25 = vadd.f32 %v6631_v21, %v1920_v22 }
 0x531   : > { %v1922_v55 = vadd.f32 %v6632_v24, %v1921_v25  ;;  %v2131_v25 = vld [vmem:[#allocation16 + $0xf8] sm:$0xff] }
 0x533   : > { %1923 = vadd.xlane.f32.xlu1 %v1922_v55  ;;  %v2124_v55 = vld [vmem:[#allocation16 + $0xc0] sm:$0xff] }
 0x5c0   : > { %v1924_v26 = vpop.xlane.xlu1 %1923 }
 0x5c1   : > { %v1925_v27 = vmul.f32 0.001953125, %v1924_v26  ;;  %v2128_v26 = vld [vmem:[#allocation16 + $0xe0] sm:$0xff] }
 0x5c3   : > { %v8037_v28 = vsub.f32 %v6629_v18, %v1925_v27  ;;  %v8039_v57 = vsub.f32 %v6630_v16, %v1925_v27  ;;  %v8041_v30 = vsub.f32 %v6631_v21, %v1925_v27  ;;  %v8043_v31 = vsub.f32 %v6632_v24, %v1925_v27  ;;  %v2118_v18 = vld [vmem:[#allocation16 + $0x90] sm:$0xff]  ;;  %v2125_v16 = vld [vmem:[#allocation16 + $0xc8] sm:$0xff]  ;;  %v2127_v21 = vld [vmem:[#allocation16 + $0xd8] sm:$0xff] }
 0x5c4   : > { %v5679_v22 = vpack.c.bf16 %v2122_v19, %v2118_v18  ;;  %v5553_v24 = vpack.c.bf16 %v2129_v20, %v2125_v16  ;;  %v5681_v27 = vpack.c.bf16 %v2131_v25, %v2127_v21  ;;  %v2161_v18 = vld [vmem:[#allocation16 + $0x1e8] sm:$0xff]  ;;  %v2159_v19 = vld [vmem:[#allocation16 + $0x1d8] sm:$0xff]  ;;  %v5567_v16 = vpack.c.bf16 %v2152_v32, %v2148_v10  ;;  %v2158_v25 = vld [vmem:[#allocation16 + $0x1d0] sm:$0xff] }
 0x5c5   : > { %v1930_v46 = vmul.f32 %v8037_v28, %v8037_v28  ;;  %v1931_v33 = vmul.f32 %v8039_v57, %v8039_v57  ;;  %v1932_v34 = vmul.f32 %v8041_v30, %v8041_v30  ;;  %v1933_v37 = vmul.f32 %v8043_v31, %v8043_v31  ;;  %v2186_v32 = vld [vmem:[#allocation16 + $0x2b0] sm:$0xff] }
 0x5c6   : > { %5680 = vmatpush1.bf16.msra.mxu1 %v5679_v22  ;;  %5554 = vmatprep.subr.bf16.mxu0 %v5553_v24  ;;  %v5695_v20 = vpack.c.bf16 %v2154_v52, %v2150_v15  ;;  %v5569_v21 = vpack.c.bf16 %v2161_v18, %v2157_v17  ;;  %v2156_v22 = vld [vmem:[#allocation16 + $0x1c0] sm:$0xff]  ;;  %v5709_v10 = vpack.c.bf16 %v2187_v3, %v2183_v2  ;;  %v2189_v15 = vld [vmem:[#allocation16 + $0x2c8] sm:$0xff]  ;;  %v2191_v52 = vld [vmem:[#allocation16 + $0x2d8] sm:$0xff] }
 0x5c7   : > { %v1934_v35 = vadd.f32 %v1931_v33, %v1930_v46  ;;  %v2126_v46 = vld [vmem:[#allocation16 + $0xd0] sm:$0xff]  ;;  %5682 = vmatprep.subr.bf16.mxu1 %v5681_v27  ;;  %v2160_v24 = vld [vmem:[#allocation16 + $0x1e0] sm:$0xff]  ;;  %v2165_v27 = vld [vmem:[#allocation16 + $0x208] sm:$0xff] }
 0x5c8   : > { %v2130_v33 = vld [vmem:[#allocation16 + $0xf0] sm:$0xff]  ;;  %v2195_v17 = vld [vmem:[#allocation16 + $0x2f8] sm:$0xff] }
 0x5c9   : > { %v1935_v49 = vadd.f32 %v1934_v35, %v1932_v34  ;;  %v2133_v34 = vld [vmem:[#allocation16 + $0x108] sm:$0xff]  ;;  %v5683_v42 = vpack.c.bf16 %v2130_v33, %v2126_v46  ;;  %v2167_v33 = vld [vmem:[#allocation16 + $0x218] sm:$0xff] }
 0x5ca   : > { %v2137_v35 = vld [vmem:[#allocation16 + $0x128] sm:$0xff] }
 0x5cb   : > { %v1936_v41 = vadd.f32 %v1935_v49, %v1933_v37  ;;  %v2135_v37 = vld [vmem:[#allocation16 + $0x118] sm:$0xff]  ;;  %v5557_v43 = vpack.c.bf16 %v2137_v35, %v2133_v34  ;;  %5684 = vmatpush1.bf16.msra.mxu1 %v5683_v42  ;;  %v2169_v46 = vld [vmem:[#allocation16 + $0x228] sm:$0xff]  ;;  %v5571_v35 = vpack.c.bf16 %v2160_v24, %v2156_v22  ;;  %v2168_v42 = vld [vmem:[#allocation16 + $0x220] sm:$0xff]  ;;  %v5713_v22 = vpack.c.bf16 %v2195_v17, %v2191_v52 }
 0x5cc   : > { %v2139_v49 = vld [vmem:[#allocation16 + $0x138] sm:$0xff]  ;;  %v2194_v24 = vld [vmem:[#allocation16 + $0x2f0] sm:$0xff] }
 0x5cd   : > { %1937 = vadd.xlane.f32.xlu1 %v1936_v41  ;;  %v5555_v41 = vpack.c.bf16 %v2128_v26, %v2124_v55  ;;  %v5685_v47 = vpack.c.bf16 %v2139_v49, %v2135_v37  ;;  %v5697_v55 = vpack.c.bf16 %v2163_v54, %v2159_v19  ;;  %v2162_v26 = vld [vmem:[#allocation16 + $0x1f0] sm:$0xff]  ;;  %v2171_v34 = vld [vmem:[#allocation16 + $0x238] sm:$0xff]  ;;  %v5573_v49 = vpack.c.bf16 %v2169_v46, %v2165_v27 }
 0x5ce   : > { %v5699_v37 = vpack.c.bf16 %v2162_v26, %v2158_v25  ;;  %v5701_v44 = vpack.c.bf16 %v2171_v34, %v2167_v33  ;;  %v2197_v25 = vld [vmem:[#allocation16 + $0x308] sm:$0xff]  ;;  %v2199_v26 = vld [vmem:[#allocation16 + $0x318] sm:$0xff] }
 0x5cf   : > { %5556 = vmatpush1.bf16.msra.mxu0 %v5555_v41  ;;  %5686 = vmatprep.subr.bf16.mxu1 %v5685_v47  ;;  %v2164_v41 = vld [vmem:[#allocation16 + $0x200] sm:$0xff]  ;;  %v2177_v47 = vld [vmem:[#allocation16 + $0x268] sm:$0xff]  ;;  %v2203_v27 = vld [vmem:[#allocation16 + $0x338] sm:$0xff] }
 0x5d0   : > { %5558 = vmatprep.subr.bf16.mxu0 %v5557_v43  ;;  %5688 = vmatpush1.bf16.msra.mxu1 %v5687_v6  ;;  %v2166_v43 = vld [vmem:[#allocation16 + $0x210] sm:$0xff]  ;;  %v5575_v56 = vpack.c.bf16 %v2168_v42, %v2164_v41  ;;  %v5577_v59 = vpack.c.bf16 %v2177_v47, %v2173_v45  ;;  %v2176_v6 = vld [vmem:[#allocation16 + $0x260] sm:$0xff]  ;;  %v5717_v41 = vpack.c.bf16 %v2203_v27, %v2199_v26  ;;  %v2211_v45 = vld [vmem:[#allocation16 + $0x378] sm:$0xff] }
 0x5d1   : > { %5690 = vmatprep.subr.bf16.mxu1 %v5689_v1  ;;  %v5703_v58 = vpack.c.bf16 %v2170_v53, %v2166_v43  ;;  %v2185_v1 = vld [vmem:[#allocation16 + $0x2a8] sm:$0xff]  ;;  %v2202_v42 = vld [vmem:[#allocation16 + $0x330] sm:$0xff]  ;;  %v2207_v53 = vld [vmem:[#allocation16 + $0x358] sm:$0xff] }
 0x5d2   : > { %v5581_v7 = vpack.c.bf16 %v2185_v1, %v2181_v8  ;;  %v2205_v43 = vld [vmem:[#allocation16 + $0x348] sm:$0xff]  ;;  %v2219_v8 = vld [vmem:[#allocation16 + $0x3b8] sm:$0xff] }
 0x5d3   : > { %5560 = vmatpush1.bf16.msra.mxu0 %v5559_v60  ;;  %v2172_v60 = vld [vmem:[#allocation16 + $0x240] sm:$0xff]  ;;  %v2235_v27 = vld [vmem:[#allocation16 + $0x438] sm:$0xff] }
 0x5d4   : > { %5562 = vmatprep.subr.bf16.mxu0 %v5561_v61  ;;  %5692 = vmatpush1.bf16.msra.mxu1 %v5691_v23  ;;  %v2174_v61 = vld [vmem:[#allocation16 + $0x250] sm:$0xff]  ;;  %v5579_v4 = vpack.c.bf16 %v2176_v6, %v2172_v60  ;;  %v2184_v23 = vld [vmem:[#allocation16 + $0x2a0] sm:$0xff]  ;;  %v5721_v60 = vpack.c.bf16 %v2211_v45, %v2207_v53 }
 0x5d5   : > { %5694 = vmatprep.subr.bf16.mxu1 %v5693_v50  ;;  %v5707_v11 = vpack.c.bf16 %v2178_v63, %v2174_v61  ;;  %v2193_v50 = vld [vmem:[#allocation16 + $0x2e8] sm:$0xff]  ;;  %v2210_v6 = vld [vmem:[#allocation16 + $0x370] sm:$0xff]  ;;  %v2215_v63 = vld [vmem:[#allocation16 + $0x398] sm:$0xff] }
 0x5d6   : > { %v5585_v54 = vpack.c.bf16 %v2193_v50, %v2189_v15  ;;  %v2213_v61 = vld [vmem:[#allocation16 + $0x388] sm:$0xff]  ;;  %v2227_v15 = vld [vmem:[#allocation16 + $0x3f8] sm:$0xff] }
 0x5d7   : > { %5564 = vmatpush1.bf16.msra.mxu0 %v5563_v13  ;;  %v2180_v13 = vld [vmem:[#allocation16 + $0x280] sm:$0xff] }
 0x5d8   : > { %5566 = vmatprep.subr.bf16.mxu0 %v5565_v14  ;;  %5696 = vmatpush1.bf16.msra.mxu1 %v5695_v20  ;;  %v2182_v14 = vld [vmem:[#allocation16 + $0x290] sm:$0xff]  ;;  %v5583_v18 = vpack.c.bf16 %v2184_v23, %v2180_v13  ;;  %v2192_v20 = vld [vmem:[#allocation16 + $0x2e0] sm:$0xff]  ;;  %v5725_v13 = vpack.c.bf16 %v2219_v8, %v2215_v63 }
 0x5d9   : > { %5698 = vmatprep.subr.bf16.mxu1 %v5697_v55  ;;  %v5711_v19 = vpack.c.bf16 %v2186_v32, %v2182_v14  ;;  %v2201_v55 = vld [vmem:[#allocation16 + $0x328] sm:$0xff]  ;;  %v2218_v23 = vld [vmem:[#allocation16 + $0x3b0] sm:$0xff]  ;;  %v2223_v32 = vld [vmem:[#allocation16 + $0x3d8] sm:$0xff] }
 0x5da   : > { %v5589_v34 = vpack.c.bf16 %v2201_v55, %v2197_v25  ;;  %v2221_v14 = vld [vmem:[#allocation16 + $0x3c8] sm:$0xff]  ;;  %v2231_v55 = vld [vmem:[#allocation16 + $0x418] sm:$0xff] }
 0x5db   : > { %5568 = vmatpush1.bf16.msra.mxu0 %v5567_v16  ;;  %v2188_v16 = vld [vmem:[#allocation16 + $0x2c0] sm:$0xff]  ;;  %v2233_v25 = vld [vmem:[#allocation16 + $0x428] sm:$0xff] }
 0x5dc   : > { %5570 = vmatprep.subr.bf16.mxu0 %v5569_v21  ;;  %5700 = vmatpush1.bf16.msra.mxu1 %v5699_v37  ;;  %v2190_v21 = vld [vmem:[#allocation16 + $0x2d0] sm:$0xff]  ;;  %v5587_v46 = vpack.c.bf16 %v2192_v20, %v2188_v16  ;;  %v2200_v37 = vld [vmem:[#allocation16 + $0x320] sm:$0xff] }
 0x5dd   : > { %5702 = vmatprep.subr.bf16.mxu1 %v5701_v44  ;;  %v5715_v33 = vpack.c.bf16 %v2194_v24, %v2190_v21  ;;  %v2209_v44 = vld [vmem:[#allocation16 + $0x368] sm:$0xff]  ;;  %v2222_v16 = vld [vmem:[#allocation16 + $0x3d0] sm:$0xff] }
 0x5de   : > { %v5593_v51 = vpack.c.bf16 %v2209_v44, %v2205_v43  ;;  %v2226_v20 = vld [vmem:[#allocation16 + $0x3f0] sm:$0xff]  ;;  %v2229_v24 = vld [vmem:[#allocation16 + $0x408] sm:$0xff] }
 0x5df   : > { %5572 = vmatpush1.bf16.msra.mxu0 %v5571_v35  ;;  %v2196_v35 = vld [vmem:[#allocation16 + $0x300] sm:$0xff]  ;;  %v5605_v26 = vpack.c.bf16 %v2233_v25, %v2229_v24 }
 0x5e0   : > { %5574 = vmatprep.subr.bf16.mxu0 %v5573_v49  ;;  %5704 = vmatpush1.bf16.msra.mxu1 %v5703_v58  ;;  %v2198_v49 = vld [vmem:[#allocation16 + $0x310] sm:$0xff]  ;;  %v5591_v47 = vpack.c.bf16 %v2200_v37, %v2196_v35  ;;  %v2208_v58 = vld [vmem:[#allocation16 + $0x360] sm:$0xff]  ;;  %v1918_v37 = vld [vmem:[#allocation14] sm:$0xf] }
 0x5e1   : > { %5706 = vmatprep.subr.bf16.mxu1 %v5705_v9  ;;  %v5719_v48 = vpack.c.bf16 %v2202_v42, %v2198_v49  ;;  %v2217_v9 = vld [vmem:[#allocation16 + $0x3a8] sm:$0xff]  ;;  %v1919_v49 = vld [vmem:[%s8517_s27] sm:$0xf]  ;;  %v1950_v42 = vrot.slane %v1918_v37, %v7925_v36  ;;  %v1962_v43 = vrot.slane %v1918_v37, %v7931_v40  ;;  %v1958_v44 = vrot.slane %v1918_v37, %v7927_v38 }
 0x5e2   : > { %v5597_v3 = vpack.c.bf16 %v2217_v9, %v2213_v61  ;;  %v1979_v45 = vrot.slane %v1919_v49, %v7929_v39 }
 0x5e3   : > { %5576 = vmatpush1.bf16.msra.mxu0 %v5575_v56  ;;  %v2204_v56 = vld [vmem:[#allocation16 + $0x340] sm:$0xff] }
 0x5e4   : > { %5578 = vmatprep.subr.bf16.mxu0 %v5577_v59  ;;  %5708 = vmatpush1.bf16.msra.mxu1 %v5707_v11  ;;  %v2206_v59 = vld [vmem:[#allocation16 + $0x350] sm:$0xff]  ;;  %v5595_v1 = vpack.c.bf16 %v2208_v58, %v2204_v56  ;;  %v2216_v11 = vld [vmem:[#allocation16 + $0x3a0] sm:$0xff] }
 0x5e5   : > { %5710 = vmatprep.subr.bf16.mxu1 %v5709_v10  ;;  %v5723_v2 = vpack.c.bf16 %v2210_v6, %v2206_v59  ;;  %v2225_v10 = vld [vmem:[#allocation16 + $0x3e8] sm:$0xff] }
 0x5e6   : > { %v5601_v17 = vpack.c.bf16 %v2225_v10, %v2221_v14 }
 0x5e7   : > { %5580 = vmatpush1.bf16.msra.mxu0 %v5579_v4  ;;  %v2212_v4 = vld [vmem:[#allocation16 + $0x380] sm:$0xff] }
 0x5e8   : > { %5582 = vmatprep.subr.bf16.mxu0 %v5581_v7  ;;  %5712 = vmatpush1.bf16.msra.mxu1 %v5711_v19  ;;  %v2214_v7 = vld [vmem:[#allocation16 + $0x390] sm:$0xff]  ;;  %v5599_v50 = vpack.c.bf16 %v2216_v11, %v2212_v4  ;;  %v2224_v19 = vld [vmem:[#allocation16 + $0x3e0] sm:$0xff] }
 0x5e9   : > { %5714 = vmatprep.subr.bf16.mxu1 %v5713_v22  ;;  %v5727_v52 = vpack.c.bf16 %v2218_v23, %v2214_v7  ;;  %v5731_v22 = vpack.c.bf16 %v2226_v20, %v2222_v16 }
 0x5eb   : > { %5584 = vmatpush1.bf16.msra.mxu0 %v5583_v18  ;;  %v2220_v18 = vld [vmem:[#allocation16 + $0x3c0] sm:$0xff] }
 0x5ec   : > { %5586 = vmatprep.subr.bf16.mxu0 %v5585_v54  ;;  %5716 = vmatpush1.bf16.msra.mxu1 %v5715_v33  ;;  %v5729_v54 = vpack.c.bf16 %v2227_v15, %v2223_v32  ;;  %v5603_v21 = vpack.c.bf16 %v2224_v19, %v2220_v18 }
 0x5ed   : > { %5718 = vmatprep.subr.bf16.mxu1 %v5717_v41  ;;  %v1954_v41 = vrot.slane %v1918_v37, %v7929_v39 }
 0x5ef   : > { %5588 = vmatpush1.bf16.msra.mxu0 %v5587_v46  ;;  %v5733_v46 = vpack.c.bf16 %v2235_v27, %v2231_v55 }
 0x5f0   : > { %5590 = vmatprep.subr.bf16.mxu0 %v5589_v34  ;;  %5720 = vmatpush1.bf16.msra.mxu1 %v5719_v48  ;;  %v1987_v48 = vrot.slane %v1919_v49, %v7931_v40 }
 0x5f1   : > { %5722 = vmatprep.subr.bf16.mxu1 %v5721_v60 }
 0x5f3   : > { %5592 = vmatpush1.bf16.msra.mxu0 %v5591_v47  ;;  %v1975_v47 = vrot.slane %v1919_v49, %v7925_v36 }
 0x5f4   : > { %5594 = vmatprep.subr.bf16.mxu0 %v5593_v51  ;;  %5724 = vmatpush1.bf16.msra.mxu1 %v5723_v2  ;;  %v1983_v51 = vrot.slane %v1919_v49, %v7927_v38 }
 0x5f5   : > { %5726 = vmatprep.subr.bf16.mxu1 %v5725_v13 }
 0x5f7   : > { %5596 = vmatpush1.bf16.msra.mxu0 %v5595_v1 }
 0x5f8   : > { %5598 = vmatprep.subr.bf16.mxu0 %v5597_v3  ;;  %5728 = vmatpush1.bf16.msra.mxu1 %v5727_v52 }
 0x5f9   : > { %5730 = vmatprep.subr.bf16.mxu1 %v5729_v54 }
 0x5fb   : > { %5600 = vmatpush1.bf16.msra.mxu0 %v5599_v50 }
 0x5fc   : > { %5602 = vmatprep.subr.bf16.mxu0 %v5601_v17  ;;  %5732 = vmatpush1.bf16.msra.mxu1 %v5731_v22 }
 0x5fd   : > { %5734 = vmatprep.subr.bf16.mxu1 %v5733_v46 }
 0x5ff   : > { %5604 = vmatpush1.bf16.msra.mxu0 %v5603_v21 }
 0x600   : > { %5606 = vmatprep.subr.bf16.mxu0 %v5605_v26 }
 0x65a   : > { %v1938_v33 = vpop.xlane.xlu1 %1937 }
 0x65b   : > { %v1939_v34 = vmul.f32 0.001953125, %v1938_v33 }
 0x65d   : > { %v1940_v35 = vadd.f32 1e-05, %v1939_v34 }
 0x65f   : > { %6860 = vrsqrt.f32 %v1940_v35 }
 0x669   : > { %v6861_v53 = vpop.eup %6860 }
 0x66a   : > { %v1943_v56 = vmul.f32 %v6861_v53, %v8039_v57  ;;  %v1942_v58 = vmul.f32 %v6861_v53, %v8037_v28  ;;  %v1945_v59 = vmul.f32 %v6861_v53, %v8043_v31  ;;  %v1944_v60 = vmul.f32 %v6861_v53, %v8041_v30 }
 0x66c   : > { %v1968_v6 = vmul.f32 %v1954_v41, %v1943_v56  ;;  %v1967_v61 = vmul.f32 %v1950_v42, %v1942_v58  ;;  %v1970_v9 = vmul.f32 %v1962_v43, %v1945_v59  ;;  %v1969_v63 = vmul.f32 %v1958_v44, %v1944_v60 }
 0x66e   : > { %v8068_v8 = vadd.f32 %v1979_v45, %v1968_v6  ;;  %v8070_v1 = vadd.f32 %v1975_v47, %v1967_v61  ;;  %v8072_v2 = vadd.f32 %v1987_v48, %v1970_v9  ;;  %v8074_v3 = vadd.f32 %v1983_v51, %v1969_v63 }
 0x670   : > { %v8077_v57 = vmul.f32 0.70710677, %v8068_v8  ;;  %v8080_v28 = vmul.f32 0.70710677, %v8070_v1  ;;  %v8083_v30 = vmul.f32 0.70710677, %v8072_v2 }
 0x671   : > { %v8089_v45 = vmul.f32 0.70710677, %v8074_v3 }
 0x672   : > { %v2013_v31 = vand.u32 2147483647, %v8077_v57  ;;  %v2012_v4 = vand.u32 2147483647, %v8080_v28  ;;  %v2015_v11 = vand.u32 2147483647, %v8083_v30 }
 0x673   : > { %v8092_v60 = vand.u32 2147483647, %v8089_v45  ;;  %vm2005_vm4 = vcmp.ge.f32.partialorder %v8077_v57, 0.0  ;;  %vm2004_vm5 = vcmp.ge.f32.partialorder %v8080_v28, 0.0  ;;  %v2232_v57 = vld [vmem:[#allocation16 + $0x420] sm:$0xff]  ;;  %vm2007_vm6 = vcmp.ge.f32.partialorder %v8083_v30, 0.0 }
 0x674   : > { %v2017_v7 = vmul.f32 0.3275911, %v2013_v31  ;;  %v2016_v13 = vmul.f32 0.3275911, %v2012_v4  ;;  %v2019_v23 = vmul.f32 0.3275911, %v2015_v11 }
 0x675   : > { %v2065_v15 = vsub.f32 0.0, %v2013_v31  ;;  %v2064_v50 = vsub.f32 0.0, %v2012_v4  ;;  %v2067_v18 = vsub.f32 0.0, %v2015_v11  ;;  %v2247_v30 = vld [vmem:[#allocation16 + $0x498] sm:$0xff]  ;;  %vm2006_vm7 = vcmp.ge.f32.partialorder %v8089_v45, 0.0 }
 0x676   : > { %v2021_v14 = vadd.f32 1.0, %v2017_v7  ;;  %v2020_v10 = vadd.f32 1.0, %v2016_v13  ;;  %v2023_v32 = vadd.f32 1.0, %v2019_v23  ;;  %v2018_v13 = vmul.f32 0.3275911, %v8092_v60 }
 0x677   : > { %v2069_v17 = vmul.f32 %v2065_v15, %v2013_v31  ;;  %v2068_v16 = vmul.f32 %v2064_v50, %v2012_v4  ;;  %v2071_v55 = vmul.f32 %v2067_v18, %v2015_v11  ;;  %v2009_v15 = vsel %vm2005_vm4, 1.0, %v7378_v12  ;;  %v2228_v18 = vld [vmem:[#allocation16 + $0x400] sm:$0xff] }
 0x678   : > { %6862 = vrcp.f32 %v2021_v14  ;;  %v2008_v50 = vsel %vm2004_vm5, 1.0, %v7378_v12 }
 0x679   : > { %6864 = vrcp.f32 %v2020_v10  ;;  %v2074_v24 = vmul.f32 1.442695, %v2069_v17  ;;  %v2072_v27 = vmul.f32 1.442695, %v2068_v16  ;;  %v2078_v49 = vmul.f32 1.442695, %v2071_v55 }
 0x67a   : > { %6866 = vrcp.f32 %v2023_v32  ;;  %v2230_v16 = vld [vmem:[#allocation16 + $0x410] sm:$0xff]  ;;  %v2241_v55 = vld [vmem:[#allocation16 + $0x468] sm:$0xff] }
 0x67b   : > { %6868 = vpow2.f32 %v2074_v24  ;;  %v1997_v24 = vmul.f32 0.5, %v8068_v8 }
 0x67c   : > { %6870 = vpow2.f32 %v2072_v27  ;;  %v2243_v27 = vld [vmem:[#allocation16 + $0x478] sm:$0xff] }
 0x67d   : > { %6872 = vpow2.f32 %v2078_v49 }
 0x682   : > { %v6863_v52 = vpop.eup %6862 }
 0x683   : > { %v6865_v19 = vpop.eup %6864  ;;  %v2029_v54 = vmul.f32 1.0614054, %v6863_v52 }
 0x684   : > { %v2028_v20 = vmul.f32 1.0614054, %v6865_v19  ;;  %v6867_v22 = vpop.eup %6866 }
 0x685   : > { %v2033_v21 = vadd.f32 -1.4531521, %v2029_v54  ;;  %v2031_v46 = vmul.f32 1.0614054, %v6867_v22  ;;  %v6869_v63 = vpop.eup %6868  ;;  %v2022_v54 = vadd.f32 1.0, %v2018_v13  ;;  %v2250_v13 = vld [vmem:[#allocation16 + $0x4b0] sm:$0xff] }
 0x686   : > { %v2032_v25 = vadd.f32 -1.4531521, %v2028_v20  ;;  %v6871_v4 = vpop.eup %6870  ;;  %v2234_v20 = vld [vmem:[#allocation16 + $0x430] sm:$0xff] }
 0x687   : > { %v2037_v26 = vmul.f32 %v6863_v52, %v2033_v21  ;;  %v2035_v35 = vadd.f32 -1.4531521, %v2031_v46  ;;  %v6873_v32 = vpop.eup %6872  ;;  %v2237_v21 = vld [vmem:[#allocation16 + $0x448] sm:$0xff]  ;;  %v1996_v46 = vmul.f32 0.5, %v8070_v1  ;;  %v5735_v49 = vpack.c.bf16 %v2234_v20, %v2230_v16  ;;  %v2263_v20 = vld [vmem:[#allocation16 + $0x518] sm:$0xff] }
 0x688   : > { %v2036_v33 = vmul.f32 %v6865_v19, %v2032_v25  ;;  %6874 = vrcp.f32 %v2022_v54  ;;  %v1999_v1 = vmul.f32 0.5, %v8072_v2  ;;  %v2253_v2 = vld [vmem:[#allocation16 + $0x4c8] sm:$0xff] }
 0x689   : > { %v2041_v34 = vadd.f32 1.4214138, %v2037_v26  ;;  %v2039_v42 = vmul.f32 %v6867_v22, %v2035_v35  ;;  %v2239_v26 = vld [vmem:[#allocation16 + $0x458] sm:$0xff]  ;;  %v2011_v35 = vsel %vm2007_vm6, 1.0, %v7378_v12  ;;  %v2261_v54 = vld [vmem:[#allocation16 + $0x508] sm:$0xff] }
 0x68a   : > { %v2040_v37 = vadd.f32 1.4214138, %v2036_v33  ;;  %v2265_v16 = vld [vmem:[#allocation16 + $0x528] sm:$0xff] }
 0x68b   : > { %v2045_v41 = vmul.f32 %v6863_v52, %v2041_v34  ;;  %v2043_v53 = vadd.f32 1.4214138, %v2039_v42  ;;  %v5607_v34 = vpack.c.bf16 %v2232_v57, %v2228_v18  ;;  %v2236_v42 = vld [vmem:[#allocation16 + $0x440] sm:$0xff]  ;;  %v2254_v57 = vld [vmem:[#allocation16 + $0x4d0] sm:$0xff] }
 0x68c   : > { %v2044_v43 = vmul.f32 %v6865_v19, %v2040_v37 }
 0x68d   : > { %v2049_v44 = vadd.f32 -0.28449672, %v2045_v41  ;;  %v2047_v51 = vmul.f32 %v6867_v22, %v2043_v53  ;;  %v5737_v53 = vpack.c.bf16 %v2243_v27, %v2239_v26  ;;  %v5621_v26 = vpack.c.bf16 %v2265_v16, %v2261_v54  ;;  %v2293_v54 = vld [vmem:[#allocation16 + $0x608] sm:$0xff] }
 0x68e   : > { %v2048_v47 = vadd.f32 -0.28449672, %v2044_v43  ;;  %v2240_v43 = vld [vmem:[#allocation16 + $0x460] sm:$0xff] }
 0x68f   : > { %v2053_v48 = vmul.f32 %v6863_v52, %v2049_v44  ;;  %v2051_v59 = vadd.f32 -0.28449672, %v2047_v51  ;;  %v5609_v44 = vpack.c.bf16 %v2241_v55, %v2237_v21  ;;  %v2245_v51 = vld [vmem:[#allocation16 + $0x488] sm:$0xff]  ;;  %v2267_v21 = vld [vmem:[#allocation16 + $0x538] sm:$0xff]  ;;  %v2264_v55 = vld [vmem:[#allocation16 + $0x520] sm:$0xff] }
 0x690   : > { %v2052_v56 = vmul.f32 %v6865_v19, %v2048_v47  ;;  %v2238_v47 = vld [vmem:[#allocation16 + $0x450] sm:$0xff]  ;;  %v5749_v27 = vpack.c.bf16 %v2267_v21, %v2263_v20  ;;  %v2297_v20 = vld [vmem:[#allocation16 + $0x628] sm:$0xff]  ;;  %v2295_v21 = vld [vmem:[#allocation16 + $0x618] sm:$0xff] }
 0x691   : > { %v2057_v58 = vadd.f32 0.2548296, %v2053_v48  ;;  %v2055_v9 = vmul.f32 %v6867_v22, %v2051_v59  ;;  %v2242_v48 = vld [vmem:[#allocation16 + $0x470] sm:$0xff]  ;;  %v2251_v59 = vld [vmem:[#allocation16 + $0x4b8] sm:$0xff] }
 0x692   : > { %v2056_v6 = vadd.f32 0.2548296, %v2052_v56 }
 0x693   : > { %v2061_v61 = vmul.f32 %v6863_v52, %v2057_v58  ;;  %v2059_v7 = vadd.f32 0.2548296, %v2055_v9  ;;  %v2249_v58 = vld [vmem:[#allocation16 + $0x4a8] sm:$0xff]  ;;  %v5739_v9 = vpack.c.bf16 %v2242_v48, %v2238_v47  ;;  %v2270_v48 = vld [vmem:[#allocation16 + $0x550] sm:$0xff] }
 0x694   : > { %v2060_v31 = vmul.f32 %v6865_v19, %v2056_v6 }
 0x695   : > { %v2081_v11 = vmul.f32 %v6869_v63, %v2061_v61  ;;  %v2063_v10 = vmul.f32 %v6867_v22, %v2059_v7  ;;  %v5611_v61 = vpack.c.bf16 %v2240_v43, %v2236_v42  ;;  %v2244_v63 = vld [vmem:[#allocation16 + $0x480] sm:$0xff]  ;;  %v2246_v7 = vld [vmem:[#allocation16 + $0x490] sm:$0xff] }
 0x696   : > { %v2080_v23 = vmul.f32 %v6871_v4, %v2060_v31  ;;  %v2248_v31 = vld [vmem:[#allocation16 + $0x4a0] sm:$0xff]  ;;  %v5613_v4 = vpack.c.bf16 %v2249_v58, %v2245_v51  ;;  %v2274_v51 = vld [vmem:[#allocation16 + $0x570] sm:$0xff]  ;;  %v2281_v58 = vld [vmem:[#allocation16 + $0x5a8] sm:$0xff] }
 0x697   : > { %v2085_v14 = vsub.f32 1.0, %v2081_v11  ;;  %v2083_v19 = vmul.f32 %v6873_v32, %v2063_v10  ;;  %v5741_v11 = vpack.c.bf16 %v2251_v59, %v2247_v30  ;;  %v2259_v10 = vld [vmem:[#allocation16 + $0x4f8] sm:$0xff]  ;;  %v5615_v32 = vpack.c.bf16 %v2248_v31, %v2244_v63  ;;  %v2280_v63 = vld [vmem:[#allocation16 + $0x5a0] sm:$0xff] }
 0x698   : > { %v2084_v52 = vsub.f32 1.0, %v2080_v23  ;;  %v2257_v23 = vld [vmem:[#allocation16 + $0x4e8] sm:$0xff]  ;;  %v2279_v30 = vld [vmem:[#allocation16 + $0x598] sm:$0xff] }
 0x699   : > { %v2089_v17 = vmul.f32 %v2085_v14, %v2009_v15  ;;  %v2087_v25 = vsub.f32 1.0, %v2083_v19  ;;  %v2255_v14 = vld [vmem:[#allocation16 + $0x4d8] sm:$0xff]  ;;  %v5743_v15 = vpack.c.bf16 %v2250_v13, %v2246_v7  ;;  %v2258_v19 = vld [vmem:[#allocation16 + $0x4f0] sm:$0xff]  ;;  %v2285_v13 = vld [vmem:[#allocation16 + $0x5c8] sm:$0xff] }
 0x69a   : > { %v2088_v28 = vmul.f32 %v2084_v52, %v2008_v50  ;;  %v2252_v50 = vld [vmem:[#allocation16 + $0x4c0] sm:$0xff]  ;;  %v5745_v18 = vpack.c.bf16 %v2259_v10, %v2255_v14  ;;  %v2283_v59 = vld [vmem:[#allocation16 + $0x5b8] sm:$0xff]  ;;  %v2282_v7 = vld [vmem:[#allocation16 + $0x5b0] sm:$0xff] }
 0x69b   : > { %v2093_v22 = vadd.f32 1.0, %v2089_v17  ;;  %v2091_v41 = vmul.f32 %v2087_v25, %v2011_v35  ;;  %v2256_v52 = vld [vmem:[#allocation16 + $0x4e0] sm:$0xff]  ;;  %v5617_v17 = vpack.c.bf16 %v2257_v23, %v2253_v2  ;;  %v2289_v23 = vld [vmem:[#allocation16 + $0x5e8] sm:$0xff]  ;;  %v2287_v14 = vld [vmem:[#allocation16 + $0x5d8] sm:$0xff] }
 0x69c   : > { %v2092_v33 = vadd.f32 1.0, %v2088_v28  ;;  %v8106_v28 = vpop.eup %6874  ;;  %v2260_v25 = vld [vmem:[#allocation16 + $0x500] sm:$0xff]  ;;  %v2291_v10 = vld [vmem:[#allocation16 + $0x5f8] sm:$0xff] }
 0x69d   : > { %v2097_v37 = vmul.f32 %v2093_v22, %v1997_v24  ;;  %v2095_v56 = vadd.f32 1.0, %v2091_v41  ;;  %v5619_v24 = vpack.c.bf16 %v2256_v52, %v2252_v50  ;;  %v5747_v22 = vpack.c.bf16 %v2258_v19, %v2254_v57  ;;  %v2275_v41 = vld [vmem:[#allocation16 + $0x578] sm:$0xff]  ;;  %v2284_v50 = vld [vmem:[#allocation16 + $0x5c0] sm:$0xff]  ;;  %v2286_v57 = vld [vmem:[#allocation16 + $0x5d0] sm:$0xff] }
 0x69e   : > { %v2096_v8 = vmul.f32 %v2092_v33, %v1996_v46  ;;  %v2262_v46 = vld [vmem:[#allocation16 + $0x510] sm:$0xff]  ;;  %v2030_v35 = vmul.f32 1.0614054, %v8106_v28  ;;  %v5623_v42 = vpack.c.bf16 %v2264_v55, %v2260_v25  ;;  %v2288_v52 = vld [vmem:[#allocation16 + $0x5e0] sm:$0xff] }
 0x69f   : > { %2442 = vmatprep.mubr.f32.mxu0 %v2097_v37  ;;  %2584 = vmatprep.mubr.f32.mxu1 %v2097_v37  ;;  %v2099_v6 = vmul.f32 %v2095_v56, %v1999_v1  ;;  %v2266_v33 = vld [vmem:[#allocation16 + $0x530] sm:$0xff]  ;;  %v2273_v37 = vld [vmem:[#allocation16 + $0x568] sm:$0xff]  ;;  %v5635_v25 = vpack.c.bf16 %v2288_v52, %v2284_v50  ;;  %v2323_v50 = vld [vmem:[#allocation16 + $0x6f8] sm:$0xff] }
 0x6a0   : > { %2443 = vmatmul.mubr.f32.vlgmr.msra.gmra.mrb[4].mxu0 %v2096_v8  ;;  %2585 = vmatmul.mubr.f32.vlgmr.msra.gmra.mrb[4].mxu1 %v2096_v8  ;;  %v5751_v43 = vpack.c.bf16 %v2266_v33, %v2262_v46  ;;  %v2268_v8 = vld [vmem:[#allocation16 + $0x540] sm:$0xff]  ;;  %v2277_v1 = vld [vmem:[#allocation16 + $0x588] sm:$0xff]  ;;  %v2034_v56 = vadd.f32 -1.4531521, %v2030_v35  ;;  %v2290_v19 = vld [vmem:[#allocation16 + $0x5f0] sm:$0xff]  ;;  %v5637_v46 = vpack.c.bf16 %v2297_v20, %v2293_v54 }
 0x6a1   : > { %5608 = vmatpush1.bf16.msra.mxu0 %v5607_v34  ;;  %5736 = vmatpush1.bf16.msra.mxu1 %v5735_v49  ;;  %v2269_v34 = vld [vmem:[#allocation16 + $0x548] sm:$0xff]  ;;  %v2271_v49 = vld [vmem:[#allocation16 + $0x558] sm:$0xff]  ;;  %v5629_v31 = vpack.c.bf16 %v2281_v58, %v2277_v1  ;;  %v5763_v55 = vpack.c.bf16 %v2290_v19, %v2286_v57  ;;  %v2298_v35 = vld [vmem:[#allocation16 + $0x630] sm:$0xff] }
 0x6a2   : > { %5610 = vmatprep.subr.bf16.mxu0 %v5609_v44  ;;  %5738 = vmatprep.subr.bf16.mxu1 %v5737_v53  ;;  %v2272_v44 = vld [vmem:[#allocation16 + $0x560] sm:$0xff]  ;;  %v5625_v53 = vpack.c.bf16 %v2273_v37, %v2269_v34  ;;  %v5753_v47 = vpack.c.bf16 %v2275_v41, %v2271_v49  ;;  %v2038_v2 = vmul.f32 %v8106_v28, %v2034_v56  ;;  %v2294_v34 = vld [vmem:[#allocation16 + $0x610] sm:$0xff]  ;;  %v2301_v37 = vld [vmem:[#allocation16 + $0x648] sm:$0xff] }
 0x6a3   : > { %2513 = vmatprep.mubr.f32.mxu0 %v2099_v6  ;;  %2655 = vmatprep.mubr.f32.mxu1 %v2099_v6  ;;  %v5627_v6 = vpack.c.bf16 %v2272_v44, %v2268_v8  ;;  %v2305_v41 = vld [vmem:[#allocation16 + $0x668] sm:$0xff]  ;;  %v2302_v56 = vld [vmem:[#allocation16 + $0x650] sm:$0xff]  ;;  %v2320_v57 = vld [vmem:[#allocation16 + $0x6e0] sm:$0xff] }
 0x6a4   : > { %v2042_v16 = vadd.f32 1.4214138, %v2038_v2  ;;  %v2306_v58 = vld [vmem:[#allocation16 + $0x670] sm:$0xff] }
 0x6a5   : > { %5612 = vmatpush1.bf16.msra.mxu0 %v5611_v61  ;;  %5740 = vmatpush1.bf16.msra.mxu1 %v5739_v9  ;;  %v5755_v61 = vpack.c.bf16 %v2274_v51, %v2270_v48  ;;  %v2276_v9 = vld [vmem:[#allocation16 + $0x580] sm:$0xff]  ;;  %v5641_v51 = vpack.c.bf16 %v2305_v41, %v2301_v37  ;;  %v2310_v2 = vld [vmem:[#allocation16 + $0x690] sm:$0xff]  ;;  %v2333_v41 = vld [vmem:[#allocation16 + $0x748] sm:$0xff] }
 0x6a6   : > { %5614 = vmatprep.subr.bf16.mxu0 %v5613_v4  ;;  %5742 = vmatprep.subr.bf16.mxu1 %v5741_v11  ;;  %v5757_v4 = vpack.c.bf16 %v2283_v59, %v2279_v30  ;;  %v2278_v11 = vld [vmem:[#allocation16 + $0x590] sm:$0xff]  ;;  %v2046_v49 = vmul.f32 %v8106_v28, %v2042_v16  ;;  %v2304_v48 = vld [vmem:[#allocation16 + $0x660] sm:$0xff]  ;;  %v2309_v30 = vld [vmem:[#allocation16 + $0x688] sm:$0xff] }
 0x6a7   : > { %v2318_v16 = vld [vmem:[#allocation16 + $0x6d0] sm:$0xff] }
 0x6a8   : > { %v2050_v59 = vadd.f32 -0.28449672, %v2046_v49  ;;  %v2322_v20 = vld [vmem:[#allocation16 + $0x6f0] sm:$0xff] }
 0x6a9   : > { %5616 = vmatpush1.bf16.msra.mxu0 %v5615_v32  ;;  %5744 = vmatpush1.bf16.msra.mxu1 %v5743_v15  ;;  %v5631_v32 = vpack.c.bf16 %v2280_v63, %v2276_v9  ;;  %v5759_v15 = vpack.c.bf16 %v2282_v7, %v2278_v11  ;;  %v2315_v9 = vld [vmem:[#allocation16 + $0x6b8] sm:$0xff]  ;;  %v2312_v11 = vld [vmem:[#allocation16 + $0x6a0] sm:$0xff]  ;;  %v2326_v37 = vld [vmem:[#allocation16 + $0x710] sm:$0xff] }
 0x6aa   : > { %5618 = vmatprep.subr.bf16.mxu0 %v5617_v17  ;;  %5746 = vmatprep.subr.bf16.mxu1 %v5745_v18  ;;  %v5633_v17 = vpack.c.bf16 %v2289_v23, %v2285_v13  ;;  %v5761_v18 = vpack.c.bf16 %v2291_v10, %v2287_v14  ;;  %v2314_v23 = vld [vmem:[#allocation16 + $0x6b0] sm:$0xff]  ;;  %v2317_v14 = vld [vmem:[#allocation16 + $0x6c8] sm:$0xff]  ;;  %v2054_v10 = vmul.f32 %v8106_v28, %v2050_v59 }
 0x6ab   : > { %v2330_v49 = vld [vmem:[#allocation16 + $0x730] sm:$0xff] }
 0x6ac   : > { %v2338_v59 = vld [vmem:[#allocation16 + $0x770] sm:$0xff] }
 0x6ad   : > { %5620 = vmatpush1.bf16.msra.mxu0 %v5619_v24  ;;  %5748 = vmatpush1.bf16.msra.mxu1 %v5747_v22  ;;  %v2299_v24 = vld [vmem:[#allocation16 + $0x638] sm:$0xff]  ;;  %v2066_v22 = vsub.f32 0.0, %v8092_v60 }
 0x6ae   : > { %5622 = vmatprep.subr.bf16.mxu0 %v5621_v26  ;;  %5750 = vmatprep.subr.bf16.mxu1 %v5749_v27  ;;  %v2292_v26 = vld [vmem:[#allocation16 + $0x600] sm:$0xff]  ;;  %v5765_v33 = vpack.c.bf16 %v2299_v24, %v2295_v21  ;;  %v2325_v21 = vld [vmem:[#allocation16 + $0x708] sm:$0xff]  ;;  %v2058_v24 = vadd.f32 0.2548296, %v2054_v10 }
 0x6af   : > { %v2296_v27 = vld [vmem:[#allocation16 + $0x620] sm:$0xff]  ;;  %v2070_v8 = vmul.f32 %v2066_v22, %v8092_v60  ;;  %v2329_v22 = vld [vmem:[#allocation16 + $0x728] sm:$0xff] }
 0x6b0   : > { %v5639_v44 = vpack.c.bf16 %v2296_v27, %v2292_v26  ;;  %v5779_v27 = vpack.c.bf16 %v2322_v20, %v2318_v16  ;;  %v2352_v16 = vld [vmem:[#allocation16 + $0x7e0] sm:$0xff]  ;;  %v2350_v20 = vld [vmem:[#allocation16 + $0x7d0] sm:$0xff] }
 0x6b1   : > { %5624 = vmatpush1.bf16.msra.mxu0 %v5623_v42  ;;  %5752 = vmatpush1.bf16.msra.mxu1 %v5751_v43  ;;  %v2303_v42 = vld [vmem:[#allocation16 + $0x658] sm:$0xff]  ;;  %v2076_v63 = vmul.f32 1.442695, %v2070_v8 }
 0x6b2   : > { %5626 = vmatprep.subr.bf16.mxu0 %v5625_v53  ;;  %5754 = vmatprep.subr.bf16.mxu1 %v5753_v47  ;;  %v2307_v43 = vld [vmem:[#allocation16 + $0x678] sm:$0xff]  ;;  %v5767_v53 = vpack.c.bf16 %v2298_v35, %v2294_v34  ;;  %v2300_v47 = vld [vmem:[#allocation16 + $0x640] sm:$0xff]  ;;  %v5653_v34 = vpack.c.bf16 %v2329_v22, %v2325_v21  ;;  %v2354_v21 = vld [vmem:[#allocation16 + $0x7f0] sm:$0xff] }
 0x6b3   : > { %v5769_v1 = vpack.c.bf16 %v2307_v43, %v2303_v42  ;;  %v5643_v60 = vpack.c.bf16 %v2304_v48, %v2300_v47  ;;  %6876 = vpow2.f32 %v2076_v63  ;;  %v2062_v42 = vmul.f32 %v8106_v28, %v2058_v24  ;;  %v2337_v43 = vld [vmem:[#allocation16 + $0x768] sm:$0xff]  ;;  %v2335_v8 = vld [vmem:[#allocation16 + $0x758] sm:$0xff] }
 0x6b4   : > { %v5783_v48 = vpack.c.bf16 %v2330_v49, %v2326_v37  ;;  %v2343_v28 = vld [vmem:[#allocation16 + $0x798] sm:$0xff]  ;;  %v5795_v22 = vpack.c.bf16 %v2354_v21, %v2350_v20  ;;  %v2764_v20 = vld [vmem:[#allocation17 + $0xa0] sm:$0xff]  ;;  %v2762_v21 = vld [vmem:[#allocation17 + $0x90] sm:$0xff] }
 0x6b5   : > { %5628 = vmatpush1.bf16.msra.mxu0 %v5627_v6  ;;  %5756 = vmatpush1.bf16.msra.mxu1 %v5755_v61  ;;  %v2313_v6 = vld [vmem:[#allocation16 + $0x6a8] sm:$0xff]  ;;  %v2311_v61 = vld [vmem:[#allocation16 + $0x698] sm:$0xff] }
 0x6b6   : > { %5630 = vmatprep.subr.bf16.mxu0 %v5629_v31  ;;  %5758 = vmatprep.subr.bf16.mxu1 %v5757_v4  ;;  %v5771_v31 = vpack.c.bf16 %v2306_v58, %v2302_v56  ;;  %v2308_v4 = vld [vmem:[#allocation16 + $0x680] sm:$0xff]  ;;  %v5645_v7 = vpack.c.bf16 %v2313_v6, %v2309_v30  ;;  %v5773_v13 = vpack.c.bf16 %v2315_v9, %v2311_v61  ;;  %v2334_v30 = vld [vmem:[#allocation16 + $0x750] sm:$0xff]  ;;  %v2341_v6 = vld [vmem:[#allocation16 + $0x788] sm:$0xff] }
 0x6b7   : > { %v5647_v52 = vpack.c.bf16 %v2312_v11, %v2308_v4  ;;  %v5657_v56 = vpack.c.bf16 %v2337_v43, %v2333_v41  ;;  %v2345_v9 = vld [vmem:[#allocation16 + $0x7a8] sm:$0xff]  ;;  %v2347_v63 = vld [vmem:[#allocation16 + $0x7b8] sm:$0xff]  ;;  %v2340_v4 = vld [vmem:[#allocation16 + $0x780] sm:$0xff] }
 0x6b8   : > { %v2344_v11 = vld [vmem:[#allocation16 + $0x7a0] sm:$0xff] }
 0x6b9   : > { %5632 = vmatpush1.bf16.msra.mxu0 %v5631_v32  ;;  %5760 = vmatpush1.bf16.msra.mxu1 %v5759_v15  ;;  %v2321_v32 = vld [vmem:[#allocation16 + $0x6e8] sm:$0xff]  ;;  %v2319_v15 = vld [vmem:[#allocation16 + $0x6d8] sm:$0xff] }
 0x6ba   : > { %5634 = vmatprep.subr.bf16.mxu0 %v5633_v17  ;;  %5762 = vmatprep.subr.bf16.mxu1 %v5761_v18  ;;  %v5775_v17 = vpack.c.bf16 %v2314_v23, %v2310_v2  ;;  %v2316_v18 = vld [vmem:[#allocation16 + $0x6c0] sm:$0xff]  ;;  %v5649_v19 = vpack.c.bf16 %v2321_v32, %v2317_v14  ;;  %v5777_v54 = vpack.c.bf16 %v2323_v50, %v2319_v15  ;;  %v2342_v2 = vld [vmem:[#allocation16 + $0x790] sm:$0xff]  ;;  %v2349_v14 = vld [vmem:[#allocation16 + $0x7c8] sm:$0xff] }
 0x6bb   : > { %v5651_v26 = vpack.c.bf16 %v2320_v57, %v2316_v18  ;;  %v2346_v23 = vld [vmem:[#allocation16 + $0x7b0] sm:$0xff]  ;;  %v2353_v32 = vld [vmem:[#allocation16 + $0x7e8] sm:$0xff]  ;;  %v2351_v15 = vld [vmem:[#allocation16 + $0x7d8] sm:$0xff]  ;;  %v2010_v57 = vsel %vm2006_vm7, 1.0, %v7378_v12 }
 0x6bc   : > { %v2355_v50 = vld [vmem:[#allocation16 + $0x7f8] sm:$0xff]  ;;  %v2348_v18 = vld [vmem:[#allocation16 + $0x7c0] sm:$0xff] }
 0x6bd   : > { %5636 = vmatpush1.bf16.msra.mxu0 %v5635_v25  ;;  %5764 = vmatpush1.bf16.msra.mxu1 %v5763_v55  ;;  %v2327_v25 = vld [vmem:[#allocation16 + $0x718] sm:$0xff]  ;;  %v5667_v45 = vpack.c.bf16 %v2352_v16, %v2348_v18 }
 0x6be   : > { %5638 = vmatprep.subr.bf16.mxu0 %v5637_v46  ;;  %5766 = vmatprep.subr.bf16.mxu1 %v5765_v33  ;;  %v2331_v55 = vld [vmem:[#allocation16 + $0x738] sm:$0xff]  ;;  %v2324_v46 = vld [vmem:[#allocation16 + $0x700] sm:$0xff] }
 0x6bf   : > { %v2328_v33 = vld [vmem:[#allocation16 + $0x720] sm:$0xff]  ;;  %v5781_v35 = vpack.c.bf16 %v2331_v55, %v2327_v25  ;;  %v1998_v55 = vmul.f32 0.5, %v8074_v3 }
 0x6c0   : > { %v5655_v47 = vpack.c.bf16 %v2328_v33, %v2324_v46 }
 0x6c1   : > { %5640 = vmatpush1.bf16.msra.mxu0 %v5639_v44  ;;  %5768 = vmatpush1.bf16.msra.mxu1 %v5767_v53  ;;  %v2339_v44 = vld [vmem:[#allocation16 + $0x778] sm:$0xff]  ;;  %v6877_v53 = vpop.eup %6876 }
 0x6c2   : > { %5642 = vmatprep.subr.bf16.mxu0 %v5641_v51  ;;  %5770 = vmatprep.subr.bf16.mxu1 %v5769_v1  ;;  %v2332_v51 = vld [vmem:[#allocation16 + $0x740] sm:$0xff]  ;;  %v5785_v58 = vpack.c.bf16 %v2339_v44, %v2335_v8  ;;  %v2082_v61 = vmul.f32 %v6877_v53, %v2062_v42 }
 0x6c3   : > { %v2336_v1 = vld [vmem:[#allocation16 + $0x760] sm:$0xff] }
 0x6c4   : > { %v2086_v10 = vsub.f32 1.0, %v2082_v61 }
 0x6c5   : > { %5644 = vmatpush1.bf16.msra.mxu0 %v5643_v60  ;;  %5772 = vmatpush1.bf16.msra.mxu1 %v5771_v31  ;;  %v5659_v60 = vpack.c.bf16 %v2336_v1, %v2332_v51  ;;  %v5787_v31 = vpack.c.bf16 %v2338_v59, %v2334_v30  ;;  %v2745_v51 = vld [vmem:[#allocation17 + $0x8] sm:$0xff]  ;;  %v2751_v30 = vld [vmem:[#allocation17 + $0x38] sm:$0xff]  ;;  %v2744_v59 = vld [vmem:[#allocation17] sm:$0xff] }
 0x6c6   : > { %5646 = vmatprep.subr.bf16.mxu0 %v5645_v7  ;;  %5774 = vmatprep.subr.bf16.mxu1 %v5773_v13  ;;  %v5661_v7 = vpack.c.bf16 %v2345_v9, %v2341_v6  ;;  %v5789_v13 = vpack.c.bf16 %v2347_v63, %v2343_v28  ;;  %v2090_v24 = vmul.f32 %v2086_v10, %v2010_v57  ;;  %v2749_v1 = vld [vmem:[#allocation17 + $0x28] sm:$0xff]  ;;  %v2748_v6 = vld [vmem:[#allocation17 + $0x20] sm:$0xff]  ;;  %v2746_v28 = vld [vmem:[#allocation17 + $0x10] sm:$0xff] }
 0x6c7   : > { %v5799_v9 = vpack.c.bf16 %v2748_v6, %v2744_v59  ;;  %v2750_v63 = vld [vmem:[#allocation17 + $0x30] sm:$0xff]  ;;  %v2763_v57 = vld [vmem:[#allocation17 + $0x98] sm:$0xff] }
 0x6c8   : > { %v2094_v25 = vadd.f32 1.0, %v2090_v24  ;;  %v2754_v10 = vld [vmem:[#allocation17 + $0x50] sm:$0xff] }
 0x6c9   : > { %5648 = vmatpush1.bf16.msra.mxu0 %v5647_v52  ;;  %5776 = vmatpush1.bf16.msra.mxu1 %v5775_v17  ;;  %v5663_v52 = vpack.c.bf16 %v2344_v11, %v2340_v4  ;;  %v5791_v17 = vpack.c.bf16 %v2346_v23, %v2342_v2  ;;  %v2757_v4 = vld [vmem:[#allocation17 + $0x68] sm:$0xff]  ;;  %v2755_v11 = vld [vmem:[#allocation17 + $0x58] sm:$0xff]  ;;  %v2752_v23 = vld [vmem:[#allocation17 + $0x40] sm:$0xff] }
 0x6ca   : > { %5650 = vmatprep.subr.bf16.mxu0 %v5649_v19  ;;  %5778 = vmatprep.subr.bf16.mxu1 %v5777_v54  ;;  %v5665_v19 = vpack.c.bf16 %v2353_v32, %v2349_v14  ;;  %v5793_v54 = vpack.c.bf16 %v2355_v50, %v2351_v15  ;;  %v2756_v14 = vld [vmem:[#allocation17 + $0x60] sm:$0xff]  ;;  %v2758_v15 = vld [vmem:[#allocation17 + $0x70] sm:$0xff]  ;;  %v2761_v50 = vld [vmem:[#allocation17 + $0x88] sm:$0xff] }
 0x6cb   : > { %v5803_v32 = vpack.c.bf16 %v2756_v14, %v2752_v23  ;;  %v2766_v24 = vld [vmem:[#allocation17 + $0xb0] sm:$0xff]  ;;  %v2793_v14 = vld [vmem:[#allocation17 + $0x188] sm:$0xff] }
 0x6cc   : > { %v2782_v6 = vld [vmem:[#allocation17 + $0x130] sm:$0xff] }
 0x6cd   : > { %5652 = vmatpush1.bf16.msra.mxu0 %v5651_v26  ;;  %5780 = vmatpush1.bf16.msra.mxu1 %v5779_v27  ;;  %v2098_v26 = vmul.f32 %v2094_v25, %v1998_v55  ;;  %v2356_v27 = vld [vmem:[%s8423_s10] sm:$0xf]  ;;  %v2773_v25 = vld [vmem:[#allocation17 + $0xe8] sm:$0xff]  ;;  %v2790_v23 = vld [vmem:[#allocation17 + $0x170] sm:$0xff] }
 0x6ce   : > { %5654 = vmatprep.subr.bf16.mxu0 %v5653_v34  ;;  %5782 = vmatprep.subr.bf16.mxu1 %v5781_v35  ;;  %v2361_v46 = vrot.slane %v2356_v27, %v7925_v36  ;;  %v2365_v33 = vrot.slane %v2356_v27, %v7929_v39  ;;  %v2369_v35 = vrot.slane %v2356_v27, %v7927_v38  ;;  %v2771_v55 = vld [vmem:[#allocation17 + $0xd8] sm:$0xff] }
 0x6cf   : > { %v2373_v43 = vrot.slane %v2356_v27, %v7931_v40 }
 0x6d1   : > { %5656 = vmatpush1.bf16.msra.mxu0 %v5655_v47  ;;  %5784 = vmatpush1.bf16.msra.mxu1 %v5783_v48 }
 0x6d2   : > { %5658 = vmatprep.subr.bf16.mxu0 %v5657_v56  ;;  %5786 = vmatprep.subr.bf16.mxu1 %v5785_v58  ;;  %v2747_v56 = vld [vmem:[#allocation17 + $0x18] sm:$0xff]  ;;  %v5797_v58 = vpack.c.bf16 %v2749_v1, %v2745_v51 }
 0x6d3   : > { %v5925_v61 = vpack.c.bf16 %v2751_v30, %v2747_v56  ;;  %v2776_v56 = vld [vmem:[#allocation17 + $0x100] sm:$0xff]  ;;  %v2778_v30 = vld [vmem:[#allocation17 + $0x110] sm:$0xff] }
 0x6d5   : > { %5660 = vmatpush1.bf16.msra.mxu0 %v5659_v60  ;;  %5788 = vmatpush1.bf16.msra.mxu1 %v5787_v31  ;;  %v2753_v60 = vld [vmem:[#allocation17 + $0x48] sm:$0xff]  ;;  %v5927_v31 = vpack.c.bf16 %v2750_v63, %v2746_v28  ;;  %v2787_v28 = vld [vmem:[#allocation17 + $0x158] sm:$0xff] }
 0x6d6   : > { %5662 = vmatprep.subr.bf16.mxu0 %v5661_v7  ;;  %5790 = vmatprep.subr.bf16.mxu1 %v5789_v13  ;;  %v2759_v7 = vld [vmem:[#allocation17 + $0x78] sm:$0xff]  ;;  %v5801_v13 = vpack.c.bf16 %v2757_v4, %v2753_v60 }
 0x6d7   : > { %v5929_v2 = vpack.c.bf16 %v2759_v7, %v2755_v11  ;;  %v2791_v63 = vld [vmem:[#allocation17 + $0x178] sm:$0xff]  ;;  %v2784_v11 = vld [vmem:[#allocation17 + $0x140] sm:$0xff] }
 0x6d8   : > { %v2788_v7 = vld [vmem:[#allocation17 + $0x160] sm:$0xff] }
 0x6d9   : > { %5664 = vmatpush1.bf16.msra.mxu0 %v5663_v52  ;;  %5792 = vmatpush1.bf16.msra.mxu1 %v5791_v17  ;;  %v2765_v52 = vld [vmem:[#allocation17 + $0xa8] sm:$0xff]  ;;  %v5931_v17 = vpack.c.bf16 %v2758_v15, %v2754_v10  ;;  %v2799_v15 = vld [vmem:[#allocation17 + $0x1b8] sm:$0xff] }
 0x6da   : > { %5666 = vmatprep.subr.bf16.mxu0 %v5665_v19  ;;  %5794 = vmatprep.subr.bf16.mxu1 %v5793_v54  ;;  %v5805_v18 = vpack.c.bf16 %v2765_v52, %v2761_v50  ;;  %v2767_v19 = vld [vmem:[#allocation17 + $0xb8] sm:$0xff]  ;;  %v2760_v54 = vld [vmem:[#allocation17 + $0x80] sm:$0xff]  ;;  %v2797_v10 = vld [vmem:[#allocation17 + $0x1a8] sm:$0xff]  ;;  %v5819_v50 = vpack.c.bf16 %v2788_v7, %v2784_v11 }
 0x6db   : > { %v5933_v16 = vpack.c.bf16 %v2767_v19, %v2763_v57  ;;  %v2796_v57 = vld [vmem:[#allocation17 + $0x1a0] sm:$0xff]  ;;  %v2794_v19 = vld [vmem:[#allocation17 + $0x190] sm:$0xff] }
 0x6dc   : > { %v2822_v7 = vld [vmem:[#allocation17 + $0x270] sm:$0xff] }
 0x6dd   : > { %5668 = vmatpush1.bf16.msra.mxu0 %v5667_v45  ;;  %5796 = vmatpush1.bf16.msra.mxu1 %v5795_v22  ;;  %v5807_v45 = vpack.c.bf16 %v2764_v20, %v2760_v54  ;;  %v2769_v22 = vld [vmem:[#allocation17 + $0xc8] sm:$0xff] }
 0x6de   : > { %5798 = vmatprep.subr.bf16.mxu0 %v5797_v58  ;;  %5926 = vmatprep.subr.bf16.mxu1 %v5925_v61  ;;  %v5809_v27 = vpack.c.bf16 %v2773_v25, %v2769_v22  ;;  %v2780_v58 = vld [vmem:[#allocation17 + $0x120] sm:$0xff]  ;;  %v2785_v61 = vld [vmem:[#allocation17 + $0x148] sm:$0xff] }
 0x6df   : > { %v5815_v60 = vpack.c.bf16 %v2780_v58, %v2776_v56  ;;  %v2801_v20 = vld [vmem:[#allocation17 + $0x1c8] sm:$0xff]  ;;  %v2814_v58 = vld [vmem:[#allocation17 + $0x230] sm:$0xff] }
 0x6e0   : > { %2514 = vmatmul.mubr.f32.vlgmr.msra.gmra.mrb[4].mxu0 %v2098_v26  ;;  %2656 = vmatmul.mubr.f32.vlgmr.msra.gmra.mrb[4].mxu1 %v2098_v26  ;;  %v5935_v26 = vpack.c.bf16 %v2766_v24, %v2762_v21  ;;  %v2805_v21 = vld [vmem:[#allocation17 + $0x1e8] sm:$0xff]  ;;  %v2803_v24 = vld [vmem:[#allocation17 + $0x1d8] sm:$0xff] }
 0x6e1   : > { %5800 = vmatpush1.bf16.msra.mxu0 %v5799_v9  ;;  %5928 = vmatpush1.bf16.msra.mxu1 %v5927_v31  ;;  %v2789_v9 = vld [vmem:[#allocation17 + $0x168] sm:$0xff]  ;;  %v5943_v31 = vpack.c.bf16 %v2782_v6, %v2778_v30  ;;  %v2819_v6 = vld [vmem:[#allocation17 + $0x258] sm:$0xff] }
 0x6e2   : > { %5802 = vmatprep.subr.bf16.mxu0 %v5801_v13  ;;  %5930 = vmatprep.subr.bf16.mxu1 %v5929_v2  ;;  %v5817_v4 = vpack.c.bf16 %v2789_v9, %v2785_v61  ;;  %v2786_v13 = vld [vmem:[#allocation17 + $0x150] sm:$0xff]  ;;  %v5945_v2 = vpack.c.bf16 %v2791_v63, %v2787_v28  ;;  %v2817_v30 = vld [vmem:[#allocation17 + $0x248] sm:$0xff]  ;;  %v2823_v61 = vld [vmem:[#allocation17 + $0x278] sm:$0xff] }
 0x6e3   : > { %v5947_v52 = vpack.c.bf16 %v2790_v23, %v2786_v13  ;;  %v5961_v11 = vpack.c.bf16 %v2823_v61, %v2819_v6  ;;  %v2825_v13 = vld [vmem:[#allocation17 + $0x288] sm:$0xff]  ;;  %v2827_v23 = vld [vmem:[#allocation17 + $0x298] sm:$0xff]  ;;  %v2840_v6 = vld [vmem:[#allocation17 + $0x300] sm:$0xff] }
 0x6e4   : > { %v2844_v61 = vld [vmem:[#allocation17 + $0x320] sm:$0xff] }
 0x6e5   : > { %5804 = vmatpush1.bf16.msra.mxu0 %v5803_v32  ;;  %5932 = vmatpush1.bf16.msra.mxu1 %v5931_v17  ;;  %v2795_v32 = vld [vmem:[#allocation17 + $0x198] sm:$0xff]  ;;  %v5821_v17 = vpack.c.bf16 %v2797_v10, %v2793_v14 }
 0x6e6   : > { %5806 = vmatprep.subr.bf16.mxu0 %v5805_v18  ;;  %5934 = vmatprep.subr.bf16.mxu1 %v5933_v16  ;;  %v2792_v18 = vld [vmem:[#allocation17 + $0x180] sm:$0xff]  ;;  %v5949_v54 = vpack.c.bf16 %v2799_v15, %v2795_v32  ;;  %v2798_v16 = vld [vmem:[#allocation17 + $0x1b0] sm:$0xff]  ;;  %v2831_v14 = vld [vmem:[#allocation17 + $0x2b8] sm:$0xff] }
 0x6e7   : > { %v5823_v22 = vpack.c.bf16 %v2796_v57, %v2792_v18  ;;  %v5951_v25 = vpack.c.bf16 %v2798_v16, %v2794_v19 }
 0x6e9   : > { %5808 = vmatpush1.bf16.msra.mxu0 %v5807_v45  ;;  %5936 = vmatpush1.bf16.msra.mxu1 %v5935_v26  ;;  %v2807_v45 = vld [vmem:[#allocation17 + $0x1f8] sm:$0xff]  ;;  %v2800_v26 = vld [vmem:[#allocation17 + $0x1c0] sm:$0xff] }
 0x6ea   : > { %5810 = vmatprep.subr.bf16.mxu0 %v5809_v27  ;;  %v2804_v27 = vld [vmem:[#allocation17 + $0x1e0] sm:$0xff] }
 0x7b3   : > { %v2515_v34 = vpop.f32.mrb[4].mxu0  ;;  %v2657_v37 = vpop.f32.mrb[4].mxu1 }
 0x7b4   : > { %v8124_v49 = vadd.f32 %v2515_v34, %v2361_v46  ;;  %v2517_v3 = vpop.f32.mrb[5].mxu0  ;;  %v2659_v41 = vpop.f32.mrb[5].mxu1  ;;  %v8129_v8 = vadd.f32 %v2657_v37, %v2369_v35  ;;  %v2775_v46 = vld [vmem:[#allocation17 + $0xf8] sm:$0xff]  ;;  %v2772_v34 = vld [vmem:[#allocation17 + $0xe0] sm:$0xff]  ;;  %v2770_v37 = vld [vmem:[#allocation17 + $0xd0] sm:$0xff] }
 0x7b5   : > { %v8126_v42 = vadd.f32 %v2517_v3, %v2365_v33  ;;  %v8133_v53 = vadd.f32 %v2659_v41, %v2373_v43  ;;  %v2768_v33 = vld [vmem:[#allocation17 + $0xc0] sm:$0xff]  ;;  %v5937_v35 = vpack.c.bf16 %v2775_v46, %v2771_v55  ;;  %v2774_v3 = vld [vmem:[#allocation17 + $0xf0] sm:$0xff]  ;;  %v2777_v41 = vld [vmem:[#allocation17 + $0x108] sm:$0xff]  ;;  %v5825_v55 = vpack.c.bf16 %v2805_v21, %v2801_v20 }
 0x7b6   : > { %v2781_v43 = vld [vmem:[#allocation17 + $0x128] sm:$0xff]  ;;  %v5939_v51 = vpack.c.bf16 %v2774_v3, %v2770_v37  ;;  %v2802_v46 = vld [vmem:[#allocation17 + $0x1d0] sm:$0xff]  ;;  %v2811_v3 = vld [vmem:[#allocation17 + $0x218] sm:$0xff] }
 0x7b7   : > { %v2664_v44 = vadd.f32 %v8126_v42, %v8124_v49  ;;  %v5813_v1 = vpack.c.bf16 %v2781_v43, %v2777_v41  ;;  %5938 = vmatprep.subr.bf16.mxu1 %v5937_v35  ;;  %v2809_v35 = vld [vmem:[#allocation17 + $0x208] sm:$0xff]  ;;  %v2815_v41 = vld [vmem:[#allocation17 + $0x238] sm:$0xff]  ;;  %v5827_v43 = vpack.c.bf16 %v2804_v27, %v2800_v26 }
 0x7b8   : > { %5940 = vmatpush1.bf16.msra.mxu1 %v5939_v51  ;;  %v2813_v37 = vld [vmem:[#allocation17 + $0x228] sm:$0xff]  ;;  %v2812_v51 = vld [vmem:[#allocation17 + $0x220] sm:$0xff]  ;;  %v5957_v56 = vpack.c.bf16 %v2815_v41, %v2811_v3 }
 0x7b9   : > { %v2665_v47 = vadd.f32 %v8129_v8, %v2664_v44  ;;  %v2779_v44 = vld [vmem:[#allocation17 + $0x118] sm:$0xff]  ;;  %v2833_v27 = vld [vmem:[#allocation17 + $0x2c8] sm:$0xff]  ;;  %v2836_v3 = vld [vmem:[#allocation17 + $0x2e0] sm:$0xff] }
 0x7bb   : > { %v2666_v48 = vadd.f32 %v8133_v53, %v2665_v47  ;;  %v2783_v47 = vld [vmem:[#allocation17 + $0x138] sm:$0xff] }
 0x7bc   : > { %v5941_v59 = vpack.c.bf16 %v2783_v47, %v2779_v44  ;;  %v5829_v47 = vpack.c.bf16 %v2813_v37, %v2809_v35  ;;  %v2839_v35 = vld [vmem:[#allocation17 + $0x2f8] sm:$0xff]  ;;  %v2832_v37 = vld [vmem:[#allocation17 + $0x2c0] sm:$0xff] }
 0x7bd   : > { %2667 = vadd.xlane.f32.xlu0 %v2666_v48  ;;  %v5811_v48 = vpack.c.bf16 %v2772_v34, %v2768_v33  ;;  %v5953_v33 = vpack.c.bf16 %v2807_v45, %v2803_v24  ;;  %v2806_v34 = vld [vmem:[#allocation17 + $0x1f0] sm:$0xff] }
 0x7be   : > { %5942 = vmatprep.subr.bf16.mxu1 %v5941_v59  ;;  %v5955_v44 = vpack.c.bf16 %v2806_v34, %v2802_v46  ;;  %v2821_v59 = vld [vmem:[#allocation17 + $0x268] sm:$0xff] }
 0x7bf   : > { %5812 = vmatpush1.bf16.msra.mxu0 %v5811_v48  ;;  %5944 = vmatpush1.bf16.msra.mxu1 %v5943_v31  ;;  %v2808_v48 = vld [vmem:[#allocation17 + $0x200] sm:$0xff]  ;;  %v5833_v63 = vpack.c.bf16 %v2821_v59, %v2817_v30  ;;  %v2837_v46 = vld [vmem:[#allocation17 + $0x2e8] sm:$0xff] }
 0x7c0   : > { %5814 = vmatprep.subr.bf16.mxu0 %v5813_v1  ;;  %5946 = vmatprep.subr.bf16.mxu1 %v5945_v2  ;;  %v2810_v1 = vld [vmem:[#allocation17 + $0x210] sm:$0xff]  ;;  %v5831_v9 = vpack.c.bf16 %v2812_v51, %v2808_v48  ;;  %v2820_v31 = vld [vmem:[#allocation17 + $0x260] sm:$0xff]  ;;  %v2829_v2 = vld [vmem:[#allocation17 + $0x2a8] sm:$0xff]  ;;  %v5841_v34 = vpack.c.bf16 %v2837_v46, %v2833_v27 }
 0x7c1   : > { %v5959_v28 = vpack.c.bf16 %v2814_v58, %v2810_v1  ;;  %v5837_v15 = vpack.c.bf16 %v2829_v2, %v2825_v13  ;;  %v2841_v48 = vld [vmem:[#allocation17 + $0x308] sm:$0xff]  ;;  %v2847_v58 = vld [vmem:[#allocation17 + $0x338] sm:$0xff]  ;;  %v2848_v2 = vld [vmem:[#allocation17 + $0x340] sm:$0xff] }
 0x7c2   : > { %v2845_v1 = vld [vmem:[#allocation17 + $0x328] sm:$0xff]  ;;  %v2855_v13 = vld [vmem:[#allocation17 + $0x378] sm:$0xff] }
 0x7c3   : > { %5816 = vmatpush1.bf16.msra.mxu0 %v5815_v60  ;;  %5948 = vmatpush1.bf16.msra.mxu1 %v5947_v52  ;;  %v2816_v60 = vld [vmem:[#allocation17 + $0x240] sm:$0xff]  ;;  %v5845_v30 = vpack.c.bf16 %v2845_v1, %v2841_v48  ;;  %v2875_v48 = vld [vmem:[#allocation17 + $0x418] sm:$0xff] }
 0x7c4   : > { %5818 = vmatprep.subr.bf16.mxu0 %v5817_v4  ;;  %5950 = vmatprep.subr.bf16.mxu1 %v5949_v54  ;;  %v2818_v4 = vld [vmem:[#allocation17 + $0x250] sm:$0xff]  ;;  %v5835_v10 = vpack.c.bf16 %v2820_v31, %v2816_v60  ;;  %v2849_v60 = vld [vmem:[#allocation17 + $0x348] sm:$0xff]  ;;  %v2879_v1 = vld [vmem:[#allocation17 + $0x438] sm:$0xff] }
 0x7c5   : > { %v5963_v32 = vpack.c.bf16 %v2822_v7, %v2818_v4  ;;  %v2853_v31 = vld [vmem:[#allocation17 + $0x368] sm:$0xff]  ;;  %v2851_v7 = vld [vmem:[#allocation17 + $0x358] sm:$0xff] }
 0x7c7   : > { %5820 = vmatpush1.bf16.msra.mxu0 %v5819_v50  ;;  %5952 = vmatpush1.bf16.msra.mxu1 %v5951_v25  ;;  %v5965_v50 = vpack.c.bf16 %v2831_v14, %v2827_v23  ;;  %v5977_v23 = vpack.c.bf16 %v2855_v13, %v2851_v7  ;;  %v2852_v14 = vld [vmem:[#allocation17 + $0x360] sm:$0xff] }
 0x7c8   : > { %5822 = vmatprep.subr.bf16.mxu0 %v5821_v17  ;;  %5954 = vmatprep.subr.bf16.mxu1 %v5953_v33  ;;  %v2835_v33 = vld [vmem:[#allocation17 + $0x2d8] sm:$0xff] }
 0x7c9   : > { %v5969_v41 = vpack.c.bf16 %v2839_v35, %v2835_v33  ;;  %v2864_v33 = vld [vmem:[#allocation17 + $0x3c0] sm:$0xff] }
 0x7cb   : > { %5824 = vmatpush1.bf16.msra.mxu0 %v5823_v22  ;;  %5956 = vmatpush1.bf16.msra.mxu1 %v5955_v44  ;;  %v2828_v22 = vld [vmem:[#allocation17 + $0x2a0] sm:$0xff]  ;;  %v2834_v44 = vld [vmem:[#allocation17 + $0x2d0] sm:$0xff] }
 0x7cc   : > { %5826 = vmatprep.subr.bf16.mxu0 %v5825_v55  ;;  %5958 = vmatprep.subr.bf16.mxu1 %v5957_v56  ;;  %v2830_v55 = vld [vmem:[#allocation17 + $0x2b0] sm:$0xff]  ;;  %v2843_v56 = vld [vmem:[#allocation17 + $0x318] sm:$0xff] }
 0x7cd   : > { %v5973_v59 = vpack.c.bf16 %v2847_v58, %v2843_v56  ;;  %v5989_v56 = vpack.c.bf16 %v2879_v1, %v2875_v48  ;;  %v2890_v1 = vld [vmem:[#allocation17 + $0x490] sm:$0xff] }
 0x7cf   : > { %5828 = vmatpush1.bf16.msra.mxu0 %v5827_v43  ;;  %5960 = vmatpush1.bf16.msra.mxu1 %v5959_v28  ;;  %v5843_v43 = vpack.c.bf16 %v2836_v3, %v2832_v37  ;;  %v5847_v28 = vpack.c.bf16 %v2844_v61, %v2840_v6  ;;  %v2866_v37 = vld [vmem:[#allocation17 + $0x3d0] sm:$0xff]  ;;  %v2662_v6 = vld [vmem:[%s8424_s11] sm:$0xf] }
 0x7d0   : > { %5830 = vmatprep.subr.bf16.mxu0 %v5829_v47  ;;  %5962 = vmatprep.subr.bf16.mxu1 %v5961_v11  ;;  %v2838_v47 = vld [vmem:[#allocation17 + $0x2f0] sm:$0xff]  ;;  %v5849_v11 = vpack.c.bf16 %v2853_v31, %v2849_v60  ;;  %v2663_v61 = vld [vmem:[%s8518_s22] sm:$0xf]  ;;  %v2702_v60 = vrot.slane %v2662_v6, %v7927_v38  ;;  %s8522_s22 = sld [smem:[#allocation47_spill]] }
 0x7d1   : > { %v5971_v51 = vpack.c.bf16 %v2838_v47, %v2834_v44  ;;  %v2870_v3 = vld [vmem:[#allocation17 + $0x3f0] sm:$0xff]  ;;  %v2873_v44 = vld [vmem:[#allocation17 + $0x408] sm:$0xff]  ;;  %v2727_v7 = vrot.slane %v2663_v61, %v7927_v38 }
 0x7d2   : > { %v2877_v47 = vld [vmem:[#allocation17 + $0x428] sm:$0xff] }
 0x7d3   : > { %5832 = vmatpush1.bf16.msra.mxu0 %v5831_v9  ;;  %5964 = vmatpush1.bf16.msra.mxu1 %v5963_v32  ;;  %v2842_v9 = vld [vmem:[#allocation17 + $0x310] sm:$0xff] }
 0x7d4   : > { %5834 = vmatprep.subr.bf16.mxu0 %v5833_v63  ;;  %5966 = vmatprep.subr.bf16.mxu1 %v5965_v50  ;;  %v2846_v63 = vld [vmem:[#allocation17 + $0x330] sm:$0xff]  ;;  %v2861_v50 = vld [vmem:[#allocation17 + $0x3a8] sm:$0xff] }
 0x7d5   : > { %v5975_v4 = vpack.c.bf16 %v2846_v63, %v2842_v9  ;;  %v2854_v32 = vld [vmem:[#allocation17 + $0x370] sm:$0xff]  ;;  %v2698_v9 = vrot.slane %v2662_v6, %v7929_v39  ;;  %v2706_v63 = vrot.slane %v2662_v6, %v7931_v40 }
 0x7d7   : > { %5836 = vmatpush1.bf16.msra.mxu0 %v5835_v10  ;;  %v2850_v10 = vld [vmem:[#allocation17 + $0x350] sm:$0xff] }
 0x7d8   : > { %5838 = vmatprep.subr.bf16.mxu0 %v5837_v15  ;;  %v2857_v15 = vld [vmem:[#allocation17 + $0x388] sm:$0xff] }
 0x84a   : > { %v2668_v52 = vpop.xlane.xlu0 %2667 }
 0x84b   : > { %v2669_v17 = vmul.f32 0.001953125, %v2668_v52  ;;  %v2859_v52 = vld [vmem:[#allocation17 + $0x398] sm:$0xff] }
 0x84d   : > { %v8138_v18 = vsub.f32 %v8124_v49, %v2669_v17  ;;  %v8141_v57 = vsub.f32 %v8126_v42, %v2669_v17  ;;  %v8144_v19 = vsub.f32 %v8129_v8, %v2669_v17  ;;  %v8147_v54 = vsub.f32 %v8133_v53, %v2669_v17  ;;  %v2824_v8 = vld [vmem:[#allocation17 + $0x280] sm:$0xff]  ;;  %v2826_v53 = vld [vmem:[#allocation17 + $0x290] sm:$0xff] }
 0x84e   : > { %v5839_v25 = vpack.c.bf16 %v2828_v22, %v2824_v8  ;;  %v5967_v26 = vpack.c.bf16 %v2830_v55, %v2826_v53  ;;  %v5851_v17 = vpack.c.bf16 %v2852_v14, %v2848_v2  ;;  %v2862_v8 = vld [vmem:[#allocation17 + $0x3b0] sm:$0xff]  ;;  %v2865_v22 = vld [vmem:[#allocation17 + $0x3c8] sm:$0xff]  ;;  %v2871_v55 = vld [vmem:[#allocation17 + $0x3f8] sm:$0xff] }
 0x84f   : > { %v2674_v16 = vmul.f32 %v8138_v18, %v8138_v18  ;;  %v2675_v20 = vmul.f32 %v8141_v57, %v8141_v57  ;;  %v2676_v21 = vmul.f32 %v8144_v19, %v8144_v19  ;;  %v2677_v42 = vmul.f32 %v8147_v54, %v8147_v54  ;;  %v2869_v53 = vld [vmem:[#allocation17 + $0x3e8] sm:$0xff] }
 0x850   : > { %5840 = vmatpush1.bf16.msra.mxu0 %v5839_v25  ;;  %5968 = vmatpush1.bf16.msra.mxu1 %v5967_v26  ;;  %v2867_v25 = vld [vmem:[#allocation17 + $0x3d8] sm:$0xff]  ;;  %v5857_v46 = vpack.c.bf16 %v2869_v53, %v2865_v22 }
 0x851   : > { %v2678_v49 = vadd.f32 %v2675_v20, %v2674_v16  ;;  %5842 = vmatprep.subr.bf16.mxu0 %v5841_v34  ;;  %5970 = vmatprep.subr.bf16.mxu1 %v5969_v41  ;;  %v2863_v16 = vld [vmem:[#allocation17 + $0x3b8] sm:$0xff]  ;;  %v5979_v20 = vpack.c.bf16 %v2854_v32, %v2850_v10  ;;  %v2868_v34 = vld [vmem:[#allocation17 + $0x3e0] sm:$0xff]  ;;  %v5985_v35 = vpack.c.bf16 %v2871_v55, %v2867_v25 }
 0x852   : > { %v5859_v41 = vpack.c.bf16 %v2868_v34, %v2864_v33  ;;  %v2731_v10 = vrot.slane %v2663_v61, %v7931_v40  ;;  %v2880_v55 = vld [vmem:[#allocation17 + $0x440] sm:$0xff]  ;;  %v2889_v33 = vld [vmem:[#allocation17 + $0x488] sm:$0xff] }
 0x853   : > { %v2679_v24 = vadd.f32 %v2678_v49, %v2676_v21  ;;  %v5853_v21 = vpack.c.bf16 %v2861_v50, %v2857_v15  ;;  %v2856_v49 = vld [vmem:[#allocation17 + $0x380] sm:$0xff] }
 0x854   : > { %5844 = vmatpush1.bf16.msra.mxu0 %v5843_v43  ;;  %5972 = vmatpush1.bf16.msra.mxu1 %v5971_v51  ;;  %v5987_v43 = vpack.c.bf16 %v2870_v3, %v2866_v37  ;;  %v5861_v51 = vpack.c.bf16 %v2877_v47, %v2873_v44  ;;  %v2872_v50 = vld [vmem:[#allocation17 + $0x400] sm:$0xff]  ;;  %v2893_v37 = vld [vmem:[#allocation17 + $0x4a8] sm:$0xff]  ;;  %v2891_v3 = vld [vmem:[#allocation17 + $0x498] sm:$0xff] }
 0x855   : > { %v2680_v45 = vadd.f32 %v2679_v24, %v2677_v42  ;;  %5846 = vmatprep.subr.bf16.mxu0 %v5845_v30  ;;  %5974 = vmatprep.subr.bf16.mxu1 %v5973_v59  ;;  %v2860_v42 = vld [vmem:[#allocation17 + $0x3a0] sm:$0xff]  ;;  %v2858_v24 = vld [vmem:[#allocation17 + $0x390] sm:$0xff]  ;;  %v5869_v48 = vpack.c.bf16 %v2893_v37, %v2889_v33 }
 0x856   : > { %v5855_v26 = vpack.c.bf16 %v2860_v42, %v2856_v49  ;;  %v5983_v27 = vpack.c.bf16 %v2862_v8, %v2858_v24  ;;  %v2881_v24 = vld [vmem:[#allocation17 + $0x448] sm:$0xff]  ;;  %v2887_v8 = vld [vmem:[#allocation17 + $0x478] sm:$0xff]  ;;  %v2888_v44 = vld [vmem:[#allocation17 + $0x480] sm:$0xff] }
 0x857   : > { %2681 = vadd.xlane.f32.xlu1 %v2680_v45  ;;  %v5981_v45 = vpack.c.bf16 %v2863_v16, %v2859_v52  ;;  %v2876_v16 = vld [vmem:[#allocation17 + $0x420] sm:$0xff] }
 0x858   : > { %5848 = vmatpush1.bf16.msra.mxu0 %v5847_v28  ;;  %5976 = vmatpush1.bf16.msra.mxu1 %v5975_v4  ;;  %v2694_v28 = vrot.slane %v2662_v6, %v7925_v36  ;;  %v2723_v4 = vrot.slane %v2663_v61, %v7929_v39  ;;  %v5863_v53 = vpack.c.bf16 %v2876_v16, %v2872_v50  ;;  %v2892_v47 = vld [vmem:[#allocation17 + $0x4a0] sm:$0xff]  ;;  %v2913_v16 = vld [vmem:[#allocation17 + $0x548] sm:$0xff] }
 0x859   : > { %5850 = vmatprep.subr.bf16.mxu0 %v5849_v11  ;;  %5978 = vmatprep.subr.bf16.mxu1 %v5977_v23  ;;  %v2719_v11 = vrot.slane %v2663_v61, %v7925_v36  ;;  %v5871_v6 = vpack.c.bf16 %v2892_v47, %v2888_v44  ;;  %v2924_v37 = vld [vmem:[#allocation17 + $0x5a0] sm:$0xff]  ;;  %v2929_v44 = vld [vmem:[#allocation17 + $0x5c8] sm:$0xff] }
 0x85a   : > { %v2933_v47 = vld [vmem:[#allocation17 + $0x5e8] sm:$0xff] }
 0x85c   : > { %5852 = vmatpush1.bf16.msra.mxu0 %v5851_v17  ;;  %5980 = vmatpush1.bf16.msra.mxu1 %v5979_v20  ;;  %v2874_v20 = vld [vmem:[#allocation17 + $0x410] sm:$0xff] }
 0x85d   : > { %5854 = vmatprep.subr.bf16.mxu0 %v5853_v21  ;;  %5982 = vmatprep.subr.bf16.mxu1 %v5981_v45  ;;  %v2878_v21 = vld [vmem:[#allocation17 + $0x430] sm:$0xff]  ;;  %v2885_v45 = vld [vmem:[#allocation17 + $0x468] sm:$0xff] }
 0x85e   : > { %v5991_v25 = vpack.c.bf16 %v2878_v21, %v2874_v20  ;;  %v5865_v34 = vpack.c.bf16 %v2885_v45, %v2881_v24  ;;  %v2917_v20 = vld [vmem:[#allocation17 + $0x568] sm:$0xff]  ;;  %v2915_v21 = vld [vmem:[#allocation17 + $0x558] sm:$0xff]  ;;  %v2916_v45 = vld [vmem:[#allocation17 + $0x560] sm:$0xff] }
 0x860   : > { %5856 = vmatpush1.bf16.msra.mxu0 %v5855_v26  ;;  %5984 = vmatpush1.bf16.msra.mxu1 %v5983_v27  ;;  %v2884_v26 = vld [vmem:[#allocation17 + $0x460] sm:$0xff]  ;;  %v2882_v27 = vld [vmem:[#allocation17 + $0x450] sm:$0xff] }
 0x861   : > { %5858 = vmatprep.subr.bf16.mxu0 %v5857_v46  ;;  %5986 = vmatprep.subr.bf16.mxu1 %v5985_v35  ;;  %v2886_v46 = vld [vmem:[#allocation17 + $0x470] sm:$0xff] }
 0x864   : > { %5860 = vmatpush1.bf16.msra.mxu0 %v5859_v41  ;;  %5988 = vmatpush1.bf16.msra.mxu1 %v5987_v43  ;;  %v5867_v41 = vpack.c.bf16 %v2884_v26, %v2880_v55  ;;  %v5995_v43 = vpack.c.bf16 %v2886_v46, %v2882_v27  ;;  %v2921_v55 = vld [vmem:[#allocation17 + $0x588] sm:$0xff]  ;;  %v2923_v27 = vld [vmem:[#allocation17 + $0x598] sm:$0xff] }
 0x865   : > { %5862 = vmatprep.subr.bf16.mxu0 %v5861_v51  ;;  %5990 = vmatprep.subr.bf16.mxu1 %v5989_v56  ;;  %v2894_v56 = vld [vmem:[#allocation17 + $0x4b0] sm:$0xff]  ;;  %v2925_v26 = vld [vmem:[#allocation17 + $0x5a8] sm:$0xff]  ;;  %v2927_v46 = vld [vmem:[#allocation17 + $0x5b8] sm:$0xff] }
 0x866   : > { %v5999_v61 = vpack.c.bf16 %v2894_v56, %v2890_v1 }
 0x8e4   : > { %v2682_v58 = vpop.xlane.xlu1 %2681 }
 0x8e5   : > { %v2683_v30 = vmul.f32 0.001953125, %v2682_v58  ;;  %v2897_v58 = vld [vmem:[#allocation17 + $0x4c8] sm:$0xff] }
 0x8e7   : > { %v2684_v59 = vadd.f32 1e-05, %v2683_v30  ;;  %v2901_v30 = vld [vmem:[#allocation17 + $0x4e8] sm:$0xff] }
 0x8e9   : > { %6878 = vrsqrt.f32 %v2684_v59  ;;  %v2903_v59 = vld [vmem:[#allocation17 + $0x4f8] sm:$0xff] }
 0x8f3   : > { %v6879_v31 = vpop.eup %6878 }
 0x8f4   : > { %v2687_v13 = vmul.f32 %v6879_v31, %v8141_v57  ;;  %v2686_v2 = vmul.f32 %v6879_v31, %v8138_v18  ;;  %v2689_v23 = vmul.f32 %v6879_v31, %v8147_v54  ;;  %v2688_v14 = vmul.f32 %v6879_v31, %v8144_v19  ;;  %v2883_v54 = vld [vmem:[#allocation17 + $0x458] sm:$0xff]  ;;  %v2898_v31 = vld [vmem:[#allocation17 + $0x4d0] sm:$0xff] }
 0x8f5   : > { %v5993_v35 = vpack.c.bf16 %v2887_v8, %v2883_v54  ;;  %v5881_v54 = vpack.c.bf16 %v2917_v20, %v2913_v16  ;;  %v2944_v16 = vld [vmem:[#allocation17 + $0x640] sm:$0xff] }
 0x8f6   : > { %v2712_v32 = vmul.f32 %v2698_v9, %v2687_v13  ;;  %v2711_v15 = vmul.f32 %v2694_v28, %v2686_v2  ;;  %v2714_v52 = vmul.f32 %v2706_v63, %v2689_v23  ;;  %v2713_v17 = vmul.f32 %v2702_v60, %v2688_v14  ;;  %v2896_v9 = vld [vmem:[#allocation17 + $0x4c0] sm:$0xff]  ;;  %v2907_v13 = vld [vmem:[#allocation17 + $0x518] sm:$0xff] }
 0x8f7   : > { %v2900_v28 = vld [vmem:[#allocation17 + $0x4e0] sm:$0xff]  ;;  %v5873_v63 = vpack.c.bf16 %v2901_v30, %v2897_v58  ;;  %v2911_v2 = vld [vmem:[#allocation17 + $0x538] sm:$0xff] }
 0x8f8   : > { %v2737_v49 = vadd.f32 %v2723_v4, %v2712_v32  ;;  %v2736_v42 = vadd.f32 %v2719_v11, %v2711_v15  ;;  %v8175_v57 = vadd.f32 %v2727_v7, %v2713_v17  ;;  %v2739_v18 = vadd.f32 %v2731_v10, %v2714_v52  ;;  %v2902_v4 = vld [vmem:[#allocation17 + $0x4f0] sm:$0xff]  ;;  %v2905_v11 = vld [vmem:[#allocation17 + $0x508] sm:$0xff]  ;;  %v2904_v10 = vld [vmem:[#allocation17 + $0x500] sm:$0xff] }
 0x8f9   : > { %v2909_v7 = vld [vmem:[#allocation17 + $0x528] sm:$0xff]  ;;  %v5875_v23 = vpack.c.bf16 %v2900_v28, %v2896_v9  ;;  %v6003_v14 = vpack.c.bf16 %v2902_v4, %v2898_v31  ;;  %v2908_v32 = vld [vmem:[#allocation17 + $0x520] sm:$0xff]  ;;  %v6005_v50 = vpack.c.bf16 %v2911_v2, %v2907_v13  ;;  %v2906_v52 = vld [vmem:[#allocation17 + $0x510] sm:$0xff] }
 0x8fa   : > { %v8178_v19 = vadd.f32 %v2737_v49, %v8017_v5  ;;  %v8181_v22 = vadd.f32 %v2736_v42, %v8019_v62  ;;  %v2895_v5 = vld [vmem:[#allocation17 + $0x4b8] sm:$0xff]  ;;  %v8188_v62 = vadd.f32 %v2739_v18, %v8027_v29  ;;  %v5877_v15 = vpack.c.bf16 %v2909_v7, %v2905_v11  ;;  %v2910_v17 = vld [vmem:[#allocation17 + $0x530] sm:$0xff]  ;;  %v2912_v18 = vld [vmem:[#allocation17 + $0x540] sm:$0xff] }
 0x8fb   : > { %v5997_v51 = vpack.c.bf16 %v2895_v5, %v2891_v3  ;;  %v2899_v29 = vld [vmem:[#allocation17 + $0x4d8] sm:$0xff]  ;;  %v5879_v42 = vpack.c.bf16 %v2908_v32, %v2904_v10  ;;  %v6007_v24 = vpack.c.bf16 %v2910_v17, %v2906_v52  ;;  %v5883_v33 = vpack.c.bf16 %v2916_v45, %v2912_v18  ;;  %v2928_v58 = vld [vmem:[#allocation17 + $0x5c0] sm:$0xff]  ;;  %v2937_v9 = vld [vmem:[#allocation17 + $0x608] sm:$0xff] }
 0x8fc   : > { %3086 = vmatprep.mubr.f32.mxu0 %v8178_v19  ;;  %3228 = vmatprep.mubr.f32.mxu1 %v8178_v19  ;;  %v6001_v60 = vpack.c.bf16 %v2903_v59, %v2899_v29  ;;  %v2919_v49 = vld [vmem:[#allocation17 + $0x578] sm:$0xff]  ;;  %v5885_v3 = vpack.c.bf16 %v2925_v26, %v2921_v55  ;;  %v6013_v5 = vpack.c.bf16 %v2927_v46, %v2923_v27  ;;  %v2932_v30 = vld [vmem:[#allocation17 + $0x5e0] sm:$0xff]  ;;  %v2941_v28 = vld [vmem:[#allocation17 + $0x628] sm:$0xff] }
 0x8fd   : > { %3087 = vmatmul.mubr.f32.vlgmr.msra.gmra.mrb[6].mxu0 %v8181_v22  ;;  %3229 = vmatmul.mubr.f32.vlgmr.msra.gmra.mrb[6].mxu1 %v8181_v22  ;;  %v6009_v8 = vpack.c.bf16 %v2919_v49, %v2915_v21  ;;  %v5889_v29 = vpack.c.bf16 %v2933_v47, %v2929_v44  ;;  %v5891_v31 = vpack.c.bf16 %v2932_v30, %v2928_v58  ;;  %v2936_v11 = vld [vmem:[#allocation17 + $0x600] sm:$0xff]  ;;  %v2945_v10 = vld [vmem:[#allocation17 + $0x648] sm:$0xff] }
 0x8fe   : > { %5864 = vmatpush1.bf16.msra.mxu0 %v5863_v53  ;;  %5992 = vmatpush1.bf16.msra.mxu1 %v5991_v25  ;;  %v2914_v53 = vld [vmem:[#allocation17 + $0x550] sm:$0xff]  ;;  %v2940_v7 = vld [vmem:[#allocation17 + $0x620] sm:$0xff]  ;;  %v5893_v13 = vpack.c.bf16 %v2941_v28, %v2937_v9  ;;  %v2949_v32 = vld [vmem:[#allocation17 + $0x668] sm:$0xff] }
 0x8ff   : > { %3157 = vmatprep.mubr.f32.mxu0 %v8188_v62  ;;  %3299 = vmatprep.mubr.f32.mxu1 %v8188_v62  ;;  %v2918_v25 = vld [vmem:[#allocation17 + $0x570] sm:$0xff]  ;;  %v5895_v52 = vpack.c.bf16 %v2940_v7, %v2936_v11  ;;  %v2948_v20 = vld [vmem:[#allocation17 + $0x660] sm:$0xff]  ;;  %v5897_v21 = vpack.c.bf16 %v2949_v32, %v2945_v10  ;;  %v2953_v18 = vld [vmem:[#allocation17 + $0x688] sm:$0xff] }
 0x900   : > { %5866 = vmatprep.subr.bf16.mxu0 %v5865_v34  ;;  %5994 = vmatprep.subr.bf16.mxu1 %v5993_v35  ;;  %v6011_v34 = vpack.c.bf16 %v2918_v25, %v2914_v53  ;;  %v2920_v35 = vld [vmem:[#allocation17 + $0x580] sm:$0xff]  ;;  %v2957_v45 = vld [vmem:[#allocation17 + $0x6a8] sm:$0xff]  ;;  %v5899_v53 = vpack.c.bf16 %v2948_v20, %v2944_v16 }
 0x901   : > { %v5887_v1 = vpack.c.bf16 %v2924_v37, %v2920_v35  ;;  %v2952_v55 = vld [vmem:[#allocation17 + $0x680] sm:$0xff]  ;;  %v5901_v27 = vpack.c.bf16 %v2957_v45, %v2953_v18  ;;  %v2961_v35 = vld [vmem:[#allocation17 + $0x6c8] sm:$0xff] }
 0x902   : > { %5868 = vmatpush1.bf16.msra.mxu0 %v5867_v41  ;;  %5996 = vmatpush1.bf16.msra.mxu1 %v5995_v43  ;;  %v2922_v41 = vld [vmem:[#allocation17 + $0x590] sm:$0xff]  ;;  %v2956_v26 = vld [vmem:[#allocation17 + $0x6a0] sm:$0xff]  ;;  %v2965_v37 = vld [vmem:[#allocation17 + $0x6e8] sm:$0xff] }
 0x903   : > { %5870 = vmatprep.subr.bf16.mxu0 %v5869_v48  ;;  %5998 = vmatprep.subr.bf16.mxu1 %v5997_v51  ;;  %v2926_v43 = vld [vmem:[#allocation17 + $0x5b0] sm:$0xff]  ;;  %v2931_v48 = vld [vmem:[#allocation17 + $0x5d8] sm:$0xff]  ;;  %v2960_v44 = vld [vmem:[#allocation17 + $0x6c0] sm:$0xff] }
 0x904   : > { %v2935_v51 = vld [vmem:[#allocation17 + $0x5f8] sm:$0xff]  ;;  %v6015_v56 = vpack.c.bf16 %v2926_v43, %v2922_v41  ;;  %v5903_v41 = vpack.c.bf16 %v2956_v26, %v2952_v55  ;;  %v2964_v47 = vld [vmem:[#allocation17 + $0x6e0] sm:$0xff]  ;;  %v2969_v58 = vld [vmem:[#allocation17 + $0x708] sm:$0xff] }
 0x905   : > { %v6017_v59 = vpack.c.bf16 %v2935_v51, %v2931_v48  ;;  %v5905_v48 = vpack.c.bf16 %v2965_v37, %v2961_v35  ;;  %v2973_v30 = vld [vmem:[#allocation17 + $0x728] sm:$0xff]  ;;  %v2968_v9 = vld [vmem:[#allocation17 + $0x700] sm:$0xff] }
 0x906   : > { %5872 = vmatpush1.bf16.msra.mxu0 %v5871_v6  ;;  %6000 = vmatpush1.bf16.msra.mxu1 %v5999_v61  ;;  %v2930_v6 = vld [vmem:[#allocation17 + $0x5d0] sm:$0xff]  ;;  %v2972_v28 = vld [vmem:[#allocation17 + $0x720] sm:$0xff]  ;;  %v2977_v11 = vld [vmem:[#allocation17 + $0x748] sm:$0xff] }
 0x907   : > { %5874 = vmatprep.subr.bf16.mxu0 %v5873_v63  ;;  %6002 = vmatprep.subr.bf16.mxu1 %v6001_v60  ;;  %v2934_v61 = vld [vmem:[#allocation17 + $0x5f0] sm:$0xff]  ;;  %v2939_v63 = vld [vmem:[#allocation17 + $0x618] sm:$0xff]  ;;  %v2981_v7 = vld [vmem:[#allocation17 + $0x768] sm:$0xff] }
 0x908   : > { %v2943_v60 = vld [vmem:[#allocation17 + $0x638] sm:$0xff]  ;;  %v6019_v4 = vpack.c.bf16 %v2934_v61, %v2930_v6  ;;  %v5907_v6 = vpack.c.bf16 %v2964_v47, %v2960_v44  ;;  %v2976_v10 = vld [vmem:[#allocation17 + $0x740] sm:$0xff]  ;;  %v2985_v16 = vld [vmem:[#allocation17 + $0x788] sm:$0xff] }
 0x909   : > { %v6021_v2 = vpack.c.bf16 %v2943_v60, %v2939_v63  ;;  %v5909_v63 = vpack.c.bf16 %v2973_v30, %v2969_v58  ;;  %v2980_v32 = vld [vmem:[#allocation17 + $0x760] sm:$0xff]  ;;  %v2989_v20 = vld [vmem:[#allocation17 + $0x7a8] sm:$0xff] }
 0x90a   : > { %5876 = vmatpush1.bf16.msra.mxu0 %v5875_v23  ;;  %6004 = vmatpush1.bf16.msra.mxu1 %v6003_v14  ;;  %v2938_v23 = vld [vmem:[#allocation17 + $0x610] sm:$0xff]  ;;  %v2984_v18 = vld [vmem:[#allocation17 + $0x780] sm:$0xff]  ;;  %v2993_v55 = vld [vmem:[#allocation17 + $0x7c8] sm:$0xff] }
 0x90b   : > { %5878 = vmatprep.subr.bf16.mxu0 %v5877_v15  ;;  %6006 = vmatprep.subr.bf16.mxu1 %v6005_v50  ;;  %v2942_v14 = vld [vmem:[#allocation17 + $0x630] sm:$0xff]  ;;  %v2947_v15 = vld [vmem:[#allocation17 + $0x658] sm:$0xff]  ;;  %v2988_v45 = vld [vmem:[#allocation17 + $0x7a0] sm:$0xff] }
 0x90c   : > { %v2951_v50 = vld [vmem:[#allocation17 + $0x678] sm:$0xff]  ;;  %v6023_v17 = vpack.c.bf16 %v2942_v14, %v2938_v23  ;;  %v5911_v23 = vpack.c.bf16 %v2972_v28, %v2968_v9  ;;  %v2997_v26 = vld [vmem:[#allocation17 + $0x7e8] sm:$0xff]  ;;  %v2992_v35 = vld [vmem:[#allocation17 + $0x7c0] sm:$0xff] }
 0x90d   : > { %v6025_v49 = vpack.c.bf16 %v2951_v50, %v2947_v15  ;;  %v5913_v15 = vpack.c.bf16 %v2981_v7, %v2977_v11  ;;  %v5921_v37 = vpack.c.bf16 %v2997_v26, %v2993_v55  ;;  %v3501_v26 = vld [vmem:[#allocation19 + $0x68] sm:$0xff] }
 0x90e   : > { %5880 = vmatpush1.bf16.msra.mxu0 %v5879_v42  ;;  %6008 = vmatpush1.bf16.msra.mxu1 %v6007_v24  ;;  %v2946_v42 = vld [vmem:[#allocation17 + $0x650] sm:$0xff] }
 0x90f   : > { %5882 = vmatprep.subr.bf16.mxu0 %v5881_v54  ;;  %6010 = vmatprep.subr.bf16.mxu1 %v6009_v8  ;;  %v2950_v24 = vld [vmem:[#allocation17 + $0x670] sm:$0xff]  ;;  %v2955_v54 = vld [vmem:[#allocation17 + $0x698] sm:$0xff] }
 0x910   : > { %v2959_v8 = vld [vmem:[#allocation17 + $0x6b8] sm:$0xff]  ;;  %v6027_v25 = vpack.c.bf16 %v2950_v24, %v2946_v42  ;;  %v5915_v42 = vpack.c.bf16 %v2980_v32, %v2976_v10 }
 0x911   : > { %v6029_v46 = vpack.c.bf16 %v2959_v8, %v2955_v54  ;;  %v5917_v54 = vpack.c.bf16 %v2989_v20, %v2985_v16  ;;  %v3489_v16 = vld [vmem:[#allocation19 + $0x8] sm:$0xff] }
 0x912   : > { %5884 = vmatpush1.bf16.msra.mxu0 %v5883_v33  ;;  %6012 = vmatpush1.bf16.msra.mxu1 %v6011_v34  ;;  %v2954_v33 = vld [vmem:[#allocation17 + $0x690] sm:$0xff]  ;;  %v3493_v20 = vld [vmem:[#allocation19 + $0x28] sm:$0xff] }
 0x913   : > { %5886 = vmatprep.subr.bf16.mxu0 %v5885_v3  ;;  %6014 = vmatprep.subr.bf16.mxu1 %v6013_v5  ;;  %v2958_v34 = vld [vmem:[#allocation17 + $0x6b0] sm:$0xff]  ;;  %v2963_v3 = vld [vmem:[#allocation17 + $0x6d8] sm:$0xff] }
 0x914   : > { %v2967_v5 = vld [vmem:[#allocation17 + $0x6f8] sm:$0xff]  ;;  %v6031_v43 = vpack.c.bf16 %v2958_v34, %v2954_v33  ;;  %v5919_v33 = vpack.c.bf16 %v2988_v45, %v2984_v18  ;;  %v3492_v18 = vld [vmem:[#allocation19 + $0x20] sm:$0xff] }
 0x915   : > { %v6033_v51 = vpack.c.bf16 %v2967_v5, %v2963_v3  ;;  %v2996_v5 = vld [vmem:[#allocation17 + $0x7e0] sm:$0xff] }
 0x916   : > { %5888 = vmatpush1.bf16.msra.mxu0 %v5887_v1  ;;  %6016 = vmatpush1.bf16.msra.mxu1 %v6015_v56  ;;  %v2962_v1 = vld [vmem:[#allocation17 + $0x6d0] sm:$0xff]  ;;  %v5923_v44 = vpack.c.bf16 %v2996_v5, %v2992_v35  ;;  %v3496_v35 = vld [vmem:[#allocation19 + $0x40] sm:$0xff] }
 0x917   : > { %5890 = vmatprep.subr.bf16.mxu0 %v5889_v29  ;;  %6018 = vmatprep.subr.bf16.mxu1 %v6017_v59  ;;  %v2966_v56 = vld [vmem:[#allocation17 + $0x6f0] sm:$0xff]  ;;  %v2971_v29 = vld [vmem:[#allocation17 + $0x718] sm:$0xff] }
 0x918   : > { %v2975_v59 = vld [vmem:[#allocation17 + $0x738] sm:$0xff]  ;;  %v6035_v61 = vpack.c.bf16 %v2966_v56, %v2962_v1 }
 0x919   : > { %v6037_v60 = vpack.c.bf16 %v2975_v59, %v2971_v29 }
 0x91a   : > { %5892 = vmatpush1.bf16.msra.mxu0 %v5891_v31  ;;  %6020 = vmatpush1.bf16.msra.mxu1 %v6019_v4  ;;  %v2970_v31 = vld [vmem:[#allocation17 + $0x710] sm:$0xff] }
 0x91b   : > { %5894 = vmatprep.subr.bf16.mxu0 %v5893_v13  ;;  %6022 = vmatprep.subr.bf16.mxu1 %v6021_v2  ;;  %v2974_v4 = vld [vmem:[#allocation17 + $0x730] sm:$0xff]  ;;  %v2979_v13 = vld [vmem:[#allocation17 + $0x758] sm:$0xff] }
 0x91c   : > { %v2983_v2 = vld [vmem:[#allocation17 + $0x778] sm:$0xff]  ;;  %v6039_v14 = vpack.c.bf16 %v2974_v4, %v2970_v31 }
 0x91d   : > { %v6041_v50 = vpack.c.bf16 %v2983_v2, %v2979_v13 }
 0x91e   : > { %5896 = vmatpush1.bf16.msra.mxu0 %v5895_v52  ;;  %6024 = vmatpush1.bf16.msra.mxu1 %v6023_v17  ;;  %v2978_v52 = vld [vmem:[#allocation17 + $0x750] sm:$0xff] }
 0x91f   : > { %5898 = vmatprep.subr.bf16.mxu0 %v5897_v21  ;;  %6026 = vmatprep.subr.bf16.mxu1 %v6025_v49  ;;  %v2982_v17 = vld [vmem:[#allocation17 + $0x770] sm:$0xff]  ;;  %v2987_v21 = vld [vmem:[#allocation17 + $0x798] sm:$0xff] }
 0x920   : > { %v2991_v49 = vld [vmem:[#allocation17 + $0x7b8] sm:$0xff]  ;;  %v6043_v24 = vpack.c.bf16 %v2982_v17, %v2978_v52 }
 0x921   : > { %v6045_v8 = vpack.c.bf16 %v2991_v49, %v2987_v21  ;;  %v3491_v21 = vld [vmem:[#allocation19 + $0x18] sm:$0xff]  ;;  %v6053_v49 = vpack.c.bf16 %v3493_v20, %v3489_v16 }
 0x922   : > { %5900 = vmatpush1.bf16.msra.mxu0 %v5899_v53  ;;  %6028 = vmatpush1.bf16.msra.mxu1 %v6027_v25  ;;  %v2986_v53 = vld [vmem:[#allocation17 + $0x790] sm:$0xff] }
 0x923   : > { %5902 = vmatprep.subr.bf16.mxu0 %v5901_v27  ;;  %6030 = vmatprep.subr.bf16.mxu1 %v6029_v46  ;;  %v2990_v25 = vld [vmem:[#allocation17 + $0x7b0] sm:$0xff]  ;;  %v2995_v27 = vld [vmem:[#allocation17 + $0x7d8] sm:$0xff] }
 0x924   : > { %v2999_v46 = vld [vmem:[#allocation17 + $0x7f8] sm:$0xff]  ;;  %v6047_v34 = vpack.c.bf16 %v2990_v25, %v2986_v53  ;;  %v3494_v53 = vld [vmem:[#allocation19 + $0x30] sm:$0xff]  ;;  %v3497_v25 = vld [vmem:[#allocation19 + $0x48] sm:$0xff] }
 0x925   : > { %v6049_v3 = vpack.c.bf16 %v2999_v46, %v2995_v27  ;;  %v3499_v27 = vld [vmem:[#allocation19 + $0x58] sm:$0xff] }
 0x926   : > { %5904 = vmatpush1.bf16.msra.mxu0 %v5903_v41  ;;  %6032 = vmatpush1.bf16.msra.mxu1 %v6031_v43  ;;  %v2994_v41 = vld [vmem:[#allocation17 + $0x7d0] sm:$0xff]  ;;  %v3503_v46 = vld [vmem:[#allocation19 + $0x78] sm:$0xff] }
 0x927   : > { %5906 = vmatprep.subr.bf16.mxu0 %v5905_v48  ;;  %6034 = vmatprep.subr.bf16.mxu1 %v6033_v51  ;;  %v2998_v43 = vld [vmem:[#allocation17 + $0x7f0] sm:$0xff]  ;;  %v8194_v48 = vadd.f32 %v8175_v57, %v8021_v0  ;;  %v3000_v51 = vld [vmem:[%s8519_s13] sm:$0xf]  ;;  %s8523_s13 = sld [smem:[#allocation48_spill]] }
 0x928   : > { %v6051_v47 = vpack.c.bf16 %v2998_v43, %v2994_v41  ;;  %v3005_v1 = vrot.slane %v3000_v51, %v7925_v36  ;;  %v3009_v56 = vrot.slane %v3000_v51, %v7929_v39  ;;  %v3013_v30 = vrot.slane %v3000_v51, %v7927_v38  ;;  %v3502_v41 = vld [vmem:[#allocation19 + $0x70] sm:$0xff]  ;;  %v3505_v43 = vld [vmem:[#allocation19 + $0x88] sm:$0xff] }
 0x92a   : > { %5908 = vmatpush1.bf16.msra.mxu0 %v5907_v6  ;;  %6036 = vmatpush1.bf16.msra.mxu1 %v6035_v61  ;;  %v3017_v61 = vrot.slane %v3000_v51, %v7931_v40 }
 0x92b   : > { %5910 = vmatprep.subr.bf16.mxu0 %v5909_v63  ;;  %6038 = vmatprep.subr.bf16.mxu1 %v6037_v60 }
 0x92e   : > { %5912 = vmatpush1.bf16.msra.mxu0 %v5911_v23  ;;  %6040 = vmatpush1.bf16.msra.mxu1 %v6039_v14 }
 0x92f   : > { %5914 = vmatprep.subr.bf16.mxu0 %v5913_v15  ;;  %6042 = vmatprep.subr.bf16.mxu1 %v6041_v50 }
 0x932   : > { %5916 = vmatpush1.bf16.msra.mxu0 %v5915_v42  ;;  %6044 = vmatpush1.bf16.msra.mxu1 %v6043_v24  ;;  %v3495_v42 = vld [vmem:[#allocation19 + $0x38] sm:$0xff]  ;;  %v3488_v24 = vld [vmem:[#allocation19] sm:$0xff] }
 0x933   : > { %5918 = vmatprep.subr.bf16.mxu0 %v5917_v54  ;;  %6046 = vmatprep.subr.bf16.mxu1 %v6045_v8  ;;  %v6181_v45 = vpack.c.bf16 %v3495_v42, %v3491_v21  ;;  %v6055_v54 = vpack.c.bf16 %v3492_v18, %v3488_v24  ;;  %v3490_v8 = vld [vmem:[#allocation19 + $0x10] sm:$0xff]  ;;  %v3520_v21 = vld [vmem:[#allocation19 + $0x100] sm:$0xff] }
 0x934   : > { %v6183_v55 = vpack.c.bf16 %v3494_v53, %v3490_v8  ;;  %v3522_v42 = vld [vmem:[#allocation19 + $0x110] sm:$0xff]  ;;  %v3531_v8 = vld [vmem:[#allocation19 + $0x158] sm:$0xff] }
 0x935   : > { %v3526_v18 = vld [vmem:[#allocation19 + $0x130] sm:$0xff]  ;;  %v3535_v53 = vld [vmem:[#allocation19 + $0x178] sm:$0xff] }
 0x936   : > { %5920 = vmatpush1.bf16.msra.mxu0 %v5919_v33  ;;  %6048 = vmatpush1.bf16.msra.mxu1 %v6047_v34  ;;  %v6057_v33 = vpack.c.bf16 %v3501_v26, %v3497_v25  ;;  %v6185_v34 = vpack.c.bf16 %v3503_v46, %v3499_v27  ;;  %v3528_v27 = vld [vmem:[#allocation19 + $0x140] sm:$0xff] }
 0x937   : > { %5922 = vmatprep.subr.bf16.mxu0 %v5921_v37  ;;  %6050 = vmatprep.subr.bf16.mxu1 %v6049_v3  ;;  %v3500_v37 = vld [vmem:[#allocation19 + $0x60] sm:$0xff]  ;;  %v3498_v3 = vld [vmem:[#allocation19 + $0x50] sm:$0xff] }
 0x938   : > { %v6059_v5 = vpack.c.bf16 %v3500_v37, %v3496_v35  ;;  %v3532_v46 = vld [vmem:[#allocation19 + $0x160] sm:$0xff]  ;;  %v3534_v35 = vld [vmem:[#allocation19 + $0x170] sm:$0xff]  ;;  %v3537_v37 = vld [vmem:[#allocation19 + $0x188] sm:$0xff] }
 0x93a   : > { %5924 = vmatpush1.bf16.msra.mxu0 %v5923_v44  ;;  %6052 = vmatpush1.bf16.msra.mxu1 %v6051_v47  ;;  %v3509_v44 = vld [vmem:[#allocation19 + $0xa8] sm:$0xff]  ;;  %v6187_v47 = vpack.c.bf16 %v3502_v41, %v3498_v3  ;;  %v3543_v41 = vld [vmem:[#allocation19 + $0x1b8] sm:$0xff] }
 0x93b   : > { %6054 = vmatprep.subr.bf16.mxu0 %v6053_v49  ;;  %6182 = vmatprep.subr.bf16.mxu1 %v6181_v45  ;;  %v6061_v51 = vpack.c.bf16 %v3509_v44, %v3505_v43  ;;  %v3524_v49 = vld [vmem:[#allocation19 + $0x120] sm:$0xff]  ;;  %v3529_v45 = vld [vmem:[#allocation19 + $0x148] sm:$0xff]  ;;  %v6075_v43 = vpack.c.bf16 %v3532_v46, %v3528_v27  ;;  %v3566_v46 = vld [vmem:[#allocation19 + $0x270] sm:$0xff] }
 0x93c   : > { %v6071_v25 = vpack.c.bf16 %v3524_v49, %v3520_v21  ;;  %v3541_v3 = vld [vmem:[#allocation19 + $0x1a8] sm:$0xff]  ;;  %v3558_v49 = vld [vmem:[#allocation19 + $0x230] sm:$0xff] }
 0x93d   : > { %3158 = vmatmul.mubr.f32.vlgmr.msra.gmra.mrb[6].mxu0 %v8194_v48  ;;  %3300 = vmatmul.mubr.f32.vlgmr.msra.gmra.mrb[6].mxu1 %v8194_v48 }
 0x93e   : > { %6056 = vmatpush1.bf16.msra.mxu0 %v6055_v54  ;;  %6184 = vmatpush1.bf16.msra.mxu1 %v6183_v55  ;;  %v3533_v54 = vld [vmem:[#allocation19 + $0x168] sm:$0xff]  ;;  %v6199_v55 = vpack.c.bf16 %v3526_v18, %v3522_v42  ;;  %v3563_v18 = vld [vmem:[#allocation19 + $0x258] sm:$0xff] }
 0x93f   : > { %6058 = vmatprep.subr.bf16.mxu0 %v6057_v33  ;;  %6186 = vmatprep.subr.bf16.mxu1 %v6185_v34  ;;  %v6073_v26 = vpack.c.bf16 %v3533_v54, %v3529_v45  ;;  %v3530_v33 = vld [vmem:[#allocation19 + $0x150] sm:$0xff]  ;;  %v6201_v34 = vpack.c.bf16 %v3535_v53, %v3531_v8  ;;  %v3561_v42 = vld [vmem:[#allocation19 + $0x248] sm:$0xff]  ;;  %v3567_v45 = vld [vmem:[#allocation19 + $0x278] sm:$0xff] }
 0x940   : > { %v6203_v44 = vpack.c.bf16 %v3534_v35, %v3530_v33  ;;  %v6217_v27 = vpack.c.bf16 %v3567_v45, %v3563_v18  ;;  %v3569_v33 = vld [vmem:[#allocation19 + $0x288] sm:$0xff]  ;;  %v3571_v35 = vld [vmem:[#allocation19 + $0x298] sm:$0xff] }
 0x942   : > { %6060 = vmatpush1.bf16.msra.mxu0 %v6059_v5  ;;  %6188 = vmatpush1.bf16.msra.mxu1 %v6187_v47  ;;  %v3539_v5 = vld [vmem:[#allocation19 + $0x198] sm:$0xff]  ;;  %v6077_v47 = vpack.c.bf16 %v3541_v3, %v3537_v37 }
 0x943   : > { %6062 = vmatprep.subr.bf16.mxu0 %v6061_v51  ;;  %v3536_v51 = vld [vmem:[#allocation19 + $0x180] sm:$0xff]  ;;  %v3575_v37 = vld [vmem:[#allocation19 + $0x2b8] sm:$0xff] }
 0xa10   : > { %v3159_v58 = vpop.f32.mrb[6].mxu0  ;;  %v3301_v29 = vpop.f32.mrb[6].mxu1 }
 0xa11   : > { %v6637_v59 = vadd.f32 %v3159_v58, %v3005_v1  ;;  %v3161_v6 = vpop.f32.mrb[7].mxu0  ;;  %v3303_v0 = vpop.f32.mrb[7].mxu1  ;;  %v6639_v9 = vadd.f32 %v3301_v29, %v3013_v30  ;;  %v3507_v1 = vld [vmem:[#allocation19 + $0x98] sm:$0xff]  ;;  %v3504_v58 = vld [vmem:[#allocation19 + $0x80] sm:$0xff] }
 0xa12   : > { %v6638_v57 = vadd.f32 %v3161_v6, %v3009_v56  ;;  %v6640_v63 = vadd.f32 %v3303_v0, %v3017_v61  ;;  %v3511_v56 = vld [vmem:[#allocation19 + $0xb8] sm:$0xff]  ;;  %v3508_v29 = vld [vmem:[#allocation19 + $0xa0] sm:$0xff]  ;;  %v3510_v6 = vld [vmem:[#allocation19 + $0xb0] sm:$0xff] }
 0xa13   : > { %v6189_v30 = vpack.c.bf16 %v3511_v56, %v3507_v1  ;;  %v6063_v0 = vpack.c.bf16 %v3508_v29, %v3504_v58  ;;  %v3517_v61 = vld [vmem:[#allocation19 + $0xe8] sm:$0xff]  ;;  %v3540_v1 = vld [vmem:[#allocation19 + $0x1a0] sm:$0xff]  ;;  %v3538_v56 = vld [vmem:[#allocation19 + $0x190] sm:$0xff]  ;;  %v6205_v58 = vpack.c.bf16 %v3543_v41, %v3539_v5 }
 0xa14   : > { %v3308_v28 = vadd.f32 %v6638_v57, %v6637_v59  ;;  %v3545_v29 = vld [vmem:[#allocation19 + $0x1c8] sm:$0xff] }
 0xa15   : > { %6190 = vmatprep.subr.bf16.mxu1 %v6189_v30  ;;  %6064 = vmatpush1.bf16.msra.mxu0 %v6063_v0  ;;  %v3542_v30 = vld [vmem:[#allocation19 + $0x1b0] sm:$0xff]  ;;  %v3551_v0 = vld [vmem:[#allocation19 + $0x1f8] sm:$0xff] }
 0xa16   : > { %v3309_v60 = vadd.f32 %v6639_v9, %v3308_v28 }
 0xa18   : > { %v3310_v31 = vadd.f32 %v6640_v63, %v3309_v60  ;;  %v3519_v60 = vld [vmem:[#allocation19 + $0xf8] sm:$0xff] }
 0xa1a   : > { %3311 = vadd.xlane.f32.xlu0 %v3310_v31  ;;  %v3512_v31 = vld [vmem:[#allocation19 + $0xc0] sm:$0xff] }
 0xaa7   : > { %v3312_v4 = vpop.xlane.xlu0 %3311 }
 0xaa8   : > { %v3313_v11 = vmul.f32 0.001953125, %v3312_v4  ;;  %v3516_v4 = vld [vmem:[#allocation19 + $0xe0] sm:$0xff] }
 0xaaa   : > { %v8205_v7 = vsub.f32 %v6637_v59, %v3313_v11  ;;  %v8207_v13 = vsub.f32 %v6638_v57, %v3313_v11  ;;  %v8209_v2 = vsub.f32 %v6639_v9, %v3313_v11  ;;  %v8211_v23 = vsub.f32 %v6640_v63, %v3313_v11  ;;  %v3506_v59 = vld [vmem:[#allocation19 + $0x90] sm:$0xff]  ;;  %v3513_v57 = vld [vmem:[#allocation19 + $0xc8] sm:$0xff]  ;;  %v3515_v9 = vld [vmem:[#allocation19 + $0xd8] sm:$0xff] }
 0xaab   : > { %v6191_v28 = vpack.c.bf16 %v3510_v6, %v3506_v59  ;;  %v6065_v63 = vpack.c.bf16 %v3517_v61, %v3513_v57  ;;  %v6193_v11 = vpack.c.bf16 %v3519_v60, %v3515_v9  ;;  %v3549_v59 = vld [vmem:[#allocation19 + $0x1e8] sm:$0xff]  ;;  %v3547_v6 = vld [vmem:[#allocation19 + $0x1d8] sm:$0xff]  ;;  %v6079_v57 = vpack.c.bf16 %v3540_v1, %v3536_v51  ;;  %v3546_v60 = vld [vmem:[#allocation19 + $0x1d0] sm:$0xff] }
 0xaac   : > { %v3318_v14 = vmul.f32 %v8205_v7, %v8205_v7  ;;  %v3319_v10 = vmul.f32 %v8207_v13, %v8207_v13  ;;  %v3320_v32 = vmul.f32 %v8209_v2, %v8209_v2  ;;  %v3321_v50 = vmul.f32 %v8211_v23, %v8211_v23  ;;  %v3574_v1 = vld [vmem:[#allocation19 + $0x2b0] sm:$0xff] }
 0xaad   : > { %6192 = vmatpush1.bf16.msra.mxu1 %v6191_v28  ;;  %6066 = vmatprep.subr.bf16.mxu0 %v6065_v63  ;;  %v6207_v61 = vpack.c.bf16 %v3542_v30, %v3538_v56  ;;  %v6081_v9 = vpack.c.bf16 %v3549_v59, %v3545_v29  ;;  %v3544_v28 = vld [vmem:[#allocation19 + $0x1c0] sm:$0xff]  ;;  %v6221_v51 = vpack.c.bf16 %v3575_v37, %v3571_v35  ;;  %v3577_v56 = vld [vmem:[#allocation19 + $0x2c8] sm:$0xff]  ;;  %v3579_v30 = vld [vmem:[#allocation19 + $0x2d8] sm:$0xff] }
 0xaae   : > { %v3322_v15 = vadd.f32 %v3319_v10, %v3318_v14  ;;  %v3514_v14 = vld [vmem:[#allocation19 + $0xd0] sm:$0xff]  ;;  %6194 = vmatprep.subr.bf16.mxu1 %v6193_v11  ;;  %v3548_v63 = vld [vmem:[#allocation19 + $0x1e0] sm:$0xff]  ;;  %v3553_v11 = vld [vmem:[#allocation19 + $0x208] sm:$0xff] }
 0xaaf   : > { %v3518_v10 = vld [vmem:[#allocation19 + $0xf0] sm:$0xff]  ;;  %v3583_v29 = vld [vmem:[#allocation19 + $0x2f8] sm:$0xff] }
 0xab0   : > { %v3323_v52 = vadd.f32 %v3322_v15, %v3320_v32  ;;  %v3521_v32 = vld [vmem:[#allocation19 + $0x108] sm:$0xff]  ;;  %v6195_v16 = vpack.c.bf16 %v3518_v10, %v3514_v14  ;;  %v3555_v10 = vld [vmem:[#allocation19 + $0x218] sm:$0xff] }
 0xab1   : > { %v3525_v15 = vld [vmem:[#allocation19 + $0x128] sm:$0xff] }
 0xab2   : > { %v3324_v17 = vadd.f32 %v3323_v52, %v3321_v50  ;;  %v3523_v50 = vld [vmem:[#allocation19 + $0x118] sm:$0xff]  ;;  %v6069_v20 = vpack.c.bf16 %v3525_v15, %v3521_v32  ;;  %6196 = vmatpush1.bf16.msra.mxu1 %v6195_v16  ;;  %v3557_v14 = vld [vmem:[#allocation19 + $0x228] sm:$0xff]  ;;  %v6083_v15 = vpack.c.bf16 %v3548_v63, %v3544_v28  ;;  %v3556_v16 = vld [vmem:[#allocation19 + $0x220] sm:$0xff]  ;;  %v6225_v28 = vpack.c.bf16 %v3583_v29, %v3579_v30 }
 0xab3   : > { %v3527_v52 = vld [vmem:[#allocation19 + $0x138] sm:$0xff]  ;;  %v3582_v63 = vld [vmem:[#allocation19 + $0x2f0] sm:$0xff] }
 0xab4   : > { %3325 = vadd.xlane.f32.xlu1 %v3324_v17  ;;  %v6067_v17 = vpack.c.bf16 %v3516_v4, %v3512_v31  ;;  %v6197_v24 = vpack.c.bf16 %v3527_v52, %v3523_v50  ;;  %v6209_v31 = vpack.c.bf16 %v3551_v0, %v3547_v6  ;;  %v3550_v4 = vld [vmem:[#allocation19 + $0x1f0] sm:$0xff]  ;;  %v3559_v32 = vld [vmem:[#allocation19 + $0x238] sm:$0xff]  ;;  %v6085_v52 = vpack.c.bf16 %v3557_v14, %v3553_v11 }
 0xab5   : > { %v6211_v50 = vpack.c.bf16 %v3550_v4, %v3546_v60  ;;  %v6213_v21 = vpack.c.bf16 %v3559_v32, %v3555_v10  ;;  %v3585_v60 = vld [vmem:[#allocation19 + $0x308] sm:$0xff]  ;;  %v3587_v4 = vld [vmem:[#allocation19 + $0x318] sm:$0xff] }
 0xab6   : > { %6068 = vmatpush1.bf16.msra.mxu0 %v6067_v17  ;;  %6198 = vmatprep.subr.bf16.mxu1 %v6197_v24  ;;  %v3552_v17 = vld [vmem:[#allocation19 + $0x200] sm:$0xff]  ;;  %v3565_v24 = vld [vmem:[#allocation19 + $0x268] sm:$0xff]  ;;  %v3591_v11 = vld [vmem:[#allocation19 + $0x338] sm:$0xff] }
 0xab7   : > { %6070 = vmatprep.subr.bf16.mxu0 %v6069_v20  ;;  %6200 = vmatpush1.bf16.msra.mxu1 %v6199_v55  ;;  %v3554_v20 = vld [vmem:[#allocation19 + $0x210] sm:$0xff]  ;;  %v6087_v54 = vpack.c.bf16 %v3556_v16, %v3552_v17  ;;  %v6089_v53 = vpack.c.bf16 %v3565_v24, %v3561_v42  ;;  %v3564_v55 = vld [vmem:[#allocation19 + $0x260] sm:$0xff]  ;;  %v6229_v17 = vpack.c.bf16 %v3591_v11, %v3587_v4  ;;  %v3599_v42 = vld [vmem:[#allocation19 + $0x378] sm:$0xff] }
 0xab8   : > { %6202 = vmatprep.subr.bf16.mxu1 %v6201_v34  ;;  %v6215_v8 = vpack.c.bf16 %v3558_v49, %v3554_v20  ;;  %v3573_v34 = vld [vmem:[#allocation19 + $0x2a8] sm:$0xff]  ;;  %v3590_v16 = vld [vmem:[#allocation19 + $0x330] sm:$0xff]  ;;  %v3595_v49 = vld [vmem:[#allocation19 + $0x358] sm:$0xff] }
 0xab9   : > { %v6093_v41 = vpack.c.bf16 %v3573_v34, %v3569_v33  ;;  %v3593_v20 = vld [vmem:[#allocation19 + $0x348] sm:$0xff]  ;;  %v3607_v33 = vld [vmem:[#allocation19 + $0x3b8] sm:$0xff] }
 0xaba   : > { %6072 = vmatpush1.bf16.msra.mxu0 %v6071_v25  ;;  %v3560_v25 = vld [vmem:[#allocation19 + $0x240] sm:$0xff]  ;;  %v3623_v11 = vld [vmem:[#allocation19 + $0x438] sm:$0xff] }
 0xabb   : > { %6074 = vmatprep.subr.bf16.mxu0 %v6073_v26  ;;  %6204 = vmatpush1.bf16.msra.mxu1 %v6203_v44  ;;  %v3562_v26 = vld [vmem:[#allocation19 + $0x250] sm:$0xff]  ;;  %v6091_v3 = vpack.c.bf16 %v3564_v55, %v3560_v25  ;;  %v3572_v44 = vld [vmem:[#allocation19 + $0x2a0] sm:$0xff]  ;;  %v6233_v25 = vpack.c.bf16 %v3599_v42, %v3595_v49 }
 0xabc   : > { %6206 = vmatprep.subr.bf16.mxu1 %v6205_v58  ;;  %v6219_v5 = vpack.c.bf16 %v3566_v46, %v3562_v26  ;;  %v3581_v58 = vld [vmem:[#allocation19 + $0x2e8] sm:$0xff]  ;;  %v3598_v55 = vld [vmem:[#allocation19 + $0x370] sm:$0xff]  ;;  %v3603_v46 = vld [vmem:[#allocation19 + $0x398] sm:$0xff] }
 0xabd   : > { %v6097_v0 = vpack.c.bf16 %v3581_v58, %v3577_v56  ;;  %v3601_v26 = vld [vmem:[#allocation19 + $0x388] sm:$0xff]  ;;  %v3615_v56 = vld [vmem:[#allocation19 + $0x3f8] sm:$0xff] }
 0xabe   : > { %6076 = vmatpush1.bf16.msra.mxu0 %v6075_v43  ;;  %v3568_v43 = vld [vmem:[#allocation19 + $0x280] sm:$0xff] }
 0xabf   : > { %6078 = vmatprep.subr.bf16.mxu0 %v6077_v47  ;;  %6208 = vmatpush1.bf16.msra.mxu1 %v6207_v61  ;;  %v3570_v47 = vld [vmem:[#allocation19 + $0x290] sm:$0xff]  ;;  %v6095_v59 = vpack.c.bf16 %v3572_v44, %v3568_v43  ;;  %v3580_v61 = vld [vmem:[#allocation19 + $0x2e0] sm:$0xff]  ;;  %v6237_v43 = vpack.c.bf16 %v3607_v33, %v3603_v46 }
 0xac0   : > { %6210 = vmatprep.subr.bf16.mxu1 %v6209_v31  ;;  %v6223_v6 = vpack.c.bf16 %v3574_v1, %v3570_v47  ;;  %v3589_v31 = vld [vmem:[#allocation19 + $0x328] sm:$0xff]  ;;  %v3606_v44 = vld [vmem:[#allocation19 + $0x3b0] sm:$0xff]  ;;  %v3611_v1 = vld [vmem:[#allocation19 + $0x3d8] sm:$0xff] }
 0xac1   : > { %v6101_v32 = vpack.c.bf16 %v3589_v31, %v3585_v60  ;;  %v3609_v47 = vld [vmem:[#allocation19 + $0x3c8] sm:$0xff]  ;;  %v3619_v31 = vld [vmem:[#allocation19 + $0x418] sm:$0xff] }
 0xac2   : > { %6080 = vmatpush1.bf16.msra.mxu0 %v6079_v57  ;;  %v3576_v57 = vld [vmem:[#allocation19 + $0x2c0] sm:$0xff]  ;;  %v3621_v60 = vld [vmem:[#allocation19 + $0x428] sm:$0xff] }
 0xac3   : > { %6082 = vmatprep.subr.bf16.mxu0 %v6081_v9  ;;  %6212 = vmatpush1.bf16.msra.mxu1 %v6211_v50  ;;  %v3578_v9 = vld [vmem:[#allocation19 + $0x2d0] sm:$0xff]  ;;  %v6099_v14 = vpack.c.bf16 %v3580_v61, %v3576_v57  ;;  %v3588_v50 = vld [vmem:[#allocation19 + $0x320] sm:$0xff] }
 0xac4   : > { %6214 = vmatprep.subr.bf16.mxu1 %v6213_v21  ;;  %v6227_v10 = vpack.c.bf16 %v3582_v63, %v3578_v9  ;;  %v3597_v21 = vld [vmem:[#allocation19 + $0x368] sm:$0xff]  ;;  %v3610_v57 = vld [vmem:[#allocation19 + $0x3d0] sm:$0xff] }
 0xac5   : > { %v6105_v45 = vpack.c.bf16 %v3597_v21, %v3593_v20  ;;  %v3614_v61 = vld [vmem:[#allocation19 + $0x3f0] sm:$0xff]  ;;  %v3617_v63 = vld [vmem:[#allocation19 + $0x408] sm:$0xff] }
 0xac6   : > { %6084 = vmatpush1.bf16.msra.mxu0 %v6083_v15  ;;  %v3584_v15 = vld [vmem:[#allocation19 + $0x300] sm:$0xff]  ;;  %v6117_v4 = vpack.c.bf16 %v3621_v60, %v3617_v63 }
 0xac7   : > { %6086 = vmatprep.subr.bf16.mxu0 %v6085_v52  ;;  %6216 = vmatpush1.bf16.msra.mxu1 %v6215_v8  ;;  %v3586_v52 = vld [vmem:[#allocation19 + $0x310] sm:$0xff]  ;;  %v6103_v24 = vpack.c.bf16 %v3588_v50, %v3584_v15  ;;  %v3596_v8 = vld [vmem:[#allocation19 + $0x360] sm:$0xff]  ;;  %v3306_v50 = vld [vmem:[%s8520_s24] sm:$0xf]  ;;  %s8524_s24 = sld [smem:[#allocation49_spill]] }
 0xac8   : > { %6218 = vmatprep.subr.bf16.mxu1 %v6217_v27  ;;  %v6231_v18 = vpack.c.bf16 %v3590_v16, %v3586_v52  ;;  %v3605_v27 = vld [vmem:[#allocation19 + $0x3a8] sm:$0xff]  ;;  %v3307_v52 = vld [vmem:[%s8521_s15] sm:$0xf]  ;;  %v3338_v16 = vrot.slane %v3306_v50, %v7925_v36  ;;  %v3350_v20 = vrot.slane %v3306_v50, %v7931_v40  ;;  %v3346_v21 = vrot.slane %v3306_v50, %v7927_v38  ;;  %s8525_s15 = sld [smem:[#allocation50_spill]] }
 0xac9   : > { %v6109_v37 = vpack.c.bf16 %v3605_v27, %v3601_v26  ;;  %v3367_v42 = vrot.slane %v3307_v52, %v7929_v39 }
 0xaca   : > { %6088 = vmatpush1.bf16.msra.mxu0 %v6087_v54  ;;  %v3592_v54 = vld [vmem:[#allocation19 + $0x340] sm:$0xff] }
 0xacb   : > { %6090 = vmatprep.subr.bf16.mxu0 %v6089_v53  ;;  %6220 = vmatpush1.bf16.msra.mxu1 %v6219_v5  ;;  %v3594_v53 = vld [vmem:[#allocation19 + $0x350] sm:$0xff]  ;;  %v6107_v34 = vpack.c.bf16 %v3596_v8, %v3592_v54  ;;  %v3604_v5 = vld [vmem:[#allocation19 + $0x3a0] sm:$0xff] }
 0xacc   : > { %6222 = vmatprep.subr.bf16.mxu1 %v6221_v51  ;;  %v6235_v35 = vpack.c.bf16 %v3598_v55, %v3594_v53  ;;  %v3613_v51 = vld [vmem:[#allocation19 + $0x3e8] sm:$0xff] }
 0xacd   : > { %v6113_v29 = vpack.c.bf16 %v3613_v51, %v3609_v47 }
 0xace   : > { %6092 = vmatpush1.bf16.msra.mxu0 %v6091_v3  ;;  %v3600_v3 = vld [vmem:[#allocation19 + $0x380] sm:$0xff] }
 0xacf   : > { %6094 = vmatprep.subr.bf16.mxu0 %v6093_v41  ;;  %6224 = vmatpush1.bf16.msra.mxu1 %v6223_v6  ;;  %v3602_v41 = vld [vmem:[#allocation19 + $0x390] sm:$0xff]  ;;  %v6111_v58 = vpack.c.bf16 %v3604_v5, %v3600_v3  ;;  %v3612_v6 = vld [vmem:[#allocation19 + $0x3e0] sm:$0xff] }
 0xad0   : > { %6226 = vmatprep.subr.bf16.mxu1 %v6225_v28  ;;  %v6239_v30 = vpack.c.bf16 %v3606_v44, %v3602_v41  ;;  %v6243_v28 = vpack.c.bf16 %v3614_v61, %v3610_v57 }
 0xad2   : > { %6096 = vmatpush1.bf16.msra.mxu0 %v6095_v59  ;;  %v3608_v59 = vld [vmem:[#allocation19 + $0x3c0] sm:$0xff] }
 0xad3   : > { %6098 = vmatprep.subr.bf16.mxu0 %v6097_v0  ;;  %6228 = vmatpush1.bf16.msra.mxu1 %v6227_v10  ;;  %v6241_v0 = vpack.c.bf16 %v3615_v56, %v3611_v1  ;;  %v6115_v9 = vpack.c.bf16 %v3612_v6, %v3608_v59 }
 0xad4   : > { %6230 = vmatprep.subr.bf16.mxu1 %v6229_v17  ;;  %v3342_v17 = vrot.slane %v3306_v50, %v7929_v39 }
 0xad6   : > { %6100 = vmatpush1.bf16.msra.mxu0 %v6099_v14  ;;  %v6245_v14 = vpack.c.bf16 %v3623_v11, %v3619_v31 }
 0xad7   : > { %6102 = vmatprep.subr.bf16.mxu0 %v6101_v32  ;;  %6232 = vmatpush1.bf16.msra.mxu1 %v6231_v18  ;;  %v3375_v18 = vrot.slane %v3307_v52, %v7931_v40 }
 0xad8   : > { %6234 = vmatprep.subr.bf16.mxu1 %v6233_v25 }
 0xada   : > { %6104 = vmatpush1.bf16.msra.mxu0 %v6103_v24  ;;  %v3363_v24 = vrot.slane %v3307_v52, %v7925_v36 }
 0xadb   : > { %6106 = vmatprep.subr.bf16.mxu0 %v6105_v45  ;;  %6236 = vmatpush1.bf16.msra.mxu1 %v6235_v35  ;;  %v3371_v45 = vrot.slane %v3307_v52, %v7927_v38 }
 0xadc   : > { %6238 = vmatprep.subr.bf16.mxu1 %v6237_v43 }
 0xade   : > { %6108 = vmatpush1.bf16.msra.mxu0 %v6107_v34 }
 0xadf   : > { %6110 = vmatprep.subr.bf16.mxu0 %v6109_v37  ;;  %6240 = vmatpush1.bf16.msra.mxu1 %v6239_v30 }
 0xae0   : > { %6242 = vmatprep.subr.bf16.mxu1 %v6241_v0 }
 0xae2   : > { %6112 = vmatpush1.bf16.msra.mxu0 %v6111_v58 }
 0xae3   : > { %6114 = vmatprep.subr.bf16.mxu0 %v6113_v29  ;;  %6244 = vmatpush1.bf16.msra.mxu1 %v6243_v28 }
 0xae4   : > { %6246 = vmatprep.subr.bf16.mxu1 %v6245_v14 }
 0xae6   : > { %6116 = vmatpush1.bf16.msra.mxu0 %v6115_v9 }
 0xae7   : > { %6118 = vmatprep.subr.bf16.mxu0 %v6117_v4 }
 0xb41   : > { %v3326_v10 = vpop.xlane.xlu1 %3325 }
 0xb42   : > { %v3327_v32 = vmul.f32 0.001953125, %v3326_v10 }
 0xb44   : > { %v3328_v15 = vadd.f32 1e-05, %v3327_v32 }
 0xb46   : > { %6880 = vrsqrt.f32 %v3328_v15 }
 0xb50   : > { %v6881_v49 = vpop.eup %6880 }
 0xb51   : > { %v3331_v54 = vmul.f32 %v6881_v49, %v8207_v13  ;;  %v3330_v8 = vmul.f32 %v6881_v49, %v8205_v7  ;;  %v3333_v53 = vmul.f32 %v6881_v49, %v8211_v23  ;;  %v3332_v25 = vmul.f32 %v6881_v49, %v8209_v2 }
 0xb53   : > { %v3356_v55 = vmul.f32 %v3342_v17, %v3331_v54  ;;  %v3355_v26 = vmul.f32 %v3338_v16, %v3330_v8  ;;  %v3358_v27 = vmul.f32 %v3350_v20, %v3333_v53  ;;  %v3357_v46 = vmul.f32 %v3346_v21, %v3332_v25 }
 0xb55   : > { %v8239_v33 = vadd.f32 %v3367_v42, %v3356_v55  ;;  %v8241_v34 = vadd.f32 %v3363_v24, %v3355_v26  ;;  %v8243_v35 = vadd.f32 %v3375_v18, %v3358_v27  ;;  %v8245_v37 = vadd.f32 %v3371_v45, %v3357_v46 }
 0xb57   : > { %v8248_v13 = vmul.f32 0.70710677, %v8239_v33  ;;  %v8251_v7 = vmul.f32 0.70710677, %v8241_v34  ;;  %v8254_v2 = vmul.f32 0.70710677, %v8243_v35 }
 0xb58   : > { %v8260_v42 = vmul.f32 0.70710677, %v8245_v37 }
 0xb59   : > { %v3401_v23 = vand.u32 2147483647, %v8248_v13  ;;  %v3400_v3 = vand.u32 2147483647, %v8251_v7  ;;  %v3403_v5 = vand.u32 2147483647, %v8254_v2 }
 0xb5a   : > { %v8263_v25 = vand.u32 2147483647, %v8260_v42  ;;  %vm3393_vm8 = vcmp.ge.f32.partialorder %v8248_v13, 0.0  ;;  %vm3392_vm9 = vcmp.ge.f32.partialorder %v8251_v7, 0.0  ;;  %v3620_v13 = vld [vmem:[#allocation19 + $0x420] sm:$0xff]  ;;  %vm3395_vm10 = vcmp.ge.f32.partialorder %v8254_v2, 0.0 }
 0xb5b   : > { %v3405_v41 = vmul.f32 0.3275911, %v3401_v23  ;;  %v3404_v43 = vmul.f32 0.3275911, %v3400_v3  ;;  %v3407_v44 = vmul.f32 0.3275911, %v3403_v5 }
 0xb5c   : > { %v3453_v56 = vsub.f32 0.0, %v3401_v23  ;;  %v3452_v58 = vsub.f32 0.0, %v3400_v3  ;;  %v3455_v59 = vsub.f32 0.0, %v3403_v5  ;;  %v3635_v2 = vld [vmem:[#allocation19 + $0x498] sm:$0xff]  ;;  %vm3394_vm11 = vcmp.ge.f32.partialorder %v8260_v42, 0.0 }
 0xb5d   : > { %v3409_v47 = vadd.f32 1.0, %v3405_v41  ;;  %v3408_v51 = vadd.f32 1.0, %v3404_v43  ;;  %v3411_v1 = vadd.f32 1.0, %v3407_v44  ;;  %v3406_v43 = vmul.f32 0.3275911, %v8263_v25 }
 0xb5e   : > { %v3457_v29 = vmul.f32 %v3453_v56, %v3401_v23  ;;  %v3456_v57 = vmul.f32 %v3452_v58, %v3400_v3  ;;  %v3459_v31 = vmul.f32 %v3455_v59, %v3403_v5  ;;  %v3397_v56 = vsel %vm3393_vm8, 1.0, %v7378_v12  ;;  %v3616_v59 = vld [vmem:[#allocation19 + $0x400] sm:$0xff] }
 0xb5f   : > { %6882 = vrcp.f32 %v3409_v47  ;;  %v3396_v58 = vsel %vm3392_vm9, 1.0, %v7378_v12 }
 0xb60   : > { %6884 = vrcp.f32 %v3408_v51  ;;  %v3462_v63 = vmul.f32 1.442695, %v3457_v29  ;;  %v3460_v11 = vmul.f32 1.442695, %v3456_v57  ;;  %v3466_v52 = vmul.f32 1.442695, %v3459_v31 }
 0xb61   : > { %6886 = vrcp.f32 %v3411_v1  ;;  %v3618_v57 = vld [vmem:[#allocation19 + $0x410] sm:$0xff]  ;;  %v3629_v31 = vld [vmem:[#allocation19 + $0x468] sm:$0xff] }
 0xb62   : > { %6888 = vpow2.f32 %v3462_v63  ;;  %v3385_v63 = vmul.f32 0.5, %v8239_v33 }
 0xb63   : > { %6890 = vpow2.f32 %v3460_v11  ;;  %v3631_v11 = vld [vmem:[#allocation19 + $0x478] sm:$0xff] }
 0xb64   : > { %6892 = vpow2.f32 %v3466_v52 }
 0xb69   : > { %v6883_v30 = vpop.eup %6882 }
 0xb6a   : > { %v6885_v6 = vpop.eup %6884  ;;  %v3417_v0 = vmul.f32 1.0614054, %v6883_v30 }
 0xb6b   : > { %v3416_v61 = vmul.f32 1.0614054, %v6885_v6  ;;  %v6887_v28 = vpop.eup %6886 }
 0xb6c   : > { %v3421_v9 = vadd.f32 -1.4531521, %v3417_v0  ;;  %v3419_v14 = vmul.f32 1.0614054, %v6887_v28  ;;  %v6889_v46 = vpop.eup %6888  ;;  %v3410_v0 = vadd.f32 1.0, %v3406_v43  ;;  %v3638_v43 = vld [vmem:[#allocation19 + $0x4b0] sm:$0xff] }
 0xb6d   : > { %v3420_v60 = vadd.f32 -1.4531521, %v3416_v61  ;;  %v6891_v3 = vpop.eup %6890  ;;  %v3622_v61 = vld [vmem:[#allocation19 + $0x430] sm:$0xff] }
 0xb6e   : > { %v3425_v4 = vmul.f32 %v6883_v30, %v3421_v9  ;;  %v3423_v15 = vadd.f32 -1.4531521, %v3419_v14  ;;  %v6893_v1 = vpop.eup %6892  ;;  %v3625_v9 = vld [vmem:[#allocation19 + $0x448] sm:$0xff]  ;;  %v3384_v14 = vmul.f32 0.5, %v8241_v34  ;;  %v6247_v52 = vpack.c.bf16 %v3622_v61, %v3618_v57  ;;  %v3651_v61 = vld [vmem:[#allocation19 + $0x518] sm:$0xff] }
 0xb6f   : > { %v3424_v10 = vmul.f32 %v6885_v6, %v3420_v60  ;;  %6894 = vrcp.f32 %v3410_v0  ;;  %v3387_v34 = vmul.f32 0.5, %v8243_v35  ;;  %v3641_v35 = vld [vmem:[#allocation19 + $0x4c8] sm:$0xff] }
 0xb70   : > { %v3429_v32 = vadd.f32 1.4214138, %v3425_v4  ;;  %v3427_v16 = vmul.f32 %v6887_v28, %v3423_v15  ;;  %v3627_v4 = vld [vmem:[#allocation19 + $0x458] sm:$0xff]  ;;  %v3399_v15 = vsel %vm3395_vm10, 1.0, %v7378_v12  ;;  %v3649_v0 = vld [vmem:[#allocation19 + $0x508] sm:$0xff] }
 0xb71   : > { %v3428_v50 = vadd.f32 1.4214138, %v3424_v10  ;;  %v3653_v57 = vld [vmem:[#allocation19 + $0x528] sm:$0xff] }
 0xb72   : > { %v3433_v17 = vmul.f32 %v6883_v30, %v3429_v32  ;;  %v3431_v49 = vadd.f32 1.4214138, %v3427_v16  ;;  %v6119_v32 = vpack.c.bf16 %v3620_v13, %v3616_v59  ;;  %v3624_v16 = vld [vmem:[#allocation19 + $0x440] sm:$0xff]  ;;  %v3642_v13 = vld [vmem:[#allocation19 + $0x4d0] sm:$0xff] }
 0xb73   : > { %v3432_v20 = vmul.f32 %v6885_v6, %v3428_v50 }
 0xb74   : > { %v3437_v21 = vadd.f32 -0.28449672, %v3433_v17  ;;  %v3435_v45 = vmul.f32 %v6887_v28, %v3431_v49  ;;  %v6249_v49 = vpack.c.bf16 %v3631_v11, %v3627_v4  ;;  %v6133_v4 = vpack.c.bf16 %v3653_v57, %v3649_v0  ;;  %v3681_v0 = vld [vmem:[#allocation19 + $0x608] sm:$0xff] }
 0xb75   : > { %v3436_v24 = vadd.f32 -0.28449672, %v3432_v20  ;;  %v3628_v20 = vld [vmem:[#allocation19 + $0x460] sm:$0xff] }
 0xb76   : > { %v3441_v18 = vmul.f32 %v6883_v30, %v3437_v21  ;;  %v3439_v53 = vadd.f32 -0.28449672, %v3435_v45  ;;  %v6121_v21 = vpack.c.bf16 %v3629_v31, %v3625_v9  ;;  %v3633_v45 = vld [vmem:[#allocation19 + $0x488] sm:$0xff]  ;;  %v3655_v9 = vld [vmem:[#allocation19 + $0x538] sm:$0xff]  ;;  %v3652_v31 = vld [vmem:[#allocation19 + $0x520] sm:$0xff] }
 0xb77   : > { %v3440_v54 = vmul.f32 %v6885_v6, %v3436_v24  ;;  %v3626_v24 = vld [vmem:[#allocation19 + $0x450] sm:$0xff]  ;;  %v6261_v11 = vpack.c.bf16 %v3655_v9, %v3651_v61  ;;  %v3685_v61 = vld [vmem:[#allocation19 + $0x628] sm:$0xff]  ;;  %v3683_v9 = vld [vmem:[#allocation19 + $0x618] sm:$0xff] }
 0xb78   : > { %v3445_v8 = vadd.f32 0.2548296, %v3441_v18  ;;  %v3443_v27 = vmul.f32 %v6887_v28, %v3439_v53  ;;  %v3630_v18 = vld [vmem:[#allocation19 + $0x470] sm:$0xff]  ;;  %v3639_v53 = vld [vmem:[#allocation19 + $0x4b8] sm:$0xff] }
 0xb79   : > { %v3444_v55 = vadd.f32 0.2548296, %v3440_v54 }
 0xb7a   : > { %v3449_v26 = vmul.f32 %v6883_v30, %v3445_v8  ;;  %v3447_v41 = vadd.f32 0.2548296, %v3443_v27  ;;  %v3637_v8 = vld [vmem:[#allocation19 + $0x4a8] sm:$0xff]  ;;  %v6251_v27 = vpack.c.bf16 %v3630_v18, %v3626_v24  ;;  %v3658_v18 = vld [vmem:[#allocation19 + $0x550] sm:$0xff] }
 0xb7b   : > { %v3448_v23 = vmul.f32 %v6885_v6, %v3444_v55 }
 0xb7c   : > { %v3469_v5 = vmul.f32 %v6889_v46, %v3449_v26  ;;  %v3451_v51 = vmul.f32 %v6887_v28, %v3447_v41  ;;  %v6123_v26 = vpack.c.bf16 %v3628_v20, %v3624_v16  ;;  %v3632_v46 = vld [vmem:[#allocation19 + $0x480] sm:$0xff]  ;;  %v3634_v41 = vld [vmem:[#allocation19 + $0x490] sm:$0xff] }
 0xb7d   : > { %v3468_v44 = vmul.f32 %v6891_v3, %v3448_v23  ;;  %v3636_v23 = vld [vmem:[#allocation19 + $0x4a0] sm:$0xff]  ;;  %v6125_v3 = vpack.c.bf16 %v3637_v8, %v3633_v45  ;;  %v3662_v45 = vld [vmem:[#allocation19 + $0x570] sm:$0xff]  ;;  %v3669_v8 = vld [vmem:[#allocation19 + $0x5a8] sm:$0xff] }
 0xb7e   : > { %v3473_v47 = vsub.f32 1.0, %v3469_v5  ;;  %v3471_v6 = vmul.f32 %v6893_v1, %v3451_v51  ;;  %v6253_v5 = vpack.c.bf16 %v3639_v53, %v3635_v2  ;;  %v3647_v51 = vld [vmem:[#allocation19 + $0x4f8] sm:$0xff]  ;;  %v6127_v1 = vpack.c.bf16 %v3636_v23, %v3632_v46  ;;  %v3668_v46 = vld [vmem:[#allocation19 + $0x5a0] sm:$0xff] }
 0xb7f   : > { %v3472_v30 = vsub.f32 1.0, %v3468_v44  ;;  %v3645_v44 = vld [vmem:[#allocation19 + $0x4e8] sm:$0xff]  ;;  %v3667_v2 = vld [vmem:[#allocation19 + $0x598] sm:$0xff] }
 0xb80   : > { %v3477_v29 = vmul.f32 %v3473_v47, %v3397_v56  ;;  %v3475_v60 = vsub.f32 1.0, %v3471_v6  ;;  %v3643_v47 = vld [vmem:[#allocation19 + $0x4d8] sm:$0xff]  ;;  %v6255_v56 = vpack.c.bf16 %v3638_v43, %v3634_v41  ;;  %v3646_v6 = vld [vmem:[#allocation19 + $0x4f0] sm:$0xff]  ;;  %v3673_v43 = vld [vmem:[#allocation19 + $0x5c8] sm:$0xff] }
 0xb81   : > { %v3476_v7 = vmul.f32 %v3472_v30, %v3396_v58  ;;  %v3640_v58 = vld [vmem:[#allocation19 + $0x4c0] sm:$0xff]  ;;  %v6257_v59 = vpack.c.bf16 %v3647_v51, %v3643_v47  ;;  %v3671_v53 = vld [vmem:[#allocation19 + $0x5b8] sm:$0xff]  ;;  %v3670_v41 = vld [vmem:[#allocation19 + $0x5b0] sm:$0xff] }
 0xb82   : > { %v3481_v28 = vadd.f32 1.0, %v3477_v29  ;;  %v3479_v17 = vmul.f32 %v3475_v60, %v3399_v15  ;;  %v3644_v30 = vld [vmem:[#allocation19 + $0x4e0] sm:$0xff]  ;;  %v6129_v29 = vpack.c.bf16 %v3645_v44, %v3641_v35  ;;  %v3677_v44 = vld [vmem:[#allocation19 + $0x5e8] sm:$0xff]  ;;  %v3675_v47 = vld [vmem:[#allocation19 + $0x5d8] sm:$0xff] }
 0xb83   : > { %v3480_v10 = vadd.f32 1.0, %v3476_v7  ;;  %v8277_v7 = vpop.eup %6894  ;;  %v3648_v60 = vld [vmem:[#allocation19 + $0x500] sm:$0xff]  ;;  %v3679_v51 = vld [vmem:[#allocation19 + $0x5f8] sm:$0xff] }
 0xb84   : > { %v3485_v50 = vmul.f32 %v3481_v28, %v3385_v63  ;;  %v3483_v54 = vadd.f32 1.0, %v3479_v17  ;;  %v6131_v63 = vpack.c.bf16 %v3644_v30, %v3640_v58  ;;  %v6259_v28 = vpack.c.bf16 %v3646_v6, %v3642_v13  ;;  %v3663_v17 = vld [vmem:[#allocation19 + $0x578] sm:$0xff]  ;;  %v3672_v58 = vld [vmem:[#allocation19 + $0x5c0] sm:$0xff]  ;;  %v3674_v13 = vld [vmem:[#allocation19 + $0x5d0] sm:$0xff] }
 0xb85   : > { %v3484_v33 = vmul.f32 %v3480_v10, %v3384_v14  ;;  %v3650_v14 = vld [vmem:[#allocation19 + $0x510] sm:$0xff]  ;;  %v3418_v15 = vmul.f32 1.0614054, %v8277_v7  ;;  %v6135_v16 = vpack.c.bf16 %v3652_v31, %v3648_v60  ;;  %v3676_v30 = vld [vmem:[#allocation19 + $0x5e0] sm:$0xff] }
 0xb86   : > { %3830 = vmatprep.mubr.f32.mxu0 %v3485_v50  ;;  %3972 = vmatprep.mubr.f32.mxu1 %v3485_v50  ;;  %v3487_v55 = vmul.f32 %v3483_v54, %v3387_v34  ;;  %v3654_v10 = vld [vmem:[#allocation19 + $0x530] sm:$0xff]  ;;  %v3661_v50 = vld [vmem:[#allocation19 + $0x568] sm:$0xff]  ;;  %v6147_v60 = vpack.c.bf16 %v3676_v30, %v3672_v58  ;;  %v3711_v58 = vld [vmem:[#allocation19 + $0x6f8] sm:$0xff] }
 0xb87   : > { %3831 = vmatmul.mubr.f32.vlgmr.msra.gmra.mrb[8].mxu0 %v3484_v33  ;;  %3973 = vmatmul.mubr.f32.vlgmr.msra.gmra.mrb[8].mxu1 %v3484_v33  ;;  %v6263_v20 = vpack.c.bf16 %v3654_v10, %v3650_v14  ;;  %v3656_v33 = vld [vmem:[#allocation19 + $0x540] sm:$0xff]  ;;  %v3665_v34 = vld [vmem:[#allocation19 + $0x588] sm:$0xff]  ;;  %v3422_v54 = vadd.f32 -1.4531521, %v3418_v15  ;;  %v3678_v6 = vld [vmem:[#allocation19 + $0x5f0] sm:$0xff]  ;;  %v6149_v14 = vpack.c.bf16 %v3685_v61, %v3681_v0 }
 0xb88   : > { %6120 = vmatpush1.bf16.msra.mxu0 %v6119_v32  ;;  %6248 = vmatpush1.bf16.msra.mxu1 %v6247_v52  ;;  %v3657_v32 = vld [vmem:[#allocation19 + $0x548] sm:$0xff]  ;;  %v3659_v52 = vld [vmem:[#allocation19 + $0x558] sm:$0xff]  ;;  %v6141_v23 = vpack.c.bf16 %v3669_v8, %v3665_v34  ;;  %v6275_v31 = vpack.c.bf16 %v3678_v6, %v3674_v13  ;;  %v3686_v15 = vld [vmem:[#allocation19 + $0x630] sm:$0xff] }
 0xb89   : > { %6122 = vmatprep.subr.bf16.mxu0 %v6121_v21  ;;  %6250 = vmatprep.subr.bf16.mxu1 %v6249_v49  ;;  %v3660_v21 = vld [vmem:[#allocation19 + $0x560] sm:$0xff]  ;;  %v6137_v49 = vpack.c.bf16 %v3661_v50, %v3657_v32  ;;  %v6265_v24 = vpack.c.bf16 %v3663_v17, %v3659_v52  ;;  %v3426_v35 = vmul.f32 %v8277_v7, %v3422_v54  ;;  %v3682_v32 = vld [vmem:[#allocation19 + $0x610] sm:$0xff]  ;;  %v3689_v50 = vld [vmem:[#allocation19 + $0x648] sm:$0xff] }
 0xb8a   : > { %3901 = vmatprep.mubr.f32.mxu0 %v3487_v55  ;;  %4043 = vmatprep.mubr.f32.mxu1 %v3487_v55  ;;  %v6139_v55 = vpack.c.bf16 %v3660_v21, %v3656_v33  ;;  %v3693_v17 = vld [vmem:[#allocation19 + $0x668] sm:$0xff]  ;;  %v3690_v54 = vld [vmem:[#allocation19 + $0x650] sm:$0xff]  ;;  %v3708_v13 = vld [vmem:[#allocation19 + $0x6e0] sm:$0xff] }
 0xb8b   : > { %v3430_v57 = vadd.f32 1.4214138, %v3426_v35  ;;  %v3694_v8 = vld [vmem:[#allocation19 + $0x670] sm:$0xff] }
 0xb8c   : > { %6124 = vmatpush1.bf16.msra.mxu0 %v6123_v26  ;;  %6252 = vmatpush1.bf16.msra.mxu1 %v6251_v27  ;;  %v6267_v26 = vpack.c.bf16 %v3662_v45, %v3658_v18  ;;  %v3664_v27 = vld [vmem:[#allocation19 + $0x580] sm:$0xff]  ;;  %v6153_v45 = vpack.c.bf16 %v3693_v17, %v3689_v50  ;;  %v3698_v35 = vld [vmem:[#allocation19 + $0x690] sm:$0xff]  ;;  %v3721_v17 = vld [vmem:[#allocation19 + $0x748] sm:$0xff] }
 0xb8d   : > { %6126 = vmatprep.subr.bf16.mxu0 %v6125_v3  ;;  %6254 = vmatprep.subr.bf16.mxu1 %v6253_v5  ;;  %v6269_v3 = vpack.c.bf16 %v3671_v53, %v3667_v2  ;;  %v3666_v5 = vld [vmem:[#allocation19 + $0x590] sm:$0xff]  ;;  %v3434_v52 = vmul.f32 %v8277_v7, %v3430_v57  ;;  %v3692_v18 = vld [vmem:[#allocation19 + $0x660] sm:$0xff]  ;;  %v3697_v2 = vld [vmem:[#allocation19 + $0x688] sm:$0xff] }
 0xb8e   : > { %v3706_v57 = vld [vmem:[#allocation19 + $0x6d0] sm:$0xff] }
 0xb8f   : > { %v3438_v53 = vadd.f32 -0.28449672, %v3434_v52  ;;  %v3710_v61 = vld [vmem:[#allocation19 + $0x6f0] sm:$0xff] }
 0xb90   : > { %6128 = vmatpush1.bf16.msra.mxu0 %v6127_v1  ;;  %6256 = vmatpush1.bf16.msra.mxu1 %v6255_v56  ;;  %v6143_v1 = vpack.c.bf16 %v3668_v46, %v3664_v27  ;;  %v6271_v56 = vpack.c.bf16 %v3670_v41, %v3666_v5  ;;  %v3703_v27 = vld [vmem:[#allocation19 + $0x6b8] sm:$0xff]  ;;  %v3700_v5 = vld [vmem:[#allocation19 + $0x6a0] sm:$0xff]  ;;  %v3714_v50 = vld [vmem:[#allocation19 + $0x710] sm:$0xff] }
 0xb91   : > { %6130 = vmatprep.subr.bf16.mxu0 %v6129_v29  ;;  %6258 = vmatprep.subr.bf16.mxu1 %v6257_v59  ;;  %v6145_v29 = vpack.c.bf16 %v3677_v44, %v3673_v43  ;;  %v6273_v59 = vpack.c.bf16 %v3679_v51, %v3675_v47  ;;  %v3702_v44 = vld [vmem:[#allocation19 + $0x6b0] sm:$0xff]  ;;  %v3705_v47 = vld [vmem:[#allocation19 + $0x6c8] sm:$0xff]  ;;  %v3442_v51 = vmul.f32 %v8277_v7, %v3438_v53 }
 0xb92   : > { %v3718_v52 = vld [vmem:[#allocation19 + $0x730] sm:$0xff] }
 0xb93   : > { %v3726_v53 = vld [vmem:[#allocation19 + $0x770] sm:$0xff] }
 0xb94   : > { %6132 = vmatpush1.bf16.msra.mxu0 %v6131_v63  ;;  %6260 = vmatpush1.bf16.msra.mxu1 %v6259_v28  ;;  %v3687_v63 = vld [vmem:[#allocation19 + $0x638] sm:$0xff]  ;;  %v3454_v28 = vsub.f32 0.0, %v8263_v25 }
 0xb95   : > { %6134 = vmatprep.subr.bf16.mxu0 %v6133_v4  ;;  %6262 = vmatprep.subr.bf16.mxu1 %v6261_v11  ;;  %v3680_v4 = vld [vmem:[#allocation19 + $0x600] sm:$0xff]  ;;  %v6277_v10 = vpack.c.bf16 %v3687_v63, %v3683_v9  ;;  %v3713_v9 = vld [vmem:[#allocation19 + $0x708] sm:$0xff]  ;;  %v3446_v63 = vadd.f32 0.2548296, %v3442_v51 }
 0xb96   : > { %v3684_v11 = vld [vmem:[#allocation19 + $0x620] sm:$0xff]  ;;  %v3458_v33 = vmul.f32 %v3454_v28, %v8263_v25  ;;  %v3717_v28 = vld [vmem:[#allocation19 + $0x728] sm:$0xff] }
 0xb97   : > { %v6151_v21 = vpack.c.bf16 %v3684_v11, %v3680_v4  ;;  %v6291_v11 = vpack.c.bf16 %v3710_v61, %v3706_v57  ;;  %v3740_v57 = vld [vmem:[#allocation19 + $0x7e0] sm:$0xff]  ;;  %v3738_v61 = vld [vmem:[#allocation19 + $0x7d0] sm:$0xff] }
 0xb98   : > { %6136 = vmatpush1.bf16.msra.mxu0 %v6135_v16  ;;  %6264 = vmatpush1.bf16.msra.mxu1 %v6263_v20  ;;  %v3691_v16 = vld [vmem:[#allocation19 + $0x658] sm:$0xff]  ;;  %v3464_v46 = vmul.f32 1.442695, %v3458_v33 }
 0xb99   : > { %6138 = vmatprep.subr.bf16.mxu0 %v6137_v49  ;;  %6266 = vmatprep.subr.bf16.mxu1 %v6265_v24  ;;  %v3695_v20 = vld [vmem:[#allocation19 + $0x678] sm:$0xff]  ;;  %v6279_v49 = vpack.c.bf16 %v3686_v15, %v3682_v32  ;;  %v3688_v24 = vld [vmem:[#allocation19 + $0x640] sm:$0xff]  ;;  %v6165_v32 = vpack.c.bf16 %v3717_v28, %v3713_v9  ;;  %v3742_v9 = vld [vmem:[#allocation19 + $0x7f0] sm:$0xff] }
 0xb9a   : > { %v6281_v34 = vpack.c.bf16 %v3695_v20, %v3691_v16  ;;  %v6155_v25 = vpack.c.bf16 %v3692_v18, %v3688_v24  ;;  %6896 = vpow2.f32 %v3464_v46  ;;  %v3450_v16 = vmul.f32 %v8277_v7, %v3446_v63  ;;  %v3725_v20 = vld [vmem:[#allocation19 + $0x768] sm:$0xff]  ;;  %v3723_v33 = vld [vmem:[#allocation19 + $0x758] sm:$0xff] }
 0xb9b   : > { %v6295_v18 = vpack.c.bf16 %v3718_v52, %v3714_v50  ;;  %v3731_v7 = vld [vmem:[#allocation19 + $0x798] sm:$0xff]  ;;  %v6307_v28 = vpack.c.bf16 %v3742_v9, %v3738_v61  ;;  %v4150_v61 = vld [vmem:[#allocation20 + $0x90] sm:$0xff] }
 0xb9c   : > { %6140 = vmatpush1.bf16.msra.mxu0 %v6139_v55  ;;  %6268 = vmatpush1.bf16.msra.mxu1 %v6267_v26  ;;  %v3701_v55 = vld [vmem:[#allocation19 + $0x6a8] sm:$0xff]  ;;  %v3699_v26 = vld [vmem:[#allocation19 + $0x698] sm:$0xff]  ;;  %v4154_v9 = vld [vmem:[#allocation20 + $0xb0] sm:$0xff] }
 0xb9d   : > { %6142 = vmatprep.subr.bf16.mxu0 %v6141_v23  ;;  %6270 = vmatprep.subr.bf16.mxu1 %v6269_v3  ;;  %v6283_v23 = vpack.c.bf16 %v3694_v8, %v3690_v54  ;;  %v3696_v3 = vld [vmem:[#allocation19 + $0x680] sm:$0xff]  ;;  %v6157_v41 = vpack.c.bf16 %v3701_v55, %v3697_v2  ;;  %v6285_v43 = vpack.c.bf16 %v3703_v27, %v3699_v26  ;;  %v3722_v2 = vld [vmem:[#allocation19 + $0x750] sm:$0xff]  ;;  %v3729_v55 = vld [vmem:[#allocation19 + $0x788] sm:$0xff] }
 0xb9e   : > { %v6159_v30 = vpack.c.bf16 %v3700_v5, %v3696_v3  ;;  %v6169_v54 = vpack.c.bf16 %v3725_v20, %v3721_v17  ;;  %v3733_v27 = vld [vmem:[#allocation19 + $0x7a8] sm:$0xff]  ;;  %v3735_v46 = vld [vmem:[#allocation19 + $0x7b8] sm:$0xff]  ;;  %v3728_v3 = vld [vmem:[#allocation19 + $0x780] sm:$0xff] }
 0xb9f   : > { %v3732_v5 = vld [vmem:[#allocation19 + $0x7a0] sm:$0xff] }
 0xba0   : > { %6144 = vmatpush1.bf16.msra.mxu0 %v6143_v1  ;;  %6272 = vmatpush1.bf16.msra.mxu1 %v6271_v56  ;;  %v3709_v1 = vld [vmem:[#allocation19 + $0x6e8] sm:$0xff]  ;;  %v3707_v56 = vld [vmem:[#allocation19 + $0x6d8] sm:$0xff] }
 0xba1   : > { %6146 = vmatprep.subr.bf16.mxu0 %v6145_v29  ;;  %6274 = vmatprep.subr.bf16.mxu1 %v6273_v59  ;;  %v6287_v29 = vpack.c.bf16 %v3702_v44, %v3698_v35  ;;  %v3704_v59 = vld [vmem:[#allocation19 + $0x6c0] sm:$0xff]  ;;  %v6161_v6 = vpack.c.bf16 %v3709_v1, %v3705_v47  ;;  %v6289_v0 = vpack.c.bf16 %v3711_v58, %v3707_v56  ;;  %v3730_v35 = vld [vmem:[#allocation19 + $0x790] sm:$0xff]  ;;  %v3737_v47 = vld [vmem:[#allocation19 + $0x7c8] sm:$0xff] }
 0xba2   : > { %v6163_v4 = vpack.c.bf16 %v3708_v13, %v3704_v59  ;;  %v3734_v44 = vld [vmem:[#allocation19 + $0x7b0] sm:$0xff]  ;;  %v3741_v1 = vld [vmem:[#allocation19 + $0x7e8] sm:$0xff]  ;;  %v3739_v56 = vld [vmem:[#allocation19 + $0x7d8] sm:$0xff]  ;;  %v3398_v13 = vsel %vm3394_vm11, 1.0, %v7378_v12 }
 0xba3   : > { %v3743_v58 = vld [vmem:[#allocation19 + $0x7f8] sm:$0xff]  ;;  %v3736_v59 = vld [vmem:[#allocation19 + $0x7c0] sm:$0xff] }
 0xba4   : > { %6148 = vmatpush1.bf16.msra.mxu0 %v6147_v60  ;;  %6276 = vmatpush1.bf16.msra.mxu1 %v6275_v31  ;;  %v3715_v60 = vld [vmem:[#allocation19 + $0x718] sm:$0xff]  ;;  %v6179_v42 = vpack.c.bf16 %v3740_v57, %v3736_v59  ;;  %v4152_v57 = vld [vmem:[#allocation20 + $0xa0] sm:$0xff] }
 0xba5   : > { %6150 = vmatprep.subr.bf16.mxu0 %v6149_v14  ;;  %6278 = vmatprep.subr.bf16.mxu1 %v6277_v10  ;;  %v3719_v31 = vld [vmem:[#allocation19 + $0x738] sm:$0xff]  ;;  %v3712_v14 = vld [vmem:[#allocation19 + $0x700] sm:$0xff] }
 0xba6   : > { %v3716_v10 = vld [vmem:[#allocation19 + $0x720] sm:$0xff]  ;;  %v6293_v15 = vpack.c.bf16 %v3719_v31, %v3715_v60  ;;  %v3386_v31 = vmul.f32 0.5, %v8245_v37  ;;  %v4151_v59 = vld [vmem:[#allocation20 + $0x98] sm:$0xff] }
 0xba7   : > { %v6167_v24 = vpack.c.bf16 %v3716_v10, %v3712_v14 }
 0xba8   : > { %6152 = vmatpush1.bf16.msra.mxu0 %v6151_v21  ;;  %6280 = vmatpush1.bf16.msra.mxu1 %v6279_v49  ;;  %v3727_v21 = vld [vmem:[#allocation19 + $0x778] sm:$0xff]  ;;  %v6897_v49 = vpop.eup %6896 }
 0xba9   : > { %6154 = vmatprep.subr.bf16.mxu0 %v6153_v45  ;;  %6282 = vmatprep.subr.bf16.mxu1 %v6281_v34  ;;  %v3720_v45 = vld [vmem:[#allocation19 + $0x740] sm:$0xff]  ;;  %v6297_v8 = vpack.c.bf16 %v3727_v21, %v3723_v33  ;;  %v3470_v26 = vmul.f32 %v6897_v49, %v3450_v16 }
 0xbaa   : > { %v3724_v34 = vld [vmem:[#allocation19 + $0x760] sm:$0xff] }
 0xbab   : > { %v3474_v51 = vsub.f32 1.0, %v3470_v26 }
 0xbac   : > { %6156 = vmatpush1.bf16.msra.mxu0 %v6155_v25  ;;  %6284 = vmatpush1.bf16.msra.mxu1 %v6283_v23  ;;  %v6171_v25 = vpack.c.bf16 %v3724_v34, %v3720_v45  ;;  %v6299_v23 = vpack.c.bf16 %v3726_v53, %v3722_v2  ;;  %v4137_v45 = vld [vmem:[#allocation20 + $0x28] sm:$0xff]  ;;  %v4135_v34 = vld [vmem:[#allocation20 + $0x18] sm:$0xff]  ;;  %v4132_v2 = vld [vmem:[#allocation20] sm:$0xff] }
 0xbad   : > { %6158 = vmatprep.subr.bf16.mxu0 %v6157_v41  ;;  %6286 = vmatprep.subr.bf16.mxu1 %v6285_v43  ;;  %v6173_v41 = vpack.c.bf16 %v3733_v27, %v3729_v55  ;;  %v6301_v43 = vpack.c.bf16 %v3735_v46, %v3731_v7  ;;  %v3478_v63 = vmul.f32 %v3474_v51, %v3398_v13  ;;  %v4136_v53 = vld [vmem:[#allocation20 + $0x20] sm:$0xff]  ;;  %v4134_v27 = vld [vmem:[#allocation20 + $0x10] sm:$0xff]  ;;  %v4141_v46 = vld [vmem:[#allocation20 + $0x48] sm:$0xff] }
 0xbae   : > { %v6311_v26 = vpack.c.bf16 %v4136_v53, %v4132_v2  ;;  %v4138_v7 = vld [vmem:[#allocation20 + $0x30] sm:$0xff]  ;;  %v4155_v13 = vld [vmem:[#allocation20 + $0xb8] sm:$0xff]  ;;  %v4173_v53 = vld [vmem:[#allocation20 + $0x148] sm:$0xff] }
 0xbaf   : > { %v3482_v60 = vadd.f32 1.0, %v3478_v63  ;;  %v4170_v2 = vld [vmem:[#allocation20 + $0x130] sm:$0xff] }
 0xbb0   : > { %6160 = vmatpush1.bf16.msra.mxu0 %v6159_v30  ;;  %6288 = vmatpush1.bf16.msra.mxu1 %v6287_v29  ;;  %v6175_v30 = vpack.c.bf16 %v3732_v5, %v3728_v3  ;;  %v6303_v29 = vpack.c.bf16 %v3734_v44, %v3730_v35  ;;  %v4143_v3 = vld [vmem:[#allocation20 + $0x58] sm:$0xff]  ;;  %v4140_v35 = vld [vmem:[#allocation20 + $0x40] sm:$0xff] }
 0xbb1   : > { %6162 = vmatprep.subr.bf16.mxu0 %v6161_v6  ;;  %6290 = vmatprep.subr.bf16.mxu1 %v6289_v0  ;;  %v6177_v6 = vpack.c.bf16 %v3741_v1, %v3737_v47  ;;  %v6305_v0 = vpack.c.bf16 %v3743_v58, %v3739_v56  ;;  %v3486_v12 = vmul.f32 %v3482_v60, %v3386_v31  ;;  %v4147_v5 = vld [vmem:[#allocation20 + $0x78] sm:$0xff]  ;;  %v4144_v44 = vld [vmem:[#allocation20 + $0x60] sm:$0xff]  ;;  %v4142_v47 = vld [vmem:[#allocation20 + $0x50] sm:$0xff] }
 0xbb2   : > { %v6315_v51 = vpack.c.bf16 %v4144_v44, %v4140_v35  ;;  %v4146_v1 = vld [vmem:[#allocation20 + $0x70] sm:$0xff]  ;;  %v4149_v56 = vld [vmem:[#allocation20 + $0x88] sm:$0xff]  ;;  %v4159_v60 = vld [vmem:[#allocation20 + $0xd8] sm:$0xff]  ;;  %v6447_v31 = vpack.c.bf16 %v4154_v9, %v4150_v61 }
 0xbb3   : > { %v4153_v58 = vld [vmem:[#allocation20 + $0xa8] sm:$0xff]  ;;  %v4191_v61 = vld [vmem:[#allocation20 + $0x1d8] sm:$0xff] }
 0xbb4   : > { %6164 = vmatpush1.bf16.msra.mxu0 %v6163_v4  ;;  %6292 = vmatpush1.bf16.msra.mxu1 %v6291_v11  ;;  %v3744_v4 = vld [vmem:[%s8522_s22] sm:$0xf]  ;;  %v4181_v35 = vld [vmem:[#allocation20 + $0x188] sm:$0xff]  ;;  %s8526_s22 = sld [smem:[#allocation51_spill]] }
 0xbb5   : > { %6166 = vmatprep.subr.bf16.mxu0 %v6165_v32  ;;  %6294 = vmatprep.subr.bf16.mxu1 %v6293_v15  ;;  %v3749_v11 = vrot.slane %v3744_v4, %v7925_v36  ;;  %v3753_v14 = vrot.slane %v3744_v4, %v7929_v39  ;;  %v3757_v32 = vrot.slane %v3744_v4, %v7927_v38  ;;  %v4185_v44 = vld [vmem:[#allocation20 + $0x1a8] sm:$0xff]  ;;  %v4195_v9 = vld [vmem:[#allocation20 + $0x1f8] sm:$0xff] }
 0xbb6   : > { %v3761_v16 = vrot.slane %v3744_v4, %v7931_v40  ;;  %v4163_v4 = vld [vmem:[#allocation20 + $0xf8] sm:$0xff] }
 0xbb8   : > { %6168 = vmatpush1.bf16.msra.mxu0 %v6167_v24  ;;  %6296 = vmatpush1.bf16.msra.mxu1 %v6295_v18  ;;  %v4133_v18 = vld [vmem:[#allocation20 + $0x8] sm:$0xff] }
 0xbb9   : > { %6170 = vmatprep.subr.bf16.mxu0 %v6169_v54  ;;  %6298 = vmatprep.subr.bf16.mxu1 %v6297_v8  ;;  %v6309_v54 = vpack.c.bf16 %v4137_v45, %v4133_v18  ;;  %v4139_v8 = vld [vmem:[#allocation20 + $0x38] sm:$0xff]  ;;  %v4164_v45 = vld [vmem:[#allocation20 + $0x100] sm:$0xff] }
 0xbba   : > { %v6437_v55 = vpack.c.bf16 %v4139_v8, %v4135_v34  ;;  %v4168_v34 = vld [vmem:[#allocation20 + $0x120] sm:$0xff] }
 0xbbc   : > { %6172 = vmatpush1.bf16.msra.mxu0 %v6171_v25  ;;  %6300 = vmatpush1.bf16.msra.mxu1 %v6299_v23  ;;  %v6439_v25 = vpack.c.bf16 %v4138_v7, %v4134_v27  ;;  %v4145_v23 = vld [vmem:[#allocation20 + $0x68] sm:$0xff]  ;;  %v4179_v27 = vld [vmem:[#allocation20 + $0x178] sm:$0xff]  ;;  %v6327_v7 = vpack.c.bf16 %v4168_v34, %v4164_v45  ;;  %v4202_v45 = vld [vmem:[#allocation20 + $0x230] sm:$0xff] }
 0xbbd   : > { %6174 = vmatprep.subr.bf16.mxu0 %v6173_v41  ;;  %6302 = vmatprep.subr.bf16.mxu1 %v6301_v43  ;;  %v6313_v41 = vpack.c.bf16 %v4145_v23, %v4141_v46  ;;  %v6441_v43 = vpack.c.bf16 %v4147_v5, %v4143_v3  ;;  %v4172_v23 = vld [vmem:[#allocation20 + $0x140] sm:$0xff]  ;;  %v4174_v5 = vld [vmem:[#allocation20 + $0x150] sm:$0xff]  ;;  %v4205_v34 = vld [vmem:[#allocation20 + $0x248] sm:$0xff] }
 0xbbe   : > { %v4176_v3 = vld [vmem:[#allocation20 + $0x160] sm:$0xff] }
 0xbc0   : > { %6176 = vmatpush1.bf16.msra.mxu0 %v6175_v30  ;;  %6304 = vmatpush1.bf16.msra.mxu1 %v6303_v29  ;;  %v6443_v30 = vpack.c.bf16 %v4146_v1, %v4142_v47  ;;  %v6317_v29 = vpack.c.bf16 %v4153_v58, %v4149_v56  ;;  %v4183_v47 = vld [vmem:[#allocation20 + $0x198] sm:$0xff]  ;;  %v6331_v1 = vpack.c.bf16 %v4176_v3, %v4172_v23  ;;  %v4210_v23 = vld [vmem:[#allocation20 + $0x270] sm:$0xff]  ;;  %v4213_v3 = vld [vmem:[#allocation20 + $0x288] sm:$0xff] }
 0xbc1   : > { %6178 = vmatprep.subr.bf16.mxu0 %v6177_v6  ;;  %6306 = vmatprep.subr.bf16.mxu1 %v6305_v0  ;;  %v4148_v6 = vld [vmem:[#allocation20 + $0x80] sm:$0xff]  ;;  %v6445_v0 = vpack.c.bf16 %v4155_v13, %v4151_v59  ;;  %v6333_v58 = vpack.c.bf16 %v4185_v44, %v4181_v35  ;;  %v4182_v59 = vld [vmem:[#allocation20 + $0x190] sm:$0xff] }
 0xbc2   : > { %v6319_v63 = vpack.c.bf16 %v4152_v57, %v4148_v6  ;;  %v4186_v6 = vld [vmem:[#allocation20 + $0x1b0] sm:$0xff]  ;;  %v4193_v57 = vld [vmem:[#allocation20 + $0x1e8] sm:$0xff] }
 0xbc4   : > { %6180 = vmatpush1.bf16.msra.mxu0 %v6179_v42  ;;  %6308 = vmatpush1.bf16.msra.mxu1 %v6307_v28  ;;  %v4157_v42 = vld [vmem:[#allocation20 + $0xc8] sm:$0xff] }
 0xbc5   : > { %6310 = vmatprep.subr.bf16.mxu0 %v6309_v54  ;;  %6438 = vmatprep.subr.bf16.mxu1 %v6437_v55  ;;  %v4161_v28 = vld [vmem:[#allocation20 + $0xe8] sm:$0xff]  ;;  %v4166_v54 = vld [vmem:[#allocation20 + $0x110] sm:$0xff] }
 0xbc6   : > { %v4177_v55 = vld [vmem:[#allocation20 + $0x168] sm:$0xff]  ;;  %v6455_v46 = vpack.c.bf16 %v4170_v2, %v4166_v54  ;;  %v4211_v2 = vld [vmem:[#allocation20 + $0x278] sm:$0xff] }
 0xbc7   : > { %3902 = vmatmul.mubr.f32.vlgmr.msra.gmra.mrb[8].mxu0 %v3486_v12  ;;  %4044 = vmatmul.mubr.f32.vlgmr.msra.gmra.mrb[8].mxu1 %v3486_v12  ;;  %v6321_v12 = vpack.c.bf16 %v4161_v28, %v4157_v42  ;;  %v6463_v42 = vpack.c.bf16 %v4186_v6, %v4182_v59  ;;  %v4209_v54 = vld [vmem:[#allocation20 + $0x268] sm:$0xff] }
 0xbc8   : > { %6312 = vmatpush1.bf16.msra.mxu0 %v6311_v26  ;;  %6440 = vmatpush1.bf16.msra.mxu1 %v6439_v25  ;;  %v4175_v26 = vld [vmem:[#allocation20 + $0x158] sm:$0xff]  ;;  %v6329_v25 = vpack.c.bf16 %v4177_v55, %v4173_v53 }
 0xbc9   : > { %6314 = vmatprep.subr.bf16.mxu0 %v6313_v41  ;;  %6442 = vmatprep.subr.bf16.mxu1 %v6441_v43  ;;  %v6457_v41 = vpack.c.bf16 %v4179_v27, %v4175_v26  ;;  %v4178_v43 = vld [vmem:[#allocation20 + $0x170] sm:$0xff]  ;;  %v6345_v26 = vpack.c.bf16 %v4209_v54, %v4205_v34  ;;  %v4204_v27 = vld [vmem:[#allocation20 + $0x240] sm:$0xff] }
 0xbca   : > { %v6459_v56 = vpack.c.bf16 %v4178_v43, %v4174_v5  ;;  %v4217_v5 = vld [vmem:[#allocation20 + $0x2a8] sm:$0xff]  ;;  %v4219_v43 = vld [vmem:[#allocation20 + $0x2b8] sm:$0xff]  ;;  %v4228_v54 = vld [vmem:[#allocation20 + $0x300] sm:$0xff] }
 0xbcc   : > { %6316 = vmatpush1.bf16.msra.mxu0 %v6315_v51  ;;  %6444 = vmatpush1.bf16.msra.mxu1 %v6443_v30  ;;  %v4187_v51 = vld [vmem:[#allocation20 + $0x1b8] sm:$0xff]  ;;  %v4180_v30 = vld [vmem:[#allocation20 + $0x180] sm:$0xff] }
 0xbcd   : > { %6318 = vmatprep.subr.bf16.mxu0 %v6317_v29  ;;  %6446 = vmatprep.subr.bf16.mxu1 %v6445_v0  ;;  %v4184_v29 = vld [vmem:[#allocation20 + $0x1a0] sm:$0xff]  ;;  %v6461_v13 = vpack.c.bf16 %v4187_v51, %v4183_v47  ;;  %v4189_v0 = vld [vmem:[#allocation20 + $0x1c8] sm:$0xff]  ;;  %v6349_v47 = vpack.c.bf16 %v4217_v5, %v4213_v3 }
 0xbce   : > { %v6337_v28 = vpack.c.bf16 %v4193_v57, %v4189_v0  ;;  %v4236_v3 = vld [vmem:[#allocation20 + $0x340] sm:$0xff] }
 0xbd0   : > { %6320 = vmatpush1.bf16.msra.mxu0 %v6319_v63  ;;  %6448 = vmatpush1.bf16.msra.mxu1 %v6447_v31  ;;  %v6335_v63 = vpack.c.bf16 %v4184_v29, %v4180_v30  ;;  %v4192_v31 = vld [vmem:[#allocation20 + $0x1e0] sm:$0xff] }
 0xbd1   : > { %6322 = vmatprep.subr.bf16.mxu0 %v6321_v12  ;;  %v4190_v12 = vld [vmem:[#allocation20 + $0x1d0] sm:$0xff] }
 0xc9a   : > { %v3903_v10 = vpop.f32.mrb[8].mxu0  ;;  %v4045_v15 = vpop.f32.mrb[8].mxu1 }
 0xc9b   : > { %v8295_v50 = vadd.f32 %v3903_v10, %v3749_v11  ;;  %v3905_v37 = vpop.f32.mrb[9].mxu0  ;;  %v4047_v52 = vpop.f32.mrb[9].mxu1  ;;  %v8300_v20 = vadd.f32 %v4045_v15, %v3757_v32  ;;  %v4156_v11 = vld [vmem:[#allocation20 + $0xc0] sm:$0xff]  ;;  %v6449_v10 = vpack.c.bf16 %v4163_v4, %v4159_v60  ;;  %v4158_v32 = vld [vmem:[#allocation20 + $0xd0] sm:$0xff]  ;;  %v6465_v4 = vpack.c.bf16 %v4195_v9, %v4191_v61 }
 0xc9c   : > { %v8297_v17 = vadd.f32 %v3905_v37, %v3753_v14  ;;  %v8304_v21 = vadd.f32 %v4047_v52, %v3761_v16  ;;  %v4160_v14 = vld [vmem:[#allocation20 + $0xe0] sm:$0xff]  ;;  %v4162_v15 = vld [vmem:[#allocation20 + $0xf0] sm:$0xff]  ;;  %v4165_v37 = vld [vmem:[#allocation20 + $0x108] sm:$0xff] }
 0xc9d   : > { %v4169_v52 = vld [vmem:[#allocation20 + $0x128] sm:$0xff]  ;;  %v4167_v16 = vld [vmem:[#allocation20 + $0x118] sm:$0xff]  ;;  %6450 = vmatprep.subr.bf16.mxu1 %v6449_v10  ;;  %v4188_v60 = vld [vmem:[#allocation20 + $0x1c0] sm:$0xff] }
 0xc9e   : > { %v4052_v33 = vadd.f32 %v8297_v17, %v8295_v50  ;;  %v6325_v18 = vpack.c.bf16 %v4169_v52, %v4165_v37  ;;  %v4201_v10 = vld [vmem:[#allocation20 + $0x228] sm:$0xff]  ;;  %v6339_v37 = vpack.c.bf16 %v4192_v31, %v4188_v60  ;;  %v4216_v9 = vld [vmem:[#allocation20 + $0x2a0] sm:$0xff] }
 0xc9f   : > { %v4221_v60 = vld [vmem:[#allocation20 + $0x2c8] sm:$0xff] }
 0xca0   : > { %v4053_v49 = vadd.f32 %v8300_v20, %v4052_v33  ;;  %v4171_v33 = vld [vmem:[#allocation20 + $0x138] sm:$0xff]  ;;  %v4225_v31 = vld [vmem:[#allocation20 + $0x2e8] sm:$0xff] }
 0xca1   : > { %v6453_v8 = vpack.c.bf16 %v4171_v33, %v4167_v16  ;;  %v4196_v33 = vld [vmem:[#allocation20 + $0x200] sm:$0xff] }
 0xca2   : > { %v4054_v24 = vadd.f32 %v8304_v21, %v4053_v49  ;;  %v6323_v49 = vpack.c.bf16 %v4160_v14, %v4156_v11  ;;  %v4194_v11 = vld [vmem:[#allocation20 + $0x1f0] sm:$0xff]  ;;  %v4197_v14 = vld [vmem:[#allocation20 + $0x208] sm:$0xff] }
 0xca3   : > { %v6467_v52 = vpack.c.bf16 %v4194_v11, %v4190_v12  ;;  %v6341_v16 = vpack.c.bf16 %v4201_v10, %v4197_v14  ;;  %v4223_v12 = vld [vmem:[#allocation20 + $0x2d8] sm:$0xff]  ;;  %v4220_v14 = vld [vmem:[#allocation20 + $0x2c0] sm:$0xff] }
 0xca4   : > { %4055 = vadd.xlane.f32.xlu0 %v4054_v24  ;;  %v6451_v24 = vpack.c.bf16 %v4162_v15, %v4158_v32  ;;  %6324 = vmatpush1.bf16.msra.mxu0 %v6323_v49  ;;  %v4199_v32 = vld [vmem:[#allocation20 + $0x218] sm:$0xff]  ;;  %v4200_v49 = vld [vmem:[#allocation20 + $0x220] sm:$0xff] }
 0xca5   : > { %6326 = vmatprep.subr.bf16.mxu0 %v6325_v18  ;;  %v4203_v15 = vld [vmem:[#allocation20 + $0x238] sm:$0xff]  ;;  %v6343_v53 = vpack.c.bf16 %v4200_v49, %v4196_v33  ;;  %v4224_v10 = vld [vmem:[#allocation20 + $0x2e0] sm:$0xff]  ;;  %v4233_v49 = vld [vmem:[#allocation20 + $0x328] sm:$0xff] }
 0xca6   : > { %6452 = vmatpush1.bf16.msra.mxu1 %v6451_v24  ;;  %v4198_v24 = vld [vmem:[#allocation20 + $0x210] sm:$0xff]  ;;  %v6469_v18 = vpack.c.bf16 %v4203_v15, %v4199_v32  ;;  %v4227_v11 = vld [vmem:[#allocation20 + $0x2f8] sm:$0xff]  ;;  %v6355_v15 = vpack.c.bf16 %v4224_v10, %v4220_v14 }
 0xca7   : > { %6454 = vmatprep.subr.bf16.mxu1 %v6453_v8  ;;  %v4207_v8 = vld [vmem:[#allocation20 + $0x258] sm:$0xff]  ;;  %v6471_v55 = vpack.c.bf16 %v4202_v45, %v4198_v24  ;;  %v6481_v32 = vpack.c.bf16 %v4227_v11, %v4223_v12  ;;  %v4256_v12 = vld [vmem:[#allocation20 + $0x3e0] sm:$0xff]  ;;  %v4254_v11 = vld [vmem:[#allocation20 + $0x3d0] sm:$0xff] }
 0xca8   : > { %6328 = vmatpush1.bf16.msra.mxu0 %v6327_v7  ;;  %v4208_v7 = vld [vmem:[#allocation20 + $0x260] sm:$0xff]  ;;  %v4231_v24 = vld [vmem:[#allocation20 + $0x318] sm:$0xff]  ;;  %v4258_v14 = vld [vmem:[#allocation20 + $0x3f0] sm:$0xff] }
 0xca9   : > { %6330 = vmatprep.subr.bf16.mxu0 %v6329_v25  ;;  %v6473_v25 = vpack.c.bf16 %v4211_v2, %v4207_v8  ;;  %v6347_v35 = vpack.c.bf16 %v4208_v7, %v4204_v27  ;;  %v4232_v8 = vld [vmem:[#allocation20 + $0x320] sm:$0xff]  ;;  %v4230_v2 = vld [vmem:[#allocation20 + $0x310] sm:$0xff]  ;;  %v4241_v27 = vld [vmem:[#allocation20 + $0x368] sm:$0xff] }
 0xcaa   : > { %6456 = vmatpush1.bf16.msra.mxu1 %v6455_v46  ;;  %v4206_v46 = vld [vmem:[#allocation20 + $0x250] sm:$0xff] }
 0xcab   : > { %6458 = vmatprep.subr.bf16.mxu1 %v6457_v41  ;;  %v4215_v41 = vld [vmem:[#allocation20 + $0x298] sm:$0xff]  ;;  %v6475_v44 = vpack.c.bf16 %v4210_v23, %v4206_v46 }
 0xcac   : > { %6332 = vmatpush1.bf16.msra.mxu0 %v6331_v1  ;;  %v6477_v51 = vpack.c.bf16 %v4219_v43, %v4215_v41  ;;  %v4243_v23 = vld [vmem:[#allocation20 + $0x378] sm:$0xff]  ;;  %v4240_v41 = vld [vmem:[#allocation20 + $0x360] sm:$0xff]  ;;  %v4238_v43 = vld [vmem:[#allocation20 + $0x350] sm:$0xff] }
 0xcad   : > { %6334 = vmatprep.subr.bf16.mxu0 %v6333_v58 }
 0xcae   : > { %6460 = vmatpush1.bf16.msra.mxu1 %v6459_v56 }
 0xcaf   : > { %6462 = vmatprep.subr.bf16.mxu1 %v6461_v13 }
 0xcb0   : > { %6336 = vmatpush1.bf16.msra.mxu0 %v6335_v63 }
 0xcb1   : > { %6338 = vmatprep.subr.bf16.mxu0 %v6337_v28 }
 0xcb2   : > { %6464 = vmatpush1.bf16.msra.mxu1 %v6463_v42  ;;  %v4218_v42 = vld [vmem:[#allocation20 + $0x2b0] sm:$0xff] }
 0xcb3   : > { %6466 = vmatprep.subr.bf16.mxu1 %v6465_v4  ;;  %v6353_v4 = vpack.c.bf16 %v4225_v31, %v4221_v60  ;;  %v4252_v31 = vld [vmem:[#allocation20 + $0x3c0] sm:$0xff] }
 0xcb4   : > { %6340 = vmatpush1.bf16.msra.mxu0 %v6339_v37  ;;  %v4222_v37 = vld [vmem:[#allocation20 + $0x2d0] sm:$0xff]  ;;  %v6371_v10 = vpack.c.bf16 %v4256_v12, %v4252_v31 }
 0xcb5   : > { %6342 = vmatprep.subr.bf16.mxu0 %v6341_v16  ;;  %v4229_v16 = vld [vmem:[#allocation20 + $0x308] sm:$0xff] }
 0xcb6   : > { %6468 = vmatpush1.bf16.msra.mxu1 %v6467_v52  ;;  %v4226_v52 = vld [vmem:[#allocation20 + $0x2f0] sm:$0xff]  ;;  %v6357_v45 = vpack.c.bf16 %v4233_v49, %v4229_v16 }
 0xcb7   : > { %6470 = vmatprep.subr.bf16.mxu1 %v6469_v18  ;;  %v6483_v33 = vpack.c.bf16 %v4226_v52, %v4222_v37  ;;  %v4235_v18 = vld [vmem:[#allocation20 + $0x338] sm:$0xff]  ;;  %v4265_v37 = vld [vmem:[#allocation20 + $0x428] sm:$0xff] }
 0xcb8   : > { %6344 = vmatpush1.bf16.msra.mxu0 %v6343_v53  ;;  %v6485_v34 = vpack.c.bf16 %v4235_v18, %v4231_v24  ;;  %v6359_v53 = vpack.c.bf16 %v4232_v8, %v4228_v54  ;;  %v4263_v52 = vld [vmem:[#allocation20 + $0x418] sm:$0xff] }
 0xcb9   : > { %6346 = vmatprep.subr.bf16.mxu0 %v6345_v26  ;;  %v4237_v26 = vld [vmem:[#allocation20 + $0x348] sm:$0xff]  ;;  %v4051_v54 = vld [vmem:[%s8524_s24] sm:$0xf]  ;;  %s8527_s24 = sld [smem:[#allocation52_spill]] }
 0xcba   : > { %6472 = vmatpush1.bf16.msra.mxu1 %v6471_v55  ;;  %v4234_v55 = vld [vmem:[#allocation20 + $0x330] sm:$0xff]  ;;  %v6361_v46 = vpack.c.bf16 %v4241_v27, %v4237_v26  ;;  %v4111_v27 = vrot.slane %v4051_v54, %v7929_v39 }
 0xcbb   : > { %6474 = vmatprep.subr.bf16.mxu1 %v6473_v25  ;;  %v6487_v7 = vpack.c.bf16 %v4234_v55, %v4230_v2  ;;  %v4239_v25 = vld [vmem:[#allocation20 + $0x358] sm:$0xff] }
 0xcbc   : > { %6348 = vmatpush1.bf16.msra.mxu0 %v6347_v35  ;;  %v6489_v5 = vpack.c.bf16 %v4243_v23, %v4239_v25  ;;  %v4242_v35 = vld [vmem:[#allocation20 + $0x370] sm:$0xff] }
 0xcbd   : > { %6350 = vmatprep.subr.bf16.mxu0 %v6349_v47  ;;  %v4249_v47 = vld [vmem:[#allocation20 + $0x3a8] sm:$0xff] }
 0xcbe   : > { %6476 = vmatpush1.bf16.msra.mxu1 %v6475_v44  ;;  %v4245_v44 = vld [vmem:[#allocation20 + $0x388] sm:$0xff] }
 0xcbf   : > { %6478 = vmatprep.subr.bf16.mxu1 %v6477_v51  ;;  %v4247_v51 = vld [vmem:[#allocation20 + $0x398] sm:$0xff]  ;;  %s8369_s19 = scalar_lea.hbm %s8527_s24, %s5148_s4 }
 0xd31   : > { %v4056_v1 = vpop.xlane.xlu0 %4055 }
 0xd32   : > { %v4057_v56 = vmul.f32 0.001953125, %v4056_v1  ;;  %v6363_v1 = vpack.c.bf16 %v4240_v41, %v4236_v3  ;;  %v4119_v41 = vrot.slane %v4051_v54, %v7931_v40 }
 0xd34   : > { %v8309_v58 = vsub.f32 %v8295_v50, %v4057_v56  ;;  %v8312_v30 = vsub.f32 %v8297_v17, %v4057_v56  ;;  %v8315_v29 = vsub.f32 %v8300_v20, %v4057_v56  ;;  %v8318_v59 = vsub.f32 %v8304_v21, %v4057_v56  ;;  %v4212_v20 = vld [vmem:[#allocation20 + $0x280] sm:$0xff]  ;;  %v4214_v21 = vld [vmem:[#allocation20 + $0x290] sm:$0xff]  ;;  %v4251_v56 = vld [vmem:[#allocation20 + $0x3b8] sm:$0xff] }
 0xd35   : > { %v6351_v63 = vpack.c.bf16 %v4216_v9, %v4212_v20  ;;  %v6479_v28 = vpack.c.bf16 %v4218_v42, %v4214_v21  ;;  %v4253_v20 = vld [vmem:[#allocation20 + $0x3c8] sm:$0xff]  ;;  %v4255_v21 = vld [vmem:[#allocation20 + $0x3d8] sm:$0xff] }
 0xd36   : > { %v4062_v13 = vmul.f32 %v8309_v58, %v8309_v58  ;;  %v4063_v6 = vmul.f32 %v8312_v30, %v8312_v30  ;;  %v4064_v0 = vmul.f32 %v8315_v29, %v8315_v29  ;;  %v4065_v17 = vmul.f32 %v8318_v59, %v8318_v59  ;;  %v4257_v9 = vld [vmem:[#allocation20 + $0x3e8] sm:$0xff] }
 0xd37   : > { %6352 = vmatpush1.bf16.msra.mxu0 %v6351_v63  ;;  %6480 = vmatpush1.bf16.msra.mxu1 %v6479_v28  ;;  %v4259_v63 = vld [vmem:[#allocation20 + $0x3f8] sm:$0xff]  ;;  %v6369_v60 = vpack.c.bf16 %v4257_v9, %v4253_v20 }
 0xd38   : > { %v4066_v50 = vadd.f32 %v4063_v6, %v4062_v13  ;;  %6354 = vmatprep.subr.bf16.mxu0 %v6353_v4  ;;  %6482 = vmatprep.subr.bf16.mxu1 %v6481_v32  ;;  %v6491_v13 = vpack.c.bf16 %v4242_v35, %v4238_v43  ;;  %v6365_v6 = vpack.c.bf16 %v4249_v47, %v4245_v44  ;;  %v4260_v44 = vld [vmem:[#allocation20 + $0x400] sm:$0xff] }
 0xd39   : > { %v6497_v4 = vpack.c.bf16 %v4259_v63, %v4255_v21  ;;  %v6499_v32 = vpack.c.bf16 %v4258_v14, %v4254_v11  ;;  %v4268_v21 = vld [vmem:[#allocation20 + $0x440] sm:$0xff]  ;;  %v4279_v11 = vld [vmem:[#allocation20 + $0x498] sm:$0xff] }
 0xd3a   : > { %v4067_v57 = vadd.f32 %v4066_v50, %v4064_v0  ;;  %v4244_v0 = vld [vmem:[#allocation20 + $0x380] sm:$0xff]  ;;  %v4283_v14 = vld [vmem:[#allocation20 + $0x4b8] sm:$0xff] }
 0xd3b   : > { %6356 = vmatpush1.bf16.msra.mxu0 %v6355_v15  ;;  %6484 = vmatpush1.bf16.msra.mxu1 %v6483_v33  ;;  %v4248_v50 = vld [vmem:[#allocation20 + $0x3a0] sm:$0xff]  ;;  %v4261_v15 = vld [vmem:[#allocation20 + $0x408] sm:$0xff]  ;;  %v4267_v33 = vld [vmem:[#allocation20 + $0x438] sm:$0xff] }
 0xd3c   : > { %v4068_v61 = vadd.f32 %v4067_v57, %v4065_v17  ;;  %6358 = vmatprep.subr.bf16.mxu0 %v6357_v45  ;;  %6486 = vmatprep.subr.bf16.mxu1 %v6485_v34  ;;  %v4246_v17 = vld [vmem:[#allocation20 + $0x390] sm:$0xff]  ;;  %v6493_v57 = vpack.c.bf16 %v4251_v56, %v4247_v51  ;;  %v6367_v42 = vpack.c.bf16 %v4248_v50, %v4244_v0  ;;  %v4050_v34 = vld [vmem:[%s8523_s13] sm:$0xf]  ;;  %v4269_v50 = vld [vmem:[#allocation20 + $0x448] sm:$0xff]  ;;  %s4930_s13 = sshll.u32 %s943_s8, 4  ;;  %s8371_s13 = int_to_ptr.vmem [resolvable:$true] %s4930_s13 }
 0xd3d   : > { %v6373_v16 = vpack.c.bf16 %v4265_v37, %v4261_v15  ;;  %v6501_v49 = vpack.c.bf16 %v4267_v33, %v4263_v52  ;;  %v4086_v8 = vrot.slane %v4050_v34, %v7929_v39  ;;  %v4082_v2 = vrot.slane %v4050_v34, %v7925_v36  ;;  %v4262_v56 = vld [vmem:[#allocation20 + $0x410] sm:$0xff]  ;;  %v4272_v63 = vld [vmem:[#allocation20 + $0x460] sm:$0xff]  ;;  %p7275_p11 = scmp.lt.s32.totalorder %s8371_s13, %s7273_s3 }
 0xd3e   : > { %4069 = vadd.xlane.f32.xlu1 %v4068_v61  ;;  %v4250_v61 = vld [vmem:[#allocation20 + $0x3b0] sm:$0xff]  ;;  %v4090_v55 = vrot.slane %v4050_v34, %v7927_v38  ;;  %v4280_v15 = vld [vmem:[#allocation20 + $0x4a0] sm:$0xff]  ;;  %v6509_v52 = vpack.c.bf16 %v4283_v14, %v4279_v11  ;;  %v4317_v14 = vld [vmem:[#allocation20 + $0x5c8] sm:$0xff] }
 0xd3f   : > { %6360 = vmatpush1.bf16.msra.mxu0 %v6359_v53  ;;  %6488 = vmatpush1.bf16.msra.mxu1 %v6487_v7  ;;  %v6495_v28 = vpack.c.bf16 %v4250_v61, %v4246_v17  ;;  %v4094_v53 = vrot.slane %v4050_v34, %v7931_v40  ;;  %v4107_v7 = vrot.slane %v4051_v54, %v7925_v36  ;;  %v4273_v17 = vld [vmem:[#allocation20 + $0x468] sm:$0xff]  ;;  %v4282_v33 = vld [vmem:[#allocation20 + $0x4b0] sm:$0xff] }
 0xd40   : > { %6362 = vmatprep.subr.bf16.mxu0 %v6361_v46  ;;  %6490 = vmatprep.subr.bf16.mxu1 %v6489_v5  ;;  %v4115_v46 = vrot.slane %v4051_v54, %v7927_v38  ;;  %v6377_v31 = vpack.c.bf16 %v4273_v17, %v4269_v50  ;;  %v4284_v54 = vld [vmem:[#allocation20 + $0x4c0] sm:$0xff]  ;;  %v4314_v11 = vld [vmem:[#allocation20 + $0x5b0] sm:$0xff] }
 0xd41   : > { %v4300_v50 = vld [vmem:[#allocation20 + $0x540] sm:$0xff] }
 0xd43   : > { %6364 = vmatpush1.bf16.msra.mxu0 %v6363_v1  ;;  %6492 = vmatpush1.bf16.msra.mxu1 %v6491_v13  ;;  %v4264_v1 = vld [vmem:[#allocation20 + $0x420] sm:$0xff]  ;;  %v4266_v13 = vld [vmem:[#allocation20 + $0x430] sm:$0xff] }
 0xd44   : > { %6366 = vmatprep.subr.bf16.mxu0 %v6365_v6  ;;  %6494 = vmatprep.subr.bf16.mxu1 %v6493_v57  ;;  %v4275_v57 = vld [vmem:[#allocation20 + $0x478] sm:$0xff]  ;;  %v6375_v20 = vpack.c.bf16 %v4264_v1, %v4260_v44  ;;  %v6503_v9 = vpack.c.bf16 %v4266_v13, %v4262_v56  ;;  %v4294_v44 = vld [vmem:[#allocation20 + $0x510] sm:$0xff]  ;;  %v4305_v1 = vld [vmem:[#allocation20 + $0x568] sm:$0xff] }
 0xd45   : > { %v4303_v56 = vld [vmem:[#allocation20 + $0x558] sm:$0xff] }
 0xd46   : > { %v4307_v13 = vld [vmem:[#allocation20 + $0x578] sm:$0xff] }
 0xd47   : > { %6368 = vmatpush1.bf16.msra.mxu0 %v6367_v42  ;;  %6496 = vmatpush1.bf16.msra.mxu1 %v6495_v28  ;;  %v4270_v42 = vld [vmem:[#allocation20 + $0x450] sm:$0xff] }
 0xd48   : > { %6370 = vmatprep.subr.bf16.mxu0 %v6369_v60  ;;  %6498 = vmatprep.subr.bf16.mxu1 %v6497_v4  ;;  %v4274_v28 = vld [vmem:[#allocation20 + $0x470] sm:$0xff]  ;;  %v4277_v60 = vld [vmem:[#allocation20 + $0x488] sm:$0xff] }
 0xd49   : > { %v4281_v4 = vld [vmem:[#allocation20 + $0x4a8] sm:$0xff] }
 0xd4a   : > { %v6381_v37 = vpack.c.bf16 %v4281_v4, %v4277_v60  ;;  %v4312_v60 = vld [vmem:[#allocation20 + $0x5a0] sm:$0xff]  ;;  %v4310_v4 = vld [vmem:[#allocation20 + $0x590] sm:$0xff] }
 0xd4b   : > { %6372 = vmatpush1.bf16.msra.mxu0 %v6371_v10  ;;  %6500 = vmatpush1.bf16.msra.mxu1 %v6499_v32  ;;  %v6507_v10 = vpack.c.bf16 %v4274_v28, %v4270_v42  ;;  %v4276_v32 = vld [vmem:[#allocation20 + $0x480] sm:$0xff] }
 0xd4c   : > { %6374 = vmatprep.subr.bf16.mxu0 %v6373_v16  ;;  %6502 = vmatprep.subr.bf16.mxu1 %v6501_v49  ;;  %v4278_v16 = vld [vmem:[#allocation20 + $0x490] sm:$0xff]  ;;  %v4285_v49 = vld [vmem:[#allocation20 + $0x4c8] sm:$0xff]  ;;  %v4308_v28 = vld [vmem:[#allocation20 + $0x580] sm:$0xff] }
 0xd4d   : > { %v6511_v34 = vpack.c.bf16 %v4282_v33, %v4278_v16 }
 0xdcb   : > { %v4070_v24 = vpop.xlane.xlu1 %4069 }
 0xdcc   : > { %v4071_v18 = vmul.f32 0.001953125, %v4070_v24  ;;  %v4289_v24 = vld [vmem:[#allocation20 + $0x4e8] sm:$0xff] }
 0xdce   : > { %v4072_v45 = vadd.f32 1e-05, %v4071_v18  ;;  %v4287_v18 = vld [vmem:[#allocation20 + $0x4d8] sm:$0xff] }
 0xdd0   : > { %6898 = vrsqrt.f32 %v4072_v45  ;;  %v4291_v45 = vld [vmem:[#allocation20 + $0x4f8] sm:$0xff] }
 0xdda   : > { %v6899_v26 = vpop.eup %6898 }
 0xddb   : > { %v4075_v25 = vmul.f32 %v6899_v26, %v8312_v30  ;;  %v4074_v23 = vmul.f32 %v6899_v26, %v8309_v58  ;;  %v4077_v3 = vmul.f32 %v6899_v26, %v8318_v59  ;;  %v4076_v5 = vmul.f32 %v6899_v26, %v8315_v29  ;;  %v4271_v59 = vld [vmem:[#allocation20 + $0x458] sm:$0xff]  ;;  %v4290_v26 = vld [vmem:[#allocation20 + $0x4f0] sm:$0xff] }
 0xddc   : > { %v6505_v12 = vpack.c.bf16 %v4275_v57, %v4271_v59  ;;  %v6521_v59 = vpack.c.bf16 %v4307_v13, %v4303_v56  ;;  %v4302_v57 = vld [vmem:[#allocation20 + $0x550] sm:$0xff]  ;;  %v4341_v56 = vld [vmem:[#allocation20 + $0x688] sm:$0xff] }
 0xddd   : > { %v4100_v43 = vmul.f32 %v4086_v8, %v4075_v25  ;;  %v4099_v35 = vmul.f32 %v4082_v2, %v4074_v23  ;;  %v4102_v47 = vmul.f32 %v4094_v53, %v4077_v3  ;;  %v4101_v51 = vmul.f32 %v4090_v55, %v4076_v5  ;;  %v4288_v8 = vld [vmem:[#allocation20 + $0x4e0] sm:$0xff]  ;;  %v4286_v55 = vld [vmem:[#allocation20 + $0x4d0] sm:$0xff]  ;;  %v4299_v25 = vld [vmem:[#allocation20 + $0x538] sm:$0xff] }
 0xdde   : > { %v6385_v2 = vpack.c.bf16 %v4289_v24, %v4285_v49  ;;  %v6513_v53 = vpack.c.bf16 %v4291_v45, %v4287_v18  ;;  %v6387_v23 = vpack.c.bf16 %v4288_v8, %v4284_v54  ;;  %v6515_v3 = vpack.c.bf16 %v4290_v26, %v4286_v55  ;;  %v4292_v5 = vld [vmem:[#allocation20 + $0x500] sm:$0xff]  ;;  %v4318_v49 = vld [vmem:[#allocation20 + $0x5d0] sm:$0xff]  ;;  %v4325_v18 = vld [vmem:[#allocation20 + $0x608] sm:$0xff] }
 0xddf   : > { %v4125_v6 = vadd.f32 %v4111_v27, %v4100_v43  ;;  %v4124_v0 = vadd.f32 %v4107_v7, %v4099_v35  ;;  %v8346_v30 = vadd.f32 %v4115_v46, %v4101_v51  ;;  %v4127_v58 = vadd.f32 %v4119_v41, %v4102_v47  ;;  %v4293_v27 = vld [vmem:[#allocation20 + $0x508] sm:$0xff]  ;;  %v4295_v46 = vld [vmem:[#allocation20 + $0x518] sm:$0xff]  ;;  %v4296_v41 = vld [vmem:[#allocation20 + $0x520] sm:$0xff] }
 0xde0   : > { %v4297_v7 = vld [vmem:[#allocation20 + $0x528] sm:$0xff]  ;;  %v6517_v35 = vpack.c.bf16 %v4299_v25, %v4295_v46  ;;  %v4298_v47 = vld [vmem:[#allocation20 + $0x530] sm:$0xff] }
 0xde1   : > { %v4129_v29 = vadd.f32 %v4125_v6, %v8178_v19  ;;  %v4128_v61 = vadd.f32 %v4124_v0, %v8181_v22  ;;  %v4131_v19 = vadd.f32 %v4127_v58, %v8188_v62  ;;  %v6379_v22 = vpack.c.bf16 %v4272_v63, %v4268_v21  ;;  %v4301_v51 = vld [vmem:[#allocation20 + $0x548] sm:$0xff]  ;;  %v4304_v58 = vld [vmem:[#allocation20 + $0x560] sm:$0xff]  ;;  %v4315_v21 = vld [vmem:[#allocation20 + $0x5b8] sm:$0xff] }
 0xde2   : > { %v6383_v62 = vpack.c.bf16 %v4280_v15, %v4276_v32  ;;  %v6389_v43 = vpack.c.bf16 %v4297_v7, %v4293_v27  ;;  %v6391_v6 = vpack.c.bf16 %v4296_v41, %v4292_v5  ;;  %v6519_v0 = vpack.c.bf16 %v4298_v47, %v4294_v44  ;;  %v4322_v24 = vld [vmem:[#allocation20 + $0x5f0] sm:$0xff]  ;;  %v4329_v45 = vld [vmem:[#allocation20 + $0x628] sm:$0xff] }
 0xde3   : > { %4474 = vmatprep.mubr.f32.mxu0 %v4129_v29  ;;  %4616 = vmatprep.mubr.f32.mxu1 %v4129_v29  ;;  %v6393_v17 = vpack.c.bf16 %v4305_v1, %v4301_v51  ;;  %v4306_v29 = vld [vmem:[#allocation20 + $0x570] sm:$0xff]  ;;  %v6395_v63 = vpack.c.bf16 %v4304_v58, %v4300_v50  ;;  %v6399_v32 = vpack.c.bf16 %v4312_v60, %v4308_v28  ;;  %v4333_v46 = vld [vmem:[#allocation20 + $0x648] sm:$0xff] }
 0xde4   : > { %4475 = vmatmul.mubr.f32.vlgmr.msra.gmra.mrb[10].mxu0 %v4128_v61  ;;  %4617 = vmatmul.mubr.f32.vlgmr.msra.gmra.mrb[10].mxu1 %v4128_v61  ;;  %v4309_v61 = vld [vmem:[#allocation20 + $0x588] sm:$0xff]  ;;  %v6523_v42 = vpack.c.bf16 %v4306_v29, %v4302_v57  ;;  %v6527_v15 = vpack.c.bf16 %v4314_v11, %v4310_v4  ;;  %v6531_v8 = vpack.c.bf16 %v4322_v24, %v4318_v49  ;;  %v4326_v27 = vld [vmem:[#allocation20 + $0x610] sm:$0xff] }
 0xde5   : > { %6376 = vmatpush1.bf16.msra.mxu0 %v6375_v20  ;;  %6504 = vmatpush1.bf16.msra.mxu1 %v6503_v9  ;;  %v4313_v20 = vld [vmem:[#allocation20 + $0x5a8] sm:$0xff]  ;;  %v4311_v9 = vld [vmem:[#allocation20 + $0x598] sm:$0xff]  ;;  %v6405_v55 = vpack.c.bf16 %v4329_v45, %v4325_v18  ;;  %v4330_v7 = vld [vmem:[#allocation20 + $0x630] sm:$0xff] }
 0xde6   : > { %4545 = vmatprep.mubr.f32.mxu0 %v4131_v19  ;;  %4687 = vmatprep.mubr.f32.mxu1 %v4131_v19  ;;  %v4321_v19 = vld [vmem:[#allocation20 + $0x5e8] sm:$0xff]  ;;  %v6535_v41 = vpack.c.bf16 %v4330_v7, %v4326_v27  ;;  %v4334_v51 = vld [vmem:[#allocation20 + $0x650] sm:$0xff] }
 0xde7   : > { %6378 = vmatprep.subr.bf16.mxu0 %v6377_v31  ;;  %6506 = vmatprep.subr.bf16.mxu1 %v6505_v12  ;;  %v6397_v31 = vpack.c.bf16 %v4313_v20, %v4309_v61  ;;  %v6525_v12 = vpack.c.bf16 %v4315_v21, %v4311_v9  ;;  %v6401_v16 = vpack.c.bf16 %v4321_v19, %v4317_v14  ;;  %v4337_v25 = vld [vmem:[#allocation20 + $0x668] sm:$0xff]  ;;  %v4338_v1 = vld [vmem:[#allocation20 + $0x670] sm:$0xff] }
 0xde8   : > { %v6409_v44 = vpack.c.bf16 %v4337_v25, %v4333_v46  ;;  %v4345_v13 = vld [vmem:[#allocation20 + $0x6a8] sm:$0xff]  ;;  %v6539_v58 = vpack.c.bf16 %v4338_v1, %v4334_v51  ;;  %v4342_v61 = vld [vmem:[#allocation20 + $0x690] sm:$0xff] }
 0xde9   : > { %6380 = vmatpush1.bf16.msra.mxu0 %v6379_v22  ;;  %6508 = vmatpush1.bf16.msra.mxu1 %v6507_v10  ;;  %v4319_v22 = vld [vmem:[#allocation20 + $0x5d8] sm:$0xff]  ;;  %v6413_v57 = vpack.c.bf16 %v4345_v13, %v4341_v56  ;;  %v4346_v20 = vld [vmem:[#allocation20 + $0x6b0] sm:$0xff]  ;;  %v4349_v9 = vld [vmem:[#allocation20 + $0x6c8] sm:$0xff] }
 0xdea   : > { %6382 = vmatprep.subr.bf16.mxu0 %v6381_v37  ;;  %6510 = vmatprep.subr.bf16.mxu1 %v6509_v52  ;;  %v4323_v10 = vld [vmem:[#allocation20 + $0x5f8] sm:$0xff]  ;;  %v4316_v37 = vld [vmem:[#allocation20 + $0x5c0] sm:$0xff]  ;;  %v4353_v21 = vld [vmem:[#allocation20 + $0x6e8] sm:$0xff]  ;;  %v6543_v60 = vpack.c.bf16 %v4346_v20, %v4342_v61 }
 0xdeb   : > { %v4320_v52 = vld [vmem:[#allocation20 + $0x5e0] sm:$0xff]  ;;  %v6529_v33 = vpack.c.bf16 %v4323_v10, %v4319_v22  ;;  %v6417_v4 = vpack.c.bf16 %v4353_v21, %v4349_v9  ;;  %v4350_v14 = vld [vmem:[#allocation20 + $0x6d0] sm:$0xff]  ;;  %v4357_v22 = vld [vmem:[#allocation20 + $0x708] sm:$0xff] }
 0xdec   : > { %v6403_v54 = vpack.c.bf16 %v4320_v52, %v4316_v37  ;;  %v4354_v19 = vld [vmem:[#allocation20 + $0x6f0] sm:$0xff]  ;;  %v4361_v10 = vld [vmem:[#allocation20 + $0x728] sm:$0xff] }
 0xded   : > { %6384 = vmatpush1.bf16.msra.mxu0 %v6383_v62  ;;  %6512 = vmatpush1.bf16.msra.mxu1 %v6511_v34  ;;  %v4327_v62 = vld [vmem:[#allocation20 + $0x618] sm:$0xff]  ;;  %v6547_v52 = vpack.c.bf16 %v4354_v19, %v4350_v14  ;;  %v6421_v49 = vpack.c.bf16 %v4361_v10, %v4357_v22  ;;  %v4358_v18 = vld [vmem:[#allocation20 + $0x710] sm:$0xff]  ;;  %v4730_v22 = vld [vmem:[#allocation22 + $0x100] sm:$0xff] }
 0xdee   : > { %6386 = vmatprep.subr.bf16.mxu0 %v6385_v2  ;;  %6514 = vmatprep.subr.bf16.mxu1 %v6513_v53  ;;  %v4331_v34 = vld [vmem:[#allocation20 + $0x638] sm:$0xff]  ;;  %v4324_v2 = vld [vmem:[#allocation20 + $0x600] sm:$0xff]  ;;  %v4362_v45 = vld [vmem:[#allocation20 + $0x730] sm:$0xff] }
 0xdef   : > { %v4328_v53 = vld [vmem:[#allocation20 + $0x620] sm:$0xff]  ;;  %v6533_v26 = vpack.c.bf16 %v4331_v34, %v4327_v62  ;;  %v4365_v62 = vld [vmem:[#allocation20 + $0x748] sm:$0xff]  ;;  %v4366_v46 = vld [vmem:[#allocation20 + $0x750] sm:$0xff] }
 0xdf0   : > { %v6407_v5 = vpack.c.bf16 %v4328_v53, %v4324_v2  ;;  %v4369_v34 = vld [vmem:[#allocation20 + $0x768] sm:$0xff]  ;;  %v6551_v53 = vpack.c.bf16 %v4362_v45, %v4358_v18  ;;  %v4370_v25 = vld [vmem:[#allocation20 + $0x770] sm:$0xff]  ;;  %v4130_v18 = vadd.f32 %v8346_v30, %v8194_v48 }
 0xdf1   : > { %6388 = vmatpush1.bf16.msra.mxu0 %v6387_v23  ;;  %6516 = vmatpush1.bf16.msra.mxu1 %v6515_v3  ;;  %v4335_v23 = vld [vmem:[#allocation20 + $0x658] sm:$0xff]  ;;  %v6425_v27 = vpack.c.bf16 %v4369_v34, %v4365_v62  ;;  %v4374_v56 = vld [vmem:[#allocation20 + $0x790] sm:$0xff]  ;;  %v4731_v10 = vld [vmem:[#allocation22 + $0x108] sm:$0xff] }
 0xdf2   : > { %6390 = vmatprep.subr.bf16.mxu0 %v6389_v43  ;;  %6518 = vmatprep.subr.bf16.mxu1 %v6517_v35  ;;  %v4339_v3 = vld [vmem:[#allocation20 + $0x678] sm:$0xff]  ;;  %v4332_v43 = vld [vmem:[#allocation20 + $0x640] sm:$0xff]  ;;  %v4378_v13 = vld [vmem:[#allocation20 + $0x7b0] sm:$0xff] }
 0xdf3   : > { %v4336_v35 = vld [vmem:[#allocation20 + $0x660] sm:$0xff]  ;;  %v6537_v47 = vpack.c.bf16 %v4339_v3, %v4335_v23  ;;  %v4373_v23 = vld [vmem:[#allocation20 + $0x788] sm:$0xff]  ;;  %v4382_v9 = vld [vmem:[#allocation20 + $0x7d0] sm:$0xff] }
 0xdf4   : > { %v6411_v50 = vpack.c.bf16 %v4336_v35, %v4332_v43  ;;  %v4377_v3 = vld [vmem:[#allocation20 + $0x7a8] sm:$0xff]  ;;  %v6555_v35 = vpack.c.bf16 %v4370_v25, %v4366_v46  ;;  %v4386_v21 = vld [vmem:[#allocation20 + $0x7f0] sm:$0xff]  ;;  %v4734_v25 = vld [vmem:[#allocation22 + $0x120] sm:$0xff] }
 0xdf5   : > { %6392 = vmatpush1.bf16.msra.mxu0 %v6391_v6  ;;  %6520 = vmatpush1.bf16.msra.mxu1 %v6519_v0  ;;  %v4343_v6 = vld [vmem:[#allocation20 + $0x698] sm:$0xff]  ;;  %v6429_v51 = vpack.c.bf16 %v4377_v3, %v4373_v23  ;;  %v4732_v34 = vld [vmem:[#allocation22 + $0x110] sm:$0xff]  ;;  %v4703_v46 = vld [vmem:[#allocation22 + $0x28] sm:$0xff] }
 0xdf6   : > { %6394 = vmatprep.subr.bf16.mxu0 %v6393_v17  ;;  %6522 = vmatprep.subr.bf16.mxu1 %v6521_v59  ;;  %v4347_v0 = vld [vmem:[#allocation20 + $0x6b8] sm:$0xff]  ;;  %v4340_v17 = vld [vmem:[#allocation20 + $0x680] sm:$0xff]  ;;  %v4735_v23 = vld [vmem:[#allocation22 + $0x128] sm:$0xff] }
 0xdf7   : > { %v4344_v59 = vld [vmem:[#allocation20 + $0x6a0] sm:$0xff]  ;;  %v6541_v29 = vpack.c.bf16 %v4347_v0, %v4343_v6  ;;  %v4381_v6 = vld [vmem:[#allocation20 + $0x7c8] sm:$0xff]  ;;  %v4720_v3 = vld [vmem:[#allocation22 + $0xb0] sm:$0xff] }
 0xdf8   : > { %v6415_v28 = vpack.c.bf16 %v4344_v59, %v4340_v17  ;;  %v4385_v0 = vld [vmem:[#allocation20 + $0x7e8] sm:$0xff]  ;;  %v6559_v59 = vpack.c.bf16 %v4378_v13, %v4374_v56  ;;  %v4736_v13 = vld [vmem:[#allocation22 + $0x130] sm:$0xff] }
 0xdf9   : > { %6396 = vmatpush1.bf16.msra.mxu0 %v6395_v63  ;;  %6524 = vmatpush1.bf16.msra.mxu1 %v6523_v42  ;;  %v4351_v63 = vld [vmem:[#allocation20 + $0x6d8] sm:$0xff]  ;;  %v6433_v61 = vpack.c.bf16 %v4385_v0, %v4381_v6  ;;  %v4722_v0 = vld [vmem:[#allocation22 + $0xc0] sm:$0xff] }
 0xdfa   : > { %6398 = vmatprep.subr.bf16.mxu0 %v6397_v31  ;;  %6526 = vmatprep.subr.bf16.mxu1 %v6525_v12  ;;  %v4355_v42 = vld [vmem:[#allocation20 + $0x6f8] sm:$0xff]  ;;  %v4348_v31 = vld [vmem:[#allocation20 + $0x6c0] sm:$0xff] }
 0xdfb   : > { %v4352_v12 = vld [vmem:[#allocation20 + $0x6e0] sm:$0xff]  ;;  %v6545_v11 = vpack.c.bf16 %v4355_v42, %v4351_v63  ;;  %v4715_v42 = vld [vmem:[#allocation22 + $0x88] sm:$0xff]  ;;  %v4737_v6 = vld [vmem:[#allocation22 + $0x138] sm:$0xff] }
 0xdfc   : > { %v6419_v37 = vpack.c.bf16 %v4352_v12, %v4348_v31  ;;  %v4714_v63 = vld [vmem:[#allocation22 + $0x80] sm:$0xff]  ;;  %v6563_v12 = vpack.c.bf16 %v4386_v21, %v4382_v9 }
 0xdfd   : > { %6400 = vmatpush1.bf16.msra.mxu0 %v6399_v32  ;;  %6528 = vmatpush1.bf16.msra.mxu1 %v6527_v15  ;;  %v4359_v32 = vld [vmem:[#allocation20 + $0x718] sm:$0xff]  ;;  %v6565_v14 = vpack.c.bf16 %v4715_v42, %v4714_v63  ;;  %v4738_v21 = vld [vmem:[#allocation22 + $0x140] sm:$0xff]  ;;  %v4739_v63 = vld [vmem:[#allocation22 + $0x148] sm:$0xff] }
 0xdfe   : > { %6402 = vmatprep.subr.bf16.mxu0 %v6401_v16  ;;  %6530 = vmatprep.subr.bf16.mxu1 %v6529_v33  ;;  %v4363_v15 = vld [vmem:[#allocation20 + $0x738] sm:$0xff]  ;;  %v4356_v16 = vld [vmem:[#allocation20 + $0x700] sm:$0xff]  ;;  %v4724_v42 = vld [vmem:[#allocation22 + $0xd0] sm:$0xff] }
 0xdff   : > { %v4360_v33 = vld [vmem:[#allocation20 + $0x720] sm:$0xff]  ;;  %v6549_v24 = vpack.c.bf16 %v4363_v15, %v4359_v32  ;;  %v4716_v32 = vld [vmem:[#allocation22 + $0x90] sm:$0xff]  ;;  %v4717_v15 = vld [vmem:[#allocation22 + $0x98] sm:$0xff] }
 0xe00   : > { %v6423_v2 = vpack.c.bf16 %v4360_v33, %v4356_v16  ;;  %v6599_v33 = vpack.c.bf16 %v4731_v10, %v4730_v22  ;;  %v6569_v45 = vpack.c.bf16 %v4717_v15, %v4716_v32  ;;  %v4740_v10 = vld [vmem:[#allocation22 + $0x150] sm:$0xff]  ;;  %v4741_v32 = vld [vmem:[#allocation22 + $0x158] sm:$0xff]  ;;  %v4726_v15 = vld [vmem:[#allocation22 + $0xe0] sm:$0xff] }
 0xe01   : > { %6404 = vmatpush1.bf16.msra.mxu0 %v6403_v54  ;;  %6532 = vmatpush1.bf16.msra.mxu1 %v6531_v8  ;;  %v4367_v54 = vld [vmem:[#allocation20 + $0x758] sm:$0xff] }
 0xe02   : > { %6406 = vmatprep.subr.bf16.mxu0 %v6405_v55  ;;  %6534 = vmatprep.subr.bf16.mxu1 %v6533_v26  ;;  %v4371_v8 = vld [vmem:[#allocation20 + $0x778] sm:$0xff]  ;;  %v4364_v55 = vld [vmem:[#allocation20 + $0x740] sm:$0xff] }
 0xe03   : > { %v4368_v26 = vld [vmem:[#allocation20 + $0x760] sm:$0xff]  ;;  %v6553_v7 = vpack.c.bf16 %v4371_v8, %v4367_v54  ;;  %v4733_v54 = vld [vmem:[#allocation22 + $0x118] sm:$0xff] }
 0xe04   : > { %v6427_v43 = vpack.c.bf16 %v4368_v26, %v4364_v55  ;;  %v4718_v8 = vld [vmem:[#allocation22 + $0xa0] sm:$0xff]  ;;  %v4751_v55 = vld [vmem:[#allocation22 + $0x1a8] sm:$0xff] }
 0xe05   : > { %6408 = vmatpush1.bf16.msra.mxu0 %v6407_v5  ;;  %6536 = vmatpush1.bf16.msra.mxu1 %v6535_v41  ;;  %v4375_v5 = vld [vmem:[#allocation20 + $0x798] sm:$0xff] }
 0xe06   : > { %6410 = vmatprep.subr.bf16.mxu0 %v6409_v44  ;;  %6538 = vmatprep.subr.bf16.mxu1 %v6537_v47  ;;  %v4379_v41 = vld [vmem:[#allocation20 + $0x7b8] sm:$0xff]  ;;  %v4372_v44 = vld [vmem:[#allocation20 + $0x780] sm:$0xff] }
 0xe07   : > { %v4376_v47 = vld [vmem:[#allocation20 + $0x7a0] sm:$0xff]  ;;  %v6557_v1 = vpack.c.bf16 %v4379_v41, %v4375_v5  ;;  %v4721_v5 = vld [vmem:[#allocation22 + $0xb8] sm:$0xff]  ;;  %v4752_v41 = vld [vmem:[#allocation22 + $0x1b0] sm:$0xff] }
 0xe08   : > { %v6431_v17 = vpack.c.bf16 %v4376_v47, %v4372_v44  ;;  %v6607_v44 = vpack.c.bf16 %v4735_v23, %v4734_v25  ;;  %v4704_v47 = vld [vmem:[#allocation22 + $0x30] sm:$0xff] }
 0xe09   : > { %6412 = vmatpush1.bf16.msra.mxu0 %v6411_v50  ;;  %6540 = vmatpush1.bf16.msra.mxu1 %v6539_v58  ;;  %v4383_v50 = vld [vmem:[#allocation20 + $0x7d8] sm:$0xff]  ;;  %v4744_v23 = vld [vmem:[#allocation22 + $0x170] sm:$0xff] }
 0xe0a   : > { %6414 = vmatprep.subr.bf16.mxu0 %v6413_v57  ;;  %6542 = vmatprep.subr.bf16.mxu1 %v6541_v29  ;;  %v4387_v58 = vld [vmem:[#allocation20 + $0x7f8] sm:$0xff]  ;;  %v4380_v57 = vld [vmem:[#allocation20 + $0x7c0] sm:$0xff] }
 0xe0b   : > { %v4384_v29 = vld [vmem:[#allocation20 + $0x7e0] sm:$0xff]  ;;  %v6561_v20 = vpack.c.bf16 %v4387_v58, %v4383_v50  ;;  %v4723_v50 = vld [vmem:[#allocation22 + $0xc8] sm:$0xff] }
 0xe0c   : > { %v6435_v31 = vpack.c.bf16 %v4384_v29, %v4380_v57  ;;  %v4754_v58 = vld [vmem:[#allocation22 + $0x1c0] sm:$0xff]  ;;  %v6611_v57 = vpack.c.bf16 %v4737_v6, %v4736_v13 }
 0xe0d   : > { %6416 = vmatpush1.bf16.msra.mxu0 %v6415_v28  ;;  %6544 = vmatpush1.bf16.msra.mxu1 %v6543_v60  ;;  %v4746_v28 = vld [vmem:[#allocation22 + $0x180] sm:$0xff]  ;;  %v4747_v60 = vld [vmem:[#allocation22 + $0x188] sm:$0xff] }
 0xe0e   : > { %6418 = vmatprep.subr.bf16.mxu0 %v6417_v4  ;;  %6546 = vmatprep.subr.bf16.mxu1 %v6545_v11  ;;  %v4698_v4 = vld [vmem:[#allocation22] sm:$0xff]  ;;  %v4699_v11 = vld [vmem:[#allocation22 + $0x8] sm:$0xff]  ;;  %v6597_v19 = vpack.c.bf16 %v4747_v60, %v4746_v28  ;;  %v4725_v28 = vld [vmem:[#allocation22 + $0xd8] sm:$0xff] }
 0xe0f   : > { %v6567_v16 = vpack.c.bf16 %v4699_v11, %v4698_v4  ;;  %v4706_v29 = vld [vmem:[#allocation22 + $0x40] sm:$0xff]  ;;  %v4756_v60 = vld [vmem:[#allocation22 + $0x1d0] sm:$0xff]  ;;  %v6615_v4 = vpack.c.bf16 %v4739_v63, %v4738_v21 }
 0xe10   : > { %v4708_v11 = vld [vmem:[#allocation22 + $0x50] sm:$0xff] }
 0xe11   : > { %6420 = vmatpush1.bf16.msra.mxu0 %v6419_v37  ;;  %6548 = vmatpush1.bf16.msra.mxu1 %v6547_v52  ;;  %v4748_v37 = vld [vmem:[#allocation22 + $0x190] sm:$0xff]  ;;  %v4749_v52 = vld [vmem:[#allocation22 + $0x198] sm:$0xff] }
 0xe12   : > { %6422 = vmatprep.subr.bf16.mxu0 %v6421_v49  ;;  %6550 = vmatprep.subr.bf16.mxu1 %v6549_v24  ;;  %v4700_v49 = vld [vmem:[#allocation22 + $0x10] sm:$0xff]  ;;  %v4701_v24 = vld [vmem:[#allocation22 + $0x18] sm:$0xff]  ;;  %v6601_v62 = vpack.c.bf16 %v4749_v52, %v4748_v37  ;;  %v4727_v37 = vld [vmem:[#allocation22 + $0xe8] sm:$0xff] }
 0xe13   : > { %v6571_v26 = vpack.c.bf16 %v4701_v24, %v4700_v49  ;;  %v4758_v52 = vld [vmem:[#allocation22 + $0x1e0] sm:$0xff]  ;;  %v6619_v49 = vpack.c.bf16 %v4741_v32, %v4740_v10  ;;  %v6589_v24 = vpack.c.bf16 %v4727_v37, %v4726_v15 }
 0xe15   : > { %6424 = vmatpush1.bf16.msra.mxu0 %v6423_v2  ;;  %6552 = vmatpush1.bf16.msra.mxu1 %v6551_v53  ;;  %v4719_v2 = vld [vmem:[#allocation22 + $0xa8] sm:$0xff]  ;;  %v4750_v53 = vld [vmem:[#allocation22 + $0x1a0] sm:$0xff] }
 0xe16   : > { %6426 = vmatprep.subr.bf16.mxu0 %v6425_v27  ;;  %6554 = vmatprep.subr.bf16.mxu1 %v6553_v7  ;;  %v6603_v27 = vpack.c.bf16 %v4733_v54, %v4732_v34  ;;  %v4702_v7 = vld [vmem:[#allocation22 + $0x20] sm:$0xff]  ;;  %v6573_v48 = vpack.c.bf16 %v4719_v2, %v4718_v8  ;;  %v6605_v30 = vpack.c.bf16 %v4751_v55, %v4750_v53  ;;  %v4743_v8 = vld [vmem:[#allocation22 + $0x168] sm:$0xff]  ;;  %v4728_v53 = vld [vmem:[#allocation22 + $0xf0] sm:$0xff] }
 0xe17   : > { %v4742_v34 = vld [vmem:[#allocation22 + $0x160] sm:$0xff]  ;;  %v4729_v55 = vld [vmem:[#allocation22 + $0xf8] sm:$0xff] }
 0xe18   : > { %v6623_v2 = vpack.c.bf16 %v4743_v8, %v4742_v34 }
 0xe19   : > { %6428 = vmatpush1.bf16.msra.mxu0 %v6427_v43  ;;  %6556 = vmatpush1.bf16.msra.mxu1 %v6555_v35  ;;  %v4753_v43 = vld [vmem:[#allocation22 + $0x1b8] sm:$0xff]  ;;  %v6575_v35 = vpack.c.bf16 %v4703_v46, %v4702_v7  ;;  %v4712_v46 = vld [vmem:[#allocation22 + $0x70] sm:$0xff] }
 0xe1a   : > { %6430 = vmatprep.subr.bf16.mxu0 %v6429_v51  ;;  %6558 = vmatprep.subr.bf16.mxu1 %v6557_v1  ;;  %v4705_v51 = vld [vmem:[#allocation22 + $0x38] sm:$0xff]  ;;  %v6577_v1 = vpack.c.bf16 %v4721_v5, %v4720_v3  ;;  %v6609_v56 = vpack.c.bf16 %v4753_v43, %v4752_v41 }
 0xe1b   : > { %v4761_v7 = vld [vmem:[#allocation22 + $0x1f8] sm:$0xff] }
 0xe1c   : > { %v4745_v3 = vld [vmem:[#allocation22 + $0x178] sm:$0xff] }
 0xe1d   : > { %6432 = vmatpush1.bf16.msra.mxu0 %v6431_v17  ;;  %6560 = vmatpush1.bf16.msra.mxu1 %v6559_v59  ;;  %v4755_v17 = vld [vmem:[#allocation22 + $0x1c8] sm:$0xff]  ;;  %v6579_v59 = vpack.c.bf16 %v4705_v51, %v4704_v47  ;;  %v6627_v5 = vpack.c.bf16 %v4745_v3, %v4744_v23  ;;  %v4388_v41 = vld [vmem:[%s8525_s15] sm:$0xf]  ;;  %s7268_s15 = scalar_lea.vmem %s8371_s13, 128 }
 0xe1e   : > { %6434 = vmatprep.subr.bf16.mxu0 %v6433_v61  ;;  %6562 = vmatprep.subr.bf16.mxu1 %v6561_v20  ;;  %v4707_v61 = vld [vmem:[#allocation22 + $0x48] sm:$0xff]  ;;  %v6581_v20 = vpack.c.bf16 %v4723_v50, %v4722_v0  ;;  %v6613_v9 = vpack.c.bf16 %v4755_v17, %v4754_v58  ;;  %v4393_v43 = vrot.slane %v4388_v41, %v7925_v36  ;;  %p7269_p2 = scmp.ne.s32.totalorder %s8371_s13, %s7268_s15  ;;  %p7276_p8 = scmp.lt.s32.totalorder %s7274_s20, %s7268_s15 }
 0xe1f   : > { %v4405_v47 = vrot.slane %v4388_v41, %v7931_v40 }
 0xe20   : > { %p7270_p4 = pnand %p7269_p2, %p8528_p0  ;;  %p7277_p5 = por %p7276_p8, %p7275_p11 }
 0xe21   : > { %6436 = vmatpush1.bf16.msra.mxu0 %v6435_v31  ;;  %6564 = vmatpush1.bf16.msra.mxu1 %v6563_v12  ;;  %v4757_v31 = vld [vmem:[#allocation22 + $0x1d8] sm:$0xff]  ;;  %v6583_v12 = vpack.c.bf16 %v4707_v61, %v4706_v29 }
 0xe22   : > { %6566 = vmatprep.subr.bf16.mxu0 %v6565_v14  ;;  %6598 = vmatprep.subr.bf16.mxu1 %v6597_v19  ;;  %v4709_v14 = vld [vmem:[#allocation22 + $0x58] sm:$0xff]  ;;  %v6585_v19 = vpack.c.bf16 %v4725_v28, %v4724_v42  ;;  %v6617_v22 = vpack.c.bf16 %v4757_v31, %v4756_v60  ;;  %p7271_p10 = pneg %p7270_p4 }
 0xe24   : > { %4546 = vmatmul.mubr.f32.vlgmr.msra.gmra.mrb[10].mxu0 %v4130_v18  ;;  %4688 = vmatmul.mubr.f32.vlgmr.msra.gmra.mrb[10].mxu1 %v4130_v18  ;;  %p7278_p7 = pnand %p7277_p5, %p7271_p10 }
 0xe25   : > { %6568 = vmatpush3.bf16.msra.mxu0 %v6567_v16  ;;  %6600 = vmatpush3.bf16.msra.mxu1 %v6599_v33  ;;  %v4759_v16 = vld [vmem:[#allocation22 + $0x1e8] sm:$0xff]  ;;  %v6587_v33 = vpack.c.bf16 %v4709_v14, %v4708_v11 }
 0xe26   : > { %6570 = vmatprep.subr.bf16.mxu0 %v6569_v45  ;;  %6602 = vmatprep.subr.bf16.mxu1 %v6601_v62  ;;  %v6621_v18 = vpack.c.bf16 %v4759_v16, %v4758_v52  ;;  %v4710_v45 = vld [vmem:[#allocation22 + $0x60] sm:$0xff]  ;;  %v4711_v62 = vld [vmem:[#allocation22 + $0x68] sm:$0xff] }
 0xe27   : > { %v6591_v54 = vpack.c.bf16 %v4711_v62, %v4710_v45 }
 0xe29   : > { %6572 = vmatpush3.bf16.msra.mxu0 %v6571_v26  ;;  %6604 = vmatpush3.bf16.msra.mxu1 %v6603_v27  ;;  %v4760_v26 = vld [vmem:[#allocation22 + $0x1f0] sm:$0xff]  ;;  %v6593_v27 = vpack.c.bf16 %v4729_v55, %v4728_v53 }
 0xe2a   : > { %6574 = vmatprep.subr.bf16.mxu0 %v6573_v48  ;;  %6606 = vmatprep.subr.bf16.mxu1 %v6605_v30  ;;  %v4713_v48 = vld [vmem:[#allocation22 + $0x78] sm:$0xff]  ;;  %v6625_v30 = vpack.c.bf16 %v4761_v7, %v4760_v26 }
 0xe2b   : > { %v6595_v25 = vpack.c.bf16 %v4713_v48, %v4712_v46 }
 0xe2d   : > { %6576 = vmatpush3.bf16.msra.mxu0 %v6575_v35  ;;  %6608 = vmatpush3.bf16.msra.mxu1 %v6607_v44  ;;  %v4401_v35 = vrot.slane %v4388_v41, %v7927_v38  ;;  %v4397_v44 = vrot.slane %v4388_v41, %v7929_v39  ;;  %v5146_v39 = vld [vmem:[%s8526_s22] ss:$0 sm:$0xff] }
 0xe2e   : > { %6578 = vmatprep.subr.bf16.mxu0 %v6577_v1  ;;  %6610 = vmatprep.subr.bf16.mxu1 %v6609_v56 }
 0xe31   : > { %6580 = vmatpush3.bf16.msra.mxu0 %v6579_v59  ;;  %6612 = vmatpush3.bf16.msra.mxu1 %v6611_v57 }
 0xe32   : > { %6582 = vmatprep.subr.bf16.mxu0 %v6581_v20  ;;  %6614 = vmatprep.subr.bf16.mxu1 %v6613_v9 }
 0xe35   : > { %6584 = vmatpush3.bf16.msra.mxu0 %v6583_v12  ;;  %6616 = vmatpush3.bf16.msra.mxu1 %v6615_v4 }
 0xe36   : > { %6586 = vmatprep.subr.bf16.mxu0 %v6585_v19  ;;  %6618 = vmatprep.subr.bf16.mxu1 %v6617_v22 }
 0xe39   : > { %6588 = vmatpush3.bf16.msra.mxu0 %v6587_v33  ;;  %6620 = vmatpush3.bf16.msra.mxu1 %v6619_v49 }
 0xe3a   : > { %6590 = vmatprep.subr.bf16.mxu0 %v6589_v24  ;;  %6622 = vmatprep.subr.bf16.mxu1 %v6621_v18 }
 0xe3d   : > { %6592 = vmatpush3.bf16.msra.mxu0 %v6591_v54  ;;  %6624 = vmatpush3.bf16.msra.mxu1 %v6623_v2 }
 0xe3e   : > { %6594 = vmatprep.subr.bf16.mxu0 %v6593_v27  ;;  %6626 = vmatprep.subr.bf16.mxu1 %v6625_v30 }
 0xe41   : > { %6596 = vmatpush3.bf16.msra.mxu0 %v6595_v25  ;;  %6628 = vmatpush3.bf16.msra.mxu1 %v6627_v5 }
 0xef7   : > { %v4547_v51 = vpop.f32.mrb[10].mxu0  ;;  %v4689_v1 = vpop.f32.mrb[10].mxu1 }
 0xef8   : > { %v6645_v56 = vadd.f32 %v4547_v51, %v4393_v43  ;;  %v6647_v13 = vadd.f32 %v4689_v1, %v4401_v35  ;;  %v4549_v6 = vpop.f32.mrb[11].mxu0  ;;  %v4691_v0 = vpop.f32.mrb[11].mxu1 }
 0xef9   : > { %v6646_v50 = vadd.f32 %v4549_v6, %v4397_v44  ;;  %v6648_v58 = vadd.f32 %v4691_v0, %v4405_v47 }
 0xefa   : > { %v4694_v57 = vmax.f32 %v6645_v56, 0.0  ;;  %v4696_v29 = vmax.f32 %v6647_v13, 0.0 }
 0xefb   : > { %v4695_v17 = vmax.f32 %v6646_v50, 0.0  ;;  %v4697_v59 = vmax.f32 %v6648_v58, 0.0 }
 0xefd   : > { %4833 = vmatprep.mubr.f32.mxu0 %v4695_v17  ;;  %4903 = vmatprep.mubr.f32.mxu1 %v4697_v59 }
 0xefe   : > { %4834 = vmatmul.mubr.f32.vlgmr.msra.gmra.mrb[12].mxu0 %v4694_v57  ;;  %4904 = vmatmul.mubr.f32.vlgmr.msra.gmra.mrb[12].mxu1 %v4696_v29 }
 0xfd1   : > { %v5183_v36 = vpop.f32.mrb[12].mxu0  ;;  %v5218_v38 = vpop.f32.mrb[12].mxu1 }
 0xfd2   : > { %v5184_v40 = vpop.f32.mrb[13].mxu0  ;;  %v5219_v61 = vpop.f32.mrb[13].mxu1 }
 0xfd3   : > { %v5185_v20 = vadd.f32 %v5184_v40, %v5183_v36  ;;  %v5220_v9 = vadd.f32 %v5219_v61, %v5218_v38 }
 0xfd5   : > { %v4836_v21 = vadd.f32 %v5185_v20, %v5146_v39 }
 0xfd7   : > { %v4906_v63 = vadd.f32 %v5220_v9, %v4836_v21 }
 0xfd9   : > { %v4909_v42 = vmul.f32 %v4906_v63, %v4906_v63 }
 0xfdb   : > { %4910 = vadd.xlane.f32.xlu0 %v4909_v42 }
0x1068   : > { %v4911_v28 = vpop.xlane.xlu0 %4910 }
0x1069   : > { %v4912_v60 = vmax.f32 %v4911_v28, 1e-24 }
0x106b   : > { %6900 = vrsqrt.f32 %v4912_v60 }
0x1075   : > { %v6901_v31 = vpop.eup %6900 }
0x1076   : > { %v4914_v12 = vmul.f32 %v6901_v31, %v4906_v63 }
0x1078   : > { %4915 = vst [vmem:[%s943_s8] sm:$0xff] %v4914_v12 }
0x1079   : > { %7281 = shalt.err (!%p7278_p7)
}
0x107a   : > { %s7282_s14 = scalar_lea.hbm %s8369_s19, 128  ;;  %s7286_s4 = scalar_lea.hbm %s8527_s24, 256 }
0x107b   : > { %p7283_p6 = scmp.ne.s32.totalorder %s8369_s19, %s7282_s14  ;;  %p7287_p13 = scmp.lt.u32.totalorder %s8369_s19, %s8527_s24 }
0x107c   : > { %p7288_p1 = scmp.lt.u32.totalorder %s7286_s4, %s7282_s14  ;;  %p7290_p2 = scmp.lt.u32.totalorder %s7282_s14, %s8369_s19 }
0x107d   : > { %p7284_p9 = pnand %p7283_p6, %p8528_p0 }
0x107e   : > { %p7289_p3 = por %p7288_p1, %p7287_p13 }
0x107f   : > { %p7285_p12 = pneg %p7284_p9 }
0x1080   : > { %p7291_p4 = por %p7290_p2, %p7289_p3 }
0x1082   : > { %p7292_p10 = pnand %p7291_p4, %p7285_p12 }
0x1084   : > { %7295 = shalt.err (!%p7292_p10)
}
0x1085   : > { %6719 = dma.vmem_to_hbm [thread:$0]  (%p8528_p0), %s8371_s13, 128, %s8369_s19, %s4917_s18  }
0x1086 PF: > { %s4942_s27 = sand.u32 1, %s7346_s29   ;;  %p8529_p11 = scmp.ne.s32.totalorder %s8501_s28, 0 }
0x1087   : > { %p8530_p8 = scmp.ge.s32.totalorder %s7358_s30, 2  ;;  %s4943_s15 = scalar_lea.sflag [#allocation4], %s4942_s27 }
0x1089   : > { %p6763_p5 = pnand %p8530_p8, %p8529_p11 }
0x108b   : > { %7341 = dma.done.wait (!%p6763_p5), %s4943_s15, 128  }
0x108c   : > { %7343 = vsyncadd (!%p6763_p5), %s4943_s15, 4294967168  ;;  %p44_p7 = scmp.ge.s32.totalorder %s7812_s9, 4   ;;  %s8531_s29 = smov %s7350_s2 }
0x108d   : > { %s8532_s2 = smov %s7354_s6  ;;  %s8533_s6 = smov %s7823_s7 }
0x108e   : > { %s8534_s30 = smov %s7812_s9  ;;  %46 = sbr.rel (!%p44_p7) target bundleno = 33 (0x21), region = 213 }
0x1095   :  { %4948 = vsyncpa [#allocation3], 1 }
0x1096   :  { %4950 = vsyncpa [#allocation3 + $0x1], 1 }
0x1097   :  { %4951 = vsyncpa [#allocation6], 1 }
0x1098   :  { %4952 = vsyncpa [#allocation9], 1 }
0x1099   :  { %4953 = vsyncpa [#allocation12], 1 }
0x109a   :  { %4954 = vsyncpa [#allocation15], 1 }
0x109b   :  { %4955 = vsyncpa [#allocation18], 1 }
0x109c   :  { %4956 = vsyncpa [#allocation21], 1 }
0x109d   :  { %4957 = vsyncpa [#allocation4], 1 }
0x109e   :  { %4959 = vsyncpa [#allocation4 + $0x1], 1 }

</bundles_post_ra>
